<compile_context>
chip_gen: v7x
topology: tpu7x:2x2x1
jax: 0.10.0
libtpu: 0.0.40
codegen_flags: <defaults>
</compile_context>

<pallas_src>
import jax
import jax.numpy as jnp
from jax.experimental import pallas as pl
from jax.experimental.pallas import tpu as pltpu


def _window_poly6(r_sqr):
    return jnp.clip((1.0 - r_sqr) ** 3, 0.0, 1.0)


def _make_kernel(K, C_in, C_out):
    KK = K * K
    KKK = KK * K

    def kernel(geo_ref, feats_ref, w_ref, b_ref, o_ref, coeff_ref):
        S = geo_ref.shape[1]
        tm = geo_ref.shape[2]

        geo = geo_ref[...]                              # [5, S, TM] f32
        rx = geo[0]                                     # [S, TM]
        ry = geo[1]
        rz = geo[2]
        dist = geo[3]                                   # normalized squared distance
        scale = geo[4]                                  # scale_compat, zeroed on padding slots

        # neighbors_importance = scale_compat * window_poly6(neighbors_distance)
        win = jnp.clip((1.0 - dist) ** 3, 0.0, 1.0)
        imp = scale * win                               # [S, TM]

        # coordinate_mapping = 'ball_to_cube_radial'
        norm = jnp.sqrt(rx * rx + ry * ry + rz * rz)
        linf = jnp.maximum(jnp.maximum(jnp.abs(rx), jnp.abs(ry)), jnp.abs(rz))
        nz = linf > 0.0
        inv_linf = pl.reciprocal(jnp.where(nz, linf, 1.0), approx=True)   # EUP slot
        ssc = jnp.where(nz, norm * inv_linf, 0.0)
        cx = rx * ssc
        cy = ry * ssc
        cz = rz * ssc

        # Separable trilinear (align_corners=True) per-axis corner weights: [S, K, TM] each.
        kgrid = jax.lax.broadcasted_iota(jnp.int32, (1, K, 1), 1).astype(jnp.float32)

        def axis_weights(c):
            g = jnp.clip((c + 1.0) * (0.5 * (K - 1)), 0.0, float(K - 1))
            i0 = jnp.clip(jnp.floor(g), 0.0, float(K - 2))
            fr = g - i0
            i0e = i0[:, None, :]                        # [S, 1, TM]
            fre = fr[:, None, :]
            return (jnp.where(kgrid == i0e, 1.0 - fre, 0.0)
                    + jnp.where(kgrid == i0e + 1.0, fre, 0.0))            # [S, K, TM]

        wx = axis_weights(cx)
        wy = axis_weights(cy)
        wz = axis_weights(cz)

        # coeff[s, kz*KK + ky*K + kx, t] = wz*wy*wx  -> VMEM scratch (reused by every channel).
        for s in range(S):
            wyx = (wy[s][:, None, :] * wx[s][None, :, :]).reshape(KK, tm)   # [KK, TM]
            for jz in range(K):
                coeff_ref[s, jz * KK:(jz + 1) * KK, :] = wz[s, jz:jz + 1, :] * wyx

        # Importance-weighted neighbor features.
        feats = feats_ref[...].astype(jnp.float32)      # [S, C_in, TM]
        wf = imp[:, None, :] * feats                    # [S, C_in, TM]

        # A[c, k, t] = sum_s wf[s, c, t] * coeff[s, k, t]; each channel goes straight into a
        # small MXU matmul accumulating into the [C_out, TM] output (no concat, small live set).
        out_acc = jnp.zeros((C_out, tm), jnp.float32)
        for c in range(C_in):
            a_c = wf[0, c:c + 1, :] * coeff_ref[0]                          # [KKK, TM]
            for s in range(1, S):
                a_c = a_c + wf[s, c:c + 1, :] * coeff_ref[s]
            out_acc = out_acc + jnp.dot(w_ref[c], a_c.astype(jnp.bfloat16),
                                        preferred_element_type=jnp.float32)  # [C_out, TM]

        # normalize=True: divide by the sum of neighbor importances (guard zero-neighbor columns).
        denom = jnp.sum(imp, axis=0, keepdims=True)     # [1, TM]
        dnz = denom != 0.0
        inv = jnp.where(dnz, 1.0 / jnp.where(dnz, denom, 1.0), 1.0)

        out = out_acc * inv + b_ref[...]                # [C_out, TM] * [1, TM] + [C_out, 1]
        o_ref[...] = jnp.maximum(out, 0.0).astype(o_ref.dtype)   # activation = relu

    return kernel


def cconv_aggregation_forward(filters, bias, feats, inp_points, out_points,
                              out_extent, scale_compat, neighbors_index,
                              neighbors_row_splits, neighbors_distance,
                              *, max_neighbors=8, tile_m=256,
                              return_importance=False):
    """Forward pass of CConvAggregationBlock (ContinuousConv + relu, normalize=True)."""
    K = filters.shape[0]
    C_in = filters.shape[3]
    C_out = filters.shape[4]
    N_out = out_points.shape[0]
    S = int(max_neighbors)
    KK = K * K
    KKK = KK * K

    tile_m = max(128, (int(tile_m) // 128) * 128)       # point dim rides the lane axis

    # ---- glue: ragged CSR neighbors -> dense [N_out, S] slots, padding slots get importance 0 ----
    # TODO(synk): the data-dependent CSR gather (neighbors_index/row_splits) is done in plain JAX and
    #             capped at S neighbors per voxel; a production kernel would keep feats/positions in
    #             HBM and drive scalar-prefetch / make_async_copy gathers from the CSR instead.
    counts = neighbors_row_splits[1:] - neighbors_row_splits[:-1]
    slot = jnp.arange(S, dtype=neighbors_row_splits.dtype)
    flat_idx = neighbors_row_splits[:-1, None] + slot[None, :]
    valid = slot[None, :] < counts[:, None]
    flat_idx = jnp.where(valid, flat_idx, 0)
    nb_idx = neighbors_index[flat_idx]                                   # [N_out, S]
    dist = jnp.where(valid, neighbors_distance[flat_idx], 0.0)           # [N_out, S]
    scmp = jnp.where(valid, scale_compat[flat_idx], 0.0)                 # [N_out, S]

    inv_e = 2.0 / jnp.asarray(out_extent, jnp.float32)
    rel = (inp_points[nb_idx] - out_points[:, None, :]) * inv_e          # [N_out, S, 3]

    # Packed, transposed geometry [5, S, N_out]: rx, ry, rz, dist, scale_compat*mask.
    geo = jnp.stack([rel[..., 0], rel[..., 1], rel[..., 2],
                     dist.astype(jnp.float32), scmp.astype(jnp.float32)], axis=0)   # [5, N_out, S]
    geo = jnp.transpose(geo, (0, 2, 1)).astype(jnp.float32)              # [5, S, N_out]

    feats_t = jnp.transpose(feats[nb_idx], (1, 2, 0)).astype(jnp.bfloat16)   # [S, C_in, N_out]

    # Pad the point (lane) dim to a multiple of tile_m; padded columns have importance 0.
    n_pad = ((N_out + tile_m - 1) // tile_m) * tile_m
    if n_pad != N_out:
        pad = n_pad - N_out
        geo = jnp.pad(geo, ((0, 0), (0, 0), (0, pad)))
        feats_t = jnp.pad(feats_t, ((0, 0), (0, 0), (0, pad)))

    # Fused filter: [C_in, C_out, K^3], flat tap k = (kz*K + ky)*K + kx (matches coeff layout).
    w_t = jnp.transpose(filters.reshape(KKK, C_in, C_out), (1, 2, 0)).astype(jnp.bfloat16)
    b_t = bias.reshape(C_out, 1).astype(jnp.float32)

    kernel = _make_kernel(K, C_in, C_out)
    grid = (n_pad // tile_m,)

    out_t = pl.pallas_call(
        kernel,
        out_shape=jax.ShapeDtypeStruct((C_out, n_pad), jnp.float32),
        grid=grid,
        in_specs=[
            pl.BlockSpec((5, S, tile_m), lambda i: (0, 0, i)),            # packed geometry
            pl.BlockSpec((S, C_in, tile_m), lambda i: (0, 0, i)),         # gathered neighbor features
            pl.BlockSpec((C_in, C_out, KKK), lambda i: (0, 0, 0)),        # fused filter
            pl.BlockSpec((C_out, 1), lambda i: (0, 0)),                   # bias
        ],
        out_specs=pl.BlockSpec((C_out, tile_m), lambda i: (0, i)),
        scratch_shapes=[pltpu.VMEM((S, KKK, tile_m), jnp.float32)],       # trilinear coefficients
        compiler_params=pltpu.CompilerParams(
            dimension_semantics=("parallel",),
            vmem_limit_bytes=32 * 1024 * 1024),
    )(geo, feats_t, w_t, b_t)

    out = jnp.transpose(out_t[:, :N_out], (1, 0))                         # [N_out, C_out]

    if return_importance:
        # Matches the PyTorch module: importance over the full CSR neighbor list.
        importance = scale_compat * _window_poly6(neighbors_distance)
        return out, importance
    return out


if __name__ == "__main__":
    key = jax.random.PRNGKey(0)
    C_in, C_out = 8, 16            # input_channels / output_channels of the block
    N_in, N_out = 64, 32           # input points / voxel centers
    S = 8                          # max neighbors per voxel (dense cap)
    K = 4                          # kernel_size = [4, 4, 4]

    ks = jax.random.split(key, 9)
    feats = jax.random.normal(ks[0], (N_in, C_in), dtype=jnp.float32)
    inp_points = jax.random.uniform(ks[1], (N_in, 3), dtype=jnp.float32)
    out_points = jax.random.uniform(ks[2], (N_out, 3), dtype=jnp.float32)
    out_extent = 0.25              # voxel size

    # Deterministic synthetic ragged neighbor structure.
    counts = jax.random.randint(ks[3], (N_out,), 1, S + 1)
    neighbors_row_splits = jnp.concatenate(
        [jnp.zeros((1,), jnp.int32), jnp.cumsum(counts).astype(jnp.int32)])
    total = int(neighbors_row_splits[-1])
    neighbors_index = jax.random.randint(ks[4], (total,), 0, N_in, dtype=jnp.int32)
    neighbors_distance = jax.random.uniform(ks[5], (total,), dtype=jnp.float32)  # normalized sq. dist
    scale_compat = jax.random.uniform(ks[6], (total,), dtype=jnp.float32,
                                      minval=0.5, maxval=1.5)

    # Deterministic synthetic ContinuousConv parameters (conv1.filter / conv1.bias).
    filters = 0.1 * jax.random.normal(ks[7], (K, K, K, C_in, C_out), dtype=jnp.float32)
    bias = 0.01 * jax.random.normal(ks[8], (C_out,), dtype=jnp.float32)

    out = cconv_aggregation_forward(
        filters, bias, feats, inp_points, out_points, out_extent,
        scale_compat, neighbors_index, neighbors_row_splits, neighbors_distance,
        max_neighbors=S, tile_m=256, return_importance=False)
    out = jax.block_until_ready(out)

    assert out.shape == (N_out, C_out), out.shape
    assert bool(jnp.all(jnp.isfinite(out)))
    print("KERNEL_OK")
</pallas_src>

<mosaic_0001>
module attributes {stable_mosaic.version = 11 : i64} {
  func.func @kernel(%arg0: i32, %arg1: memref<5x8x256xf32, #tpu.memory_space<vmem>>, %arg2: memref<8x8x256xbf16, #tpu.memory_space<vmem>>, %arg3: memref<8x16x64xbf16, #tpu.memory_space<vmem>>, %arg4: memref<16x1xf32, #tpu.memory_space<vmem>>, %arg5: memref<16x256xf32, #tpu.memory_space<vmem>>, %arg6: memref<8x64x256xf32, #tpu.memory_space<vmem>>) attributes {dimension_semantics = [#tpu.dimension_semantics<parallel>], iteration_bounds = array<i64: 1>, scalar_prefetch = 0 : i64, scratch_operands = 1 : i64, tpu.core_type = #tpu.core_type<tc>, window_params = [{transform_indices = @transform_0, window_bounds = array<i64: 5, 8, 256>}, {transform_indices = @transform_1, window_bounds = array<i64: 8, 8, 256>}, {pipeline_mode = #tpu.pipeline_mode<synchronous>, transform_indices = @transform_2, window_bounds = array<i64: 8, 16, 64>}, {pipeline_mode = #tpu.pipeline_mode<synchronous>, transform_indices = @transform_3, window_bounds = array<i64: 16, 1>}, {transform_indices = @transform_4, window_bounds = array<i64: 16, 256>}]} {
    %c0 = arith.constant 0 : index
    %c0_0 = arith.constant 0 : index
    %c0_1 = arith.constant 0 : index
    %0 = vector.load %arg1[%c0, %c0_0, %c0_1] : memref<5x8x256xf32, #tpu.memory_space<vmem>>, vector<5x8x256xf32>
    %1 = vector.extract_strided_slice %0 {offsets = [0, 0, 0], sizes = [1, 8, 256], strides = [1, 1, 1]} : vector<5x8x256xf32> to vector<1x8x256xf32>
    %2 = vector.shape_cast %1 : vector<1x8x256xf32> to vector<8x256xf32>
    %3 = vector.extract_strided_slice %0 {offsets = [1, 0, 0], sizes = [1, 8, 256], strides = [1, 1, 1]} : vector<5x8x256xf32> to vector<1x8x256xf32>
    %4 = vector.shape_cast %3 : vector<1x8x256xf32> to vector<8x256xf32>
    %5 = vector.extract_strided_slice %0 {offsets = [2, 0, 0], sizes = [1, 8, 256], strides = [1, 1, 1]} : vector<5x8x256xf32> to vector<1x8x256xf32>
    %6 = vector.shape_cast %5 : vector<1x8x256xf32> to vector<8x256xf32>
    %7 = vector.extract_strided_slice %0 {offsets = [3, 0, 0], sizes = [1, 8, 256], strides = [1, 1, 1]} : vector<5x8x256xf32> to vector<1x8x256xf32>
    %8 = vector.shape_cast %7 : vector<1x8x256xf32> to vector<8x256xf32>
    %9 = vector.extract_strided_slice %0 {offsets = [4, 0, 0], sizes = [1, 8, 256], strides = [1, 1, 1]} : vector<5x8x256xf32> to vector<1x8x256xf32>
    %10 = vector.shape_cast %9 : vector<1x8x256xf32> to vector<8x256xf32>
    %cst = arith.constant 1.000000e+00 : f32
    %11 = vector.broadcast %cst : f32 to vector<8x256xf32>
    %12 = arith.subf %11, %8 : vector<8x256xf32>
    %13 = arith.mulf %12, %12 : vector<8x256xf32>
    %14 = arith.mulf %12, %13 : vector<8x256xf32>
    %cst_2 = arith.constant 0.000000e+00 : f32
    %cst_3 = arith.constant 1.000000e+00 : f32
    %15 = vector.broadcast %cst_2 : f32 to vector<8x256xf32>
    %16 = arith.maximumf %15, %14 : vector<8x256xf32>
    %17 = vector.broadcast %cst_3 : f32 to vector<8x256xf32>
    %18 = arith.minimumf %17, %16 : vector<8x256xf32>
    %19 = arith.mulf %10, %18 : vector<8x256xf32>
    %20 = arith.mulf %2, %2 : vector<8x256xf32>
    %21 = arith.mulf %4, %4 : vector<8x256xf32>
    %22 = arith.addf %20, %21 : vector<8x256xf32>
    %23 = arith.mulf %6, %6 : vector<8x256xf32>
    %24 = arith.addf %22, %23 : vector<8x256xf32>
    %25 = math.sqrt %24 : vector<8x256xf32>
    %26 = math.absf %2 : vector<8x256xf32>
    %27 = math.absf %4 : vector<8x256xf32>
    %28 = arith.maximumf %26, %27 : vector<8x256xf32>
    %29 = math.absf %6 : vector<8x256xf32>
    %30 = arith.maximumf %28, %29 : vector<8x256xf32>
    %cst_4 = arith.constant 0.000000e+00 : f32
    %31 = vector.broadcast %cst_4 : f32 to vector<8x256xf32>
    %32 = arith.cmpf ogt, %30, %31 : vector<8x256xf32>
    %cst_5 = arith.constant 1.000000e+00 : f32
    %33 = vector.broadcast %cst_5 : f32 to vector<8x256xf32>
    %34 = arith.select %32, %30, %33 : vector<8x256xi1>, vector<8x256xf32>
    %35 = tpu.reciprocal %34 {approx = true} : vector<8x256xf32> -> vector<8x256xf32>
    %36 = arith.mulf %25, %35 : vector<8x256xf32>
    %cst_6 = arith.constant 0.000000e+00 : f32
    %37 = vector.broadcast %cst_6 : f32 to vector<8x256xf32>
    %38 = arith.select %32, %36, %37 : vector<8x256xi1>, vector<8x256xf32>
    %39 = arith.mulf %2, %38 : vector<8x256xf32>
    %40 = arith.mulf %4, %38 : vector<8x256xf32>
    %41 = arith.mulf %6, %38 : vector<8x256xf32>
    %42 = tpu.iota {dimensions = array<i32: 1>} : vector<1x4x1xi32>
    %43 = arith.sitofp %42 : vector<1x4x1xi32> to vector<1x4x1xf32>
    %cst_7 = arith.constant 1.000000e+00 : f32
    %44 = vector.broadcast %cst_7 : f32 to vector<8x256xf32>
    %45 = arith.addf %39, %44 : vector<8x256xf32>
    %cst_8 = arith.constant 1.500000e+00 : f32
    %46 = vector.broadcast %cst_8 : f32 to vector<8x256xf32>
    %47 = arith.mulf %45, %46 : vector<8x256xf32>
    %cst_9 = arith.constant 0.000000e+00 : f32
    %cst_10 = arith.constant 3.000000e+00 : f32
    %48 = vector.broadcast %cst_9 : f32 to vector<8x256xf32>
    %49 = arith.maximumf %48, %47 : vector<8x256xf32>
    %50 = vector.broadcast %cst_10 : f32 to vector<8x256xf32>
    %51 = arith.minimumf %50, %49 : vector<8x256xf32>
    %52 = math.floor %51 : vector<8x256xf32>
    %cst_11 = arith.constant 0.000000e+00 : f32
    %cst_12 = arith.constant 2.000000e+00 : f32
    %53 = vector.broadcast %cst_11 : f32 to vector<8x256xf32>
    %54 = arith.maximumf %53, %52 : vector<8x256xf32>
    %55 = vector.broadcast %cst_12 : f32 to vector<8x256xf32>
    %56 = arith.minimumf %55, %54 : vector<8x256xf32>
    %57 = arith.subf %51, %56 : vector<8x256xf32>
    %58 = vector.shape_cast %56 : vector<8x256xf32> to vector<8x1x256xf32>
    %59 = vector.shape_cast %57 : vector<8x256xf32> to vector<8x1x256xf32>
    %60 = vector.broadcast %43 : vector<1x4x1xf32> to vector<8x4x256xf32>
    %61 = vector.broadcast %58 : vector<8x1x256xf32> to vector<8x4x256xf32>
    %62 = arith.cmpf oeq, %60, %61 : vector<8x4x256xf32>
    %cst_13 = arith.constant 1.000000e+00 : f32
    %63 = vector.broadcast %cst_13 : f32 to vector<8x1x256xf32>
    %64 = arith.subf %63, %59 : vector<8x1x256xf32>
    %cst_14 = arith.constant 0.000000e+00 : f32
    %65 = vector.shape_cast %64 : vector<8x1x256xf32> to vector<8x1x256xf32>
    %66 = vector.broadcast %65 : vector<8x1x256xf32> to vector<8x4x256xf32>
    %67 = vector.broadcast %cst_14 : f32 to vector<8x4x256xf32>
    %68 = arith.select %62, %66, %67 : vector<8x4x256xi1>, vector<8x4x256xf32>
    %cst_15 = arith.constant 1.000000e+00 : f32
    %69 = vector.broadcast %cst_15 : f32 to vector<8x1x256xf32>
    %70 = arith.addf %58, %69 : vector<8x1x256xf32>
    %71 = vector.broadcast %43 : vector<1x4x1xf32> to vector<8x4x256xf32>
    %72 = vector.broadcast %70 : vector<8x1x256xf32> to vector<8x4x256xf32>
    %73 = arith.cmpf oeq, %71, %72 : vector<8x4x256xf32>
    %cst_16 = arith.constant 0.000000e+00 : f32
    %74 = vector.shape_cast %59 : vector<8x1x256xf32> to vector<8x1x256xf32>
    %75 = vector.broadcast %74 : vector<8x1x256xf32> to vector<8x4x256xf32>
    %76 = vector.broadcast %cst_16 : f32 to vector<8x4x256xf32>
    %77 = arith.select %73, %75, %76 : vector<8x4x256xi1>, vector<8x4x256xf32>
    %78 = arith.addf %68, %77 : vector<8x4x256xf32>
    %cst_17 = arith.constant 1.000000e+00 : f32
    %79 = vector.broadcast %cst_17 : f32 to vector<8x256xf32>
    %80 = arith.addf %40, %79 : vector<8x256xf32>
    %cst_18 = arith.constant 1.500000e+00 : f32
    %81 = vector.broadcast %cst_18 : f32 to vector<8x256xf32>
    %82 = arith.mulf %80, %81 : vector<8x256xf32>
    %cst_19 = arith.constant 0.000000e+00 : f32
    %cst_20 = arith.constant 3.000000e+00 : f32
    %83 = vector.broadcast %cst_19 : f32 to vector<8x256xf32>
    %84 = arith.maximumf %83, %82 : vector<8x256xf32>
    %85 = vector.broadcast %cst_20 : f32 to vector<8x256xf32>
    %86 = arith.minimumf %85, %84 : vector<8x256xf32>
    %87 = math.floor %86 : vector<8x256xf32>
    %cst_21 = arith.constant 0.000000e+00 : f32
    %cst_22 = arith.constant 2.000000e+00 : f32
    %88 = vector.broadcast %cst_21 : f32 to vector<8x256xf32>
    %89 = arith.maximumf %88, %87 : vector<8x256xf32>
    %90 = vector.broadcast %cst_22 : f32 to vector<8x256xf32>
    %91 = arith.minimumf %90, %89 : vector<8x256xf32>
    %92 = arith.subf %86, %91 : vector<8x256xf32>
    %93 = vector.shape_cast %91 : vector<8x256xf32> to vector<8x1x256xf32>
    %94 = vector.shape_cast %92 : vector<8x256xf32> to vector<8x1x256xf32>
    %95 = vector.broadcast %43 : vector<1x4x1xf32> to vector<8x4x256xf32>
    %96 = vector.broadcast %93 : vector<8x1x256xf32> to vector<8x4x256xf32>
    %97 = arith.cmpf oeq, %95, %96 : vector<8x4x256xf32>
    %cst_23 = arith.constant 1.000000e+00 : f32
    %98 = vector.broadcast %cst_23 : f32 to vector<8x1x256xf32>
    %99 = arith.subf %98, %94 : vector<8x1x256xf32>
    %cst_24 = arith.constant 0.000000e+00 : f32
    %100 = vector.shape_cast %99 : vector<8x1x256xf32> to vector<8x1x256xf32>
    %101 = vector.broadcast %100 : vector<8x1x256xf32> to vector<8x4x256xf32>
    %102 = vector.broadcast %cst_24 : f32 to vector<8x4x256xf32>
    %103 = arith.select %97, %101, %102 : vector<8x4x256xi1>, vector<8x4x256xf32>
    %cst_25 = arith.constant 1.000000e+00 : f32
    %104 = vector.broadcast %cst_25 : f32 to vector<8x1x256xf32>
    %105 = arith.addf %93, %104 : vector<8x1x256xf32>
    %106 = vector.broadcast %43 : vector<1x4x1xf32> to vector<8x4x256xf32>
    %107 = vector.broadcast %105 : vector<8x1x256xf32> to vector<8x4x256xf32>
    %108 = arith.cmpf oeq, %106, %107 : vector<8x4x256xf32>
    %cst_26 = arith.constant 0.000000e+00 : f32
    %109 = vector.shape_cast %94 : vector<8x1x256xf32> to vector<8x1x256xf32>
    %110 = vector.broadcast %109 : vector<8x1x256xf32> to vector<8x4x256xf32>
    %111 = vector.broadcast %cst_26 : f32 to vector<8x4x256xf32>
    %112 = arith.select %108, %110, %111 : vector<8x4x256xi1>, vector<8x4x256xf32>
    %113 = arith.addf %103, %112 : vector<8x4x256xf32>
    %cst_27 = arith.constant 1.000000e+00 : f32
    %114 = vector.broadcast %cst_27 : f32 to vector<8x256xf32>
    %115 = arith.addf %41, %114 : vector<8x256xf32>
    %cst_28 = arith.constant 1.500000e+00 : f32
    %116 = vector.broadcast %cst_28 : f32 to vector<8x256xf32>
    %117 = arith.mulf %115, %116 : vector<8x256xf32>
    %cst_29 = arith.constant 0.000000e+00 : f32
    %cst_30 = arith.constant 3.000000e+00 : f32
    %118 = vector.broadcast %cst_29 : f32 to vector<8x256xf32>
    %119 = arith.maximumf %118, %117 : vector<8x256xf32>
    %120 = vector.broadcast %cst_30 : f32 to vector<8x256xf32>
    %121 = arith.minimumf %120, %119 : vector<8x256xf32>
    %122 = math.floor %121 : vector<8x256xf32>
    %cst_31 = arith.constant 0.000000e+00 : f32
    %cst_32 = arith.constant 2.000000e+00 : f32
    %123 = vector.broadcast %cst_31 : f32 to vector<8x256xf32>
    %124 = arith.maximumf %123, %122 : vector<8x256xf32>
    %125 = vector.broadcast %cst_32 : f32 to vector<8x256xf32>
    %126 = arith.minimumf %125, %124 : vector<8x256xf32>
    %127 = arith.subf %121, %126 : vector<8x256xf32>
    %128 = vector.shape_cast %126 : vector<8x256xf32> to vector<8x1x256xf32>
    %129 = vector.shape_cast %127 : vector<8x256xf32> to vector<8x1x256xf32>
    %130 = vector.broadcast %43 : vector<1x4x1xf32> to vector<8x4x256xf32>
    %131 = vector.broadcast %128 : vector<8x1x256xf32> to vector<8x4x256xf32>
    %132 = arith.cmpf oeq, %130, %131 : vector<8x4x256xf32>
    %cst_33 = arith.constant 1.000000e+00 : f32
    %133 = vector.broadcast %cst_33 : f32 to vector<8x1x256xf32>
    %134 = arith.subf %133, %129 : vector<8x1x256xf32>
    %cst_34 = arith.constant 0.000000e+00 : f32
    %135 = vector.shape_cast %134 : vector<8x1x256xf32> to vector<8x1x256xf32>
    %136 = vector.broadcast %135 : vector<8x1x256xf32> to vector<8x4x256xf32>
    %137 = vector.broadcast %cst_34 : f32 to vector<8x4x256xf32>
    %138 = arith.select %132, %136, %137 : vector<8x4x256xi1>, vector<8x4x256xf32>
    %cst_35 = arith.constant 1.000000e+00 : f32
    %139 = vector.broadcast %cst_35 : f32 to vector<8x1x256xf32>
    %140 = arith.addf %128, %139 : vector<8x1x256xf32>
    %141 = vector.broadcast %43 : vector<1x4x1xf32> to vector<8x4x256xf32>
    %142 = vector.broadcast %140 : vector<8x1x256xf32> to vector<8x4x256xf32>
    %143 = arith.cmpf oeq, %141, %142 : vector<8x4x256xf32>
    %cst_36 = arith.constant 0.000000e+00 : f32
    %144 = vector.shape_cast %129 : vector<8x1x256xf32> to vector<8x1x256xf32>
    %145 = vector.broadcast %144 : vector<8x1x256xf32> to vector<8x4x256xf32>
    %146 = vector.broadcast %cst_36 : f32 to vector<8x4x256xf32>
    %147 = arith.select %143, %145, %146 : vector<8x4x256xi1>, vector<8x4x256xf32>
    %148 = arith.addf %138, %147 : vector<8x4x256xf32>
    %149 = vector.extract_strided_slice %113 {offsets = [0, 0, 0], sizes = [1, 4, 256], strides = [1, 1, 1]} : vector<8x4x256xf32> to vector<1x4x256xf32>
    %150 = vector.shape_cast %149 : vector<1x4x256xf32> to vector<4x256xf32>
    %151 = vector.shape_cast %150 : vector<4x256xf32> to vector<4x1x256xf32>
    %152 = vector.extract_strided_slice %78 {offsets = [0, 0, 0], sizes = [1, 4, 256], strides = [1, 1, 1]} : vector<8x4x256xf32> to vector<1x4x256xf32>
    %153 = vector.shape_cast %152 : vector<1x4x256xf32> to vector<4x256xf32>
    %154 = vector.shape_cast %153 : vector<4x256xf32> to vector<1x4x256xf32>
    %155 = vector.broadcast %151 : vector<4x1x256xf32> to vector<4x4x256xf32>
    %156 = vector.broadcast %154 : vector<1x4x256xf32> to vector<4x4x256xf32>
    %157 = arith.mulf %155, %156 : vector<4x4x256xf32>
    %158 = vector.shape_cast %157 : vector<4x4x256xf32> to vector<16x256xf32>
    %159 = vector.extract_strided_slice %148 {offsets = [0, 0, 0], sizes = [1, 1, 256], strides = [1, 1, 1]} : vector<8x4x256xf32> to vector<1x1x256xf32>
    %160 = vector.shape_cast %159 : vector<1x1x256xf32> to vector<1x256xf32>
    %161 = vector.broadcast %160 : vector<1x256xf32> to vector<16x256xf32>
    %162 = arith.mulf %161, %158 : vector<16x256xf32>
    %c0_37 = arith.constant 0 : index
    %c0_38 = arith.constant 0 : index
    %c0_39 = arith.constant 0 : index
    %163 = vector.load %arg6[%c0_37, %c0_38, %c0_39] : memref<8x64x256xf32, #tpu.memory_space<vmem>>, vector<1x16x256xf32>
    %164 = vector.shape_cast %163 : vector<1x16x256xf32> to vector<16x256xf32>
    %165 = vector.shape_cast %162 : vector<16x256xf32> to vector<1x16x256xf32>
    tpu.vector_store %arg6[%c0_37, %c0_38, %c0_39], %165 {strides = array<i32>} : memref<8x64x256xf32, #tpu.memory_space<vmem>>, vector<1x16x256xf32>,
    %166 = vector.extract_strided_slice %148 {offsets = [0, 1, 0], sizes = [1, 1, 256], strides = [1, 1, 1]} : vector<8x4x256xf32> to vector<1x1x256xf32>
    %167 = vector.shape_cast %166 : vector<1x1x256xf32> to vector<1x256xf32>
    %168 = vector.broadcast %167 : vector<1x256xf32> to vector<16x256xf32>
    %169 = arith.mulf %168, %158 : vector<16x256xf32>
    %c0_40 = arith.constant 0 : index
    %c16 = arith.constant 16 : index
    %c0_41 = arith.constant 0 : index
    %170 = vector.load %arg6[%c0_40, %c16, %c0_41] : memref<8x64x256xf32, #tpu.memory_space<vmem>>, vector<1x16x256xf32>
    %171 = vector.shape_cast %170 : vector<1x16x256xf32> to vector<16x256xf32>
    %172 = vector.shape_cast %169 : vector<16x256xf32> to vector<1x16x256xf32>
    tpu.vector_store %arg6[%c0_40, %c16, %c0_41], %172 {strides = array<i32>} : memref<8x64x256xf32, #tpu.memory_space<vmem>>, vector<1x16x256xf32>,
    %173 = vector.extract_strided_slice %148 {offsets = [0, 2, 0], sizes = [1, 1, 256], strides = [1, 1, 1]} : vector<8x4x256xf32> to vector<1x1x256xf32>
    %174 = vector.shape_cast %173 : vector<1x1x256xf32> to vector<1x256xf32>
    %175 = vector.broadcast %174 : vector<1x256xf32> to vector<16x256xf32>
    %176 = arith.mulf %175, %158 : vector<16x256xf32>
    %c0_42 = arith.constant 0 : index
    %c32 = arith.constant 32 : index
    %c0_43 = arith.constant 0 : index
    %177 = vector.load %arg6[%c0_42, %c32, %c0_43] : memref<8x64x256xf32, #tpu.memory_space<vmem>>, vector<1x16x256xf32>
    %178 = vector.shape_cast %177 : vector<1x16x256xf32> to vector<16x256xf32>
    %179 = vector.shape_cast %176 : vector<16x256xf32> to vector<1x16x256xf32>
    tpu.vector_store %arg6[%c0_42, %c32, %c0_43], %179 {strides = array<i32>} : memref<8x64x256xf32, #tpu.memory_space<vmem>>, vector<1x16x256xf32>,
    %180 = vector.extract_strided_slice %148 {offsets = [0, 3, 0], sizes = [1, 1, 256], strides = [1, 1, 1]} : vector<8x4x256xf32> to vector<1x1x256xf32>
    %181 = vector.shape_cast %180 : vector<1x1x256xf32> to vector<1x256xf32>
    %182 = vector.broadcast %181 : vector<1x256xf32> to vector<16x256xf32>
    %183 = arith.mulf %182, %158 : vector<16x256xf32>
    %c0_44 = arith.constant 0 : index
    %c48 = arith.constant 48 : index
    %c0_45 = arith.constant 0 : index
    %184 = vector.load %arg6[%c0_44, %c48, %c0_45] : memref<8x64x256xf32, #tpu.memory_space<vmem>>, vector<1x16x256xf32>
    %185 = vector.shape_cast %184 : vector<1x16x256xf32> to vector<16x256xf32>
    %186 = vector.shape_cast %183 : vector<16x256xf32> to vector<1x16x256xf32>
    tpu.vector_store %arg6[%c0_44, %c48, %c0_45], %186 {strides = array<i32>} : memref<8x64x256xf32, #tpu.memory_space<vmem>>, vector<1x16x256xf32>,
    %187 = vector.extract_strided_slice %113 {offsets = [1, 0, 0], sizes = [1, 4, 256], strides = [1, 1, 1]} : vector<8x4x256xf32> to vector<1x4x256xf32>
    %188 = vector.shape_cast %187 : vector<1x4x256xf32> to vector<4x256xf32>
    %189 = vector.shape_cast %188 : vector<4x256xf32> to vector<4x1x256xf32>
    %190 = vector.extract_strided_slice %78 {offsets = [1, 0, 0], sizes = [1, 4, 256], strides = [1, 1, 1]} : vector<8x4x256xf32> to vector<1x4x256xf32>
    %191 = vector.shape_cast %190 : vector<1x4x256xf32> to vector<4x256xf32>
    %192 = vector.shape_cast %191 : vector<4x256xf32> to vector<1x4x256xf32>
    %193 = vector.broadcast %189 : vector<4x1x256xf32> to vector<4x4x256xf32>
    %194 = vector.broadcast %192 : vector<1x4x256xf32> to vector<4x4x256xf32>
    %195 = arith.mulf %193, %194 : vector<4x4x256xf32>
    %196 = vector.shape_cast %195 : vector<4x4x256xf32> to vector<16x256xf32>
    %197 = vector.extract_strided_slice %148 {offsets = [1, 0, 0], sizes = [1, 1, 256], strides = [1, 1, 1]} : vector<8x4x256xf32> to vector<1x1x256xf32>
    %198 = vector.shape_cast %197 : vector<1x1x256xf32> to vector<1x256xf32>
    %199 = vector.broadcast %198 : vector<1x256xf32> to vector<16x256xf32>
    %200 = arith.mulf %199, %196 : vector<16x256xf32>
    %c1 = arith.constant 1 : index
    %c0_46 = arith.constant 0 : index
    %c0_47 = arith.constant 0 : index
    %201 = vector.load %arg6[%c1, %c0_46, %c0_47] : memref<8x64x256xf32, #tpu.memory_space<vmem>>, vector<1x16x256xf32>
    %202 = vector.shape_cast %201 : vector<1x16x256xf32> to vector<16x256xf32>
    %203 = vector.shape_cast %200 : vector<16x256xf32> to vector<1x16x256xf32>
    tpu.vector_store %arg6[%c1, %c0_46, %c0_47], %203 {strides = array<i32>} : memref<8x64x256xf32, #tpu.memory_space<vmem>>, vector<1x16x256xf32>,
    %204 = vector.extract_strided_slice %148 {offsets = [1, 1, 0], sizes = [1, 1, 256], strides = [1, 1, 1]} : vector<8x4x256xf32> to vector<1x1x256xf32>
    %205 = vector.shape_cast %204 : vector<1x1x256xf32> to vector<1x256xf32>
    %206 = vector.broadcast %205 : vector<1x256xf32> to vector<16x256xf32>
    %207 = arith.mulf %206, %196 : vector<16x256xf32>
    %c1_48 = arith.constant 1 : index
    %c16_49 = arith.constant 16 : index
    %c0_50 = arith.constant 0 : index
    %208 = vector.load %arg6[%c1_48, %c16_49, %c0_50] : memref<8x64x256xf32, #tpu.memory_space<vmem>>, vector<1x16x256xf32>
    %209 = vector.shape_cast %208 : vector<1x16x256xf32> to vector<16x256xf32>
    %210 = vector.shape_cast %207 : vector<16x256xf32> to vector<1x16x256xf32>
    tpu.vector_store %arg6[%c1_48, %c16_49, %c0_50], %210 {strides = array<i32>} : memref<8x64x256xf32, #tpu.memory_space<vmem>>, vector<1x16x256xf32>,
    %211 = vector.extract_strided_slice %148 {offsets = [1, 2, 0], sizes = [1, 1, 256], strides = [1, 1, 1]} : vector<8x4x256xf32> to vector<1x1x256xf32>
    %212 = vector.shape_cast %211 : vector<1x1x256xf32> to vector<1x256xf32>
    %213 = vector.broadcast %212 : vector<1x256xf32> to vector<16x256xf32>
    %214 = arith.mulf %213, %196 : vector<16x256xf32>
    %c1_51 = arith.constant 1 : index
    %c32_52 = arith.constant 32 : index
    %c0_53 = arith.constant 0 : index
    %215 = vector.load %arg6[%c1_51, %c32_52, %c0_53] : memref<8x64x256xf32, #tpu.memory_space<vmem>>, vector<1x16x256xf32>
    %216 = vector.shape_cast %215 : vector<1x16x256xf32> to vector<16x256xf32>
    %217 = vector.shape_cast %214 : vector<16x256xf32> to vector<1x16x256xf32>
    tpu.vector_store %arg6[%c1_51, %c32_52, %c0_53], %217 {strides = array<i32>} : memref<8x64x256xf32, #tpu.memory_space<vmem>>, vector<1x16x256xf32>,
    %218 = vector.extract_strided_slice %148 {offsets = [1, 3, 0], sizes = [1, 1, 256], strides = [1, 1, 1]} : vector<8x4x256xf32> to vector<1x1x256xf32>
    %219 = vector.shape_cast %218 : vector<1x1x256xf32> to vector<1x256xf32>
    %220 = vector.broadcast %219 : vector<1x256xf32> to vector<16x256xf32>
    %221 = arith.mulf %220, %196 : vector<16x256xf32>
    %c1_54 = arith.constant 1 : index
    %c48_55 = arith.constant 48 : index
    %c0_56 = arith.constant 0 : index
    %222 = vector.load %arg6[%c1_54, %c48_55, %c0_56] : memref<8x64x256xf32, #tpu.memory_space<vmem>>, vector<1x16x256xf32>
    %223 = vector.shape_cast %222 : vector<1x16x256xf32> to vector<16x256xf32>
    %224 = vector.shape_cast %221 : vector<16x256xf32> to vector<1x16x256xf32>
    tpu.vector_store %arg6[%c1_54, %c48_55, %c0_56], %224 {strides = array<i32>} : memref<8x64x256xf32, #tpu.memory_space<vmem>>, vector<1x16x256xf32>,
    %225 = vector.extract_strided_slice %113 {offsets = [2, 0, 0], sizes = [1, 4, 256], strides = [1, 1, 1]} : vector<8x4x256xf32> to vector<1x4x256xf32>
    %226 = vector.shape_cast %225 : vector<1x4x256xf32> to vector<4x256xf32>
    %227 = vector.shape_cast %226 : vector<4x256xf32> to vector<4x1x256xf32>
    %228 = vector.extract_strided_slice %78 {offsets = [2, 0, 0], sizes = [1, 4, 256], strides = [1, 1, 1]} : vector<8x4x256xf32> to vector<1x4x256xf32>
    %229 = vector.shape_cast %228 : vector<1x4x256xf32> to vector<4x256xf32>
    %230 = vector.shape_cast %229 : vector<4x256xf32> to vector<1x4x256xf32>
    %231 = vector.broadcast %227 : vector<4x1x256xf32> to vector<4x4x256xf32>
    %232 = vector.broadcast %230 : vector<1x4x256xf32> to vector<4x4x256xf32>
    %233 = arith.mulf %231, %232 : vector<4x4x256xf32>
    %234 = vector.shape_cast %233 : vector<4x4x256xf32> to vector<16x256xf32>
    %235 = vector.extract_strided_slice %148 {offsets = [2, 0, 0], sizes = [1, 1, 256], strides = [1, 1, 1]} : vector<8x4x256xf32> to vector<1x1x256xf32>
    %236 = vector.shape_cast %235 : vector<1x1x256xf32> to vector<1x256xf32>
    %237 = vector.broadcast %236 : vector<1x256xf32> to vector<16x256xf32>
    %238 = arith.mulf %237, %234 : vector<16x256xf32>
    %c2 = arith.constant 2 : index
    %c0_57 = arith.constant 0 : index
    %c0_58 = arith.constant 0 : index
    %239 = vector.load %arg6[%c2, %c0_57, %c0_58] : memref<8x64x256xf32, #tpu.memory_space<vmem>>, vector<1x16x256xf32>
    %240 = vector.shape_cast %239 : vector<1x16x256xf32> to vector<16x256xf32>
    %241 = vector.shape_cast %238 : vector<16x256xf32> to vector<1x16x256xf32>
    tpu.vector_store %arg6[%c2, %c0_57, %c0_58], %241 {strides = array<i32>} : memref<8x64x256xf32, #tpu.memory_space<vmem>>, vector<1x16x256xf32>,
    %242 = vector.extract_strided_slice %148 {offsets = [2, 1, 0], sizes = [1, 1, 256], strides = [1, 1, 1]} : vector<8x4x256xf32> to vector<1x1x256xf32>
    %243 = vector.shape_cast %242 : vector<1x1x256xf32> to vector<1x256xf32>
    %244 = vector.broadcast %243 : vector<1x256xf32> to vector<16x256xf32>
    %245 = arith.mulf %244, %234 : vector<16x256xf32>
    %c2_59 = arith.constant 2 : index
    %c16_60 = arith.constant 16 : index
    %c0_61 = arith.constant 0 : index
    %246 = vector.load %arg6[%c2_59, %c16_60, %c0_61] : memref<8x64x256xf32, #tpu.memory_space<vmem>>, vector<1x16x256xf32>
    %247 = vector.shape_cast %246 : vector<1x16x256xf32> to vector<16x256xf32>
    %248 = vector.shape_cast %245 : vector<16x256xf32> to vector<1x16x256xf32>
    tpu.vector_store %arg6[%c2_59, %c16_60, %c0_61], %248 {strides = array<i32>} : memref<8x64x256xf32, #tpu.memory_space<vmem>>, vector<1x16x256xf32>,
    %249 = vector.extract_strided_slice %148 {offsets = [2, 2, 0], sizes = [1, 1, 256], strides = [1, 1, 1]} : vector<8x4x256xf32> to vector<1x1x256xf32>
    %250 = vector.shape_cast %249 : vector<1x1x256xf32> to vector<1x256xf32>
    %251 = vector.broadcast %250 : vector<1x256xf32> to vector<16x256xf32>
    %252 = arith.mulf %251, %234 : vector<16x256xf32>
    %c2_62 = arith.constant 2 : index
    %c32_63 = arith.constant 32 : index
    %c0_64 = arith.constant 0 : index
    %253 = vector.load %arg6[%c2_62, %c32_63, %c0_64] : memref<8x64x256xf32, #tpu.memory_space<vmem>>, vector<1x16x256xf32>
    %254 = vector.shape_cast %253 : vector<1x16x256xf32> to vector<16x256xf32>
    %255 = vector.shape_cast %252 : vector<16x256xf32> to vector<1x16x256xf32>
    tpu.vector_store %arg6[%c2_62, %c32_63, %c0_64], %255 {strides = array<i32>} : memref<8x64x256xf32, #tpu.memory_space<vmem>>, vector<1x16x256xf32>,
    %256 = vector.extract_strided_slice %148 {offsets = [2, 3, 0], sizes = [1, 1, 256], strides = [1, 1, 1]} : vector<8x4x256xf32> to vector<1x1x256xf32>
    %257 = vector.shape_cast %256 : vector<1x1x256xf32> to vector<1x256xf32>
    %258 = vector.broadcast %257 : vector<1x256xf32> to vector<16x256xf32>
    %259 = arith.mulf %258, %234 : vector<16x256xf32>
    %c2_65 = arith.constant 2 : index
    %c48_66 = arith.constant 48 : index
    %c0_67 = arith.constant 0 : index
    %260 = vector.load %arg6[%c2_65, %c48_66, %c0_67] : memref<8x64x256xf32, #tpu.memory_space<vmem>>, vector<1x16x256xf32>
    %261 = vector.shape_cast %260 : vector<1x16x256xf32> to vector<16x256xf32>
    %262 = vector.shape_cast %259 : vector<16x256xf32> to vector<1x16x256xf32>
    tpu.vector_store %arg6[%c2_65, %c48_66, %c0_67], %262 {strides = array<i32>} : memref<8x64x256xf32, #tpu.memory_space<vmem>>, vector<1x16x256xf32>,
    %263 = vector.extract_strided_slice %113 {offsets = [3, 0, 0], sizes = [1, 4, 256], strides = [1, 1, 1]} : vector<8x4x256xf32> to vector<1x4x256xf32>
    %264 = vector.shape_cast %263 : vector<1x4x256xf32> to vector<4x256xf32>
    %265 = vector.shape_cast %264 : vector<4x256xf32> to vector<4x1x256xf32>
    %266 = vector.extract_strided_slice %78 {offsets = [3, 0, 0], sizes = [1, 4, 256], strides = [1, 1, 1]} : vector<8x4x256xf32> to vector<1x4x256xf32>
    %267 = vector.shape_cast %266 : vector<1x4x256xf32> to vector<4x256xf32>
    %268 = vector.shape_cast %267 : vector<4x256xf32> to vector<1x4x256xf32>
    %269 = vector.broadcast %265 : vector<4x1x256xf32> to vector<4x4x256xf32>
    %270 = vector.broadcast %268 : vector<1x4x256xf32> to vector<4x4x256xf32>
    %271 = arith.mulf %269, %270 : vector<4x4x256xf32>
    %272 = vector.shape_cast %271 : vector<4x4x256xf32> to vector<16x256xf32>
    %273 = vector.extract_strided_slice %148 {offsets = [3, 0, 0], sizes = [1, 1, 256], strides = [1, 1, 1]} : vector<8x4x256xf32> to vector<1x1x256xf32>
    %274 = vector.shape_cast %273 : vector<1x1x256xf32> to vector<1x256xf32>
    %275 = vector.broadcast %274 : vector<1x256xf32> to vector<16x256xf32>
    %276 = arith.mulf %275, %272 : vector<16x256xf32>
    %c3 = arith.constant 3 : index
    %c0_68 = arith.constant 0 : index
    %c0_69 = arith.constant 0 : index
    %277 = vector.load %arg6[%c3, %c0_68, %c0_69] : memref<8x64x256xf32, #tpu.memory_space<vmem>>, vector<1x16x256xf32>
    %278 = vector.shape_cast %277 : vector<1x16x256xf32> to vector<16x256xf32>
    %279 = vector.shape_cast %276 : vector<16x256xf32> to vector<1x16x256xf32>
    tpu.vector_store %arg6[%c3, %c0_68, %c0_69], %279 {strides = array<i32>} : memref<8x64x256xf32, #tpu.memory_space<vmem>>, vector<1x16x256xf32>,
    %280 = vector.extract_strided_slice %148 {offsets = [3, 1, 0], sizes = [1, 1, 256], strides = [1, 1, 1]} : vector<8x4x256xf32> to vector<1x1x256xf32>
    %281 = vector.shape_cast %280 : vector<1x1x256xf32> to vector<1x256xf32>
    %282 = vector.broadcast %281 : vector<1x256xf32> to vector<16x256xf32>
    %283 = arith.mulf %282, %272 : vector<16x256xf32>
    %c3_70 = arith.constant 3 : index
    %c16_71 = arith.constant 16 : index
    %c0_72 = arith.constant 0 : index
    %284 = vector.load %arg6[%c3_70, %c16_71, %c0_72] : memref<8x64x256xf32, #tpu.memory_space<vmem>>, vector<1x16x256xf32>
    %285 = vector.shape_cast %284 : vector<1x16x256xf32> to vector<16x256xf32>
    %286 = vector.shape_cast %283 : vector<16x256xf32> to vector<1x16x256xf32>
    tpu.vector_store %arg6[%c3_70, %c16_71, %c0_72], %286 {strides = array<i32>} : memref<8x64x256xf32, #tpu.memory_space<vmem>>, vector<1x16x256xf32>,
    %287 = vector.extract_strided_slice %148 {offsets = [3, 2, 0], sizes = [1, 1, 256], strides = [1, 1, 1]} : vector<8x4x256xf32> to vector<1x1x256xf32>
    %288 = vector.shape_cast %287 : vector<1x1x256xf32> to vector<1x256xf32>
    %289 = vector.broadcast %288 : vector<1x256xf32> to vector<16x256xf32>
    %290 = arith.mulf %289, %272 : vector<16x256xf32>
    %c3_73 = arith.constant 3 : index
    %c32_74 = arith.constant 32 : index
    %c0_75 = arith.constant 0 : index
    %291 = vector.load %arg6[%c3_73, %c32_74, %c0_75] : memref<8x64x256xf32, #tpu.memory_space<vmem>>, vector<1x16x256xf32>
    %292 = vector.shape_cast %291 : vector<1x16x256xf32> to vector<16x256xf32>
    %293 = vector.shape_cast %290 : vector<16x256xf32> to vector<1x16x256xf32>
    tpu.vector_store %arg6[%c3_73, %c32_74, %c0_75], %293 {strides = array<i32>} : memref<8x64x256xf32, #tpu.memory_space<vmem>>, vector<1x16x256xf32>,
    %294 = vector.extract_strided_slice %148 {offsets = [3, 3, 0], sizes = [1, 1, 256], strides = [1, 1, 1]} : vector<8x4x256xf32> to vector<1x1x256xf32>
    %295 = vector.shape_cast %294 : vector<1x1x256xf32> to vector<1x256xf32>
    %296 = vector.broadcast %295 : vector<1x256xf32> to vector<16x256xf32>
    %297 = arith.mulf %296, %272 : vector<16x256xf32>
    %c3_76 = arith.constant 3 : index
    %c48_77 = arith.constant 48 : index
    %c0_78 = arith.constant 0 : index
    %298 = vector.load %arg6[%c3_76, %c48_77, %c0_78] : memref<8x64x256xf32, #tpu.memory_space<vmem>>, vector<1x16x256xf32>
    %299 = vector.shape_cast %298 : vector<1x16x256xf32> to vector<16x256xf32>
    %300 = vector.shape_cast %297 : vector<16x256xf32> to vector<1x16x256xf32>
    tpu.vector_store %arg6[%c3_76, %c48_77, %c0_78], %300 {strides = array<i32>} : memref<8x64x256xf32, #tpu.memory_space<vmem>>, vector<1x16x256xf32>,
    %301 = vector.extract_strided_slice %113 {offsets = [4, 0, 0], sizes = [1, 4, 256], strides = [1, 1, 1]} : vector<8x4x256xf32> to vector<1x4x256xf32>
    %302 = vector.shape_cast %301 : vector<1x4x256xf32> to vector<4x256xf32>
    %303 = vector.shape_cast %302 : vector<4x256xf32> to vector<4x1x256xf32>
    %304 = vector.extract_strided_slice %78 {offsets = [4, 0, 0], sizes = [1, 4, 256], strides = [1, 1, 1]} : vector<8x4x256xf32> to vector<1x4x256xf32>
    %305 = vector.shape_cast %304 : vector<1x4x256xf32> to vector<4x256xf32>
    %306 = vector.shape_cast %305 : vector<4x256xf32> to vector<1x4x256xf32>
    %307 = vector.broadcast %303 : vector<4x1x256xf32> to vector<4x4x256xf32>
    %308 = vector.broadcast %306 : vector<1x4x256xf32> to vector<4x4x256xf32>
    %309 = arith.mulf %307, %308 : vector<4x4x256xf32>
    %310 = vector.shape_cast %309 : vector<4x4x256xf32> to vector<16x256xf32>
    %311 = vector.extract_strided_slice %148 {offsets = [4, 0, 0], sizes = [1, 1, 256], strides = [1, 1, 1]} : vector<8x4x256xf32> to vector<1x1x256xf32>
    %312 = vector.shape_cast %311 : vector<1x1x256xf32> to vector<1x256xf32>
    %313 = vector.broadcast %312 : vector<1x256xf32> to vector<16x256xf32>
    %314 = arith.mulf %313, %310 : vector<16x256xf32>
    %c4 = arith.constant 4 : index
    %c0_79 = arith.constant 0 : index
    %c0_80 = arith.constant 0 : index
    %315 = vector.load %arg6[%c4, %c0_79, %c0_80] : memref<8x64x256xf32, #tpu.memory_space<vmem>>, vector<1x16x256xf32>
    %316 = vector.shape_cast %315 : vector<1x16x256xf32> to vector<16x256xf32>
    %317 = vector.shape_cast %314 : vector<16x256xf32> to vector<1x16x256xf32>
    tpu.vector_store %arg6[%c4, %c0_79, %c0_80], %317 {strides = array<i32>} : memref<8x64x256xf32, #tpu.memory_space<vmem>>, vector<1x16x256xf32>,
    %318 = vector.extract_strided_slice %148 {offsets = [4, 1, 0], sizes = [1, 1, 256], strides = [1, 1, 1]} : vector<8x4x256xf32> to vector<1x1x256xf32>
    %319 = vector.shape_cast %318 : vector<1x1x256xf32> to vector<1x256xf32>
    %320 = vector.broadcast %319 : vector<1x256xf32> to vector<16x256xf32>
    %321 = arith.mulf %320, %310 : vector<16x256xf32>
    %c4_81 = arith.constant 4 : index
    %c16_82 = arith.constant 16 : index
    %c0_83 = arith.constant 0 : index
    %322 = vector.load %arg6[%c4_81, %c16_82, %c0_83] : memref<8x64x256xf32, #tpu.memory_space<vmem>>, vector<1x16x256xf32>
    %323 = vector.shape_cast %322 : vector<1x16x256xf32> to vector<16x256xf32>
    %324 = vector.shape_cast %321 : vector<16x256xf32> to vector<1x16x256xf32>
    tpu.vector_store %arg6[%c4_81, %c16_82, %c0_83], %324 {strides = array<i32>} : memref<8x64x256xf32, #tpu.memory_space<vmem>>, vector<1x16x256xf32>,
    %325 = vector.extract_strided_slice %148 {offsets = [4, 2, 0], sizes = [1, 1, 256], strides = [1, 1, 1]} : vector<8x4x256xf32> to vector<1x1x256xf32>
    %326 = vector.shape_cast %325 : vector<1x1x256xf32> to vector<1x256xf32>
    %327 = vector.broadcast %326 : vector<1x256xf32> to vector<16x256xf32>
    %328 = arith.mulf %327, %310 : vector<16x256xf32>
    %c4_84 = arith.constant 4 : index
    %c32_85 = arith.constant 32 : index
    %c0_86 = arith.constant 0 : index
    %329 = vector.load %arg6[%c4_84, %c32_85, %c0_86] : memref<8x64x256xf32, #tpu.memory_space<vmem>>, vector<1x16x256xf32>
    %330 = vector.shape_cast %329 : vector<1x16x256xf32> to vector<16x256xf32>
    %331 = vector.shape_cast %328 : vector<16x256xf32> to vector<1x16x256xf32>
    tpu.vector_store %arg6[%c4_84, %c32_85, %c0_86], %331 {strides = array<i32>} : memref<8x64x256xf32, #tpu.memory_space<vmem>>, vector<1x16x256xf32>,
    %332 = vector.extract_strided_slice %148 {offsets = [4, 3, 0], sizes = [1, 1, 256], strides = [1, 1, 1]} : vector<8x4x256xf32> to vector<1x1x256xf32>
    %333 = vector.shape_cast %332 : vector<1x1x256xf32> to vector<1x256xf32>
    %334 = vector.broadcast %333 : vector<1x256xf32> to vector<16x256xf32>
    %335 = arith.mulf %334, %310 : vector<16x256xf32>
    %c4_87 = arith.constant 4 : index
    %c48_88 = arith.constant 48 : index
    %c0_89 = arith.constant 0 : index
    %336 = vector.load %arg6[%c4_87, %c48_88, %c0_89] : memref<8x64x256xf32, #tpu.memory_space<vmem>>, vector<1x16x256xf32>
    %337 = vector.shape_cast %336 : vector<1x16x256xf32> to vector<16x256xf32>
    %338 = vector.shape_cast %335 : vector<16x256xf32> to vector<1x16x256xf32>
    tpu.vector_store %arg6[%c4_87, %c48_88, %c0_89], %338 {strides = array<i32>} : memref<8x64x256xf32, #tpu.memory_space<vmem>>, vector<1x16x256xf32>,
    %339 = vector.extract_strided_slice %113 {offsets = [5, 0, 0], sizes = [1, 4, 256], strides = [1, 1, 1]} : vector<8x4x256xf32> to vector<1x4x256xf32>
    %340 = vector.shape_cast %339 : vector<1x4x256xf32> to vector<4x256xf32>
    %341 = vector.shape_cast %340 : vector<4x256xf32> to vector<4x1x256xf32>
    %342 = vector.extract_strided_slice %78 {offsets = [5, 0, 0], sizes = [1, 4, 256], strides = [1, 1, 1]} : vector<8x4x256xf32> to vector<1x4x256xf32>
    %343 = vector.shape_cast %342 : vector<1x4x256xf32> to vector<4x256xf32>
    %344 = vector.shape_cast %343 : vector<4x256xf32> to vector<1x4x256xf32>
    %345 = vector.broadcast %341 : vector<4x1x256xf32> to vector<4x4x256xf32>
    %346 = vector.broadcast %344 : vector<1x4x256xf32> to vector<4x4x256xf32>
    %347 = arith.mulf %345, %346 : vector<4x4x256xf32>
    %348 = vector.shape_cast %347 : vector<4x4x256xf32> to vector<16x256xf32>
    %349 = vector.extract_strided_slice %148 {offsets = [5, 0, 0], sizes = [1, 1, 256], strides = [1, 1, 1]} : vector<8x4x256xf32> to vector<1x1x256xf32>
    %350 = vector.shape_cast %349 : vector<1x1x256xf32> to vector<1x256xf32>
    %351 = vector.broadcast %350 : vector<1x256xf32> to vector<16x256xf32>
    %352 = arith.mulf %351, %348 : vector<16x256xf32>
    %c5 = arith.constant 5 : index
    %c0_90 = arith.constant 0 : index
    %c0_91 = arith.constant 0 : index
    %353 = vector.load %arg6[%c5, %c0_90, %c0_91] : memref<8x64x256xf32, #tpu.memory_space<vmem>>, vector<1x16x256xf32>
    %354 = vector.shape_cast %353 : vector<1x16x256xf32> to vector<16x256xf32>
    %355 = vector.shape_cast %352 : vector<16x256xf32> to vector<1x16x256xf32>
    tpu.vector_store %arg6[%c5, %c0_90, %c0_91], %355 {strides = array<i32>} : memref<8x64x256xf32, #tpu.memory_space<vmem>>, vector<1x16x256xf32>,
    %356 = vector.extract_strided_slice %148 {offsets = [5, 1, 0], sizes = [1, 1, 256], strides = [1, 1, 1]} : vector<8x4x256xf32> to vector<1x1x256xf32>
    %357 = vector.shape_cast %356 : vector<1x1x256xf32> to vector<1x256xf32>
    %358 = vector.broadcast %357 : vector<1x256xf32> to vector<16x256xf32>
    %359 = arith.mulf %358, %348 : vector<16x256xf32>
    %c5_92 = arith.constant 5 : index
    %c16_93 = arith.constant 16 : index
    %c0_94 = arith.constant 0 : index
    %360 = vector.load %arg6[%c5_92, %c16_93, %c0_94] : memref<8x64x256xf32, #tpu.memory_space<vmem>>, vector<1x16x256xf32>
    %361 = vector.shape_cast %360 : vector<1x16x256xf32> to vector<16x256xf32>
    %362 = vector.shape_cast %359 : vector<16x256xf32> to vector<1x16x256xf32>
    tpu.vector_store %arg6[%c5_92, %c16_93, %c0_94], %362 {strides = array<i32>} : memref<8x64x256xf32, #tpu.memory_space<vmem>>, vector<1x16x256xf32>,
    %363 = vector.extract_strided_slice %148 {offsets = [5, 2, 0], sizes = [1, 1, 256], strides = [1, 1, 1]} : vector<8x4x256xf32> to vector<1x1x256xf32>
    %364 = vector.shape_cast %363 : vector<1x1x256xf32> to vector<1x256xf32>
    %365 = vector.broadcast %364 : vector<1x256xf32> to vector<16x256xf32>
    %366 = arith.mulf %365, %348 : vector<16x256xf32>
    %c5_95 = arith.constant 5 : index
    %c32_96 = arith.constant 32 : index
    %c0_97 = arith.constant 0 : index
    %367 = vector.load %arg6[%c5_95, %c32_96, %c0_97] : memref<8x64x256xf32, #tpu.memory_space<vmem>>, vector<1x16x256xf32>
    %368 = vector.shape_cast %367 : vector<1x16x256xf32> to vector<16x256xf32>
    %369 = vector.shape_cast %366 : vector<16x256xf32> to vector<1x16x256xf32>
    tpu.vector_store %arg6[%c5_95, %c32_96, %c0_97], %369 {strides = array<i32>} : memref<8x64x256xf32, #tpu.memory_space<vmem>>, vector<1x16x256xf32>,
    %370 = vector.extract_strided_slice %148 {offsets = [5, 3, 0], sizes = [1, 1, 256], strides = [1, 1, 1]} : vector<8x4x256xf32> to vector<1x1x256xf32>
    %371 = vector.shape_cast %370 : vector<1x1x256xf32> to vector<1x256xf32>
    %372 = vector.broadcast %371 : vector<1x256xf32> to vector<16x256xf32>
    %373 = arith.mulf %372, %348 : vector<16x256xf32>
    %c5_98 = arith.constant 5 : index
    %c48_99 = arith.constant 48 : index
    %c0_100 = arith.constant 0 : index
    %374 = vector.load %arg6[%c5_98, %c48_99, %c0_100] : memref<8x64x256xf32, #tpu.memory_space<vmem>>, vector<1x16x256xf32>
    %375 = vector.shape_cast %374 : vector<1x16x256xf32> to vector<16x256xf32>
    %376 = vector.shape_cast %373 : vector<16x256xf32> to vector<1x16x256xf32>
    tpu.vector_store %arg6[%c5_98, %c48_99, %c0_100], %376 {strides = array<i32>} : memref<8x64x256xf32, #tpu.memory_space<vmem>>, vector<1x16x256xf32>,
    %377 = vector.extract_strided_slice %113 {offsets = [6, 0, 0], sizes = [1, 4, 256], strides = [1, 1, 1]} : vector<8x4x256xf32> to vector<1x4x256xf32>
    %378 = vector.shape_cast %377 : vector<1x4x256xf32> to vector<4x256xf32>
    %379 = vector.shape_cast %378 : vector<4x256xf32> to vector<4x1x256xf32>
    %380 = vector.extract_strided_slice %78 {offsets = [6, 0, 0], sizes = [1, 4, 256], strides = [1, 1, 1]} : vector<8x4x256xf32> to vector<1x4x256xf32>
    %381 = vector.shape_cast %380 : vector<1x4x256xf32> to vector<4x256xf32>
    %382 = vector.shape_cast %381 : vector<4x256xf32> to vector<1x4x256xf32>
    %383 = vector.broadcast %379 : vector<4x1x256xf32> to vector<4x4x256xf32>
    %384 = vector.broadcast %382 : vector<1x4x256xf32> to vector<4x4x256xf32>
    %385 = arith.mulf %383, %384 : vector<4x4x256xf32>
    %386 = vector.shape_cast %385 : vector<4x4x256xf32> to vector<16x256xf32>
    %387 = vector.extract_strided_slice %148 {offsets = [6, 0, 0], sizes = [1, 1, 256], strides = [1, 1, 1]} : vector<8x4x256xf32> to vector<1x1x256xf32>
    %388 = vector.shape_cast %387 : vector<1x1x256xf32> to vector<1x256xf32>
    %389 = vector.broadcast %388 : vector<1x256xf32> to vector<16x256xf32>
    %390 = arith.mulf %389, %386 : vector<16x256xf32>
    %c6 = arith.constant 6 : index
    %c0_101 = arith.constant 0 : index
    %c0_102 = arith.constant 0 : index
    %391 = vector.load %arg6[%c6, %c0_101, %c0_102] : memref<8x64x256xf32, #tpu.memory_space<vmem>>, vector<1x16x256xf32>
    %392 = vector.shape_cast %391 : vector<1x16x256xf32> to vector<16x256xf32>
    %393 = vector.shape_cast %390 : vector<16x256xf32> to vector<1x16x256xf32>
    tpu.vector_store %arg6[%c6, %c0_101, %c0_102], %393 {strides = array<i32>} : memref<8x64x256xf32, #tpu.memory_space<vmem>>, vector<1x16x256xf32>,
    %394 = vector.extract_strided_slice %148 {offsets = [6, 1, 0], sizes = [1, 1, 256], strides = [1, 1, 1]} : vector<8x4x256xf32> to vector<1x1x256xf32>
    %395 = vector.shape_cast %394 : vector<1x1x256xf32> to vector<1x256xf32>
    %396 = vector.broadcast %395 : vector<1x256xf32> to vector<16x256xf32>
    %397 = arith.mulf %396, %386 : vector<16x256xf32>
    %c6_103 = arith.constant 6 : index
    %c16_104 = arith.constant 16 : index
    %c0_105 = arith.constant 0 : index
    %398 = vector.load %arg6[%c6_103, %c16_104, %c0_105] : memref<8x64x256xf32, #tpu.memory_space<vmem>>, vector<1x16x256xf32>
    %399 = vector.shape_cast %398 : vector<1x16x256xf32> to vector<16x256xf32>
    %400 = vector.shape_cast %397 : vector<16x256xf32> to vector<1x16x256xf32>
    tpu.vector_store %arg6[%c6_103, %c16_104, %c0_105], %400 {strides = array<i32>} : memref<8x64x256xf32, #tpu.memory_space<vmem>>, vector<1x16x256xf32>,
    %401 = vector.extract_strided_slice %148 {offsets = [6, 2, 0], sizes = [1, 1, 256], strides = [1, 1, 1]} : vector<8x4x256xf32> to vector<1x1x256xf32>
    %402 = vector.shape_cast %401 : vector<1x1x256xf32> to vector<1x256xf32>
    %403 = vector.broadcast %402 : vector<1x256xf32> to vector<16x256xf32>
    %404 = arith.mulf %403, %386 : vector<16x256xf32>
    %c6_106 = arith.constant 6 : index
    %c32_107 = arith.constant 32 : index
    %c0_108 = arith.constant 0 : index
    %405 = vector.load %arg6[%c6_106, %c32_107, %c0_108] : memref<8x64x256xf32, #tpu.memory_space<vmem>>, vector<1x16x256xf32>
    %406 = vector.shape_cast %405 : vector<1x16x256xf32> to vector<16x256xf32>
    %407 = vector.shape_cast %404 : vector<16x256xf32> to vector<1x16x256xf32>
    tpu.vector_store %arg6[%c6_106, %c32_107, %c0_108], %407 {strides = array<i32>} : memref<8x64x256xf32, #tpu.memory_space<vmem>>, vector<1x16x256xf32>,
    %408 = vector.extract_strided_slice %148 {offsets = [6, 3, 0], sizes = [1, 1, 256], strides = [1, 1, 1]} : vector<8x4x256xf32> to vector<1x1x256xf32>
    %409 = vector.shape_cast %408 : vector<1x1x256xf32> to vector<1x256xf32>
    %410 = vector.broadcast %409 : vector<1x256xf32> to vector<16x256xf32>
    %411 = arith.mulf %410, %386 : vector<16x256xf32>
    %c6_109 = arith.constant 6 : index
    %c48_110 = arith.constant 48 : index
    %c0_111 = arith.constant 0 : index
    %412 = vector.load %arg6[%c6_109, %c48_110, %c0_111] : memref<8x64x256xf32, #tpu.memory_space<vmem>>, vector<1x16x256xf32>
    %413 = vector.shape_cast %412 : vector<1x16x256xf32> to vector<16x256xf32>
    %414 = vector.shape_cast %411 : vector<16x256xf32> to vector<1x16x256xf32>
    tpu.vector_store %arg6[%c6_109, %c48_110, %c0_111], %414 {strides = array<i32>} : memref<8x64x256xf32, #tpu.memory_space<vmem>>, vector<1x16x256xf32>,
    %415 = vector.extract_strided_slice %113 {offsets = [7, 0, 0], sizes = [1, 4, 256], strides = [1, 1, 1]} : vector<8x4x256xf32> to vector<1x4x256xf32>
    %416 = vector.shape_cast %415 : vector<1x4x256xf32> to vector<4x256xf32>
    %417 = vector.shape_cast %416 : vector<4x256xf32> to vector<4x1x256xf32>
    %418 = vector.extract_strided_slice %78 {offsets = [7, 0, 0], sizes = [1, 4, 256], strides = [1, 1, 1]} : vector<8x4x256xf32> to vector<1x4x256xf32>
    %419 = vector.shape_cast %418 : vector<1x4x256xf32> to vector<4x256xf32>
    %420 = vector.shape_cast %419 : vector<4x256xf32> to vector<1x4x256xf32>
    %421 = vector.broadcast %417 : vector<4x1x256xf32> to vector<4x4x256xf32>
    %422 = vector.broadcast %420 : vector<1x4x256xf32> to vector<4x4x256xf32>
    %423 = arith.mulf %421, %422 : vector<4x4x256xf32>
    %424 = vector.shape_cast %423 : vector<4x4x256xf32> to vector<16x256xf32>
    %425 = vector.extract_strided_slice %148 {offsets = [7, 0, 0], sizes = [1, 1, 256], strides = [1, 1, 1]} : vector<8x4x256xf32> to vector<1x1x256xf32>
    %426 = vector.shape_cast %425 : vector<1x1x256xf32> to vector<1x256xf32>
    %427 = vector.broadcast %426 : vector<1x256xf32> to vector<16x256xf32>
    %428 = arith.mulf %427, %424 : vector<16x256xf32>
    %c7 = arith.constant 7 : index
    %c0_112 = arith.constant 0 : index
    %c0_113 = arith.constant 0 : index
    %429 = vector.load %arg6[%c7, %c0_112, %c0_113] : memref<8x64x256xf32, #tpu.memory_space<vmem>>, vector<1x16x256xf32>
    %430 = vector.shape_cast %429 : vector<1x16x256xf32> to vector<16x256xf32>
    %431 = vector.shape_cast %428 : vector<16x256xf32> to vector<1x16x256xf32>
    tpu.vector_store %arg6[%c7, %c0_112, %c0_113], %431 {strides = array<i32>} : memref<8x64x256xf32, #tpu.memory_space<vmem>>, vector<1x16x256xf32>,
    %432 = vector.extract_strided_slice %148 {offsets = [7, 1, 0], sizes = [1, 1, 256], strides = [1, 1, 1]} : vector<8x4x256xf32> to vector<1x1x256xf32>
    %433 = vector.shape_cast %432 : vector<1x1x256xf32> to vector<1x256xf32>
    %434 = vector.broadcast %433 : vector<1x256xf32> to vector<16x256xf32>
    %435 = arith.mulf %434, %424 : vector<16x256xf32>
    %c7_114 = arith.constant 7 : index
    %c16_115 = arith.constant 16 : index
    %c0_116 = arith.constant 0 : index
    %436 = vector.load %arg6[%c7_114, %c16_115, %c0_116] : memref<8x64x256xf32, #tpu.memory_space<vmem>>, vector<1x16x256xf32>
    %437 = vector.shape_cast %436 : vector<1x16x256xf32> to vector<16x256xf32>
    %438 = vector.shape_cast %435 : vector<16x256xf32> to vector<1x16x256xf32>
    tpu.vector_store %arg6[%c7_114, %c16_115, %c0_116], %438 {strides = array<i32>} : memref<8x64x256xf32, #tpu.memory_space<vmem>>, vector<1x16x256xf32>,
    %439 = vector.extract_strided_slice %148 {offsets = [7, 2, 0], sizes = [1, 1, 256], strides = [1, 1, 1]} : vector<8x4x256xf32> to vector<1x1x256xf32>
    %440 = vector.shape_cast %439 : vector<1x1x256xf32> to vector<1x256xf32>
    %441 = vector.broadcast %440 : vector<1x256xf32> to vector<16x256xf32>
    %442 = arith.mulf %441, %424 : vector<16x256xf32>
    %c7_117 = arith.constant 7 : index
    %c32_118 = arith.constant 32 : index
    %c0_119 = arith.constant 0 : index
    %443 = vector.load %arg6[%c7_117, %c32_118, %c0_119] : memref<8x64x256xf32, #tpu.memory_space<vmem>>, vector<1x16x256xf32>
    %444 = vector.shape_cast %443 : vector<1x16x256xf32> to vector<16x256xf32>
    %445 = vector.shape_cast %442 : vector<16x256xf32> to vector<1x16x256xf32>
    tpu.vector_store %arg6[%c7_117, %c32_118, %c0_119], %445 {strides = array<i32>} : memref<8x64x256xf32, #tpu.memory_space<vmem>>, vector<1x16x256xf32>,
    %446 = vector.extract_strided_slice %148 {offsets = [7, 3, 0], sizes = [1, 1, 256], strides = [1, 1, 1]} : vector<8x4x256xf32> to vector<1x1x256xf32>
    %447 = vector.shape_cast %446 : vector<1x1x256xf32> to vector<1x256xf32>
    %448 = vector.broadcast %447 : vector<1x256xf32> to vector<16x256xf32>
    %449 = arith.mulf %448, %424 : vector<16x256xf32>
    %c7_120 = arith.constant 7 : index
    %c48_121 = arith.constant 48 : index
    %c0_122 = arith.constant 0 : index
    %450 = vector.load %arg6[%c7_120, %c48_121, %c0_122] : memref<8x64x256xf32, #tpu.memory_space<vmem>>, vector<1x16x256xf32>
    %451 = vector.shape_cast %450 : vector<1x16x256xf32> to vector<16x256xf32>
    %452 = vector.shape_cast %449 : vector<16x256xf32> to vector<1x16x256xf32>
    tpu.vector_store %arg6[%c7_120, %c48_121, %c0_122], %452 {strides = array<i32>} : memref<8x64x256xf32, #tpu.memory_space<vmem>>, vector<1x16x256xf32>,
    %c0_123 = arith.constant 0 : index
    %c0_124 = arith.constant 0 : index
    %c0_125 = arith.constant 0 : index
    %453 = vector.load %arg2[%c0_123, %c0_124, %c0_125] : memref<8x8x256xbf16, #tpu.memory_space<vmem>>, vector<8x8x256xbf16>
    %454 = arith.extf %453 : vector<8x8x256xbf16> to vector<8x8x256xf32>
    %455 = vector.shape_cast %19 : vector<8x256xf32> to vector<8x1x256xf32>
    %456 = vector.broadcast %455 : vector<8x1x256xf32> to vector<8x8x256xf32>
    %457 = arith.mulf %456, %454 : vector<8x8x256xf32>
    %cst_126 = arith.constant 0.000000e+00 : f32
    %458 = vector.broadcast %cst_126 : f32 to vector<16x256xf32>
    %459 = vector.extract_strided_slice %457 {offsets = [0, 0, 0], sizes = [1, 1, 256], strides = [1, 1, 1]} : vector<8x8x256xf32> to vector<1x1x256xf32>
    %460 = vector.shape_cast %459 : vector<1x1x256xf32> to vector<1x256xf32>
    %c0_127 = arith.constant 0 : index
    %c0_128 = arith.constant 0 : index
    %c0_129 = arith.constant 0 : index
    %461 = vector.load %arg6[%c0_127, %c0_128, %c0_129] : memref<8x64x256xf32, #tpu.memory_space<vmem>>, vector<1x64x256xf32>
    %462 = vector.shape_cast %461 : vector<1x64x256xf32> to vector<64x256xf32>
    %463 = vector.broadcast %460 : vector<1x256xf32> to vector<64x256xf32>
    %464 = arith.mulf %463, %462 : vector<64x256xf32>
    %465 = vector.extract_strided_slice %457 {offsets = [1, 0, 0], sizes = [1, 1, 256], strides = [1, 1, 1]} : vector<8x8x256xf32> to vector<1x1x256xf32>
    %466 = vector.shape_cast %465 : vector<1x1x256xf32> to vector<1x256xf32>
    %c1_130 = arith.constant 1 : index
    %c0_131 = arith.constant 0 : index
    %c0_132 = arith.constant 0 : index
    %467 = vector.load %arg6[%c1_130, %c0_131, %c0_132] : memref<8x64x256xf32, #tpu.memory_space<vmem>>, vector<1x64x256xf32>
    %468 = vector.shape_cast %467 : vector<1x64x256xf32> to vector<64x256xf32>
    %469 = vector.broadcast %466 : vector<1x256xf32> to vector<64x256xf32>
    %470 = arith.mulf %469, %468 : vector<64x256xf32>
    %471 = arith.addf %464, %470 : vector<64x256xf32>
    %472 = vector.extract_strided_slice %457 {offsets = [2, 0, 0], sizes = [1, 1, 256], strides = [1, 1, 1]} : vector<8x8x256xf32> to vector<1x1x256xf32>
    %473 = vector.shape_cast %472 : vector<1x1x256xf32> to vector<1x256xf32>
    %c2_133 = arith.constant 2 : index
    %c0_134 = arith.constant 0 : index
    %c0_135 = arith.constant 0 : index
    %474 = vector.load %arg6[%c2_133, %c0_134, %c0_135] : memref<8x64x256xf32, #tpu.memory_space<vmem>>, vector<1x64x256xf32>
    %475 = vector.shape_cast %474 : vector<1x64x256xf32> to vector<64x256xf32>
    %476 = vector.broadcast %473 : vector<1x256xf32> to vector<64x256xf32>
    %477 = arith.mulf %476, %475 : vector<64x256xf32>
    %478 = arith.addf %471, %477 : vector<64x256xf32>
    %479 = vector.extract_strided_slice %457 {offsets = [3, 0, 0], sizes = [1, 1, 256], strides = [1, 1, 1]} : vector<8x8x256xf32> to vector<1x1x256xf32>
    %480 = vector.shape_cast %479 : vector<1x1x256xf32> to vector<1x256xf32>
    %c3_136 = arith.constant 3 : index
    %c0_137 = arith.constant 0 : index
    %c0_138 = arith.constant 0 : index
    %481 = vector.load %arg6[%c3_136, %c0_137, %c0_138] : memref<8x64x256xf32, #tpu.memory_space<vmem>>, vector<1x64x256xf32>
    %482 = vector.shape_cast %481 : vector<1x64x256xf32> to vector<64x256xf32>
    %483 = vector.broadcast %480 : vector<1x256xf32> to vector<64x256xf32>
    %484 = arith.mulf %483, %482 : vector<64x256xf32>
    %485 = arith.addf %478, %484 : vector<64x256xf32>
    %486 = vector.extract_strided_slice %457 {offsets = [4, 0, 0], sizes = [1, 1, 256], strides = [1, 1, 1]} : vector<8x8x256xf32> to vector<1x1x256xf32>
    %487 = vector.shape_cast %486 : vector<1x1x256xf32> to vector<1x256xf32>
    %c4_139 = arith.constant 4 : index
    %c0_140 = arith.constant 0 : index
    %c0_141 = arith.constant 0 : index
    %488 = vector.load %arg6[%c4_139, %c0_140, %c0_141] : memref<8x64x256xf32, #tpu.memory_space<vmem>>, vector<1x64x256xf32>
    %489 = vector.shape_cast %488 : vector<1x64x256xf32> to vector<64x256xf32>
    %490 = vector.broadcast %487 : vector<1x256xf32> to vector<64x256xf32>
    %491 = arith.mulf %490, %489 : vector<64x256xf32>
    %492 = arith.addf %485, %491 : vector<64x256xf32>
    %493 = vector.extract_strided_slice %457 {offsets = [5, 0, 0], sizes = [1, 1, 256], strides = [1, 1, 1]} : vector<8x8x256xf32> to vector<1x1x256xf32>
    %494 = vector.shape_cast %493 : vector<1x1x256xf32> to vector<1x256xf32>
    %c5_142 = arith.constant 5 : index
    %c0_143 = arith.constant 0 : index
    %c0_144 = arith.constant 0 : index
    %495 = vector.load %arg6[%c5_142, %c0_143, %c0_144] : memref<8x64x256xf32, #tpu.memory_space<vmem>>, vector<1x64x256xf32>
    %496 = vector.shape_cast %495 : vector<1x64x256xf32> to vector<64x256xf32>
    %497 = vector.broadcast %494 : vector<1x256xf32> to vector<64x256xf32>
    %498 = arith.mulf %497, %496 : vector<64x256xf32>
    %499 = arith.addf %492, %498 : vector<64x256xf32>
    %500 = vector.extract_strided_slice %457 {offsets = [6, 0, 0], sizes = [1, 1, 256], strides = [1, 1, 1]} : vector<8x8x256xf32> to vector<1x1x256xf32>
    %501 = vector.shape_cast %500 : vector<1x1x256xf32> to vector<1x256xf32>
    %c6_145 = arith.constant 6 : index
    %c0_146 = arith.constant 0 : index
    %c0_147 = arith.constant 0 : index
    %502 = vector.load %arg6[%c6_145, %c0_146, %c0_147] : memref<8x64x256xf32, #tpu.memory_space<vmem>>, vector<1x64x256xf32>
    %503 = vector.shape_cast %502 : vector<1x64x256xf32> to vector<64x256xf32>
    %504 = vector.broadcast %501 : vector<1x256xf32> to vector<64x256xf32>
    %505 = arith.mulf %504, %503 : vector<64x256xf32>
    %506 = arith.addf %499, %505 : vector<64x256xf32>
    %507 = vector.extract_strided_slice %457 {offsets = [7, 0, 0], sizes = [1, 1, 256], strides = [1, 1, 1]} : vector<8x8x256xf32> to vector<1x1x256xf32>
    %508 = vector.shape_cast %507 : vector<1x1x256xf32> to vector<1x256xf32>
    %c7_148 = arith.constant 7 : index
    %c0_149 = arith.constant 0 : index
    %c0_150 = arith.constant 0 : index
    %509 = vector.load %arg6[%c7_148, %c0_149, %c0_150] : memref<8x64x256xf32, #tpu.memory_space<vmem>>, vector<1x64x256xf32>
    %510 = vector.shape_cast %509 : vector<1x64x256xf32> to vector<64x256xf32>
    %511 = vector.broadcast %508 : vector<1x256xf32> to vector<64x256xf32>
    %512 = arith.mulf %511, %510 : vector<64x256xf32>
    %513 = arith.addf %506, %512 : vector<64x256xf32>
    %c0_151 = arith.constant 0 : index
    %c0_152 = arith.constant 0 : index
    %c0_153 = arith.constant 0 : index
    %514 = vector.load %arg3[%c0_151, %c0_152, %c0_153] : memref<8x16x64xbf16, #tpu.memory_space<vmem>>, vector<1x16x64xbf16>
    %515 = vector.shape_cast %514 : vector<1x16x64xbf16> to vector<16x64xbf16>
    %516 = arith.truncf %513 : vector<64x256xf32> to vector<64x256xbf16>
    %cst_154 = arith.constant dense<0.000000e+00> : vector<16x256xf32>
    %517 = tpu.matmul %515, %516, %cst_154 {dimension_numbers = #tpu.dot_dimension_numbers<[1], [0], [0], [1], [0, 0, 1, 1], [], []>} : vector<16x64xbf16>, vector<64x256xbf16>, vector<16x256xf32> -> vector<16x256xf32>
    %518 = arith.addf %458, %517 : vector<16x256xf32>
    %519 = vector.extract_strided_slice %457 {offsets = [0, 1, 0], sizes = [1, 1, 256], strides = [1, 1, 1]} : vector<8x8x256xf32> to vector<1x1x256xf32>
    %520 = vector.shape_cast %519 : vector<1x1x256xf32> to vector<1x256xf32>
    %c0_155 = arith.constant 0 : index
    %c0_156 = arith.constant 0 : index
    %c0_157 = arith.constant 0 : index
    %521 = vector.load %arg6[%c0_155, %c0_156, %c0_157] : memref<8x64x256xf32, #tpu.memory_space<vmem>>, vector<1x64x256xf32>
    %522 = vector.shape_cast %521 : vector<1x64x256xf32> to vector<64x256xf32>
    %523 = vector.broadcast %520 : vector<1x256xf32> to vector<64x256xf32>
    %524 = arith.mulf %523, %522 : vector<64x256xf32>
    %525 = vector.extract_strided_slice %457 {offsets = [1, 1, 0], sizes = [1, 1, 256], strides = [1, 1, 1]} : vector<8x8x256xf32> to vector<1x1x256xf32>
    %526 = vector.shape_cast %525 : vector<1x1x256xf32> to vector<1x256xf32>
    %c1_158 = arith.constant 1 : index
    %c0_159 = arith.constant 0 : index
    %c0_160 = arith.constant 0 : index
    %527 = vector.load %arg6[%c1_158, %c0_159, %c0_160] : memref<8x64x256xf32, #tpu.memory_space<vmem>>, vector<1x64x256xf32>
    %528 = vector.shape_cast %527 : vector<1x64x256xf32> to vector<64x256xf32>
    %529 = vector.broadcast %526 : vector<1x256xf32> to vector<64x256xf32>
    %530 = arith.mulf %529, %528 : vector<64x256xf32>
    %531 = arith.addf %524, %530 : vector<64x256xf32>
    %532 = vector.extract_strided_slice %457 {offsets = [2, 1, 0], sizes = [1, 1, 256], strides = [1, 1, 1]} : vector<8x8x256xf32> to vector<1x1x256xf32>
    %533 = vector.shape_cast %532 : vector<1x1x256xf32> to vector<1x256xf32>
    %c2_161 = arith.constant 2 : index
    %c0_162 = arith.constant 0 : index
    %c0_163 = arith.constant 0 : index
    %534 = vector.load %arg6[%c2_161, %c0_162, %c0_163] : memref<8x64x256xf32, #tpu.memory_space<vmem>>, vector<1x64x256xf32>
    %535 = vector.shape_cast %534 : vector<1x64x256xf32> to vector<64x256xf32>
    %536 = vector.broadcast %533 : vector<1x256xf32> to vector<64x256xf32>
    %537 = arith.mulf %536, %535 : vector<64x256xf32>
    %538 = arith.addf %531, %537 : vector<64x256xf32>
    %539 = vector.extract_strided_slice %457 {offsets = [3, 1, 0], sizes = [1, 1, 256], strides = [1, 1, 1]} : vector<8x8x256xf32> to vector<1x1x256xf32>
    %540 = vector.shape_cast %539 : vector<1x1x256xf32> to vector<1x256xf32>
    %c3_164 = arith.constant 3 : index
    %c0_165 = arith.constant 0 : index
    %c0_166 = arith.constant 0 : index
    %541 = vector.load %arg6[%c3_164, %c0_165, %c0_166] : memref<8x64x256xf32, #tpu.memory_space<vmem>>, vector<1x64x256xf32>
    %542 = vector.shape_cast %541 : vector<1x64x256xf32> to vector<64x256xf32>
    %543 = vector.broadcast %540 : vector<1x256xf32> to vector<64x256xf32>
    %544 = arith.mulf %543, %542 : vector<64x256xf32>
    %545 = arith.addf %538, %544 : vector<64x256xf32>
    %546 = vector.extract_strided_slice %457 {offsets = [4, 1, 0], sizes = [1, 1, 256], strides = [1, 1, 1]} : vector<8x8x256xf32> to vector<1x1x256xf32>
    %547 = vector.shape_cast %546 : vector<1x1x256xf32> to vector<1x256xf32>
    %c4_167 = arith.constant 4 : index
    %c0_168 = arith.constant 0 : index
    %c0_169 = arith.constant 0 : index
    %548 = vector.load %arg6[%c4_167, %c0_168, %c0_169] : memref<8x64x256xf32, #tpu.memory_space<vmem>>, vector<1x64x256xf32>
    %549 = vector.shape_cast %548 : vector<1x64x256xf32> to vector<64x256xf32>
    %550 = vector.broadcast %547 : vector<1x256xf32> to vector<64x256xf32>
    %551 = arith.mulf %550, %549 : vector<64x256xf32>
    %552 = arith.addf %545, %551 : vector<64x256xf32>
    %553 = vector.extract_strided_slice %457 {offsets = [5, 1, 0], sizes = [1, 1, 256], strides = [1, 1, 1]} : vector<8x8x256xf32> to vector<1x1x256xf32>
    %554 = vector.shape_cast %553 : vector<1x1x256xf32> to vector<1x256xf32>
    %c5_170 = arith.constant 5 : index
    %c0_171 = arith.constant 0 : index
    %c0_172 = arith.constant 0 : index
    %555 = vector.load %arg6[%c5_170, %c0_171, %c0_172] : memref<8x64x256xf32, #tpu.memory_space<vmem>>, vector<1x64x256xf32>
    %556 = vector.shape_cast %555 : vector<1x64x256xf32> to vector<64x256xf32>
    %557 = vector.broadcast %554 : vector<1x256xf32> to vector<64x256xf32>
    %558 = arith.mulf %557, %556 : vector<64x256xf32>
    %559 = arith.addf %552, %558 : vector<64x256xf32>
    %560 = vector.extract_strided_slice %457 {offsets = [6, 1, 0], sizes = [1, 1, 256], strides = [1, 1, 1]} : vector<8x8x256xf32> to vector<1x1x256xf32>
    %561 = vector.shape_cast %560 : vector<1x1x256xf32> to vector<1x256xf32>
    %c6_173 = arith.constant 6 : index
    %c0_174 = arith.constant 0 : index
    %c0_175 = arith.constant 0 : index
    %562 = vector.load %arg6[%c6_173, %c0_174, %c0_175] : memref<8x64x256xf32, #tpu.memory_space<vmem>>, vector<1x64x256xf32>
    %563 = vector.shape_cast %562 : vector<1x64x256xf32> to vector<64x256xf32>
    %564 = vector.broadcast %561 : vector<1x256xf32> to vector<64x256xf32>
    %565 = arith.mulf %564, %563 : vector<64x256xf32>
    %566 = arith.addf %559, %565 : vector<64x256xf32>
    %567 = vector.extract_strided_slice %457 {offsets = [7, 1, 0], sizes = [1, 1, 256], strides = [1, 1, 1]} : vector<8x8x256xf32> to vector<1x1x256xf32>
    %568 = vector.shape_cast %567 : vector<1x1x256xf32> to vector<1x256xf32>
    %c7_176 = arith.constant 7 : index
    %c0_177 = arith.constant 0 : index
    %c0_178 = arith.constant 0 : index
    %569 = vector.load %arg6[%c7_176, %c0_177, %c0_178] : memref<8x64x256xf32, #tpu.memory_space<vmem>>, vector<1x64x256xf32>
    %570 = vector.shape_cast %569 : vector<1x64x256xf32> to vector<64x256xf32>
    %571 = vector.broadcast %568 : vector<1x256xf32> to vector<64x256xf32>
    %572 = arith.mulf %571, %570 : vector<64x256xf32>
    %573 = arith.addf %566, %572 : vector<64x256xf32>
    %c1_179 = arith.constant 1 : index
    %c0_180 = arith.constant 0 : index
    %c0_181 = arith.constant 0 : index
    %574 = vector.load %arg3[%c1_179, %c0_180, %c0_181] : memref<8x16x64xbf16, #tpu.memory_space<vmem>>, vector<1x16x64xbf16>
    %575 = vector.shape_cast %574 : vector<1x16x64xbf16> to vector<16x64xbf16>
    %576 = arith.truncf %573 : vector<64x256xf32> to vector<64x256xbf16>
    %cst_182 = arith.constant dense<0.000000e+00> : vector<16x256xf32>
    %577 = tpu.matmul %575, %576, %cst_182 {dimension_numbers = #tpu.dot_dimension_numbers<[1], [0], [0], [1], [0, 0, 1, 1], [], []>} : vector<16x64xbf16>, vector<64x256xbf16>, vector<16x256xf32> -> vector<16x256xf32>
    %578 = arith.addf %518, %577 : vector<16x256xf32>
    %579 = vector.extract_strided_slice %457 {offsets = [0, 2, 0], sizes = [1, 1, 256], strides = [1, 1, 1]} : vector<8x8x256xf32> to vector<1x1x256xf32>
    %580 = vector.shape_cast %579 : vector<1x1x256xf32> to vector<1x256xf32>
    %c0_183 = arith.constant 0 : index
    %c0_184 = arith.constant 0 : index
    %c0_185 = arith.constant 0 : index
    %581 = vector.load %arg6[%c0_183, %c0_184, %c0_185] : memref<8x64x256xf32, #tpu.memory_space<vmem>>, vector<1x64x256xf32>
    %582 = vector.shape_cast %581 : vector<1x64x256xf32> to vector<64x256xf32>
    %583 = vector.broadcast %580 : vector<1x256xf32> to vector<64x256xf32>
    %584 = arith.mulf %583, %582 : vector<64x256xf32>
    %585 = vector.extract_strided_slice %457 {offsets = [1, 2, 0], sizes = [1, 1, 256], strides = [1, 1, 1]} : vector<8x8x256xf32> to vector<1x1x256xf32>
    %586 = vector.shape_cast %585 : vector<1x1x256xf32> to vector<1x256xf32>
    %c1_186 = arith.constant 1 : index
    %c0_187 = arith.constant 0 : index
    %c0_188 = arith.constant 0 : index
    %587 = vector.load %arg6[%c1_186, %c0_187, %c0_188] : memref<8x64x256xf32, #tpu.memory_space<vmem>>, vector<1x64x256xf32>
    %588 = vector.shape_cast %587 : vector<1x64x256xf32> to vector<64x256xf32>
    %589 = vector.broadcast %586 : vector<1x256xf32> to vector<64x256xf32>
    %590 = arith.mulf %589, %588 : vector<64x256xf32>
    %591 = arith.addf %584, %590 : vector<64x256xf32>
    %592 = vector.extract_strided_slice %457 {offsets = [2, 2, 0], sizes = [1, 1, 256], strides = [1, 1, 1]} : vector<8x8x256xf32> to vector<1x1x256xf32>
    %593 = vector.shape_cast %592 : vector<1x1x256xf32> to vector<1x256xf32>
    %c2_189 = arith.constant 2 : index
    %c0_190 = arith.constant 0 : index
    %c0_191 = arith.constant 0 : index
    %594 = vector.load %arg6[%c2_189, %c0_190, %c0_191] : memref<8x64x256xf32, #tpu.memory_space<vmem>>, vector<1x64x256xf32>
    %595 = vector.shape_cast %594 : vector<1x64x256xf32> to vector<64x256xf32>
    %596 = vector.broadcast %593 : vector<1x256xf32> to vector<64x256xf32>
    %597 = arith.mulf %596, %595 : vector<64x256xf32>
    %598 = arith.addf %591, %597 : vector<64x256xf32>
    %599 = vector.extract_strided_slice %457 {offsets = [3, 2, 0], sizes = [1, 1, 256], strides = [1, 1, 1]} : vector<8x8x256xf32> to vector<1x1x256xf32>
    %600 = vector.shape_cast %599 : vector<1x1x256xf32> to vector<1x256xf32>
    %c3_192 = arith.constant 3 : index
    %c0_193 = arith.constant 0 : index
    %c0_194 = arith.constant 0 : index
    %601 = vector.load %arg6[%c3_192, %c0_193, %c0_194] : memref<8x64x256xf32, #tpu.memory_space<vmem>>, vector<1x64x256xf32>
    %602 = vector.shape_cast %601 : vector<1x64x256xf32> to vector<64x256xf32>
    %603 = vector.broadcast %600 : vector<1x256xf32> to vector<64x256xf32>
    %604 = arith.mulf %603, %602 : vector<64x256xf32>
    %605 = arith.addf %598, %604 : vector<64x256xf32>
    %606 = vector.extract_strided_slice %457 {offsets = [4, 2, 0], sizes = [1, 1, 256], strides = [1, 1, 1]} : vector<8x8x256xf32> to vector<1x1x256xf32>
    %607 = vector.shape_cast %606 : vector<1x1x256xf32> to vector<1x256xf32>
    %c4_195 = arith.constant 4 : index
    %c0_196 = arith.constant 0 : index
    %c0_197 = arith.constant 0 : index
    %608 = vector.load %arg6[%c4_195, %c0_196, %c0_197] : memref<8x64x256xf32, #tpu.memory_space<vmem>>, vector<1x64x256xf32>
    %609 = vector.shape_cast %608 : vector<1x64x256xf32> to vector<64x256xf32>
    %610 = vector.broadcast %607 : vector<1x256xf32> to vector<64x256xf32>
    %611 = arith.mulf %610, %609 : vector<64x256xf32>
    %612 = arith.addf %605, %611 : vector<64x256xf32>
    %613 = vector.extract_strided_slice %457 {offsets = [5, 2, 0], sizes = [1, 1, 256], strides = [1, 1, 1]} : vector<8x8x256xf32> to vector<1x1x256xf32>
    %614 = vector.shape_cast %613 : vector<1x1x256xf32> to vector<1x256xf32>
    %c5_198 = arith.constant 5 : index
    %c0_199 = arith.constant 0 : index
    %c0_200 = arith.constant 0 : index
    %615 = vector.load %arg6[%c5_198, %c0_199, %c0_200] : memref<8x64x256xf32, #tpu.memory_space<vmem>>, vector<1x64x256xf32>
    %616 = vector.shape_cast %615 : vector<1x64x256xf32> to vector<64x256xf32>
    %617 = vector.broadcast %614 : vector<1x256xf32> to vector<64x256xf32>
    %618 = arith.mulf %617, %616 : vector<64x256xf32>
    %619 = arith.addf %612, %618 : vector<64x256xf32>
    %620 = vector.extract_strided_slice %457 {offsets = [6, 2, 0], sizes = [1, 1, 256], strides = [1, 1, 1]} : vector<8x8x256xf32> to vector<1x1x256xf32>
    %621 = vector.shape_cast %620 : vector<1x1x256xf32> to vector<1x256xf32>
    %c6_201 = arith.constant 6 : index
    %c0_202 = arith.constant 0 : index
    %c0_203 = arith.constant 0 : index
    %622 = vector.load %arg6[%c6_201, %c0_202, %c0_203] : memref<8x64x256xf32, #tpu.memory_space<vmem>>, vector<1x64x256xf32>
    %623 = vector.shape_cast %622 : vector<1x64x256xf32> to vector<64x256xf32>
    %624 = vector.broadcast %621 : vector<1x256xf32> to vector<64x256xf32>
    %625 = arith.mulf %624, %623 : vector<64x256xf32>
    %626 = arith.addf %619, %625 : vector<64x256xf32>
    %627 = vector.extract_strided_slice %457 {offsets = [7, 2, 0], sizes = [1, 1, 256], strides = [1, 1, 1]} : vector<8x8x256xf32> to vector<1x1x256xf32>
    %628 = vector.shape_cast %627 : vector<1x1x256xf32> to vector<1x256xf32>
    %c7_204 = arith.constant 7 : index
    %c0_205 = arith.constant 0 : index
    %c0_206 = arith.constant 0 : index
    %629 = vector.load %arg6[%c7_204, %c0_205, %c0_206] : memref<8x64x256xf32, #tpu.memory_space<vmem>>, vector<1x64x256xf32>
    %630 = vector.shape_cast %629 : vector<1x64x256xf32> to vector<64x256xf32>
    %631 = vector.broadcast %628 : vector<1x256xf32> to vector<64x256xf32>
    %632 = arith.mulf %631, %630 : vector<64x256xf32>
    %633 = arith.addf %626, %632 : vector<64x256xf32>
    %c2_207 = arith.constant 2 : index
    %c0_208 = arith.constant 0 : index
    %c0_209 = arith.constant 0 : index
    %634 = vector.load %arg3[%c2_207, %c0_208, %c0_209] : memref<8x16x64xbf16, #tpu.memory_space<vmem>>, vector<1x16x64xbf16>
    %635 = vector.shape_cast %634 : vector<1x16x64xbf16> to vector<16x64xbf16>
    %636 = arith.truncf %633 : vector<64x256xf32> to vector<64x256xbf16>
    %cst_210 = arith.constant dense<0.000000e+00> : vector<16x256xf32>
    %637 = tpu.matmul %635, %636, %cst_210 {dimension_numbers = #tpu.dot_dimension_numbers<[1], [0], [0], [1], [0, 0, 1, 1], [], []>} : vector<16x64xbf16>, vector<64x256xbf16>, vector<16x256xf32> -> vector<16x256xf32>
    %638 = arith.addf %578, %637 : vector<16x256xf32>
    %639 = vector.extract_strided_slice %457 {offsets = [0, 3, 0], sizes = [1, 1, 256], strides = [1, 1, 1]} : vector<8x8x256xf32> to vector<1x1x256xf32>
    %640 = vector.shape_cast %639 : vector<1x1x256xf32> to vector<1x256xf32>
    %c0_211 = arith.constant 0 : index
    %c0_212 = arith.constant 0 : index
    %c0_213 = arith.constant 0 : index
    %641 = vector.load %arg6[%c0_211, %c0_212, %c0_213] : memref<8x64x256xf32, #tpu.memory_space<vmem>>, vector<1x64x256xf32>
    %642 = vector.shape_cast %641 : vector<1x64x256xf32> to vector<64x256xf32>
    %643 = vector.broadcast %640 : vector<1x256xf32> to vector<64x256xf32>
    %644 = arith.mulf %643, %642 : vector<64x256xf32>
    %645 = vector.extract_strided_slice %457 {offsets = [1, 3, 0], sizes = [1, 1, 256], strides = [1, 1, 1]} : vector<8x8x256xf32> to vector<1x1x256xf32>
    %646 = vector.shape_cast %645 : vector<1x1x256xf32> to vector<1x256xf32>
    %c1_214 = arith.constant 1 : index
    %c0_215 = arith.constant 0 : index
    %c0_216 = arith.constant 0 : index
    %647 = vector.load %arg6[%c1_214, %c0_215, %c0_216] : memref<8x64x256xf32, #tpu.memory_space<vmem>>, vector<1x64x256xf32>
    %648 = vector.shape_cast %647 : vector<1x64x256xf32> to vector<64x256xf32>
    %649 = vector.broadcast %646 : vector<1x256xf32> to vector<64x256xf32>
    %650 = arith.mulf %649, %648 : vector<64x256xf32>
    %651 = arith.addf %644, %650 : vector<64x256xf32>
    %652 = vector.extract_strided_slice %457 {offsets = [2, 3, 0], sizes = [1, 1, 256], strides = [1, 1, 1]} : vector<8x8x256xf32> to vector<1x1x256xf32>
    %653 = vector.shape_cast %652 : vector<1x1x256xf32> to vector<1x256xf32>
    %c2_217 = arith.constant 2 : index
    %c0_218 = arith.constant 0 : index
    %c0_219 = arith.constant 0 : index
    %654 = vector.load %arg6[%c2_217, %c0_218, %c0_219] : memref<8x64x256xf32, #tpu.memory_space<vmem>>, vector<1x64x256xf32>
    %655 = vector.shape_cast %654 : vector<1x64x256xf32> to vector<64x256xf32>
    %656 = vector.broadcast %653 : vector<1x256xf32> to vector<64x256xf32>
    %657 = arith.mulf %656, %655 : vector<64x256xf32>
    %658 = arith.addf %651, %657 : vector<64x256xf32>
    %659 = vector.extract_strided_slice %457 {offsets = [3, 3, 0], sizes = [1, 1, 256], strides = [1, 1, 1]} : vector<8x8x256xf32> to vector<1x1x256xf32>
    %660 = vector.shape_cast %659 : vector<1x1x256xf32> to vector<1x256xf32>
    %c3_220 = arith.constant 3 : index
    %c0_221 = arith.constant 0 : index
    %c0_222 = arith.constant 0 : index
    %661 = vector.load %arg6[%c3_220, %c0_221, %c0_222] : memref<8x64x256xf32, #tpu.memory_space<vmem>>, vector<1x64x256xf32>
    %662 = vector.shape_cast %661 : vector<1x64x256xf32> to vector<64x256xf32>
    %663 = vector.broadcast %660 : vector<1x256xf32> to vector<64x256xf32>
    %664 = arith.mulf %663, %662 : vector<64x256xf32>
    %665 = arith.addf %658, %664 : vector<64x256xf32>
    %666 = vector.extract_strided_slice %457 {offsets = [4, 3, 0], sizes = [1, 1, 256], strides = [1, 1, 1]} : vector<8x8x256xf32> to vector<1x1x256xf32>
    %667 = vector.shape_cast %666 : vector<1x1x256xf32> to vector<1x256xf32>
    %c4_223 = arith.constant 4 : index
    %c0_224 = arith.constant 0 : index
    %c0_225 = arith.constant 0 : index
    %668 = vector.load %arg6[%c4_223, %c0_224, %c0_225] : memref<8x64x256xf32, #tpu.memory_space<vmem>>, vector<1x64x256xf32>
    %669 = vector.shape_cast %668 : vector<1x64x256xf32> to vector<64x256xf32>
    %670 = vector.broadcast %667 : vector<1x256xf32> to vector<64x256xf32>
    %671 = arith.mulf %670, %669 : vector<64x256xf32>
    %672 = arith.addf %665, %671 : vector<64x256xf32>
    %673 = vector.extract_strided_slice %457 {offsets = [5, 3, 0], sizes = [1, 1, 256], strides = [1, 1, 1]} : vector<8x8x256xf32> to vector<1x1x256xf32>
    %674 = vector.shape_cast %673 : vector<1x1x256xf32> to vector<1x256xf32>
    %c5_226 = arith.constant 5 : index
    %c0_227 = arith.constant 0 : index
    %c0_228 = arith.constant 0 : index
    %675 = vector.load %arg6[%c5_226, %c0_227, %c0_228] : memref<8x64x256xf32, #tpu.memory_space<vmem>>, vector<1x64x256xf32>
    %676 = vector.shape_cast %675 : vector<1x64x256xf32> to vector<64x256xf32>
    %677 = vector.broadcast %674 : vector<1x256xf32> to vector<64x256xf32>
    %678 = arith.mulf %677, %676 : vector<64x256xf32>
    %679 = arith.addf %672, %678 : vector<64x256xf32>
    %680 = vector.extract_strided_slice %457 {offsets = [6, 3, 0], sizes = [1, 1, 256], strides = [1, 1, 1]} : vector<8x8x256xf32> to vector<1x1x256xf32>
    %681 = vector.shape_cast %680 : vector<1x1x256xf32> to vector<1x256xf32>
    %c6_229 = arith.constant 6 : index
    %c0_230 = arith.constant 0 : index
    %c0_231 = arith.constant 0 : index
    %682 = vector.load %arg6[%c6_229, %c0_230, %c0_231] : memref<8x64x256xf32, #tpu.memory_space<vmem>>, vector<1x64x256xf32>
    %683 = vector.shape_cast %682 : vector<1x64x256xf32> to vector<64x256xf32>
    %684 = vector.broadcast %681 : vector<1x256xf32> to vector<64x256xf32>
    %685 = arith.mulf %684, %683 : vector<64x256xf32>
    %686 = arith.addf %679, %685 : vector<64x256xf32>
    %687 = vector.extract_strided_slice %457 {offsets = [7, 3, 0], sizes = [1, 1, 256], strides = [1, 1, 1]} : vector<8x8x256xf32> to vector<1x1x256xf32>
    %688 = vector.shape_cast %687 : vector<1x1x256xf32> to vector<1x256xf32>
    %c7_232 = arith.constant 7 : index
    %c0_233 = arith.constant 0 : index
    %c0_234 = arith.constant 0 : index
    %689 = vector.load %arg6[%c7_232, %c0_233, %c0_234] : memref<8x64x256xf32, #tpu.memory_space<vmem>>, vector<1x64x256xf32>
    %690 = vector.shape_cast %689 : vector<1x64x256xf32> to vector<64x256xf32>
    %691 = vector.broadcast %688 : vector<1x256xf32> to vector<64x256xf32>
    %692 = arith.mulf %691, %690 : vector<64x256xf32>
    %693 = arith.addf %686, %692 : vector<64x256xf32>
    %c3_235 = arith.constant 3 : index
    %c0_236 = arith.constant 0 : index
    %c0_237 = arith.constant 0 : index
    %694 = vector.load %arg3[%c3_235, %c0_236, %c0_237] : memref<8x16x64xbf16, #tpu.memory_space<vmem>>, vector<1x16x64xbf16>
    %695 = vector.shape_cast %694 : vector<1x16x64xbf16> to vector<16x64xbf16>
    %696 = arith.truncf %693 : vector<64x256xf32> to vector<64x256xbf16>
    %cst_238 = arith.constant dense<0.000000e+00> : vector<16x256xf32>
    %697 = tpu.matmul %695, %696, %cst_238 {dimension_numbers = #tpu.dot_dimension_numbers<[1], [0], [0], [1], [0, 0, 1, 1], [], []>} : vector<16x64xbf16>, vector<64x256xbf16>, vector<16x256xf32> -> vector<16x256xf32>
    %698 = arith.addf %638, %697 : vector<16x256xf32>
    %699 = vector.extract_strided_slice %457 {offsets = [0, 4, 0], sizes = [1, 1, 256], strides = [1, 1, 1]} : vector<8x8x256xf32> to vector<1x1x256xf32>
    %700 = vector.shape_cast %699 : vector<1x1x256xf32> to vector<1x256xf32>
    %c0_239 = arith.constant 0 : index
    %c0_240 = arith.constant 0 : index
    %c0_241 = arith.constant 0 : index
    %701 = vector.load %arg6[%c0_239, %c0_240, %c0_241] : memref<8x64x256xf32, #tpu.memory_space<vmem>>, vector<1x64x256xf32>
    %702 = vector.shape_cast %701 : vector<1x64x256xf32> to vector<64x256xf32>
    %703 = vector.broadcast %700 : vector<1x256xf32> to vector<64x256xf32>
    %704 = arith.mulf %703, %702 : vector<64x256xf32>
    %705 = vector.extract_strided_slice %457 {offsets = [1, 4, 0], sizes = [1, 1, 256], strides = [1, 1, 1]} : vector<8x8x256xf32> to vector<1x1x256xf32>
    %706 = vector.shape_cast %705 : vector<1x1x256xf32> to vector<1x256xf32>
    %c1_242 = arith.constant 1 : index
    %c0_243 = arith.constant 0 : index
    %c0_244 = arith.constant 0 : index
    %707 = vector.load %arg6[%c1_242, %c0_243, %c0_244] : memref<8x64x256xf32, #tpu.memory_space<vmem>>, vector<1x64x256xf32>
    %708 = vector.shape_cast %707 : vector<1x64x256xf32> to vector<64x256xf32>
    %709 = vector.broadcast %706 : vector<1x256xf32> to vector<64x256xf32>
    %710 = arith.mulf %709, %708 : vector<64x256xf32>
    %711 = arith.addf %704, %710 : vector<64x256xf32>
    %712 = vector.extract_strided_slice %457 {offsets = [2, 4, 0], sizes = [1, 1, 256], strides = [1, 1, 1]} : vector<8x8x256xf32> to vector<1x1x256xf32>
    %713 = vector.shape_cast %712 : vector<1x1x256xf32> to vector<1x256xf32>
    %c2_245 = arith.constant 2 : index
    %c0_246 = arith.constant 0 : index
    %c0_247 = arith.constant 0 : index
    %714 = vector.load %arg6[%c2_245, %c0_246, %c0_247] : memref<8x64x256xf32, #tpu.memory_space<vmem>>, vector<1x64x256xf32>
    %715 = vector.shape_cast %714 : vector<1x64x256xf32> to vector<64x256xf32>
    %716 = vector.broadcast %713 : vector<1x256xf32> to vector<64x256xf32>
    %717 = arith.mulf %716, %715 : vector<64x256xf32>
    %718 = arith.addf %711, %717 : vector<64x256xf32>
    %719 = vector.extract_strided_slice %457 {offsets = [3, 4, 0], sizes = [1, 1, 256], strides = [1, 1, 1]} : vector<8x8x256xf32> to vector<1x1x256xf32>
    %720 = vector.shape_cast %719 : vector<1x1x256xf32> to vector<1x256xf32>
    %c3_248 = arith.constant 3 : index
    %c0_249 = arith.constant 0 : index
    %c0_250 = arith.constant 0 : index
    %721 = vector.load %arg6[%c3_248, %c0_249, %c0_250] : memref<8x64x256xf32, #tpu.memory_space<vmem>>, vector<1x64x256xf32>
    %722 = vector.shape_cast %721 : vector<1x64x256xf32> to vector<64x256xf32>
    %723 = vector.broadcast %720 : vector<1x256xf32> to vector<64x256xf32>
    %724 = arith.mulf %723, %722 : vector<64x256xf32>
    %725 = arith.addf %718, %724 : vector<64x256xf32>
    %726 = vector.extract_strided_slice %457 {offsets = [4, 4, 0], sizes = [1, 1, 256], strides = [1, 1, 1]} : vector<8x8x256xf32> to vector<1x1x256xf32>
    %727 = vector.shape_cast %726 : vector<1x1x256xf32> to vector<1x256xf32>
    %c4_251 = arith.constant 4 : index
    %c0_252 = arith.constant 0 : index
    %c0_253 = arith.constant 0 : index
    %728 = vector.load %arg6[%c4_251, %c0_252, %c0_253] : memref<8x64x256xf32, #tpu.memory_space<vmem>>, vector<1x64x256xf32>
    %729 = vector.shape_cast %728 : vector<1x64x256xf32> to vector<64x256xf32>
    %730 = vector.broadcast %727 : vector<1x256xf32> to vector<64x256xf32>
    %731 = arith.mulf %730, %729 : vector<64x256xf32>
    %732 = arith.addf %725, %731 : vector<64x256xf32>
    %733 = vector.extract_strided_slice %457 {offsets = [5, 4, 0], sizes = [1, 1, 256], strides = [1, 1, 1]} : vector<8x8x256xf32> to vector<1x1x256xf32>
    %734 = vector.shape_cast %733 : vector<1x1x256xf32> to vector<1x256xf32>
    %c5_254 = arith.constant 5 : index
    %c0_255 = arith.constant 0 : index
    %c0_256 = arith.constant 0 : index
    %735 = vector.load %arg6[%c5_254, %c0_255, %c0_256] : memref<8x64x256xf32, #tpu.memory_space<vmem>>, vector<1x64x256xf32>
    %736 = vector.shape_cast %735 : vector<1x64x256xf32> to vector<64x256xf32>
    %737 = vector.broadcast %734 : vector<1x256xf32> to vector<64x256xf32>
    %738 = arith.mulf %737, %736 : vector<64x256xf32>
    %739 = arith.addf %732, %738 : vector<64x256xf32>
    %740 = vector.extract_strided_slice %457 {offsets = [6, 4, 0], sizes = [1, 1, 256], strides = [1, 1, 1]} : vector<8x8x256xf32> to vector<1x1x256xf32>
    %741 = vector.shape_cast %740 : vector<1x1x256xf32> to vector<1x256xf32>
    %c6_257 = arith.constant 6 : index
    %c0_258 = arith.constant 0 : index
    %c0_259 = arith.constant 0 : index
    %742 = vector.load %arg6[%c6_257, %c0_258, %c0_259] : memref<8x64x256xf32, #tpu.memory_space<vmem>>, vector<1x64x256xf32>
    %743 = vector.shape_cast %742 : vector<1x64x256xf32> to vector<64x256xf32>
    %744 = vector.broadcast %741 : vector<1x256xf32> to vector<64x256xf32>
    %745 = arith.mulf %744, %743 : vector<64x256xf32>
    %746 = arith.addf %739, %745 : vector<64x256xf32>
    %747 = vector.extract_strided_slice %457 {offsets = [7, 4, 0], sizes = [1, 1, 256], strides = [1, 1, 1]} : vector<8x8x256xf32> to vector<1x1x256xf32>
    %748 = vector.shape_cast %747 : vector<1x1x256xf32> to vector<1x256xf32>
    %c7_260 = arith.constant 7 : index
    %c0_261 = arith.constant 0 : index
    %c0_262 = arith.constant 0 : index
    %749 = vector.load %arg6[%c7_260, %c0_261, %c0_262] : memref<8x64x256xf32, #tpu.memory_space<vmem>>, vector<1x64x256xf32>
    %750 = vector.shape_cast %749 : vector<1x64x256xf32> to vector<64x256xf32>
    %751 = vector.broadcast %748 : vector<1x256xf32> to vector<64x256xf32>
    %752 = arith.mulf %751, %750 : vector<64x256xf32>
    %753 = arith.addf %746, %752 : vector<64x256xf32>
    %c4_263 = arith.constant 4 : index
    %c0_264 = arith.constant 0 : index
    %c0_265 = arith.constant 0 : index
    %754 = vector.load %arg3[%c4_263, %c0_264, %c0_265] : memref<8x16x64xbf16, #tpu.memory_space<vmem>>, vector<1x16x64xbf16>
    %755 = vector.shape_cast %754 : vector<1x16x64xbf16> to vector<16x64xbf16>
    %756 = arith.truncf %753 : vector<64x256xf32> to vector<64x256xbf16>
    %cst_266 = arith.constant dense<0.000000e+00> : vector<16x256xf32>
    %757 = tpu.matmul %755, %756, %cst_266 {dimension_numbers = #tpu.dot_dimension_numbers<[1], [0], [0], [1], [0, 0, 1, 1], [], []>} : vector<16x64xbf16>, vector<64x256xbf16>, vector<16x256xf32> -> vector<16x256xf32>
    %758 = arith.addf %698, %757 : vector<16x256xf32>
    %759 = vector.extract_strided_slice %457 {offsets = [0, 5, 0], sizes = [1, 1, 256], strides = [1, 1, 1]} : vector<8x8x256xf32> to vector<1x1x256xf32>
    %760 = vector.shape_cast %759 : vector<1x1x256xf32> to vector<1x256xf32>
    %c0_267 = arith.constant 0 : index
    %c0_268 = arith.constant 0 : index
    %c0_269 = arith.constant 0 : index
    %761 = vector.load %arg6[%c0_267, %c0_268, %c0_269] : memref<8x64x256xf32, #tpu.memory_space<vmem>>, vector<1x64x256xf32>
    %762 = vector.shape_cast %761 : vector<1x64x256xf32> to vector<64x256xf32>
    %763 = vector.broadcast %760 : vector<1x256xf32> to vector<64x256xf32>
    %764 = arith.mulf %763, %762 : vector<64x256xf32>
    %765 = vector.extract_strided_slice %457 {offsets = [1, 5, 0], sizes = [1, 1, 256], strides = [1, 1, 1]} : vector<8x8x256xf32> to vector<1x1x256xf32>
    %766 = vector.shape_cast %765 : vector<1x1x256xf32> to vector<1x256xf32>
    %c1_270 = arith.constant 1 : index
    %c0_271 = arith.constant 0 : index
    %c0_272 = arith.constant 0 : index
    %767 = vector.load %arg6[%c1_270, %c0_271, %c0_272] : memref<8x64x256xf32, #tpu.memory_space<vmem>>, vector<1x64x256xf32>
    %768 = vector.shape_cast %767 : vector<1x64x256xf32> to vector<64x256xf32>
    %769 = vector.broadcast %766 : vector<1x256xf32> to vector<64x256xf32>
    %770 = arith.mulf %769, %768 : vector<64x256xf32>
    %771 = arith.addf %764, %770 : vector<64x256xf32>
    %772 = vector.extract_strided_slice %457 {offsets = [2, 5, 0], sizes = [1, 1, 256], strides = [1, 1, 1]} : vector<8x8x256xf32> to vector<1x1x256xf32>
    %773 = vector.shape_cast %772 : vector<1x1x256xf32> to vector<1x256xf32>
    %c2_273 = arith.constant 2 : index
    %c0_274 = arith.constant 0 : index
    %c0_275 = arith.constant 0 : index
    %774 = vector.load %arg6[%c2_273, %c0_274, %c0_275] : memref<8x64x256xf32, #tpu.memory_space<vmem>>, vector<1x64x256xf32>
    %775 = vector.shape_cast %774 : vector<1x64x256xf32> to vector<64x256xf32>
    %776 = vector.broadcast %773 : vector<1x256xf32> to vector<64x256xf32>
    %777 = arith.mulf %776, %775 : vector<64x256xf32>
    %778 = arith.addf %771, %777 : vector<64x256xf32>
    %779 = vector.extract_strided_slice %457 {offsets = [3, 5, 0], sizes = [1, 1, 256], strides = [1, 1, 1]} : vector<8x8x256xf32> to vector<1x1x256xf32>
    %780 = vector.shape_cast %779 : vector<1x1x256xf32> to vector<1x256xf32>
    %c3_276 = arith.constant 3 : index
    %c0_277 = arith.constant 0 : index
    %c0_278 = arith.constant 0 : index
    %781 = vector.load %arg6[%c3_276, %c0_277, %c0_278] : memref<8x64x256xf32, #tpu.memory_space<vmem>>, vector<1x64x256xf32>
    %782 = vector.shape_cast %781 : vector<1x64x256xf32> to vector<64x256xf32>
    %783 = vector.broadcast %780 : vector<1x256xf32> to vector<64x256xf32>
    %784 = arith.mulf %783, %782 : vector<64x256xf32>
    %785 = arith.addf %778, %784 : vector<64x256xf32>
    %786 = vector.extract_strided_slice %457 {offsets = [4, 5, 0], sizes = [1, 1, 256], strides = [1, 1, 1]} : vector<8x8x256xf32> to vector<1x1x256xf32>
    %787 = vector.shape_cast %786 : vector<1x1x256xf32> to vector<1x256xf32>
    %c4_279 = arith.constant 4 : index
    %c0_280 = arith.constant 0 : index
    %c0_281 = arith.constant 0 : index
    %788 = vector.load %arg6[%c4_279, %c0_280, %c0_281] : memref<8x64x256xf32, #tpu.memory_space<vmem>>, vector<1x64x256xf32>
    %789 = vector.shape_cast %788 : vector<1x64x256xf32> to vector<64x256xf32>
    %790 = vector.broadcast %787 : vector<1x256xf32> to vector<64x256xf32>
    %791 = arith.mulf %790, %789 : vector<64x256xf32>
    %792 = arith.addf %785, %791 : vector<64x256xf32>
    %793 = vector.extract_strided_slice %457 {offsets = [5, 5, 0], sizes = [1, 1, 256], strides = [1, 1, 1]} : vector<8x8x256xf32> to vector<1x1x256xf32>
    %794 = vector.shape_cast %793 : vector<1x1x256xf32> to vector<1x256xf32>
    %c5_282 = arith.constant 5 : index
    %c0_283 = arith.constant 0 : index
    %c0_284 = arith.constant 0 : index
    %795 = vector.load %arg6[%c5_282, %c0_283, %c0_284] : memref<8x64x256xf32, #tpu.memory_space<vmem>>, vector<1x64x256xf32>
    %796 = vector.shape_cast %795 : vector<1x64x256xf32> to vector<64x256xf32>
    %797 = vector.broadcast %794 : vector<1x256xf32> to vector<64x256xf32>
    %798 = arith.mulf %797, %796 : vector<64x256xf32>
    %799 = arith.addf %792, %798 : vector<64x256xf32>
    %800 = vector.extract_strided_slice %457 {offsets = [6, 5, 0], sizes = [1, 1, 256], strides = [1, 1, 1]} : vector<8x8x256xf32> to vector<1x1x256xf32>
    %801 = vector.shape_cast %800 : vector<1x1x256xf32> to vector<1x256xf32>
    %c6_285 = arith.constant 6 : index
    %c0_286 = arith.constant 0 : index
    %c0_287 = arith.constant 0 : index
    %802 = vector.load %arg6[%c6_285, %c0_286, %c0_287] : memref<8x64x256xf32, #tpu.memory_space<vmem>>, vector<1x64x256xf32>
    %803 = vector.shape_cast %802 : vector<1x64x256xf32> to vector<64x256xf32>
    %804 = vector.broadcast %801 : vector<1x256xf32> to vector<64x256xf32>
    %805 = arith.mulf %804, %803 : vector<64x256xf32>
    %806 = arith.addf %799, %805 : vector<64x256xf32>
    %807 = vector.extract_strided_slice %457 {offsets = [7, 5, 0], sizes = [1, 1, 256], strides = [1, 1, 1]} : vector<8x8x256xf32> to vector<1x1x256xf32>
    %808 = vector.shape_cast %807 : vector<1x1x256xf32> to vector<1x256xf32>
    %c7_288 = arith.constant 7 : index
    %c0_289 = arith.constant 0 : index
    %c0_290 = arith.constant 0 : index
    %809 = vector.load %arg6[%c7_288, %c0_289, %c0_290] : memref<8x64x256xf32, #tpu.memory_space<vmem>>, vector<1x64x256xf32>
    %810 = vector.shape_cast %809 : vector<1x64x256xf32> to vector<64x256xf32>
    %811 = vector.broadcast %808 : vector<1x256xf32> to vector<64x256xf32>
    %812 = arith.mulf %811, %810 : vector<64x256xf32>
    %813 = arith.addf %806, %812 : vector<64x256xf32>
    %c5_291 = arith.constant 5 : index
    %c0_292 = arith.constant 0 : index
    %c0_293 = arith.constant 0 : index
    %814 = vector.load %arg3[%c5_291, %c0_292, %c0_293] : memref<8x16x64xbf16, #tpu.memory_space<vmem>>, vector<1x16x64xbf16>
    %815 = vector.shape_cast %814 : vector<1x16x64xbf16> to vector<16x64xbf16>
    %816 = arith.truncf %813 : vector<64x256xf32> to vector<64x256xbf16>
    %cst_294 = arith.constant dense<0.000000e+00> : vector<16x256xf32>
    %817 = tpu.matmul %815, %816, %cst_294 {dimension_numbers = #tpu.dot_dimension_numbers<[1], [0], [0], [1], [0, 0, 1, 1], [], []>} : vector<16x64xbf16>, vector<64x256xbf16>, vector<16x256xf32> -> vector<16x256xf32>
    %818 = arith.addf %758, %817 : vector<16x256xf32>
    %819 = vector.extract_strided_slice %457 {offsets = [0, 6, 0], sizes = [1, 1, 256], strides = [1, 1, 1]} : vector<8x8x256xf32> to vector<1x1x256xf32>
    %820 = vector.shape_cast %819 : vector<1x1x256xf32> to vector<1x256xf32>
    %c0_295 = arith.constant 0 : index
    %c0_296 = arith.constant 0 : index
    %c0_297 = arith.constant 0 : index
    %821 = vector.load %arg6[%c0_295, %c0_296, %c0_297] : memref<8x64x256xf32, #tpu.memory_space<vmem>>, vector<1x64x256xf32>
    %822 = vector.shape_cast %821 : vector<1x64x256xf32> to vector<64x256xf32>
    %823 = vector.broadcast %820 : vector<1x256xf32> to vector<64x256xf32>
    %824 = arith.mulf %823, %822 : vector<64x256xf32>
    %825 = vector.extract_strided_slice %457 {offsets = [1, 6, 0], sizes = [1, 1, 256], strides = [1, 1, 1]} : vector<8x8x256xf32> to vector<1x1x256xf32>
    %826 = vector.shape_cast %825 : vector<1x1x256xf32> to vector<1x256xf32>
    %c1_298 = arith.constant 1 : index
    %c0_299 = arith.constant 0 : index
    %c0_300 = arith.constant 0 : index
    %827 = vector.load %arg6[%c1_298, %c0_299, %c0_300] : memref<8x64x256xf32, #tpu.memory_space<vmem>>, vector<1x64x256xf32>
    %828 = vector.shape_cast %827 : vector<1x64x256xf32> to vector<64x256xf32>
    %829 = vector.broadcast %826 : vector<1x256xf32> to vector<64x256xf32>
    %830 = arith.mulf %829, %828 : vector<64x256xf32>
    %831 = arith.addf %824, %830 : vector<64x256xf32>
    %832 = vector.extract_strided_slice %457 {offsets = [2, 6, 0], sizes = [1, 1, 256], strides = [1, 1, 1]} : vector<8x8x256xf32> to vector<1x1x256xf32>
    %833 = vector.shape_cast %832 : vector<1x1x256xf32> to vector<1x256xf32>
    %c2_301 = arith.constant 2 : index
    %c0_302 = arith.constant 0 : index
    %c0_303 = arith.constant 0 : index
    %834 = vector.load %arg6[%c2_301, %c0_302, %c0_303] : memref<8x64x256xf32, #tpu.memory_space<vmem>>, vector<1x64x256xf32>
    %835 = vector.shape_cast %834 : vector<1x64x256xf32> to vector<64x256xf32>
    %836 = vector.broadcast %833 : vector<1x256xf32> to vector<64x256xf32>
    %837 = arith.mulf %836, %835 : vector<64x256xf32>
    %838 = arith.addf %831, %837 : vector<64x256xf32>
    %839 = vector.extract_strided_slice %457 {offsets = [3, 6, 0], sizes = [1, 1, 256], strides = [1, 1, 1]} : vector<8x8x256xf32> to vector<1x1x256xf32>
    %840 = vector.shape_cast %839 : vector<1x1x256xf32> to vector<1x256xf32>
    %c3_304 = arith.constant 3 : index
    %c0_305 = arith.constant 0 : index
    %c0_306 = arith.constant 0 : index
    %841 = vector.load %arg6[%c3_304, %c0_305, %c0_306] : memref<8x64x256xf32, #tpu.memory_space<vmem>>, vector<1x64x256xf32>
    %842 = vector.shape_cast %841 : vector<1x64x256xf32> to vector<64x256xf32>
    %843 = vector.broadcast %840 : vector<1x256xf32> to vector<64x256xf32>
    %844 = arith.mulf %843, %842 : vector<64x256xf32>
    %845 = arith.addf %838, %844 : vector<64x256xf32>
    %846 = vector.extract_strided_slice %457 {offsets = [4, 6, 0], sizes = [1, 1, 256], strides = [1, 1, 1]} : vector<8x8x256xf32> to vector<1x1x256xf32>
    %847 = vector.shape_cast %846 : vector<1x1x256xf32> to vector<1x256xf32>
    %c4_307 = arith.constant 4 : index
    %c0_308 = arith.constant 0 : index
    %c0_309 = arith.constant 0 : index
    %848 = vector.load %arg6[%c4_307, %c0_308, %c0_309] : memref<8x64x256xf32, #tpu.memory_space<vmem>>, vector<1x64x256xf32>
    %849 = vector.shape_cast %848 : vector<1x64x256xf32> to vector<64x256xf32>
    %850 = vector.broadcast %847 : vector<1x256xf32> to vector<64x256xf32>
    %851 = arith.mulf %850, %849 : vector<64x256xf32>
    %852 = arith.addf %845, %851 : vector<64x256xf32>
    %853 = vector.extract_strided_slice %457 {offsets = [5, 6, 0], sizes = [1, 1, 256], strides = [1, 1, 1]} : vector<8x8x256xf32> to vector<1x1x256xf32>
    %854 = vector.shape_cast %853 : vector<1x1x256xf32> to vector<1x256xf32>
    %c5_310 = arith.constant 5 : index
    %c0_311 = arith.constant 0 : index
    %c0_312 = arith.constant 0 : index
    %855 = vector.load %arg6[%c5_310, %c0_311, %c0_312] : memref<8x64x256xf32, #tpu.memory_space<vmem>>, vector<1x64x256xf32>
    %856 = vector.shape_cast %855 : vector<1x64x256xf32> to vector<64x256xf32>
    %857 = vector.broadcast %854 : vector<1x256xf32> to vector<64x256xf32>
    %858 = arith.mulf %857, %856 : vector<64x256xf32>
    %859 = arith.addf %852, %858 : vector<64x256xf32>
    %860 = vector.extract_strided_slice %457 {offsets = [6, 6, 0], sizes = [1, 1, 256], strides = [1, 1, 1]} : vector<8x8x256xf32> to vector<1x1x256xf32>
    %861 = vector.shape_cast %860 : vector<1x1x256xf32> to vector<1x256xf32>
    %c6_313 = arith.constant 6 : index
    %c0_314 = arith.constant 0 : index
    %c0_315 = arith.constant 0 : index
    %862 = vector.load %arg6[%c6_313, %c0_314, %c0_315] : memref<8x64x256xf32, #tpu.memory_space<vmem>>, vector<1x64x256xf32>
    %863 = vector.shape_cast %862 : vector<1x64x256xf32> to vector<64x256xf32>
    %864 = vector.broadcast %861 : vector<1x256xf32> to vector<64x256xf32>
    %865 = arith.mulf %864, %863 : vector<64x256xf32>
    %866 = arith.addf %859, %865 : vector<64x256xf32>
    %867 = vector.extract_strided_slice %457 {offsets = [7, 6, 0], sizes = [1, 1, 256], strides = [1, 1, 1]} : vector<8x8x256xf32> to vector<1x1x256xf32>
    %868 = vector.shape_cast %867 : vector<1x1x256xf32> to vector<1x256xf32>
    %c7_316 = arith.constant 7 : index
    %c0_317 = arith.constant 0 : index
    %c0_318 = arith.constant 0 : index
    %869 = vector.load %arg6[%c7_316, %c0_317, %c0_318] : memref<8x64x256xf32, #tpu.memory_space<vmem>>, vector<1x64x256xf32>
    %870 = vector.shape_cast %869 : vector<1x64x256xf32> to vector<64x256xf32>
    %871 = vector.broadcast %868 : vector<1x256xf32> to vector<64x256xf32>
    %872 = arith.mulf %871, %870 : vector<64x256xf32>
    %873 = arith.addf %866, %872 : vector<64x256xf32>
    %c6_319 = arith.constant 6 : index
    %c0_320 = arith.constant 0 : index
    %c0_321 = arith.constant 0 : index
    %874 = vector.load %arg3[%c6_319, %c0_320, %c0_321] : memref<8x16x64xbf16, #tpu.memory_space<vmem>>, vector<1x16x64xbf16>
    %875 = vector.shape_cast %874 : vector<1x16x64xbf16> to vector<16x64xbf16>
    %876 = arith.truncf %873 : vector<64x256xf32> to vector<64x256xbf16>
    %cst_322 = arith.constant dense<0.000000e+00> : vector<16x256xf32>
    %877 = tpu.matmul %875, %876, %cst_322 {dimension_numbers = #tpu.dot_dimension_numbers<[1], [0], [0], [1], [0, 0, 1, 1], [], []>} : vector<16x64xbf16>, vector<64x256xbf16>, vector<16x256xf32> -> vector<16x256xf32>
    %878 = arith.addf %818, %877 : vector<16x256xf32>
    %879 = vector.extract_strided_slice %457 {offsets = [0, 7, 0], sizes = [1, 1, 256], strides = [1, 1, 1]} : vector<8x8x256xf32> to vector<1x1x256xf32>
    %880 = vector.shape_cast %879 : vector<1x1x256xf32> to vector<1x256xf32>
    %c0_323 = arith.constant 0 : index
    %c0_324 = arith.constant 0 : index
    %c0_325 = arith.constant 0 : index
    %881 = vector.load %arg6[%c0_323, %c0_324, %c0_325] : memref<8x64x256xf32, #tpu.memory_space<vmem>>, vector<1x64x256xf32>
    %882 = vector.shape_cast %881 : vector<1x64x256xf32> to vector<64x256xf32>
    %883 = vector.broadcast %880 : vector<1x256xf32> to vector<64x256xf32>
    %884 = arith.mulf %883, %882 : vector<64x256xf32>
    %885 = vector.extract_strided_slice %457 {offsets = [1, 7, 0], sizes = [1, 1, 256], strides = [1, 1, 1]} : vector<8x8x256xf32> to vector<1x1x256xf32>
    %886 = vector.shape_cast %885 : vector<1x1x256xf32> to vector<1x256xf32>
    %c1_326 = arith.constant 1 : index
    %c0_327 = arith.constant 0 : index
    %c0_328 = arith.constant 0 : index
    %887 = vector.load %arg6[%c1_326, %c0_327, %c0_328] : memref<8x64x256xf32, #tpu.memory_space<vmem>>, vector<1x64x256xf32>
    %888 = vector.shape_cast %887 : vector<1x64x256xf32> to vector<64x256xf32>
    %889 = vector.broadcast %886 : vector<1x256xf32> to vector<64x256xf32>
    %890 = arith.mulf %889, %888 : vector<64x256xf32>
    %891 = arith.addf %884, %890 : vector<64x256xf32>
    %892 = vector.extract_strided_slice %457 {offsets = [2, 7, 0], sizes = [1, 1, 256], strides = [1, 1, 1]} : vector<8x8x256xf32> to vector<1x1x256xf32>
    %893 = vector.shape_cast %892 : vector<1x1x256xf32> to vector<1x256xf32>
    %c2_329 = arith.constant 2 : index
    %c0_330 = arith.constant 0 : index
    %c0_331 = arith.constant 0 : index
    %894 = vector.load %arg6[%c2_329, %c0_330, %c0_331] : memref<8x64x256xf32, #tpu.memory_space<vmem>>, vector<1x64x256xf32>
    %895 = vector.shape_cast %894 : vector<1x64x256xf32> to vector<64x256xf32>
    %896 = vector.broadcast %893 : vector<1x256xf32> to vector<64x256xf32>
    %897 = arith.mulf %896, %895 : vector<64x256xf32>
    %898 = arith.addf %891, %897 : vector<64x256xf32>
    %899 = vector.extract_strided_slice %457 {offsets = [3, 7, 0], sizes = [1, 1, 256], strides = [1, 1, 1]} : vector<8x8x256xf32> to vector<1x1x256xf32>
    %900 = vector.shape_cast %899 : vector<1x1x256xf32> to vector<1x256xf32>
    %c3_332 = arith.constant 3 : index
    %c0_333 = arith.constant 0 : index
    %c0_334 = arith.constant 0 : index
    %901 = vector.load %arg6[%c3_332, %c0_333, %c0_334] : memref<8x64x256xf32, #tpu.memory_space<vmem>>, vector<1x64x256xf32>
    %902 = vector.shape_cast %901 : vector<1x64x256xf32> to vector<64x256xf32>
    %903 = vector.broadcast %900 : vector<1x256xf32> to vector<64x256xf32>
    %904 = arith.mulf %903, %902 : vector<64x256xf32>
    %905 = arith.addf %898, %904 : vector<64x256xf32>
    %906 = vector.extract_strided_slice %457 {offsets = [4, 7, 0], sizes = [1, 1, 256], strides = [1, 1, 1]} : vector<8x8x256xf32> to vector<1x1x256xf32>
    %907 = vector.shape_cast %906 : vector<1x1x256xf32> to vector<1x256xf32>
    %c4_335 = arith.constant 4 : index
    %c0_336 = arith.constant 0 : index
    %c0_337 = arith.constant 0 : index
    %908 = vector.load %arg6[%c4_335, %c0_336, %c0_337] : memref<8x64x256xf32, #tpu.memory_space<vmem>>, vector<1x64x256xf32>
    %909 = vector.shape_cast %908 : vector<1x64x256xf32> to vector<64x256xf32>
    %910 = vector.broadcast %907 : vector<1x256xf32> to vector<64x256xf32>
    %911 = arith.mulf %910, %909 : vector<64x256xf32>
    %912 = arith.addf %905, %911 : vector<64x256xf32>
    %913 = vector.extract_strided_slice %457 {offsets = [5, 7, 0], sizes = [1, 1, 256], strides = [1, 1, 1]} : vector<8x8x256xf32> to vector<1x1x256xf32>
    %914 = vector.shape_cast %913 : vector<1x1x256xf32> to vector<1x256xf32>
    %c5_338 = arith.constant 5 : index
    %c0_339 = arith.constant 0 : index
    %c0_340 = arith.constant 0 : index
    %915 = vector.load %arg6[%c5_338, %c0_339, %c0_340] : memref<8x64x256xf32, #tpu.memory_space<vmem>>, vector<1x64x256xf32>
    %916 = vector.shape_cast %915 : vector<1x64x256xf32> to vector<64x256xf32>
    %917 = vector.broadcast %914 : vector<1x256xf32> to vector<64x256xf32>
    %918 = arith.mulf %917, %916 : vector<64x256xf32>
    %919 = arith.addf %912, %918 : vector<64x256xf32>
    %920 = vector.extract_strided_slice %457 {offsets = [6, 7, 0], sizes = [1, 1, 256], strides = [1, 1, 1]} : vector<8x8x256xf32> to vector<1x1x256xf32>
    %921 = vector.shape_cast %920 : vector<1x1x256xf32> to vector<1x256xf32>
    %c6_341 = arith.constant 6 : index
    %c0_342 = arith.constant 0 : index
    %c0_343 = arith.constant 0 : index
    %922 = vector.load %arg6[%c6_341, %c0_342, %c0_343] : memref<8x64x256xf32, #tpu.memory_space<vmem>>, vector<1x64x256xf32>
    %923 = vector.shape_cast %922 : vector<1x64x256xf32> to vector<64x256xf32>
    %924 = vector.broadcast %921 : vector<1x256xf32> to vector<64x256xf32>
    %925 = arith.mulf %924, %923 : vector<64x256xf32>
    %926 = arith.addf %919, %925 : vector<64x256xf32>
    %927 = vector.extract_strided_slice %457 {offsets = [7, 7, 0], sizes = [1, 1, 256], strides = [1, 1, 1]} : vector<8x8x256xf32> to vector<1x1x256xf32>
    %928 = vector.shape_cast %927 : vector<1x1x256xf32> to vector<1x256xf32>
    %c7_344 = arith.constant 7 : index
    %c0_345 = arith.constant 0 : index
    %c0_346 = arith.constant 0 : index
    %929 = vector.load %arg6[%c7_344, %c0_345, %c0_346] : memref<8x64x256xf32, #tpu.memory_space<vmem>>, vector<1x64x256xf32>
    %930 = vector.shape_cast %929 : vector<1x64x256xf32> to vector<64x256xf32>
    %931 = vector.broadcast %928 : vector<1x256xf32> to vector<64x256xf32>
    %932 = arith.mulf %931, %930 : vector<64x256xf32>
    %933 = arith.addf %926, %932 : vector<64x256xf32>
    %c7_347 = arith.constant 7 : index
    %c0_348 = arith.constant 0 : index
    %c0_349 = arith.constant 0 : index
    %934 = vector.load %arg3[%c7_347, %c0_348, %c0_349] : memref<8x16x64xbf16, #tpu.memory_space<vmem>>, vector<1x16x64xbf16>
    %935 = vector.shape_cast %934 : vector<1x16x64xbf16> to vector<16x64xbf16>
    %936 = arith.truncf %933 : vector<64x256xf32> to vector<64x256xbf16>
    %cst_350 = arith.constant dense<0.000000e+00> : vector<16x256xf32>
    %937 = tpu.matmul %935, %936, %cst_350 {dimension_numbers = #tpu.dot_dimension_numbers<[1], [0], [0], [1], [0, 0, 1, 1], [], []>} : vector<16x64xbf16>, vector<64x256xbf16>, vector<16x256xf32> -> vector<16x256xf32>
    %938 = arith.addf %878, %937 : vector<16x256xf32>
    %cst_351 = arith.constant dense<0.000000e+00> : vector<256xf32>
    %939 = vector.multi_reduction <add>, %19, %cst_351 [0] : vector<8x256xf32> to vector<256xf32>
    %940 = vector.shape_cast %939 : vector<256xf32> to vector<1x256xf32>
    %cst_352 = arith.constant 0.000000e+00 : f32
    %941 = vector.broadcast %cst_352 : f32 to vector<1x256xf32>
    %942 = arith.cmpf one, %940, %941 : vector<1x256xf32>
    %cst_353 = arith.constant 1.000000e+00 : f32
    %943 = vector.broadcast %cst_353 : f32 to vector<1x256xf32>
    %944 = arith.select %942, %940, %943 : vector<1x256xi1>, vector<1x256xf32>
    %cst_354 = arith.constant 1.000000e+00 : f32
    %945 = vector.broadcast %cst_354 : f32 to vector<1x256xf32>
    %946 = arith.divf %945, %944 : vector<1x256xf32>
    %cst_355 = arith.constant 1.000000e+00 : f32
    %947 = vector.broadcast %cst_355 : f32 to vector<1x256xf32>
    %948 = arith.select %942, %946, %947 : vector<1x256xi1>, vector<1x256xf32>
    %949 = vector.broadcast %948 : vector<1x256xf32> to vector<16x256xf32>
    %950 = arith.mulf %938, %949 : vector<16x256xf32>
    %c0_356 = arith.constant 0 : index
    %c0_357 = arith.constant 0 : index
    %951 = vector.load %arg4[%c0_356, %c0_357] : memref<16x1xf32, #tpu.memory_space<vmem>>, vector<16x1xf32>
    %952 = vector.broadcast %951 : vector<16x1xf32> to vector<16x256xf32>
    %953 = arith.addf %950, %952 : vector<16x256xf32>
    %cst_358 = arith.constant 0.000000e+00 : f32
    %954 = vector.broadcast %cst_358 : f32 to vector<16x256xf32>
    %955 = arith.maximumf %953, %954 : vector<16x256xf32>
    %c0_359 = arith.constant 0 : index
    %c0_360 = arith.constant 0 : index
    %956 = vector.load %arg5[%c0_359, %c0_360] : memref<16x256xf32, #tpu.memory_space<vmem>>, vector<16x256xf32>
    tpu.vector_store %arg5[%c0_359, %c0_360], %955 {strides = array<i32>} : memref<16x256xf32, #tpu.memory_space<vmem>>, vector<16x256xf32>,
    return
  }
  func.func @transform_0(%arg0: i32) -> (i32, i32, i32) {
    %c0_i32 = arith.constant 0 : i32
    %c0_i32_0 = arith.constant 0 : i32
    %c0_i32_1 = arith.constant 0 : i32
    return %c0_i32, %c0_i32_0, %arg0 : i32, i32, i32
  }
  func.func @transform_1(%arg0: i32) -> (i32, i32, i32) {
    %c0_i32 = arith.constant 0 : i32
    %c0_i32_0 = arith.constant 0 : i32
    %c0_i32_1 = arith.constant 0 : i32
    return %c0_i32, %c0_i32_0, %arg0 : i32, i32, i32
  }
  func.func @transform_2(%arg0: i32) -> (i32, i32, i32) {
    %c0_i32 = arith.constant 0 : i32
    %c0_i32_0 = arith.constant 0 : i32
    %c0_i32_1 = arith.constant 0 : i32
    %c0_i32_2 = arith.constant 0 : i32
    return %c0_i32, %c0_i32_0, %c0_i32_1 : i32, i32, i32
  }
  func.func @transform_3(%arg0: i32) -> (i32, i32) {
    %c0_i32 = arith.constant 0 : i32
    %c0_i32_0 = arith.constant 0 : i32
    %c0_i32_1 = arith.constant 0 : i32
    return %c0_i32, %c0_i32_0 : i32, i32
  }
  func.func @transform_4(%arg0: i32) -> (i32, i32) {
    %c0_i32 = arith.constant 0 : i32
    %c0_i32_0 = arith.constant 0 : i32
    return %c0_i32, %arg0 : i32, i32
  }
}

</mosaic_0001>

<bundles_post_ra>
// kernel: tpu_custom_call.1
= control target key start
LH: loop header
LB: loop body
LE: loop exit
PB: predicated region body
PF: predicated region fallthrough
CT: control target
= control target key end

     0   :  { %9 = vsyncpa [#allocation4], 0  ;;  %s12022_s0 = inlined_call_operand.hbm [shape: f32[5,8,256], index: 0, kind: input, shape index: {}]   ;;  %s12023_s1 = inlined_call_operand.hbm [shape: bf16[8,8,256], index: 1, kind: input, shape index: {}]   ;;  %s12024_s2 = inlined_call_operand.hbm [shape: bf16[8,16,64], index: 2, kind: input, shape index: {}]   ;;  %s12025_s3 = inlined_call_operand.vmem [shape: f32[16,1], index: 3, kind: input, shape index: {}]   ;;  %s12026_s4 = inlined_call_operand.hbm [shape: f32[16,256], index: 4, kind: output, shape index: {}]  }
   0x1   :  { %10 = vsyncpa [#allocation7], 0 }
   0x2   :  { %11 = vsyncpa [#allocation5], 0  ;;  %s6641_s15 = smov [#allocation6]   ;;  %s6547_s19 = scalar_lea.hbm %s12023_s1, 1024 }
   0x3   :  { %s29_s16 = sshll.u32 %s6641_s15, 4  ;;  %p6548_p0 = scmp.ne.s32.totalorder %s12023_s1, %s6547_s19  ;;  %s30_s16 = int_to_ptr.vmem [resolvable:$true] %s29_s16 }
   0x4   :  { %p6551_p1 = scmp.lt.u32.totalorder %s6547_s19, %s12023_s1 }
   0x6   :  { %p6553_p2 = pnand %p6551_p1, %p6548_p0 }
   0x8   :  { %6556 = shalt.err (!%p6553_p2)
}
   0x9   :  { %s6557_s24 = scalar_lea.vmem %s30_s16, 1024  ;;  %p6562_p4 = scmp.lt.s32.totalorder %s30_s16, %s30_s16 }
   0xa   :  { %p6558_p3 = scmp.ne.s32.totalorder %s30_s16, %s6557_s24  ;;  %p6563_p5 = scmp.lt.s32.totalorder %s6557_s24, %s6557_s24 }
   0xc   :  { %p6564_p6 = por %p6563_p5, %p6562_p4 }
   0xe   :  { %p6565_p7 = pnand %p6564_p6, %p6558_p3 }
  0x10   :  { %6568 = shalt.err (!%p6565_p7)
}
  0x11   :  { %s6642_s25 = smov 128   ;;  %s6643_s26 = smov 8  }
  0x12   :  { %35 = dma.hbm_to_vmem [thread:$0]  %s12023_s1, 1024, %s30_s16, [#allocation7], %s6642_s25, %s6642_s25, %s6643_s26  }
  0x13   :  { %s6644_s29 = smov [#allocation3]   ;;  %s6569_s7 = scalar_lea.hbm %s12022_s0, 1280 }
  0x14   :  { %s17_s30 = sshll.u32 %s6644_s29, 4  ;;  %p6570_p8 = scmp.ne.s32.totalorder %s12022_s0, %s6569_s7  ;;  %s18_s30 = int_to_ptr.vmem [resolvable:$true] %s17_s30 }
  0x15   :  { %p6573_p9 = scmp.lt.u32.totalorder %s6569_s7, %s12022_s0 }
  0x17   :  { %p6575_p10 = pnand %p6573_p9, %p6570_p8 }
  0x19   :  { %6578 = shalt.err (!%p6575_p10)
}
  0x1a   :  { %s6579_s12 = scalar_lea.vmem %s18_s30, 1280  ;;  %p6584_p12 = scmp.lt.s32.totalorder %s18_s30, %s18_s30 }
  0x1b   :  { %p6580_p11 = scmp.ne.s32.totalorder %s18_s30, %s6579_s12  ;;  %p6585_p13 = scmp.lt.s32.totalorder %s6579_s12, %s6579_s12 }
  0x1d   :  { %p6586_p0 = por %p6585_p13, %p6584_p12 }
  0x1f   :  { %p6587_p1 = pnand %p6586_p0, %p6580_p11 }
  0x21   :  { %6590 = shalt.err (!%p6587_p1)
}
  0x22   :  { %s6645_s1 = smov 256   ;;  %s6646_s13 = smov 16  }
  0x23   :  { %23 = dma.hbm_to_vmem [thread:$0]  %s12022_s0, 1280, %s18_s30, [#allocation4], %s6645_s1, %s6645_s1, %s6646_s13  }
  0x24   :  { %s6647_s16 = smov [#allocation8]   ;;  %s6591_s20 = scalar_lea.hbm %s12024_s2, 1024 }
  0x25   :  { %s41_s17 = sshll.u32 %s6647_s16, 4  ;;  %p6592_p2 = scmp.ne.s32.totalorder %s12024_s2, %s6591_s20  ;;  %s42_s17 = int_to_ptr.vmem [resolvable:$true] %s41_s17 }
  0x26   :  { %p6595_p3 = scmp.lt.u32.totalorder %s6591_s20, %s12024_s2 }
  0x28   :  { %p6597_p4 = pnand %p6595_p3, %p6592_p2 }
  0x2a   :  { %6600 = shalt.err (!%p6597_p4)
}
  0x2b   :  { %s6601_s25 = scalar_lea.vmem %s42_s17, 1024  ;;  %p6606_p6 = scmp.lt.s32.totalorder %s42_s17, %s42_s17 }
  0x2c   :  { %p6602_p5 = scmp.ne.s32.totalorder %s42_s17, %s6601_s25  ;;  %p6607_p7 = scmp.lt.s32.totalorder %s6601_s25, %s6601_s25 }
  0x2e   :  { %p6608_p8 = por %p6607_p7, %p6606_p6 }
  0x30   :  { %p6609_p9 = pnand %p6608_p8, %p6602_p5 }
  0x32   :  { %6612 = shalt.err (!%p6609_p9)
}
  0x33   :  { %s6648_s0 = smov 64   ;;  %s6649_s26 = smov 4  }
  0x34   :  { %47 = dma.hbm_to_vmem [thread:$0]  %s12024_s2, 1024, %s42_s17, [#allocation7], %s6648_s0, %s6648_s0, %s6649_s26  }
  0x35   :  { %6635 = dma.done.wait [#allocation4], 1280  }
  0x36   :  { %6636 = vsyncadd [#allocation4], 4294966016 }
  0x37   :  { %6637 = dma.done.wait [#allocation7], 2048  }
  0x38   :  { %6638 = vsyncadd [#allocation7], 4294965248  ;;  %v60_v0 = vld [vmem:[#allocation3] sm:$0xff]  ;;  %v61_v1 = vld [vmem:[#allocation3 + $0x8] sm:$0xff]  ;;  %v132_v56 = vlaneseq  ;;  %v6650_v58 = vmov 1966171168  }
  0x39   :  { %v62_v2 = vld [vmem:[#allocation3 + $0x10] sm:$0xff]  ;;  %v63_v3 = vld [vmem:[#allocation3 + $0x18] sm:$0xff]  ;;  %v64_v4 = vld [vmem:[#allocation3 + $0x20] sm:$0xff]  ;;  %v82_v6 = vmul.f32 %v60_v0, %v60_v0  ;;  %v83_v7 = vmul.f32 %v61_v1, %v61_v1  ;;  %v106_v9 = vand.u32 2147483647, %v60_v0  ;;  %v156_v59 = vunpack.c.l.s4 %v6650_v58 }
  0x3a   :  { %v65_v5 = vld [vmem:[#allocation3 + $0x28] sm:$0xff]  ;;  %v84_v8 = vmul.f32 %v62_v2, %v62_v2  ;;  %v85_v10 = vmul.f32 %v63_v3, %v63_v3  ;;  %v88_v11 = vmul.f32 %v64_v4, %v64_v4  ;;  %v107_v13 = vand.u32 2147483647, %v61_v1  ;;  %v66_v34 = vld [vmem:[#allocation3 + $0x30] sm:$0xff]  ;;  %v67_v35 = vld [vmem:[#allocation3 + $0x38] sm:$0xff] }
  0x3b   :  { %v89_v12 = vmul.f32 %v65_v5, %v65_v5  ;;  %v108_v15 = vand.u32 2147483647, %v62_v2  ;;  %v109_v17 = vand.u32 2147483647, %v63_v3  ;;  %v112_v18 = vand.u32 2147483647, %v64_v4 }
  0x3c   :  { %v86_v14 = vadd.f32 %v84_v8, %v82_v6  ;;  %v87_v16 = vadd.f32 %v85_v10, %v83_v7  ;;  %v113_v19 = vand.u32 2147483647, %v65_v5  ;;  %v70_v39 = vsub.f32 1.0, %v66_v34  ;;  %v68_v34 = vld [vmem:[#allocation3 + $0x40] sm:$0xff] }
  0x3d   :  { %v110_v22 = vmax.f32.f32 %v106_v9, %v108_v15  ;;  %v111_v23 = vmax.f32.f32 %v107_v13, %v109_v17  ;;  %v71_v40 = vsub.f32 1.0, %v67_v35 }
  0x3e   :  { %v90_v20 = vadd.f32 %v88_v11, %v86_v14  ;;  %v91_v21 = vadd.f32 %v89_v12, %v87_v16  ;;  %v72_v46 = vmul.f32 %v70_v39, %v70_v39 }
  0x3f   :  { %v114_v24 = vmax.f32.f32 %v110_v22, %v112_v18  ;;  %v115_v25 = vmax.f32.f32 %v111_v23, %v113_v19  ;;  %v73_v47 = vmul.f32 %v71_v40, %v71_v40 }
  0x40   :  { %6535 = vrsqrt.f32 %v90_v20  ;;  %vm94_vm2 = vcmp.eq.f32.partialorder %v90_v20, inf  ;;  %v97_v31 = vand.u32 2147483648, %v90_v20  ;;  %vm101_vm3 = vcmp.eq.f32.partialorder %v91_v21, inf }
  0x41   :  { %6537 = vrsqrt.f32 %v91_v21  ;;  %vm116_vm0 = vcmp.gt.f32.partialorder %v114_v24, 0.0  ;;  %vm117_vm1 = vcmp.gt.f32.partialorder %v115_v25, 0.0  ;;  %vm96_vm4 = vcmp.eq.f32.partialorder %v90_v20, 0.0 }
  0x42   :  { %v118_v26 = vsel %vm116_vm0, %v114_v24, 1.0  ;;  %v119_v27 = vsel %vm117_vm1, %v115_v25, 1.0  ;;  %v104_v33 = vand.u32 2147483648, %v91_v21  ;;  %vm103_vm5 = vcmp.eq.f32.partialorder %v91_v21, 0.0 }
  0x43   :  { %6539 = vrcp.f32 %v118_v26  ;;  %v74_v62 = vmul.f32 %v72_v46, %v70_v39  ;;  %v75_v8 = vmul.f32 %v73_v47, %v71_v40  ;;  %v69_v39 = vld [vmem:[#allocation3 + $0x48] sm:$0xff] }
  0x44   :  { %6541 = vrcp.f32 %v119_v27 }
  0x45   :  { %v76_v14 = vmax.f32 %v74_v62, 0.0  ;;  %v77_v18 = vmax.f32 %v75_v8, 0.0 }
  0x47   :  { %v79_v35 = vmin.f32 %v77_v18, 1.0 }
  0x4a   :  { %v6536_v28 = vpop.eup %6535 }
  0x4b   :  { %v6538_v29 = vpop.eup %6537  ;;  %v93_v30 = vmul.f32 %v6536_v28, %v90_v20 }
  0x4c   :  { %v100_v32 = vmul.f32 %v6538_v29, %v91_v21 }
  0x4d   :  { %v95_v36 = vsel %vm94_vm2, %v90_v20, %v93_v30  ;;  %v6540_v42 = vpop.eup %6539  ;;  %v78_v30 = vmin.f32 %v76_v14, 1.0 }
  0x4e   :  { %v102_v37 = vsel %vm101_vm3, %v91_v21, %v100_v32  ;;  %v98_v38 = vsel %vm96_vm4, %v97_v31, %v95_v36  ;;  %v6542_v43 = vpop.eup %6541 }
  0x4f   :  { %v105_v41 = vsel %vm103_vm5, %v104_v33, %v102_v37  ;;  %v122_v44 = vmul.f32 %v6540_v42, %v98_v38 }
  0x50   :  { %v123_v45 = vmul.f32 %v6542_v43, %v105_v41 }
  0x51   :  { %v124_v48 = vsel %vm116_vm0, %v122_v44, 0.0 }
  0x52   :  { %v125_v49 = vsel %vm117_vm1, %v123_v45, 0.0  ;;  %v126_v50 = vmul.f32 %v124_v48, %v60_v0  ;;  %v128_v51 = vmul.f32 %v124_v48, %v62_v2  ;;  %v130_v52 = vmul.f32 %v124_v48, %v64_v4 }
  0x53   :  { %v127_v53 = vmul.f32 %v125_v49, %v61_v1  ;;  %v129_v54 = vmul.f32 %v125_v49, %v63_v3  ;;  %v131_v55 = vmul.f32 %v125_v49, %v65_v5  ;;  %v6721_v0 = vshrl.u32 %v132_v56, 7 }
  0x54   :  { %v135_v57 = vadd.f32 1.0, %v126_v50  ;;  %v703_v60 = vadd.f32 1.0, %v128_v51  ;;  %v1271_v61 = vadd.f32 1.0, %v130_v52  ;;  %v157_v5 = vunpack.c.0.s8 %v156_v59 }
  0x55   :  { %v136_v63 = vadd.f32 1.0, %v127_v53  ;;  %v704_v6 = vadd.f32 1.0, %v129_v54  ;;  %v1272_v7 = vadd.f32 1.0, %v131_v55  ;;  %13040 = vst [vmem:[#allocation13_spill] sm:$0xff] %v6721_v0  ;;  %v6724_v22 = vcvt.s32.f32 %v6721_v0 }
  0x56   :  { %v137_v9 = vmul.f32 1.5, %v135_v57  ;;  %v705_v10 = vmul.f32 1.5, %v703_v60  ;;  %v1273_v11 = vmul.f32 1.5, %v1271_v61  ;;  %v6727_v27 = vsub.s32 0, %v6721_v0 }
  0x57   :  { %v138_v2 = vmul.f32 1.5, %v136_v63  ;;  %v706_v1 = vmul.f32 1.5, %v704_v6  ;;  %v1274_v3 = vmul.f32 1.5, %v1272_v7  ;;  %13041 = vst [vmem:[#allocation14_spill] sm:$0xff] %v6724_v22  ;;  %v6730_v41 = vsub.s32 1, %v6721_v0 }
  0x58   :  { %v139_v4 = vmax.f32 %v137_v9, 0.0  ;;  %v707_v12 = vmax.f32 %v705_v10, 0.0  ;;  %v1275_v13 = vmax.f32 %v1273_v11, 0.0  ;;  %13042 = vst [vmem:[#allocation15_spill] sm:$0xff] %v6727_v27  ;;  %v6733_v45 = vsub.s32 %v157_v5, %v6721_v0 }
  0x59   :  { %v140_v15 = vmax.f32 %v138_v2, 0.0  ;;  %v708_v16 = vmax.f32 %v706_v1, 0.0  ;;  %v1276_v17 = vmax.f32 %v1274_v3, 0.0  ;;  %13043 = vst [vmem:[#allocation16_spill] sm:$0xff] %v6730_v41  ;;  %v6737_v48 = vmul.f32 %v78_v30, %v68_v34 }
  0x5a   :  { %v141_v19 = vmin.f32 %v139_v4, 3.0  ;;  %v709_v20 = vmin.f32 %v707_v12, 3.0  ;;  %v1277_v21 = vmin.f32 %v1275_v13, 3.0  ;;  %13044 = vst [vmem:[#allocation17_spill] sm:$0xff] %v6733_v45  ;;  %v6741_v52 = vmul.f32 %v79_v35, %v69_v39 }
  0x5b   :  { %v142_v23 = vmin.f32 %v140_v15, 3.0  ;;  %v710_v24 = vmin.f32 %v708_v16, 3.0  ;;  %v1278_v25 = vmin.f32 %v1276_v17, 3.0  ;;  %13046 = vst [vmem:[#allocation19_spill] sm:$0xff] %v6737_v48 }
  0x5c   :  { %v143_v26 = vfloor.f32 %v141_v19  ;;  %v711_v28 = vfloor.f32 %v709_v20  ;;  %v1279_v29 = vfloor.f32 %v1277_v21  ;;  %13048 = vst [vmem:[#allocation21_spill] sm:$0xff] %v6741_v52 }
  0x5d   :  { %v144_v31 = vfloor.f32 %v142_v23  ;;  %v712_v32 = vfloor.f32 %v710_v24  ;;  %v1280_v33 = vfloor.f32 %v1278_v25 }
  0x5e   :  { %v145_v36 = vmax.f32 %v143_v26, 0.0  ;;  %v713_v37 = vmax.f32 %v711_v28, 0.0  ;;  %v1281_v38 = vmax.f32 %v1279_v29, 0.0 }
  0x5f   :  { %v146_v40 = vmax.f32 %v144_v31, 0.0  ;;  %v714_v42 = vmax.f32 %v712_v32, 0.0  ;;  %v1282_v43 = vmax.f32 %v1280_v33, 0.0 }
  0x60   :  { %v147_v44 = vmin.f32 %v145_v36, 2.0  ;;  %v715_v46 = vmin.f32 %v713_v37, 2.0  ;;  %v6735_v47 = vmin.f32 %v1281_v38, 2.0 }
  0x61   :  { %v148_v49 = vmin.f32 %v146_v40, 2.0  ;;  %v716_v50 = vmin.f32 %v714_v42, 2.0  ;;  %v6739_v51 = vmin.f32 %v1282_v43, 2.0 }
  0x62   :  { %13045 = vst [vmem:[#allocation18_spill] sm:$0xff] %v6735_v47  ;;  %v149_v53 = vsub.f32 %v141_v19, %v147_v44  ;;  %v6743_v54 = vsub.f32 %v709_v20, %v715_v46  ;;  %v6746_v55 = vsub.f32 %v1277_v21, %v6735_v47 }
  0x63   :  { %13047 = vst [vmem:[#allocation20_spill] sm:$0xff] %v6739_v51  ;;  %v150_v56 = vsub.f32 %v142_v23, %v148_v49  ;;  %v153_v57 = vcombine.low %v147_v44, %v148_v49  ;;  %v154_v58 = vcombine.high %v147_v44, %v148_v49  ;;  %v6748_v59 = vsub.f32 %v710_v24, %v716_v50 }
  0x64   :  { %13049 = vst [vmem:[#allocation22_spill] sm:$0xff] %v6746_v55  ;;  %v721_v60 = vcombine.low %v715_v46, %v716_v50  ;;  %v722_v61 = vcombine.high %v715_v46, %v716_v50  ;;  %v6751_v62 = vsub.f32 %v1278_v25, %v6739_v51 }
  0x65   :  { %v161_v6 = vrot.slane %v153_v57, %v6733_v45  ;;  %v168_v7 = vrot.slane %v154_v58, %v6733_v45  ;;  %v213_v8 = vcombine.low %v149_v53, %v150_v56  ;;  %v214_v9 = vcombine.high %v149_v53, %v150_v56 }
  0x66   :  { %13050 = vst [vmem:[#allocation23_spill] sm:$0xff] %v6751_v62  ;;  %v6758_v10 = vrot.slane %v721_v60, %v6733_v45  ;;  %v6761_v11 = vrot.slane %v722_v61, %v6733_v45 }
  0x67   :  { %v169_v3 = vcombine.high %v161_v6, %v161_v6  ;;  %v170_v4 = vcombine.high %v168_v7, %v168_v7  ;;  %v6768_v5 = vrot.slane %v161_v6, %v6733_v45  ;;  %v6771_v12 = vrot.slane %v168_v7, %v6733_v45 }
  0x68   :  { %v221_v13 = vrot.slane %v213_v8, %v6733_v45  ;;  %v228_v14 = vrot.slane %v214_v9, %v6733_v45 }
  0x69   :  { %13051 = vst [vmem:[#allocation24_spill] sm:$0xff] %v6768_v5  ;;  %13052 = vst [vmem:[#allocation25_spill] sm:$0xff] %v6771_v12  ;;  %v6780_v17 = vrot.slane %v169_v3, %v6733_v45  ;;  %v6783_v18 = vrot.slane %v170_v4, %v6733_v45  ;;  %v6787_v19 = vcombine.high %v6768_v5, %v6768_v5  ;;  %v6934_v46 = vadd.f32 1.0, %v6768_v5 }
  0x6a   :  { %v6791_v20 = vcombine.high %v6771_v12, %v6771_v12  ;;  %v229_v21 = vcombine.high %v221_v13, %v221_v13  ;;  %v230_v23 = vcombine.high %v228_v14, %v228_v14  ;;  %v6794_v24 = vrot.slane %v221_v13, %v6733_v45 }
  0x6b   :  { %13053 = vst [vmem:[#allocation26_spill] sm:$0xff] %v6780_v17  ;;  %13054 = vst [vmem:[#allocation27_spill] sm:$0xff] %v6783_v18  ;;  %v6797_v25 = vrot.slane %v228_v14, %v6733_v45  ;;  %v6801_v26 = vcombine.high %v6780_v17, %v6780_v17  ;;  %v6805_v28 = vcombine.high %v6783_v18, %v6783_v18  ;;  %v6937_v49 = vadd.f32 1.0, %v6780_v17 }
  0x6c   :  { %13055 = vst [vmem:[#allocation28_spill] sm:$0xff] %v6787_v19  ;;  %13056 = vst [vmem:[#allocation29_spill] sm:$0xff] %v6791_v20  ;;  %v278_v29 = vrot.slane %v6768_v5, %v6730_v41  ;;  %v286_v30 = vrot.slane %v6780_v17, %v6730_v41  ;;  %v6812_v31 = vrot.slane %v229_v21, %v6733_v45  ;;  %v12034_v60 = vsub.f32 1.0, %v6794_v24 }
  0x6d   :  { %13057 = vst [vmem:[#allocation30_spill] sm:$0xff] %v6794_v24  ;;  %13058 = vst [vmem:[#allocation31_spill] sm:$0xff] %v6797_v25  ;;  %v6815_v32 = vrot.slane %v230_v23, %v6733_v45  ;;  %v6819_v33 = vcombine.high %v6794_v24, %v6794_v24  ;;  %v6823_v34 = vcombine.high %v6797_v25, %v6797_v25  ;;  %v12030_v8 = vsub.f32 1.0, %v6797_v25 }
  0x6e   :  { %13059 = vst [vmem:[#allocation32_spill] sm:$0xff] %v6801_v26  ;;  %13060 = vst [vmem:[#allocation33_spill] sm:$0xff] %v6805_v28  ;;  %v294_v35 = vrot.slane %v6787_v19, %v6730_v41  ;;  %v302_v36 = vrot.slane %v6801_v26, %v6730_v41  ;;  %v310_v37 = vrot.slane %v6771_v12, %v6730_v41  ;;  %v12033_v61 = vsub.f32 1.0, %v6812_v31 }
  0x6f   :  { %13061 = vst [vmem:[#allocation34_spill] sm:$0xff] %v6812_v31  ;;  %13062 = vst [vmem:[#allocation35_spill] sm:$0xff] %v6815_v32  ;;  %v318_v38 = vrot.slane %v6783_v18, %v6730_v41  ;;  %v6835_v39 = vcombine.high %v6812_v31, %v6812_v31  ;;  %v6839_v40 = vcombine.high %v6815_v32, %v6815_v32  ;;  %v12032_v6 = vsub.f32 1.0, %v6819_v33 }
  0x70   :  { %13063 = vst [vmem:[#allocation36_spill] sm:$0xff] %v6819_v33  ;;  %13064 = vst [vmem:[#allocation37_spill] sm:$0xff] %v6823_v34  ;;  %v326_v42 = vrot.slane %v6791_v20, %v6730_v41  ;;  %v334_v43 = vrot.slane %v6805_v28, %v6730_v41  ;;  %vm6846_vm6 = vcmp.eq.f32.partialorder %v6724_v22, %v278_v29  ;;  %v12027_v9 = vsub.f32 1.0, %v6815_v32 }
  0x71   :  { %13065 = vst [vmem:[#allocation38_spill] sm:$0xff] %v6835_v39  ;;  %13066 = vst [vmem:[#allocation39_spill] sm:$0xff] %v6839_v40  ;;  %vm6851_vm7 = vcmp.eq.f32.partialorder %v6724_v22, %v286_v30  ;;  %vm6856_vm8 = vcmp.eq.f32.partialorder %v6724_v22, %v294_v35  ;;  %vm6861_vm9 = vcmp.eq.f32.partialorder %v6724_v22, %v302_v36  ;;  %v12031_v7 = vsub.f32 1.0, %v6835_v39 }
  0x72   :  { %vm6866_vm10 = vcmp.eq.f32.partialorder %v6724_v22, %v310_v37  ;;  %vm6871_vm11 = vcmp.eq.f32.partialorder %v6724_v22, %v318_v38  ;;  %vm6876_vm12 = vcmp.eq.f32.partialorder %v6724_v22, %v326_v42  ;;  %vm6881_vm13 = vcmp.eq.f32.partialorder %v6724_v22, %v334_v43  ;;  %13083 = vst [vmem:[#allocation40_spill] sm:$0xff] %v6934_v46 }
  0x73   :  { %v12028_v3 = vsub.f32 1.0, %v6823_v34  ;;  %v12029_v4 = vsub.f32 1.0, %v6839_v40  ;;  %v390_v13 = vrot.slane %v12034_v60, %v6730_v41  ;;  %v398_v14 = vrot.slane %v12033_v61, %v6730_v41  ;;  %13084 = vst [vmem:[#allocation41_spill] sm:$0xff] %v6937_v49 }
  0x74   :  { %v406_v21 = vrot.slane %v12032_v6, %v6730_v41  ;;  %v414_v23 = vrot.slane %v12031_v7, %v6730_v41  ;;  %v422_v29 = vrot.slane %v12030_v8, %v6730_v41  ;;  %v430_v30 = vrot.slane %v12027_v9, %v6730_v41 }
  0x75   :  { %v438_v35 = vrot.slane %v12028_v3, %v6730_v41  ;;  %v446_v36 = vrot.slane %v12029_v4, %v6730_v41  ;;  %v464_v37 = vsel %vm6846_vm6, %v390_v13, 0.0  ;;  %v466_v38 = vsel %vm6851_vm7, %v398_v14, 0.0 }
  0x76   :  { %v468_v42 = vsel %vm6856_vm8, %v406_v21, 0.0  ;;  %v470_v43 = vsel %vm6861_vm9, %v414_v23, 0.0  ;;  %v472_v9 = vsel %vm6866_vm10, %v422_v29, 0.0  ;;  %v474_v3 = vsel %vm6871_vm11, %v430_v30, 0.0 }
  0x77   :  { %v476_v4 = vsel %vm6876_vm12, %v438_v35, 0.0  ;;  %v478_v44 = vsel %vm6881_vm13, %v446_v36, 0.0  ;;  %v6940_v50 = vadd.f32 1.0, %v6787_v19  ;;  %v6943_v53 = vadd.f32 1.0, %v6801_v26 }
  0x78   :  { %v6946_v56 = vadd.f32 1.0, %v6771_v12  ;;  %v6949_v57 = vadd.f32 1.0, %v6783_v18  ;;  %v6952_v58 = vadd.f32 1.0, %v6791_v20  ;;  %v6955_v13 = vadd.f32 1.0, %v6805_v28 }
  0x79   :  { %13085 = vst [vmem:[#allocation42_spill] sm:$0xff] %v6940_v50  ;;  %13086 = vst [vmem:[#allocation43_spill] sm:$0xff] %v6943_v53  ;;  %v502_v14 = vrot.slane %v6934_v46, %v6730_v41  ;;  %v510_v21 = vrot.slane %v6937_v49, %v6730_v41  ;;  %v518_v23 = vrot.slane %v6940_v50, %v6730_v41 }
  0x7a   :  { %13087 = vst [vmem:[#allocation44_spill] sm:$0xff] %v6946_v56  ;;  %13088 = vst [vmem:[#allocation45_spill] sm:$0xff] %v6949_v57  ;;  %v526_v29 = vrot.slane %v6943_v53, %v6730_v41  ;;  %v534_v30 = vrot.slane %v6946_v56, %v6730_v41  ;;  %v542_v35 = vrot.slane %v6949_v57, %v6730_v41 }
  0x7b   :  { %13089 = vst [vmem:[#allocation46_spill] sm:$0xff] %v6952_v58  ;;  %13090 = vst [vmem:[#allocation47_spill] sm:$0xff] %v6955_v13  ;;  %v550_v36 = vrot.slane %v6952_v58, %v6730_v41  ;;  %v558_v8 = vrot.slane %v6955_v13, %v6730_v41  ;;  %vm6974_vm14 = vcmp.eq.f32.partialorder %v6724_v22, %v502_v14 }
  0x7c   :  { %vm6979_vm15 = vcmp.eq.f32.partialorder %v6724_v22, %v510_v21  ;;  %vm6984_vm0 = vcmp.eq.f32.partialorder %v6724_v22, %v518_v23  ;;  %vm6989_vm1 = vcmp.eq.f32.partialorder %v6724_v22, %v526_v29  ;;  %vm6994_vm2 = vcmp.eq.f32.partialorder %v6724_v22, %v534_v30 }
  0x7d   :  { %vm6999_vm3 = vcmp.eq.f32.partialorder %v6724_v22, %v542_v35  ;;  %vm7004_vm4 = vcmp.eq.f32.partialorder %v6724_v22, %v550_v36  ;;  %vm7009_vm5 = vcmp.eq.f32.partialorder %v6724_v22, %v558_v8  ;;  %v598_v30 = vrot.slane %v6794_v24, %v6730_v41 }
  0x7e   :  { %v606_v63 = vrot.slane %v6812_v31, %v6730_v41  ;;  %v614_v35 = vrot.slane %v6819_v33, %v6730_v41  ;;  %v622_v36 = vrot.slane %v6835_v39, %v6730_v41  ;;  %v630_v1 = vrot.slane %v6797_v25, %v6730_v41 }
  0x7f   :  { %v638_v8 = vrot.slane %v6815_v32, %v6730_v41  ;;  %v646_v2 = vrot.slane %v6823_v34, %v6730_v41  ;;  %v654_v16 = vrot.slane %v6839_v40, %v6730_v41  ;;  %v672_v15 = vsel %vm6974_vm14, %v598_v30, 0.0 }
  0x80   :  { %v674_v13 = vsel %vm6979_vm15, %v606_v63, 0.0  ;;  %v676_v58 = vsel %vm6984_vm0, %v614_v35, 0.0  ;;  %v678_v57 = vsel %vm6989_vm1, %v622_v36, 0.0  ;;  %v680_v56 = vsel %vm6994_vm2, %v630_v1, 0.0 }
  0x81   :  { %v682_v53 = vsel %vm6999_vm3, %v638_v8, 0.0  ;;  %v684_v50 = vsel %vm7004_vm4, %v646_v2, 0.0  ;;  %v686_v7 = vsel %vm7009_vm5, %v654_v16, 0.0  ;;  %v7045_v6 = vadd.f32 %v672_v15, %v464_v37 }
  0x82   :  { %v7047_v63 = vadd.f32 %v674_v13, %v466_v38  ;;  %v7049_v61 = vadd.f32 %v676_v58, %v468_v42  ;;  %v7051_v60 = vadd.f32 %v678_v57, %v470_v43  ;;  %v7053_v30 = vadd.f32 %v680_v56, %v472_v9 }
  0x83   :  { %13107 = vst [vmem:[#allocation48_spill] sm:$0xff] %v7045_v6  ;;  %v7055_v1 = vadd.f32 %v682_v53, %v474_v3  ;;  %v7057_v14 = vadd.f32 %v684_v50, %v476_v4  ;;  %v7059_v21 = vadd.f32 %v686_v7, %v478_v44  ;;  %v7063_v2 = vrot.slane %v6758_v10, %v6733_v45 }
  0x84   :  { %13108 = vst [vmem:[#allocation49_spill] sm:$0xff] %v7047_v63  ;;  %13109 = vst [vmem:[#allocation50_spill] sm:$0xff] %v7049_v61  ;;  %v7067_v15 = vrot.slane %v6761_v11, %v6733_v45  ;;  %v13115_v16 = vcombine.high %v6758_v10, %v6758_v10  ;;  %v13116_v3 = vcombine.high %v6761_v11, %v6761_v11  ;;  %v13121_v39 = vmov 0 }
  0x85   :  { %13110 = vst [vmem:[#allocation51_spill] sm:$0xff] %v7051_v60  ;;  %13111 = vst [vmem:[#allocation52_spill] sm:$0xff] %v7053_v30  ;;  %v13117_v37 = vcombine.low %v6743_v54, %v6748_v59  ;;  %v13118_v42 = vcombine.high %v6743_v54, %v6748_v59  ;;  %v13119_v44 = vcombine.low %v6735_v47, %v6739_v51  ;;  %v13123_v33 = vmov 0 }
  0x86   :  { %13112 = vst [vmem:[#allocation53_spill] sm:$0xff] %v7055_v1  ;;  %13113 = vst [vmem:[#allocation54_spill] sm:$0xff] %v7057_v14  ;;  %v7073_v9 = vrot.slane %v13115_v16, %v6733_v45  ;;  %v7079_v4 = vrot.slane %v13116_v3, %v6733_v45  ;;  %v7099_v50 = vcombine.high %v7063_v2, %v7063_v2  ;;  %v13125_v31 = vmov 0 }
  0x87   :  { %13114 = vst [vmem:[#allocation55_spill] sm:$0xff] %v7059_v21  ;;  %v789_v38 = vrot.slane %v13117_v37, %v6733_v45  ;;  %v796_v43 = vrot.slane %v13118_v42, %v6733_v45  ;;  %v7095_v11 = vrot.slane %v13119_v44, %v6733_v45  ;;  %v7103_v53 = vcombine.high %v7067_v15, %v7067_v15 }
  0x88   :  { %v7107_v54 = vcombine.high %v7073_v9, %v7073_v9  ;;  %v7111_v59 = vcombine.high %v7079_v4, %v7079_v4  ;;  %v842_v23 = vrot.slane %v7063_v2, %v6727_v27  ;;  %v846_v29 = vrot.slane %v7063_v2, %v6730_v41 }
  0x89   :  { %13120 = vst [vmem:[#allocation56_spill] sm:$0xff] %v7095_v11  ;;  %v797_v56 = vcombine.high %v789_v38, %v789_v38  ;;  %v798_v57 = vcombine.high %v796_v43, %v796_v43  ;;  %v7114_v58 = vrot.slane %v789_v38, %v6733_v45  ;;  %v7117_v13 = vrot.slane %v796_v43, %v6733_v45 }
  0x8a   :  { %v850_v35 = vrot.slane %v7073_v9, %v6727_v27  ;;  %v854_v36 = vrot.slane %v7073_v9, %v6730_v41  ;;  %v858_v37 = vrot.slane %v7099_v50, %v6727_v27  ;;  %v862_v38 = vrot.slane %v7099_v50, %v6730_v41 }
  0x8b   :  { %v7128_v8 = vrot.slane %v797_v56, %v6733_v45  ;;  %v7131_v7 = vrot.slane %v798_v57, %v6733_v45  ;;  %v7135_v16 = vcombine.high %v7114_v58, %v7114_v58  ;;  %v7139_v3 = vcombine.high %v7117_v13, %v7117_v13 }
  0x8c   :  { %v866_v42 = vrot.slane %v7107_v54, %v6727_v27  ;;  %v870_v43 = vrot.slane %v7107_v54, %v6730_v41  ;;  %v874_v57 = vrot.slane %v7067_v15, %v6727_v27  ;;  %v878_v10 = vrot.slane %v7067_v15, %v6730_v41 }
  0x8d   :  { %v7151_v44 = vcombine.high %v7128_v8, %v7128_v8  ;;  %v7155_v56 = vcombine.high %v7131_v7, %v7131_v7  ;;  %v882_v49 = vrot.slane %v7079_v4, %v6727_v27  ;;  %v886_v46 = vrot.slane %v7079_v4, %v6730_v41 }
  0x8e   :  { %v890_v40 = vrot.slane %v7103_v53, %v6727_v27  ;;  %v894_v34 = vrot.slane %v7103_v53, %v6730_v41  ;;  %v898_v32 = vrot.slane %v7111_v59, %v6727_v27  ;;  %v902_v25 = vrot.slane %v7111_v59, %v6730_v41 }
  0x8f   :  { %vm7174_vm6 = vcmp.eq.f32.partialorder %v6724_v22, %v842_v23  ;;  %vm7179_vm7 = vcmp.eq.f32.partialorder %v6724_v22, %v846_v29  ;;  %vm7184_vm8 = vcmp.eq.f32.partialorder %v6724_v22, %v850_v35  ;;  %vm7189_vm9 = vcmp.eq.f32.partialorder %v6724_v22, %v854_v36 }
  0x90   :  { %v13122_v39 = vsel %vm7174_vm6, 4294967295, %v13121_v39  ;;  %v13124_v33 = vsel %vm7179_vm7, 4294967295, %v13123_v33  ;;  %v13126_v31 = vsel %vm7184_vm8, 4294967295, %v13125_v31  ;;  %v13127_v24 = vmov 0 }
  0x91   :  { %v13128_v24 = vsel %vm7189_vm9, 4294967295, %v13127_v24  ;;  %vm7194_vm10 = vcmp.eq.f32.partialorder %v6724_v22, %v858_v37  ;;  %v13129_v23 = vmov 0  ;;  %vm7199_vm11 = vcmp.eq.f32.partialorder %v6724_v22, %v862_v38 }
  0x92   :  { %v13130_v23 = vsel %vm7194_vm10, 4294967295, %v13129_v23  ;;  %v13131_v29 = vmov 0  ;;  %vm7204_vm12 = vcmp.eq.f32.partialorder %v6724_v22, %v866_v42  ;;  %v13133_v35 = vmov 0 }
  0x93   :  { %v13132_v29 = vsel %vm7199_vm11, 4294967295, %v13131_v29  ;;  %v13134_v35 = vsel %vm7204_vm12, 4294967295, %v13133_v35  ;;  %vm7209_vm13 = vcmp.eq.f32.partialorder %v6724_v22, %v870_v43  ;;  %v13135_v36 = vmov 0 }
  0x94   :  { %v13136_v36 = vsel %vm7209_vm13, 4294967295, %v13135_v36  ;;  %vm7214_vm14 = vcmp.eq.f32.partialorder %v6724_v22, %v874_v57  ;;  %v13137_v37 = vmov 0  ;;  %vm7219_vm15 = vcmp.eq.f32.partialorder %v6724_v22, %v878_v10 }
  0x95   :  { %v13138_v37 = vsel %vm7214_vm14, 4294967295, %v13137_v37  ;;  %v13139_v38 = vmov 0  ;;  %vm7224_vm0 = vcmp.eq.f32.partialorder %v6724_v22, %v882_v49  ;;  %v13141_v42 = vmov 0 }
  0x96   :  { %v13140_v38 = vsel %vm7219_vm15, 4294967295, %v13139_v38  ;;  %v13142_v42 = vsel %vm7224_vm0, 4294967295, %v13141_v42  ;;  %vm7229_vm1 = vcmp.eq.f32.partialorder %v6724_v22, %v886_v46  ;;  %v13143_v43 = vmov 0 }
  0x97   :  { %v13144_v43 = vsel %vm7229_vm1, 4294967295, %v13143_v43  ;;  %vm7234_vm2 = vcmp.eq.f32.partialorder %v6724_v22, %v890_v40  ;;  %v13145_v57 = vmov 0  ;;  %vm7239_vm3 = vcmp.eq.f32.partialorder %v6724_v22, %v894_v34 }
  0x98   :  { %v13146_v57 = vsel %vm7234_vm2, 4294967295, %v13145_v57  ;;  %v13148_v10 = vmov 0  ;;  %vm7244_vm4 = vcmp.eq.f32.partialorder %v6724_v22, %v898_v32  ;;  %v13151_v49 = vmov 0 }
  0x99   :  { %13147 = vst [vmem:[#allocation57_spill] sm:$0xff] %v13146_v57  ;;  %v13149_v10 = vsel %vm7239_vm3, 4294967295, %v13148_v10  ;;  %v13152_v49 = vsel %vm7244_vm4, 4294967295, %v13151_v49  ;;  %vm7249_vm5 = vcmp.eq.f32.partialorder %v6724_v22, %v902_v25  ;;  %v13154_v46 = vmov 0 }
  0x9a   :  { %13150 = vst [vmem:[#allocation58_spill] sm:$0xff] %v13149_v10  ;;  %13153 = vst [vmem:[#allocation59_spill] sm:$0xff] %v13152_v49  ;;  %v13155_v46 = vsel %vm7249_vm5, 4294967295, %v13154_v46  ;;  %v935_v40 = vsub.f32 1.0, %v7114_v58  ;;  %v936_v28 = vsub.f32 1.0, %v7128_v8  ;;  %v937_v20 = vsub.f32 1.0, %v7135_v16 }
  0x9b   :  { %13156 = vst [vmem:[#allocation60_spill] sm:$0xff] %v13155_v46  ;;  %v938_v34 = vsub.f32 1.0, %v7151_v44  ;;  %v939_v18 = vsub.f32 1.0, %v7117_v13  ;;  %v940_v32 = vsub.f32 1.0, %v7131_v7  ;;  %v941_v12 = vsub.f32 1.0, %v7139_v3 }
  0x9c   :  { %v942_v26 = vsub.f32 1.0, %v7155_v56  ;;  %v7262_v25 = vrot.slane %v935_v40, %v6727_v27  ;;  %v7265_v19 = vrot.slane %v935_v40, %v6730_v41  ;;  %v7268_v17 = vrot.slane %v936_v28, %v6727_v27 }
  0x9d   :  { %v7271_v5 = vrot.slane %v936_v28, %v6730_v41  ;;  %v7274_v0 = vrot.slane %v937_v20, %v6727_v27  ;;  %v7277_v48 = vrot.slane %v937_v20, %v6730_v41  ;;  %v7280_v52 = vrot.slane %v938_v34, %v6727_v27 }
  0x9e   :  { %v7283_v21 = vrot.slane %v938_v34, %v6730_v41  ;;  %v7286_v40 = vrot.slane %v939_v18, %v6727_v27  ;;  %v7289_v14 = vrot.slane %v939_v18, %v6730_v41  ;;  %v7292_v28 = vrot.slane %v940_v32, %v6727_v27 }
  0x9f   :  { %v7295_v1 = vrot.slane %v940_v32, %v6730_v41  ;;  %v7298_v20 = vrot.slane %v941_v12, %v6727_v27  ;;  %v7301_v30 = vrot.slane %v941_v12, %v6730_v41  ;;  %v7304_v34 = vrot.slane %v942_v26, %v6727_v27 }
  0xa0   :  { %v7307_v60 = vrot.slane %v942_v26, %v6730_v41  ;;  %v1047_v63 = vadd.f32 1.0, %v7063_v2  ;;  %v1048_v32 = vadd.f32 1.0, %v7073_v9  ;;  %v1049_v6 = vadd.f32 1.0, %v7099_v50 }
  0xa1   :  { %13157 = vst [vmem:[#allocation61_spill] sm:$0xff] %v7298_v20  ;;  %13158 = vst [vmem:[#allocation62_spill] sm:$0xff] %v7301_v30  ;;  %v1050_v61 = vadd.f32 1.0, %v7107_v54  ;;  %v1051_v55 = vadd.f32 1.0, %v7067_v15  ;;  %v1052_v12 = vadd.f32 1.0, %v7079_v4  ;;  %v1053_v62 = vadd.f32 1.0, %v7103_v53 }
  0xa2   :  { %13159 = vst [vmem:[#allocation63_spill] sm:$0xff] %v7304_v34  ;;  %13160 = vst [vmem:[#allocation64_spill] sm:$0xff] %v7307_v60  ;;  %v1054_v26 = vadd.f32 1.0, %v7111_v59  ;;  %v1066_v11 = vrot.slane %v1047_v63, %v6727_v27  ;;  %v1070_v18 = vrot.slane %v1047_v63, %v6730_v41  ;;  %v1074_v2 = vrot.slane %v1048_v32, %v6727_v27 }
  0xa3   :  { %v1078_v9 = vrot.slane %v1048_v32, %v6730_v41  ;;  %v1082_v50 = vrot.slane %v1049_v6, %v6727_v27  ;;  %v1086_v54 = vrot.slane %v1049_v6, %v6730_v41  ;;  %v1090_v15 = vrot.slane %v1050_v61, %v6727_v27 }
  0xa4   :  { %v1094_v4 = vrot.slane %v1050_v61, %v6730_v41  ;;  %v1098_v53 = vrot.slane %v1051_v55, %v6727_v27  ;;  %v1102_v59 = vrot.slane %v1051_v55, %v6730_v41  ;;  %v1106_v51 = vrot.slane %v1052_v12, %v6727_v27 }
  0xa5   :  { %v1110_v63 = vrot.slane %v1052_v12, %v6730_v41  ;;  %v1114_v47 = vrot.slane %v1053_v62, %v6727_v27  ;;  %v1118_v32 = vrot.slane %v1053_v62, %v6730_v41  ;;  %v1122_v45 = vrot.slane %v1054_v26, %v6727_v27 }
  0xa6   :  { %v1126_v6 = vrot.slane %v1054_v26, %v6730_v41  ;;  %vm7382_vm5 = vcmp.eq.f32.partialorder %v6724_v22, %v1066_v11  ;;  %vm7387_vm4 = vcmp.eq.f32.partialorder %v6724_v22, %v1070_v18  ;;  %vm7392_vm3 = vcmp.eq.f32.partialorder %v6724_v22, %v1074_v2 }
  0xa7   :  { %vm7397_vm2 = vcmp.eq.f32.partialorder %v6724_v22, %v1078_v9  ;;  %vm7402_vm1 = vcmp.eq.f32.partialorder %v6724_v22, %v1082_v50  ;;  %vm7407_vm0 = vcmp.eq.f32.partialorder %v6724_v22, %v1086_v54  ;;  %vm7412_vm15 = vcmp.eq.f32.partialorder %v6724_v22, %v1090_v15 }
  0xa8   :  { %vm7417_vm14 = vcmp.eq.f32.partialorder %v6724_v22, %v1094_v4  ;;  %vm7422_vm13 = vcmp.eq.f32.partialorder %v6724_v22, %v1098_v53  ;;  %vm7427_vm12 = vcmp.eq.f32.partialorder %v6724_v22, %v1102_v59  ;;  %vm7432_vm11 = vcmp.eq.f32.partialorder %v6724_v22, %v1106_v51 }
  0xa9   :  { %vm7437_vm10 = vcmp.eq.f32.partialorder %v6724_v22, %v1110_v63  ;;  %vm7442_vm9 = vcmp.eq.f32.partialorder %v6724_v22, %v1114_v47  ;;  %vm7447_vm8 = vcmp.eq.f32.partialorder %v6724_v22, %v1118_v32  ;;  %vm7452_vm7 = vcmp.eq.f32.partialorder %v6724_v22, %v1122_v45  ;;  %v13227_v54 = vld [vmem:[#allocation63_spill] sm:$0xff]  ;;  %v13231_v4 = vld [vmem:[#allocation64_spill] sm:$0xff] }
  0xaa   :  { %vm7457_vm6 = vcmp.eq.f32.partialorder %v6724_v22, %v1126_v6  ;;  %v1162_v47 = vrot.slane %v7114_v58, %v6727_v27  ;;  %v1166_v59 = vrot.slane %v7114_v58, %v6730_v41  ;;  %v1170_v63 = vrot.slane %v7128_v8, %v6727_v27 }
  0xab   :  { %v1174_v45 = vrot.slane %v7128_v8, %v6730_v41  ;;  %v1178_v32 = vrot.slane %v7135_v16, %v6727_v27  ;;  %v1182_v6 = vrot.slane %v7135_v16, %v6730_v41  ;;  %v1186_v22 = vrot.slane %v7151_v44, %v6727_v27 }
  0xac   :  { %v1190_v46 = vrot.slane %v7151_v44, %v6730_v41  ;;  %v1194_v58 = vrot.slane %v7117_v13, %v6727_v27  ;;  %v1198_v34 = vrot.slane %v7117_v13, %v6730_v41  ;;  %v1202_v8 = vrot.slane %v7131_v7, %v6727_v27 }
  0xad   :  { %v1206_v49 = vrot.slane %v7131_v7, %v6730_v41  ;;  %v1210_v16 = vrot.slane %v7139_v3, %v6727_v27  ;;  %v1214_v30 = vrot.slane %v7139_v3, %v6730_v41  ;;  %v1218_v44 = vrot.slane %v7155_v56, %v6727_v27 }
  0xae   :  { %v1222_v10 = vrot.slane %v7155_v56, %v6730_v41  ;;  %v1239_v13 = vsel %vm7382_vm5, %v1162_v47, 0.0  ;;  %v1240_v20 = vsel %vm7387_vm4, %v1166_v59, 0.0  ;;  %v1241_v7 = vsel %vm7392_vm3, %v1170_v63, 0.0  ;;  %v13233_v47 = vld [vmem:[#allocation17_spill] sm:$0xff]  ;;  %v13234_v59 = vld [vmem:[#allocation18_spill] sm:$0xff]  ;;  %v13235_v63 = vld [vmem:[#allocation20_spill] sm:$0xff] }
  0xaf   :  { %v1242_v57 = vsel %vm7397_vm2, %v1174_v45, 0.0  ;;  %v1243_v3 = vsel %vm7402_vm1, %v1178_v32, 0.0  ;;  %v1244_v27 = vsel %vm7407_vm0, %v1182_v6, 0.0  ;;  %v1245_v56 = vsel %vm7412_vm15, %v1186_v22, 0.0  ;;  %v13237_v6 = vld [vmem:[#allocation56_spill] sm:$0xff] }
  0xb0   :  { %v1246_v60 = vsel %vm7417_vm14, %v1190_v46, 0.0  ;;  %v1247_v55 = vsel %vm7422_vm13, %v1194_v58, 0.0  ;;  %v1248_v61 = vsel %vm7427_vm12, %v1198_v34, 0.0  ;;  %v1249_v62 = vsel %vm7432_vm11, %v1202_v8, 0.0 }
  0xb1   :  { %v1250_v11 = vsel %vm7437_vm10, %v1206_v49, 0.0  ;;  %v1251_v18 = vsel %vm7442_vm9, %v1210_v16, 0.0  ;;  %v1252_v22 = vsel %vm7447_vm8, %v1214_v30, 0.0  ;;  %v1253_v46 = vsel %vm7452_vm7, %v1218_v44, 0.0  ;;  %v13238_v16 = vld [vmem:[#allocation23_spill] sm:$0xff]  ;;  %v13239_v44 = vld [vmem:[#allocation22_spill] sm:$0xff] }
  0xb2   :  { %v1254_v12 = vsel %vm7457_vm6, %v1222_v10, 0.0  ;;  %vm13193_vm12 = vnez %v13122_v39  ;;  %vm13195_vm10 = vnez %v13124_v33  ;;  %vm13197_vm8 = vnez %v13126_v31 }
  0xb3   :  { %v13194_v34 = vsel %vm13193_vm12, %v7262_v25, 0.0  ;;  %v13196_v49 = vsel %vm13195_vm10, %v7265_v19, 0.0  ;;  %v13198_v30 = vsel %vm13197_vm8, %v7268_v17, 0.0  ;;  %vm13199_vm6 = vnez %v13128_v24 }
  0xb4   :  { %v7529_v26 = vadd.f32 %v1239_v13, %v13194_v34  ;;  %v7535_v2 = vadd.f32 %v1240_v20, %v13196_v49  ;;  %v7541_v9 = vadd.f32 %v1241_v7, %v13198_v30  ;;  %v13200_v39 = vsel %vm13199_vm6, %v7271_v5, 0.0  ;;  %v13223_v20 = vld [vmem:[#allocation62_spill] sm:$0xff] }
  0xb5   :  { %v7547_v10 = vadd.f32 %v1242_v57, %v13200_v39  ;;  %vm13201_vm7 = vnez %v13130_v23  ;;  %vm13203_vm9 = vnez %v13132_v29  ;;  %vm13205_vm11 = vnez %v13134_v35  ;;  %v13219_v57 = vld [vmem:[#allocation61_spill] sm:$0xff] }
  0xb6   :  { %v13202_v33 = vsel %vm13201_vm7, %v7274_v0, 0.0  ;;  %v13204_v19 = vsel %vm13203_vm9, %v7277_v48, 0.0  ;;  %v13206_v17 = vsel %vm13205_vm11, %v7280_v52, 0.0  ;;  %vm13207_vm13 = vnez %v13136_v36 }
  0xb7   :  { %v7553_v25 = vadd.f32 %v1243_v3, %v13202_v33  ;;  %v7559_v31 = vadd.f32 %v1244_v27, %v13204_v19  ;;  %v7565_v24 = vadd.f32 %v1245_v56, %v13206_v17  ;;  %v13208_v5 = vsel %vm13207_vm13, %v7283_v21, 0.0 }
  0xb8   :  { %v7571_v23 = vadd.f32 %v1246_v60, %v13208_v5  ;;  %vm13209_vm14 = vnez %v13138_v37  ;;  %vm13211_vm15 = vnez %v13140_v38  ;;  %vm13213_vm0 = vnez %v13142_v42  ;;  %v13217_v37 = vld [vmem:[#allocation57_spill] sm:$0xff] }
  0xb9   :  { %v13210_v0 = vsel %vm13209_vm14, %v7286_v40, 0.0  ;;  %v13212_v27 = vsel %vm13211_vm15, %v7289_v14, 0.0  ;;  %v13214_v52 = vsel %vm13213_vm0, %v7292_v28, 0.0  ;;  %vm13215_vm1 = vnez %v13144_v43  ;;  %v13221_v14 = vld [vmem:[#allocation58_spill] sm:$0xff]  ;;  %v13225_v28 = vld [vmem:[#allocation59_spill] sm:$0xff] }
  0xba   :  { %v7577_v29 = vadd.f32 %v1247_v55, %v13210_v0  ;;  %v7583_v48 = vadd.f32 %v1248_v61, %v13212_v27  ;;  %v7589_v35 = vadd.f32 %v1249_v62, %v13214_v52  ;;  %v13216_v21 = vsel %vm13215_vm1, %v7295_v1, 0.0  ;;  %v13229_v1 = vld [vmem:[#allocation60_spill] sm:$0xff] }
  0xbb   :  { %v7595_v36 = vadd.f32 %v1250_v11, %v13216_v21  ;;  %vm13218_vm2 = vnez %v13217_v37  ;;  %vm13222_vm3 = vnez %v13221_v14  ;;  %vm13226_vm4 = vnez %v13225_v28 }
  0xbc   :  { %v13220_v38 = vsel %vm13218_vm2, %v13219_v57, 0.0  ;;  %v13224_v42 = vsel %vm13222_vm3, %v13223_v20, 0.0  ;;  %v13228_v43 = vsel %vm13226_vm4, %v13227_v54, 0.0  ;;  %vm13230_vm5 = vnez %v13229_v1 }
  0xbd   :  { %v7601_v40 = vadd.f32 %v1251_v18, %v13220_v38  ;;  %v7607_v50 = vadd.f32 %v1252_v22, %v13224_v42  ;;  %v7613_v15 = vadd.f32 %v1253_v46, %v13228_v43  ;;  %v13232_v51 = vsel %vm13230_vm5, %v13231_v4, 0.0  ;;  %v13243_v42 = vld [vmem:[#allocation14_spill] sm:$0xff] }
  0xbe   :  { %v7619_v53 = vadd.f32 %v1254_v12, %v13232_v51  ;;  %v13236_v45 = vcombine.high %v13234_v59, %v13235_v63  ;;  %v1305_v58 = vcombine.high %v13237_v6, %v13237_v6  ;;  %v7629_v8 = vrot.slane %v13237_v6, %v13233_v47 }
  0xbf   :  { %v1349_v13 = vcombine.low %v13239_v44, %v13238_v16  ;;  %v1350_v7 = vcombine.high %v13239_v44, %v13238_v16 }
  0xc0   :  { %v1304_v32 = vrot.slane %v13236_v45, %v13233_v47  ;;  %v7641_v55 = vrot.slane %v1305_v58, %v13233_v47  ;;  %v7647_v62 = vcombine.high %v7629_v8, %v7629_v8  ;;  %v1414_v22 = vrot.slane %v7629_v8, %v6730_v41 }
  0xc1   :  { %v1357_v11 = vrot.slane %v1349_v13, %v13233_v47  ;;  %v1364_v18 = vrot.slane %v1350_v7, %v13233_v47  ;;  %v7799_v1 = vadd.f32 1.0, %v7629_v8 }
  0xc2   :  { %v1306_v56 = vcombine.high %v1304_v32, %v1304_v32  ;;  %v7638_v60 = vrot.slane %v1304_v32, %v13233_v47  ;;  %v7662_v34 = vcombine.high %v7641_v55, %v7641_v55  ;;  %v1422_v49 = vrot.slane %v7641_v55, %v6730_v41 }
  0xc3   :  { %v1365_v30 = vcombine.high %v1357_v11, %v1357_v11  ;;  %v1366_v39 = vcombine.high %v1364_v18, %v1364_v18  ;;  %v7667_v33 = vrot.slane %v1357_v11, %v13233_v47  ;;  %v7670_v19 = vrot.slane %v1364_v18, %v13233_v47  ;;  %13262 = vst [vmem:[#allocation63_spill] sm:$0xff] %v7799_v1 }
  0xc4   :  { %v7654_v46 = vrot.slane %v1306_v56, %v13233_v47  ;;  %v7658_v12 = vcombine.high %v7638_v60, %v7638_v60  ;;  %v1430_v5 = vrot.slane %v7647_v62, %v6730_v41  ;;  %v1438_v0 = vrot.slane %v7662_v34, %v6730_v41 }
  0xc5   :  { %13240 = vst [vmem:[#allocation57_spill] sm:$0xff] %v7670_v19  ;;  %v1446_v27 = vrot.slane %v7638_v60, %v6730_v41  ;;  %v7683_v52 = vrot.slane %v1365_v30, %v13233_v47  ;;  %v7686_v21 = vrot.slane %v1366_v39, %v13233_v47  ;;  %v7690_v37 = vcombine.high %v7667_v33, %v7667_v33 }
  0xc6   :  { %v7674_v17 = vcombine.high %v7654_v46, %v7654_v46  ;;  %v7694_v57 = vcombine.high %v7670_v19, %v7670_v19  ;;  %v1454_v38 = vrot.slane %v7654_v46, %v6730_v41  ;;  %v1462_v14 = vrot.slane %v7658_v12, %v6730_v41 }
  0xc7   :  { %13241 = vst [vmem:[#allocation61_spill] sm:$0xff] %v7686_v21  ;;  %vm7703_vm12 = vcmp.eq.f32.partialorder %v13243_v42, %v1414_v22  ;;  %v7709_v54 = vcombine.high %v7683_v52, %v7683_v52  ;;  %v7713_v43 = vcombine.high %v7686_v21, %v7686_v21  ;;  %vm7716_vm10 = vcmp.eq.f32.partialorder %v13243_v42, %v1422_v49 }
  0xc8   :  { %13242 = vst [vmem:[#allocation58_spill] sm:$0xff] %v7694_v57  ;;  %v1470_v20 = vrot.slane %v7674_v17, %v6730_v41  ;;  %vm7721_vm8 = vcmp.eq.f32.partialorder %v13243_v42, %v1430_v5  ;;  %vm7726_vm6 = vcmp.eq.f32.partialorder %v13243_v42, %v1438_v0  ;;  %vm7731_vm7 = vcmp.eq.f32.partialorder %v13243_v42, %v1446_v27 }
  0xc9   :  { %13246 = vst [vmem:[#allocation62_spill] sm:$0xff] %v7709_v54  ;;  %13247 = vst [vmem:[#allocation59_spill] sm:$0xff] %v7713_v43  ;;  %vm7736_vm9 = vcmp.eq.f32.partialorder %v13243_v42, %v1454_v38  ;;  %vm7741_vm11 = vcmp.eq.f32.partialorder %v13243_v42, %v1462_v14  ;;  %v12127_v6 = vsub.f32 1.0, %v7667_v33  ;;  %v12126_v58 = vsub.f32 1.0, %v7683_v52 }
  0xca   :  { %vm7746_vm13 = vcmp.eq.f32.partialorder %v13243_v42, %v1470_v20  ;;  %v12125_v16 = vsub.f32 1.0, %v7690_v37  ;;  %v12124_v44 = vsub.f32 1.0, %v7709_v54  ;;  %v12121_v13 = vsub.f32 1.0, %v7670_v19 }
  0xcb   :  { %v12120_v7 = vsub.f32 1.0, %v7686_v21  ;;  %v12122_v56 = vsub.f32 1.0, %v7694_v57  ;;  %v12123_v11 = vsub.f32 1.0, %v7713_v43  ;;  %v1526_v18 = vrot.slane %v12127_v6, %v6730_v41 }
  0xcc   :  { %v1534_v22 = vrot.slane %v12126_v58, %v6730_v41  ;;  %v1542_v49 = vrot.slane %v12125_v16, %v6730_v41  ;;  %v1550_v30 = vrot.slane %v12124_v44, %v6730_v41  ;;  %v1558_v39 = vrot.slane %v12121_v13, %v6730_v41 }
  0xcd   :  { %v1566_v5 = vrot.slane %v12120_v7, %v6730_v41  ;;  %v1574_v0 = vrot.slane %v12122_v56, %v6730_v41  ;;  %v1582_v27 = vrot.slane %v12123_v11, %v6730_v41  ;;  %v1600_v38 = vsel %vm7703_vm12, %v1526_v18, 0.0 }
  0xce   :  { %v1602_v14 = vsel %vm7716_vm10, %v1534_v22, 0.0  ;;  %v1604_v20 = vsel %vm7721_vm8, %v1542_v49, 0.0  ;;  %v1606_v7 = vsel %vm7726_vm6, %v1550_v30, 0.0  ;;  %v1608_v13 = vsel %vm7731_vm7, %v1558_v39, 0.0 }
  0xcf   :  { %v1610_v56 = vsel %vm7736_vm9, %v1566_v5, 0.0  ;;  %v1612_v11 = vsel %vm7741_vm11, %v1574_v0, 0.0  ;;  %v1614_v28 = vsel %vm7746_vm13, %v1582_v27, 0.0  ;;  %v7802_v4 = vadd.f32 1.0, %v7641_v55 }
  0xd0   :  { %v7805_v51 = vadd.f32 1.0, %v7647_v62  ;;  %v7808_v59 = vadd.f32 1.0, %v7662_v34  ;;  %v7811_v63 = vadd.f32 1.0, %v7638_v60  ;;  %v7814_v45 = vadd.f32 1.0, %v7654_v46 }
  0xd1   :  { %13263 = vst [vmem:[#allocation60_spill] sm:$0xff] %v7802_v4  ;;  %v7817_v32 = vadd.f32 1.0, %v7658_v12  ;;  %v7820_v18 = vadd.f32 1.0, %v7674_v17  ;;  %v1638_v22 = vrot.slane %v7799_v1, %v6730_v41  ;;  %v1646_v49 = vrot.slane %v7802_v4, %v6730_v41 }
  0xd2   :  { %13264 = vst [vmem:[#allocation64_spill] sm:$0xff] %v7805_v51  ;;  %13265 = vst [vmem:[#allocation17_spill] sm:$0xff] %v7808_v59  ;;  %v1654_v30 = vrot.slane %v7805_v51, %v6730_v41  ;;  %v1662_v39 = vrot.slane %v7808_v59, %v6730_v41  ;;  %v1670_v5 = vrot.slane %v7811_v63, %v6730_v41 }
  0xd3   :  { %13266 = vst [vmem:[#allocation18_spill] sm:$0xff] %v7811_v63  ;;  %13267 = vst [vmem:[#allocation20_spill] sm:$0xff] %v7814_v45  ;;  %v1678_v0 = vrot.slane %v7814_v45, %v6730_v41  ;;  %v1686_v27 = vrot.slane %v7817_v32, %v6730_v41  ;;  %v1694_v44 = vrot.slane %v7820_v18, %v6730_v41 }
  0xd4   :  { %13268 = vst [vmem:[#allocation56_spill] sm:$0xff] %v7817_v32  ;;  %13269 = vst [vmem:[#allocation23_spill] sm:$0xff] %v7820_v18  ;;  %vm7839_vm14 = vcmp.eq.f32.partialorder %v13243_v42, %v1638_v22  ;;  %vm7844_vm15 = vcmp.eq.f32.partialorder %v13243_v42, %v1646_v49  ;;  %vm7849_vm0 = vcmp.eq.f32.partialorder %v13243_v42, %v1654_v30 }
  0xd5   :  { %vm7854_vm1 = vcmp.eq.f32.partialorder %v13243_v42, %v1662_v39  ;;  %vm7859_vm2 = vcmp.eq.f32.partialorder %v13243_v42, %v1670_v5  ;;  %vm7864_vm3 = vcmp.eq.f32.partialorder %v13243_v42, %v1678_v0  ;;  %vm7869_vm4 = vcmp.eq.f32.partialorder %v13243_v42, %v1686_v27 }
  0xd6   :  { %vm7874_vm5 = vcmp.eq.f32.partialorder %v13243_v42, %v1694_v44  ;;  %v1734_v5 = vrot.slane %v7667_v33, %v6730_v41  ;;  %v1742_v3 = vrot.slane %v7683_v52, %v6730_v41  ;;  %v1750_v0 = vrot.slane %v7690_v37, %v6730_v41 }
  0xd7   :  { %v1758_v27 = vrot.slane %v7709_v54, %v6730_v41  ;;  %v1766_v18 = vrot.slane %v7670_v19, %v6730_v41  ;;  %v1774_v44 = vrot.slane %v7686_v21, %v6730_v41  ;;  %v1782_v32 = vrot.slane %v7694_v57, %v6730_v41 }
  0xd8   :  { %v1790_v45 = vrot.slane %v7713_v43, %v6730_v41  ;;  %v1808_v63 = vsel %vm7839_vm14, %v1734_v5, 0.0  ;;  %v1810_v59 = vsel %vm7844_vm15, %v1742_v3, 0.0  ;;  %v1812_v51 = vsel %vm7849_vm0, %v1750_v0, 0.0  ;;  %v13305_v0 = vld [vmem:[#allocation48_spill] sm:$0xff] }
  0xd9   :  { %v1814_v4 = vsel %vm7854_vm1, %v1758_v27, 0.0  ;;  %v1816_v1 = vsel %vm7859_vm2, %v1766_v18, 0.0  ;;  %v1818_v57 = vsel %vm7864_vm3, %v1774_v44, 0.0  ;;  %v1820_v43 = vsel %vm7869_vm4, %v1782_v32, 0.0 }
  0xda   :  { %v1822_v16 = vsel %vm7874_vm5, %v1790_v45, 0.0  ;;  %v7910_v58 = vadd.f32 %v1808_v63, %v1600_v38  ;;  %v7912_v3 = vadd.f32 %v1810_v59, %v1602_v14  ;;  %v7914_v6 = vadd.f32 %v1812_v51, %v1604_v20  ;;  %v13295_v63 = vld [vmem:[#allocation15_spill] sm:$0xff] }
  0xdb   :  { %v7916_v61 = vadd.f32 %v1814_v4, %v1606_v7  ;;  %v7918_v5 = vadd.f32 %v1816_v1, %v1608_v13  ;;  %v7920_v18 = vadd.f32 %v1818_v57, %v1610_v56  ;;  %v7922_v22 = vadd.f32 %v1820_v43, %v1612_v11 }
  0xdc   :  { %13286 = vst [vmem:[#allocation22_spill] sm:$0xff] %v7910_v58  ;;  %13287 = vst [vmem:[#allocation14_spill] sm:$0xff] %v7912_v3  ;;  %v7924_v49 = vadd.f32 %v1822_v16, %v1614_v28  ;;  %v13294_v45 = vcombine.low %v7529_v26, %v7535_v2  ;;  %v1933_v14 = vrot.slane %v7910_v58, %v13295_v63 }
  0xdd   :  { %13288 = vst [vmem:[#allocation65_spill] sm:$0xff] %v7914_v6  ;;  %13289 = vst [vmem:[#allocation66_spill] sm:$0xff] %v7916_v61  ;;  %v13296_v7 = vcombine.low %v7541_v9, %v7547_v10  ;;  %v2092_v57 = vrot.slane %v7912_v3, %v13295_v63  ;;  %v2160_v43 = vcombine.low %v7553_v25, %v7559_v31 }
  0xde   :  { %13290 = vst [vmem:[#allocation67_spill] sm:$0xff] %v7918_v5  ;;  %13291 = vst [vmem:[#allocation68_spill] sm:$0xff] %v7920_v18  ;;  %v1848_v38 = vrot.slane %v13294_v45, %v13233_v47  ;;  %v7942_v56 = vrot.slane %v7914_v6, %v13295_v63  ;;  %v2320_v26 = vcombine.low %v7565_v24, %v7571_v23 }
  0xdf   :  { %13292 = vst [vmem:[#allocation69_spill] sm:$0xff] %v7922_v22  ;;  %13293 = vst [vmem:[#allocation70_spill] sm:$0xff] %v7924_v49  ;;  %v2007_v13 = vrot.slane %v13296_v7, %v13233_v47  ;;  %v2167_v10 = vrot.slane %v2160_v43, %v13233_v47  ;;  %v7956_v25 = vrot.slane %v7916_v61, %v13295_v63 }
  0xe0   :  { %v1849_v2 = vcombine.high %v1848_v38, %v1848_v38  ;;  %v7947_v11 = vrot.slane %v1848_v38, %v13233_v47  ;;  %v2327_v28 = vrot.slane %v2320_v26, %v13233_v47  ;;  %v2480_v31 = vcombine.low %v7577_v29, %v7583_v48  ;;  %v13307_v38 = vld [vmem:[#allocation49_spill] sm:$0xff] }
  0xe1   :  { %v2008_v20 = vcombine.high %v2007_v13, %v2007_v13  ;;  %v7950_v9 = vrot.slane %v2007_v13, %v13233_v47  ;;  %v2168_v48 = vcombine.high %v2167_v10, %v2167_v10  ;;  %v7979_v59 = vrot.slane %v2167_v10, %v13233_v47 }
  0xe2   :  { %13297 = vst [vmem:[#allocation71_spill] sm:$0xff] %v7947_v11  ;;  %v7961_v24 = vrot.slane %v1849_v2, %v13233_v47  ;;  %v7965_v23 = vcombine.high %v7947_v11, %v7947_v11  ;;  %v1873_v1 = vrot.slane %v7947_v11, %v6730_v41 }
  0xe3   :  { %13298 = vst [vmem:[#allocation72_spill] sm:$0xff] %v7950_v9  ;;  %v7970_v4 = vrot.slane %v2008_v20, %v13233_v47  ;;  %v7974_v51 = vcombine.high %v7950_v9, %v7950_v9  ;;  %v2032_v29 = vrot.slane %v7950_v9, %v6730_v41  ;;  %13303 = vst [vmem:[#allocation77_spill] sm:$0xff] %v7979_v59  ;;  %v13376_v9 = vld [vmem:[#allocation24_spill] sm:$0xff] }
  0xe4   :  { %13299 = vst [vmem:[#allocation73_spill] sm:$0xff] %v7961_v24  ;;  %13300 = vst [vmem:[#allocation74_spill] sm:$0xff] %v7965_v23  ;;  %v7983_v32 = vcombine.high %v7961_v24, %v7961_v24  ;;  %v1881_v30 = vrot.slane %v7961_v24, %v6730_v41  ;;  %v1889_v39 = vrot.slane %v7965_v23, %v6730_v41 }
  0xe5   :  { %13301 = vst [vmem:[#allocation75_spill] sm:$0xff] %v7970_v4  ;;  %13302 = vst [vmem:[#allocation76_spill] sm:$0xff] %v7974_v51  ;;  %v1907_v27 = vmul.f32 %v1873_v1, %v13305_v0  ;;  %v7992_v44 = vcombine.high %v7970_v4, %v7970_v4  ;;  %v2040_v16 = vrot.slane %v7970_v4, %v6730_v41  ;;  %v13374_v4 = vld [vmem:[#allocation13_spill] sm:$0xff] }
  0xe6   :  { %13304 = vst [vmem:[#allocation78_spill] sm:$0xff] %v7983_v32  ;;  %v2048_v45 = vrot.slane %v7974_v51, %v6730_v41  ;;  %v2066_v7 = vmul.f32 %v2032_v29, %v13307_v38  ;;  %v1897_v13 = vrot.slane %v7983_v32, %v6730_v41  ;;  %v1909_v43 = vmul.f32 %v1881_v30, %v13305_v0 }
  0xe7   :  { %13306 = vst [vmem:[#allocation48_spill] sm:$0xff] %v7992_v44  ;;  %v1911_v26 = vmul.f32 %v1889_v39, %v13305_v0  ;;  %v8004_v2 = vrot.slane %v2168_v48, %v13233_v47  ;;  %v2056_v20 = vrot.slane %v7992_v44, %v6730_v41  ;;  %v2068_v10 = vmul.f32 %v2040_v16, %v13307_v38  ;;  %v13369_v44 = vld [vmem:[#allocation55_spill] sm:$0xff] }
  0xe8   :  { %v2070_v1 = vmul.f32 %v2048_v45, %v13307_v38  ;;  %v8012_v29 = vcombine.high %v7979_v59, %v7979_v59  ;;  %v1913_v61 = vmul.f32 %v1897_v13, %v13305_v0  ;;  %v8015_v6 = vcombine.low %v1907_v27, %v1909_v43  ;;  %v13315_v43 = vld [vmem:[#allocation50_spill] sm:$0xff] }
  0xe9   :  { %13308 = vst [vmem:[#allocation49_spill] sm:$0xff] %v8004_v2  ;;  %v8019_v30 = vcombine.high %v8004_v2, %v8004_v2  ;;  %v2192_v48 = vrot.slane %v7979_v59, %v6730_v41  ;;  %v2072_v39 = vmul.f32 %v2056_v20, %v13307_v38  ;;  %v8024_v16 = vcombine.low %v2066_v7, %v2068_v10 }
  0xea   :  { %13309 = vst [vmem:[#allocation79_spill] sm:$0xff] %v8012_v29  ;;  %13310 = vst [vmem:[#allocation80_spill] sm:$0xff] %v8015_v6  ;;  %v2200_v45 = vrot.slane %v8004_v2, %v6730_v41  ;;  %v2208_v3 = vrot.slane %v8012_v29, %v6730_v41  ;;  %v8030_v0 = vcombine.low %v1911_v26, %v1913_v61 }
  0xeb   :  { %13311 = vst [vmem:[#allocation81_spill] sm:$0xff] %v8019_v30  ;;  %13312 = vst [vmem:[#allocation82_spill] sm:$0xff] %v8024_v16  ;;  %v8033_v27 = vmul.f32 %v8015_v6, %v1933_v14  ;;  %v2216_v13 = vrot.slane %v8019_v30, %v6730_v41  ;;  %v2226_v58 = vmul.f32 %v2192_v48, %v13315_v43 }
  0xec   :  { %13313 = vst [vmem:[#allocation83_spill] sm:$0xff] %v8030_v0  ;;  %v8038_v59 = vcombine.low %v2070_v1, %v2072_v39  ;;  %v8041_v38 = vmul.f32 %v8024_v16, %v2092_v57  ;;  %v2228_v7 = vmul.f32 %v2200_v45, %v13315_v43  ;;  %v2230_v20 = vmul.f32 %v2208_v3, %v13315_v43 }
  0xed   :  { %13314 = vst [vmem:[#allocation84_spill] sm:$0xff] %v8033_v27  ;;  %v8046_v61 = vmul.f32 %v8030_v0, %v1933_v14  ;;  %v2232_v26 = vmul.f32 %v2216_v13, %v13315_v43  ;;  %v2328_v10 = vcombine.high %v2327_v28, %v2327_v28  ;;  %v8050_v6 = vrot.slane %v2327_v28, %v13233_v47 }
  0xee   :  { %13316 = vst [vmem:[#allocation50_spill] sm:$0xff] %v8038_v59  ;;  %13317 = vst [vmem:[#allocation85_spill] sm:$0xff] %v8041_v38  ;;  %v8053_v48 = vmul.f32 %v8038_v59, %v2092_v57  ;;  %v8055_v1 = vcombine.low %v2226_v58, %v2228_v7  ;;  %v2487_v39 = vrot.slane %v2480_v31, %v13233_v47 }
  0xef   :  { %13318 = vst [vmem:[#allocation86_spill] sm:$0xff] %v8046_v61  ;;  %13319 = vst [vmem:[#allocation87_spill] sm:$0xff] %v8050_v6  ;;  %v2572_v45 = vrot.slane %v7918_v5, %v13295_v63  ;;  %v8060_v3 = vcombine.low %v2230_v20, %v2232_v26  ;;  %v8063_v14 = vrot.slane %v2328_v10, %v13233_v47 }
  0xf0   :  { %13320 = vst [vmem:[#allocation88_spill] sm:$0xff] %v8053_v48  ;;  %13321 = vst [vmem:[#allocation89_spill] sm:$0xff] %v8055_v1  ;;  %v8067_v13 = vcombine.high %v8050_v6, %v8050_v6  ;;  %v2352_v57 = vrot.slane %v8050_v6, %v6730_v41  ;;  %v8073_v58 = vmul.f32 %v8055_v1, %v7942_v56  ;;  %v13329_v1 = vld [vmem:[#allocation51_spill] sm:$0xff] }
  0xf1   :  { %13322 = vst [vmem:[#allocation90_spill] sm:$0xff] %v8060_v3  ;;  %13323 = vst [vmem:[#allocation91_spill] sm:$0xff] %v8063_v14  ;;  %v2488_v28 = vcombine.high %v2487_v39, %v2487_v39  ;;  %v8076_v31 = vrot.slane %v2487_v39, %v13233_v47  ;;  %v2640_v43 = vcombine.low %v7589_v35, %v7595_v36 }
  0xf2   :  { %13324 = vst [vmem:[#allocation92_spill] sm:$0xff] %v8067_v13  ;;  %13325 = vst [vmem:[#allocation93_spill] sm:$0xff] %v8073_v58  ;;  %v8082_v7 = vmul.f32 %v8060_v3, %v7942_v56  ;;  %v8086_v20 = vcombine.high %v8063_v14, %v8063_v14  ;;  %v2360_v26 = vrot.slane %v8063_v14, %v6730_v41 }
  0xf3   :  { %13326 = vst [vmem:[#allocation94_spill] sm:$0xff] %v8076_v31  ;;  %v2368_v10 = vrot.slane %v8067_v13, %v6730_v41  ;;  %v2386_v39 = vmul.f32 %v2352_v57, %v13329_v1  ;;  %v8094_v5 = vrot.slane %v2488_v28, %v13233_v47  ;;  %v8098_v35 = vcombine.high %v8076_v31, %v8076_v31 }
  0xf4   :  { %13327 = vst [vmem:[#allocation95_spill] sm:$0xff] %v8082_v7  ;;  %13328 = vst [vmem:[#allocation96_spill] sm:$0xff] %v8086_v20  ;;  %v2512_v36 = vrot.slane %v8076_v31, %v6730_v41  ;;  %v2376_v56 = vrot.slane %v8086_v20, %v6730_v41  ;;  %v2388_v3 = vmul.f32 %v2360_v26, %v13329_v1  ;;  %v13333_v31 = vld [vmem:[#allocation52_spill] sm:$0xff] }
  0xf5   :  { %13330 = vst [vmem:[#allocation51_spill] sm:$0xff] %v8094_v5  ;;  %13331 = vst [vmem:[#allocation97_spill] sm:$0xff] %v8098_v35  ;;  %v2390_v59 = vmul.f32 %v2368_v10, %v13329_v1  ;;  %v2647_v16 = vrot.slane %v2640_v43, %v13233_v47  ;;  %v8109_v57 = vcombine.high %v8094_v5, %v8094_v5 }
  0xf6   :  { %v2520_v28 = vrot.slane %v8094_v5, %v6730_v41  ;;  %v2528_v0 = vrot.slane %v8098_v35, %v6730_v41  ;;  %v2546_v13 = vmul.f32 %v2512_v36, %v13333_v31  ;;  %v2392_v20 = vmul.f32 %v2376_v56, %v13329_v1 }
  0xf7   :  { %13332 = vst [vmem:[#allocation98_spill] sm:$0xff] %v8109_v57  ;;  %v8117_v14 = vcombine.low %v2386_v39, %v2388_v3  ;;  %v2648_v26 = vcombine.high %v2647_v16, %v2647_v16  ;;  %v8120_v10 = vrot.slane %v2647_v16, %v13233_v47  ;;  %v2536_v43 = vrot.slane %v8109_v57, %v6730_v41 }
  0xf8   :  { %v2548_v6 = vmul.f32 %v2520_v28, %v13333_v31  ;;  %v2550_v5 = vmul.f32 %v2528_v0, %v13333_v31  ;;  %v2732_v35 = vrot.slane %v7920_v18, %v13295_v63  ;;  %v8128_v30 = vcombine.low %v2390_v59, %v2392_v20  ;;  %v8183_v18 = vld [vmem:[#allocation6 + $0x8] sm:$0xff] }
  0xf9   :  { %13334 = vst [vmem:[#allocation52_spill] sm:$0xff] %v8117_v14  ;;  %13335 = vst [vmem:[#allocation99_spill] sm:$0xff] %v8120_v10  ;;  %v8132_v1 = vmul.f32 %v8117_v14, %v7956_v25  ;;  %v8135_v3 = vrot.slane %v2648_v26, %v13233_v47  ;;  %v8139_v16 = vcombine.high %v8120_v10, %v8120_v10  ;;  %v8167_v26 = vld [vmem:[#allocation6] sm:$0xff] }
  0xfa   :  { %13336 = vst [vmem:[#allocation100_spill] sm:$0xff] %v8128_v30  ;;  %v2552_v39 = vmul.f32 %v2536_v43, %v13333_v31  ;;  %v8142_v36 = vcombine.low %v2546_v13, %v2548_v6  ;;  %v2672_v0 = vrot.slane %v8120_v10, %v6730_v41  ;;  %v2800_v59 = vcombine.low %v7601_v40, %v7607_v50  ;;  %v13345_v40 = vld [vmem:[#allocation53_spill] sm:$0xff]  ;;  %v8235_v10 = vld [vmem:[#allocation6 + $0x38] sm:$0xff] }
  0xfb   :  { %13337 = vst [vmem:[#allocation101_spill] sm:$0xff] %v8132_v1  ;;  %13338 = vst [vmem:[#allocation102_spill] sm:$0xff] %v8135_v3  ;;  %v8150_v20 = vmul.f32 %v8128_v30, %v7956_v25  ;;  %v8154_v56 = vcombine.high %v8135_v3, %v8135_v3  ;;  %v2680_v28 = vrot.slane %v8135_v3, %v6730_v41  ;;  %v8233_v3 = vld [vmem:[#allocation6 + $0x30] sm:$0xff] }
  0xfc   :  { %13339 = vst [vmem:[#allocation103_spill] sm:$0xff] %v8139_v16  ;;  %13340 = vst [vmem:[#allocation104_spill] sm:$0xff] %v8142_v36  ;;  %v2688_v6 = vrot.slane %v8139_v16, %v6730_v41  ;;  %v8160_v13 = vcombine.low %v2550_v5, %v2552_v39  ;;  %v8163_v31 = vmul.f32 %v8142_v36, %v2572_v45 }
  0xfd   :  { %13341 = vst [vmem:[#allocation105_spill] sm:$0xff] %v8150_v20  ;;  %13342 = vst [vmem:[#allocation106_spill] sm:$0xff] %v8154_v56  ;;  %v2706_v50 = vmul.f32 %v2672_v0, %v13345_v40  ;;  %v2807_v25 = vrot.slane %v2800_v59, %v13233_v47  ;;  %v2696_v43 = vrot.slane %v8154_v56, %v6730_v41  ;;  %v8185_v56 = vld [vmem:[#allocation6 + $0x10] sm:$0xff] }
  0xfe   :  { %13343 = vst [vmem:[#allocation107_spill] sm:$0xff] %v8160_v13  ;;  %13344 = vst [vmem:[#allocation108_spill] sm:$0xff] %v8163_v31  ;;  %v2708_v30 = vmul.f32 %v2680_v28, %v13345_v40  ;;  %v2710_v14 = vmul.f32 %v2688_v6, %v13345_v40  ;;  %v2892_v5 = vrot.slane %v7922_v22, %v13295_v63 }
  0xff   :  { %13346 = vst [vmem:[#allocation53_spill] sm:$0xff] %v8167_v26  ;;  %v8176_v39 = vmul.f32 %v8160_v13, %v2572_v45  ;;  %v2808_v36 = vcombine.high %v2807_v25, %v2807_v25  ;;  %v8179_v0 = vrot.slane %v2807_v25, %v13233_v47  ;;  %v2960_v59 = vcombine.low %v7613_v15, %v7619_v53  ;;  %v8212_v45 = vld [vmem:[#allocation6 + $0x20] sm:$0xff] }
 0x100   :  { %13349 = vst [vmem:[#allocation111_spill] sm:$0xff] %v8183_v18  ;;  %13350 = vst [vmem:[#allocation112_spill] sm:$0xff] %v8185_v56  ;;  %v2712_v28 = vmul.f32 %v2696_v43, %v13345_v40  ;;  %v8188_v6 = vcombine.low %v2706_v50, %v2708_v30  ;;  %v8192_v22 = vrot.slane %v7924_v49, %v13295_v63  ;;  %v8205_v30 = vld [vmem:[#allocation6 + $0x18] sm:$0xff] }
 0x101   :  { %13347 = vst [vmem:[#allocation109_spill] sm:$0xff] %v8176_v39  ;;  %13348 = vst [vmem:[#allocation110_spill] sm:$0xff] %v8179_v0  ;;  %v8196_v25 = vrot.slane %v2808_v36, %v13233_v47  ;;  %v8200_v15 = vcombine.high %v8179_v0, %v8179_v0  ;;  %v2832_v53 = vrot.slane %v8179_v0, %v6730_v41 }
 0x102   :  { %13351 = vst [vmem:[#allocation113_spill] sm:$0xff] %v8188_v6  ;;  %v2967_v40 = vrot.slane %v2960_v59, %v13233_v47  ;;  %13354 = vst [vmem:[#allocation116_spill] sm:$0xff] %v8205_v30  ;;  %v8207_v50 = vcombine.low %v2710_v14, %v2712_v28  ;;  %v8210_v43 = vmul.f32 %v8188_v6, %v2732_v35  ;;  %v13359_v28 = vld [vmem:[#allocation54_spill] sm:$0xff] }
 0x103   :  { %13352 = vst [vmem:[#allocation114_spill] sm:$0xff] %v8196_v25  ;;  %13353 = vst [vmem:[#allocation115_spill] sm:$0xff] %v8200_v15  ;;  %v8218_v13 = vcombine.high %v8196_v25, %v8196_v25  ;;  %v2840_v59 = vrot.slane %v8196_v25, %v6730_v41  ;;  %v2848_v14 = vrot.slane %v8200_v15, %v6730_v41  ;;  %v8225_v6 = vld [vmem:[#allocation6 + $0x28] sm:$0xff] }
 0x104   :  { %13355 = vst [vmem:[#allocation117_spill] sm:$0xff] %v8207_v50  ;;  %13356 = vst [vmem:[#allocation118_spill] sm:$0xff] %v8210_v43  ;;  %v2866_v0 = vmul.f32 %v2832_v53, %v13359_v28  ;;  %v8228_v16 = vmul.f32 %v8207_v50, %v2732_v35  ;;  %v2968_v36 = vcombine.high %v2967_v40, %v2967_v40  ;;  %v3135_v35 = vunpack.c.h.bf16 %v8212_v45 }
 0x105   :  { %13357 = vst [vmem:[#allocation119_spill] sm:$0xff] %v8212_v45  ;;  %13358 = vst [vmem:[#allocation120_spill] sm:$0xff] %v8218_v13  ;;  %v8231_v49 = vrot.slane %v2967_v40, %v13233_v47  ;;  %v2856_v15 = vrot.slane %v8218_v13, %v6730_v41  ;;  %v2868_v53 = vmul.f32 %v2840_v59, %v13359_v28  ;;  %v3137_v25 = vunpack.c.h.bf16 %v8225_v6 }
 0x106   :  { %13360 = vst [vmem:[#allocation54_spill] sm:$0xff] %v8225_v6  ;;  %13361 = vst [vmem:[#allocation121_spill] sm:$0xff] %v8228_v16  ;;  %v2870_v57 = vmul.f32 %v2848_v14, %v13359_v28  ;;  %v8244_v50 = vrot.slane %v2968_v36, %v13233_v47  ;;  %v3139_v59 = vunpack.c.h.bf16 %v8233_v3  ;;  %v3141_v14 = vunpack.c.h.bf16 %v8235_v10 }
 0x107   :  { %13362 = vst [vmem:[#allocation122_spill] sm:$0xff] %v8231_v49  ;;  %13363 = vst [vmem:[#allocation123_spill] sm:$0xff] %v8233_v3  ;;  %v8248_v40 = vcombine.high %v8231_v49, %v8231_v49  ;;  %v2992_v29 = vrot.slane %v8231_v49, %v6730_v41  ;;  %v2872_v13 = vmul.f32 %v2856_v15, %v13359_v28  ;;  %v13372_v15 = vld [vmem:[#allocation21_spill] sm:$0xff]  ;;  %v13373_v28 = vld [vmem:[#allocation19_spill] sm:$0xff] }
 0x108   :  { %13364 = vst [vmem:[#allocation124_spill] sm:$0xff] %v8235_v10  ;;  %13365 = vst [vmem:[#allocation125_spill] sm:$0xff] %v8244_v50  ;;  %v8254_v2 = vcombine.low %v2866_v0, %v2868_v53  ;;  %v8260_v36 = vcombine.high %v8244_v50, %v8244_v50  ;;  %v3000_v45 = vrot.slane %v8244_v50, %v6730_v41 }
 0x109   :  { %13366 = vst [vmem:[#allocation126_spill] sm:$0xff] %v8248_v40  ;;  %v3008_v49 = vrot.slane %v8248_v40, %v6730_v41  ;;  %v3026_v6 = vmul.f32 %v2992_v29, %v13369_v44  ;;  %v8267_v51 = vcombine.low %v2870_v57, %v2872_v13  ;;  %v3144_v53 = vcombine.low %v13373_v28, %v13372_v15 }
 0x10a   :  { %13367 = vst [vmem:[#allocation127_spill] sm:$0xff] %v8254_v2  ;;  %13368 = vst [vmem:[#allocation128_spill] sm:$0xff] %v8260_v36  ;;  %v8270_v0 = vmul.f32 %v8254_v2, %v2892_v5  ;;  %v3145_v10 = vcombine.high %v13373_v28, %v13372_v15  ;;  %v3016_v3 = vrot.slane %v8260_v36, %v6730_v41  ;;  %v8281_v29 = vsub.s32 4, %v13374_v4  ;;  %v13379_v4 = vld [vmem:[#allocation28_spill] sm:$0xff] }
 0x10b   :  { %13370 = vst [vmem:[#allocation55_spill] sm:$0xff] %v8267_v51  ;;  %v3028_v50 = vmul.f32 %v3000_v45, %v13369_v44  ;;  %v3030_v40 = vmul.f32 %v3008_v49, %v13369_v44  ;;  %v8284_v57 = vmul.f32 %v8267_v51, %v2892_v5  ;;  %v3152_v13 = vrot.slane %v3144_v53, %v13233_v47  ;;  %v13378_v45 = vld [vmem:[#allocation26_spill] sm:$0xff] }
 0x10c   :  { %13371 = vst [vmem:[#allocation129_spill] sm:$0xff] %v8270_v0  ;;  %v3159_v2 = vrot.slane %v3145_v10, %v13233_v47  ;;  %v3032_v28 = vmul.f32 %v3016_v3, %v13369_v44  ;;  %v13384_v3 = vld [vmem:[#allocation32_spill] sm:$0xff] }
 0x10d   :  { %13375 = vst [vmem:[#allocation130_spill] sm:$0xff] %v8284_v57  ;;  %v8291_v36 = vcombine.low %v3026_v6, %v3028_v50  ;;  %v3160_v23 = vcombine.high %v3152_v13, %v3152_v13  ;;  %v8298_v51 = vrot.slane %v3152_v13, %v13233_v47  ;;  %v13385_v50 = vld [vmem:[#allocation25_spill] sm:$0xff] }
 0x10e   :  { %v3161_v5 = vcombine.high %v3159_v2, %v3159_v2  ;;  %v8301_v10 = vrot.slane %v3159_v2, %v13233_v47  ;;  %v8303_v53 = vcombine.low %v3030_v40, %v3032_v28 }
 0x10f   :  { %13377 = vst [vmem:[#allocation24_spill] sm:$0xff] %v8291_v36  ;;  %13380 = vst [vmem:[#allocation26_spill] sm:$0xff] %v8298_v51  ;;  %v8307_v44 = vmul.f32 %v8291_v36, %v8192_v22  ;;  %v8314_v49 = vrot.slane %v3160_v23, %v13233_v47  ;;  %v8321_v2 = vcombine.high %v8298_v51, %v8298_v51 }
 0x110   :  { %13381 = vst [vmem:[#allocation28_spill] sm:$0xff] %v8301_v10  ;;  %13382 = vst [vmem:[#allocation131_spill] sm:$0xff] %v8303_v53  ;;  %v8317_v13 = vrot.slane %v3161_v5, %v13233_v47  ;;  %v8325_v40 = vcombine.high %v8301_v10, %v8301_v10  ;;  %v8329_v28 = vmul.f32 %v8303_v53, %v8192_v22  ;;  %v13391_v47 = vld [vmem:[#allocation27_spill] sm:$0xff] }
 0x111   :  { %13383 = vst [vmem:[#allocation132_spill] sm:$0xff] %v8307_v44  ;;  %13386 = vst [vmem:[#allocation32_spill] sm:$0xff] %v8314_v49  ;;  %v3201_v32 = vrot.slane %v8298_v51, %v6730_v41  ;;  %v3233_v23 = vrot.slane %v8301_v10, %v6730_v41  ;;  %v8339_v6 = vcombine.high %v8314_v49, %v8314_v49  ;;  %v13394_v10 = vunpack.c.h.bf16 %v8167_v26 }
 0x112   :  { %13387 = vst [vmem:[#allocation25_spill] sm:$0xff] %v8317_v13  ;;  %13388 = vst [vmem:[#allocation133_spill] sm:$0xff] %v8321_v2  ;;  %v8343_v15 = vcombine.high %v8317_v13, %v8317_v13  ;;  %v3209_v22 = vrot.slane %v8314_v49, %v6730_v41  ;;  %v3217_v53 = vrot.slane %v8321_v2, %v6730_v41  ;;  %v13397_v2 = vunpack.c.h.bf16 %v8183_v18 }
 0x113   :  { %13389 = vst [vmem:[#allocation134_spill] sm:$0xff] %v8325_v40  ;;  %13390 = vst [vmem:[#allocation135_spill] sm:$0xff] %v8329_v28  ;;  %v3241_v36 = vrot.slane %v8317_v13, %v6730_v41  ;;  %v3249_v5 = vrot.slane %v8325_v40, %v6730_v41  ;;  %v8355_v51 = vmul.f32 %v3201_v32, %v13394_v10  ;;  %v13399_v13 = vunpack.c.h.bf16 %v8185_v56 }
 0x114   :  { %13392 = vst [vmem:[#allocation27_spill] sm:$0xff] %v8339_v6  ;;  %13393 = vst [vmem:[#allocation136_spill] sm:$0xff] %v8343_v15  ;;  %v8357_v24 = vmul.f32 %v3233_v23, %v3135_v35  ;;  %v3225_v11 = vrot.slane %v8339_v6, %v6730_v41  ;;  %v3257_v49 = vrot.slane %v8343_v15, %v6730_v41  ;;  %v13405_v23 = vunpack.c.h.bf16 %v8205_v30 }
 0x115   :  { %13395 = vst [vmem:[#allocation137_spill] sm:$0xff] %v8355_v51  ;;  %v8365_v21 = vmul.f32 %v3209_v22, %v13397_v2  ;;  %v8369_v19 = vmul.f32 %v3217_v53, %v13399_v13  ;;  %v8371_v40 = vmul.f32 %v3241_v36, %v3137_v25  ;;  %v8373_v32 = vmul.f32 %v3249_v5, %v3139_v59 }
 0x116   :  { %13396 = vst [vmem:[#allocation138_spill] sm:$0xff] %v8357_v24  ;;  %v8377_v35 = vrot.slane %v8355_v51, %v6730_v41  ;;  %v8381_v10 = vrot.slane %v8357_v24, %v6730_v41  ;;  %v8385_v2 = vmul.f32 %v3225_v11, %v13405_v23  ;;  %v8387_v22 = vmul.f32 %v3257_v49, %v3141_v14 }
 0x117   :  { %13398 = vst [vmem:[#allocation139_spill] sm:$0xff] %v8365_v21  ;;  %13400 = vst [vmem:[#allocation140_spill] sm:$0xff] %v8369_v19  ;;  %v8391_v25 = vrot.slane %v8365_v21, %v6730_v41  ;;  %v8395_v59 = vrot.slane %v8369_v19, %v6730_v41  ;;  %v8419_v15 = vrot.slane %v8371_v40, %v6730_v41 }
 0x118   :  { %13401 = vst [vmem:[#allocation141_spill] sm:$0xff] %v8371_v40  ;;  %13402 = vst [vmem:[#allocation142_spill] sm:$0xff] %v8373_v32  ;;  %v3741_v36 = vmul.f32 %v8377_v35, %v8033_v27  ;;  %v3743_v53 = vmul.f32 %v8377_v35, %v8046_v61  ;;  %v3885_v11 = vmul.f32 %v8381_v10, %v8163_v31 }
 0x119   :  { %13403 = vst [vmem:[#allocation143_spill] sm:$0xff] %v8377_v35  ;;  %13404 = vst [vmem:[#allocation144_spill] sm:$0xff] %v8381_v10  ;;  %v3887_v14 = vmul.f32 %v8381_v10, %v8176_v39  ;;  %v3765_v49 = vmul.f32 %v8391_v25, %v8041_v38  ;;  %v3767_v13 = vmul.f32 %v8391_v25, %v8053_v48 }
 0x11a   :  { %13406 = vst [vmem:[#allocation145_spill] sm:$0xff] %v8385_v2  ;;  %13407 = vst [vmem:[#allocation146_spill] sm:$0xff] %v8387_v22  ;;  %v3805_v5 = vmul.f32 %v8395_v59, %v8073_v58  ;;  %v3807_v23 = vmul.f32 %v8395_v59, %v8082_v7  ;;  %v8415_v35 = vrot.slane %v8385_v2, %v6730_v41 }
 0x11b   :  { %13408 = vst [vmem:[#allocation147_spill] sm:$0xff] %v8391_v25  ;;  %13409 = vst [vmem:[#allocation148_spill] sm:$0xff] %v8395_v59  ;;  %v8423_v10 = vrot.slane %v8373_v32, %v6730_v41  ;;  %v8427_v25 = vrot.slane %v8387_v22, %v6730_v41  ;;  %v3781_v6 = vadd.f32 %v3765_v49, %v3741_v36 }
 0x11c   :  { %13410 = vst [vmem:[#allocation149_spill] sm:$0xff] %v8415_v35  ;;  %13411 = vst [vmem:[#allocation150_spill] sm:$0xff] %v8419_v15  ;;  %v3783_v30 = vadd.f32 %v3767_v13, %v3743_v53  ;;  %v8431_v59 = vrot.slane %v8355_v51, %v8281_v29  ;;  %v8435_v56 = vrot.slane %v8365_v21, %v8281_v29 }
 0x11d   :  { %13412 = vst [vmem:[#allocation151_spill] sm:$0xff] %v8423_v10  ;;  %13413 = vst [vmem:[#allocation152_spill] sm:$0xff] %v8427_v25  ;;  %v3845_v18 = vmul.f32 %v8415_v35, %v8132_v1  ;;  %v3847_v26 = vmul.f32 %v8415_v35, %v8150_v20  ;;  %v3925_v41 = vmul.f32 %v8419_v15, %v8210_v43 }
 0x11e   :  { %13414 = vst [vmem:[#allocation153_spill] sm:$0xff] %v8435_v56  ;;  %v3927_v36 = vmul.f32 %v8419_v15, %v8228_v16  ;;  %v3821_v53 = vadd.f32 %v3805_v5, %v3781_v6  ;;  %v3823_v49 = vadd.f32 %v3807_v23, %v3783_v30  ;;  %v3965_v13 = vmul.f32 %v8423_v10, %v8270_v0 }
 0x11f   :  { %v3967_v21 = vmul.f32 %v8423_v10, %v8284_v57  ;;  %v4005_v51 = vmul.f32 %v8427_v25, %v8307_v44  ;;  %v4007_v35 = vmul.f32 %v8427_v25, %v8329_v28  ;;  %v4899_v54 = vmul.f32 %v8431_v59, %v8033_v27 }
 0x120   :  { %v4901_v15 = vmul.f32 %v8431_v59, %v8046_v61  ;;  %v3861_v6 = vadd.f32 %v3845_v18, %v3821_v53  ;;  %v3863_v30 = vadd.f32 %v3847_v26, %v3823_v49  ;;  %v4923_v5 = vmul.f32 %v8435_v56, %v8041_v38 }
 0x121   :  { %v4925_v23 = vmul.f32 %v8435_v56, %v8053_v48  ;;  %v8463_v10 = vrot.slane %v8369_v19, %v8281_v29  ;;  %v8467_v25 = vrot.slane %v8385_v2, %v8281_v29  ;;  %v8471_v27 = vrot.slane %v8357_v24, %v8281_v29 }
 0x122   :  { %v8475_v18 = vrot.slane %v8371_v40, %v8281_v29  ;;  %v3901_v26 = vadd.f32 %v3885_v11, %v3861_v6  ;;  %v3903_v53 = vadd.f32 %v3887_v14, %v3863_v30  ;;  %v4939_v49 = vadd.f32 %v4923_v5, %v4899_v54  ;;  %v13587_v40 = vld [vmem:[#allocation128_spill] sm:$0xff] }
 0x123   :  { %13415 = vst [vmem:[#allocation154_spill] sm:$0xff] %v8463_v10  ;;  %v4941_v48 = vadd.f32 %v4925_v23, %v4901_v15  ;;  %v4963_v38 = vmul.f32 %v8463_v10, %v8073_v58  ;;  %v4965_v19 = vmul.f32 %v8463_v10, %v8082_v7  ;;  %v5003_v2 = vmul.f32 %v8467_v25, %v8132_v1  ;;  %v13596_v7 = vld [vmem:[#allocation116_spill] sm:$0xff] }
 0x124   :  { %v5005_v24 = vmul.f32 %v8467_v25, %v8150_v20  ;;  %v3941_v61 = vadd.f32 %v3925_v41, %v3901_v26  ;;  %v3943_v56 = vadd.f32 %v3927_v36, %v3903_v53  ;;  %v5043_v11 = vmul.f32 %v8471_v27, %v8163_v31 }
 0x125   :  { %v5045_v54 = vmul.f32 %v8471_v27, %v8176_v39  ;;  %v4979_v15 = vadd.f32 %v4963_v38, %v4939_v49  ;;  %v4981_v14 = vadd.f32 %v4965_v19, %v4941_v48  ;;  %v5083_v6 = vmul.f32 %v8475_v18, %v8210_v43  ;;  %v13416_v19 = vld [vmem:[#allocation29_spill] sm:$0xff] }
 0x126   :  { %v5085_v30 = vmul.f32 %v8475_v18, %v8228_v16  ;;  %v3981_v5 = vadd.f32 %v3965_v13, %v3941_v61  ;;  %v3983_v23 = vadd.f32 %v3967_v21, %v3943_v56  ;;  %v8495_v41 = vrot.slane %v8373_v32, %v8281_v29  ;;  %v13417_v48 = vld [vmem:[#allocation33_spill] sm:$0xff] }
 0x127   :  { %v8499_v36 = vrot.slane %v8387_v22, %v8281_v29  ;;  %v5019_v26 = vadd.f32 %v5003_v2, %v4979_v15  ;;  %v5021_v53 = vadd.f32 %v5005_v24, %v4981_v14  ;;  %v322_v38 = vrot.slane %v13416_v19, %v13295_v63 }
 0x128   :  { %v330_v49 = vrot.slane %v13417_v48, %v13295_v63  ;;  %v4021_v43 = vadd.f32 %v4005_v51, %v3981_v5  ;;  %v4023_v16 = vadd.f32 %v4007_v35, %v3983_v23  ;;  %v5123_v21 = vmul.f32 %v8495_v41, %v8270_v0 }
 0x129   :  { %v5125_v61 = vmul.f32 %v8495_v41, %v8284_v57  ;;  %v5059_v56 = vadd.f32 %v5043_v11, %v5019_v26  ;;  %v5061_v13 = vadd.f32 %v5045_v54, %v5021_v53  ;;  %v5163_v2 = vmul.f32 %v8499_v36, %v8307_v44  ;;  %v13440_v26 = vld [vmem:[#allocation30_spill] sm:$0xff]  ;;  %v13456_v11 = vld [vmem:[#allocation40_spill] sm:$0xff] }
 0x12a   :  { %v5165_v24 = vmul.f32 %v8499_v36, %v8329_v28  ;;  %v4040_v15 = vpack.c.bf16 %v4023_v16, %v4021_v43  ;;  %v13418_v14 = vrot.slane %v13376_v9, %v13295_v63  ;;  %v13421_v35 = vrot.slane %v13378_v45, %v13295_v63 }
 0x12b   :  { %v13424_v54 = vrot.slane %v13379_v4, %v13295_v63  ;;  %v5099_v9 = vadd.f32 %v5083_v6, %v5059_v56  ;;  %v5101_v43 = vadd.f32 %v5085_v30, %v5061_v13  ;;  %v13427_v5 = vrot.slane %v13384_v3, %v13295_v63  ;;  %v13442_v56 = vld [vmem:[#allocation34_spill] sm:$0xff]  ;;  %v13461_v30 = vld [vmem:[#allocation45_spill] sm:$0xff] }
 0x12c   :  { %vm8517_vm12 = vcmp.eq.f32.partialorder %v13243_v42, %v13418_v14  ;;  %vm8525_vm10 = vcmp.eq.f32.partialorder %v13243_v42, %v13421_v35  ;;  %v13430_v23 = vrot.slane %v13385_v50, %v13295_v63  ;;  %4056 = vmatprep.subr.bf16.mxu1 %v4040_v15  ;;  %v13433_v6 = vrot.slane %v13391_v47, %v13295_v63 }
 0x12d   :  { %vm8533_vm8 = vcmp.eq.f32.partialorder %v13243_v42, %v13424_v54  ;;  %vm8541_vm6 = vcmp.eq.f32.partialorder %v13243_v42, %v13427_v5  ;;  %vm8562_vm11 = vcmp.eq.f32.partialorder %v13243_v42, %v322_v38  ;;  %vm8567_vm13 = vcmp.eq.f32.partialorder %v13243_v42, %v330_v49  ;;  %v13444_v38 = vld [vmem:[#allocation36_spill] sm:$0xff]  ;;  %v13446_v54 = vld [vmem:[#allocation38_spill] sm:$0xff] }
 0x12e   :  { %vm8549_vm7 = vcmp.eq.f32.partialorder %v13243_v42, %v13430_v23  ;;  %vm8557_vm9 = vcmp.eq.f32.partialorder %v13243_v42, %v13433_v6  ;;  %v13441_v53 = vsub.f32 1.0, %v13440_v26  ;;  %v5139_v47 = vadd.f32 %v5123_v21, %v5099_v9  ;;  %v13448_v23 = vld [vmem:[#allocation31_spill] sm:$0xff]  ;;  %v13452_v9 = vld [vmem:[#allocation37_spill] sm:$0xff] }
 0x12f   :  { %v5141_v48 = vadd.f32 %v5125_v61, %v5101_v43  ;;  %v13443_v13 = vsub.f32 1.0, %v13442_v56  ;;  %v13445_v14 = vsub.f32 1.0, %v13444_v38  ;;  %v13447_v49 = vsub.f32 1.0, %v13446_v54 }
 0x130   :  { %v386_v19 = vrot.slane %v13441_v53, %v13295_v63  ;;  %v13449_v6 = vsub.f32 1.0, %v13448_v23  ;;  %v13450_v53 = vld [vmem:[#allocation35_spill] sm:$0xff]  ;;  %v13453_v43 = vsub.f32 1.0, %v13452_v9  ;;  %v5179_v44 = vadd.f32 %v5163_v2, %v5139_v47 }
 0x131   :  { %v394_v15 = vrot.slane %v13443_v13, %v13295_v63  ;;  %v402_v35 = vrot.slane %v13445_v14, %v13295_v63  ;;  %v410_v5 = vrot.slane %v13447_v49, %v13295_v63  ;;  %v13451_v21 = vsub.f32 1.0, %v13450_v53  ;;  %v13454_v14 = vld [vmem:[#allocation39_spill] sm:$0xff] }
 0x132   :  { %v418_v28 = vrot.slane %v13449_v6, %v13295_v63  ;;  %v434_v13 = vrot.slane %v13453_v43, %v13295_v63  ;;  %v5181_v57 = vadd.f32 %v5165_v24, %v5141_v48  ;;  %v13455_v0 = vsub.f32 1.0, %v13454_v14  ;;  %v13458_v48 = vld [vmem:[#allocation42_spill] sm:$0xff] }
 0x133   :  { %v426_v61 = vrot.slane %v13451_v21, %v13295_v63  ;;  %v463_v49 = vsel %vm8517_vm12, %v386_v19, 0.0  ;;  %v465_v6 = vsel %vm8525_vm10, %v394_v15, 0.0  ;;  %v467_v32 = vsel %vm8533_vm8, %v402_v35, 0.0  ;;  %v13457_v19 = vld [vmem:[#allocation41_spill] sm:$0xff]  ;;  %v13463_v35 = vld [vmem:[#allocation47_spill] sm:$0xff] }
 0x134   :  { %v442_v22 = vrot.slane %v13455_v0, %v13295_v63  ;;  %v469_v21 = vsel %vm8541_vm6, %v410_v5, 0.0  ;;  %v471_v2 = vsel %vm8549_vm7, %v418_v28, 0.0  ;;  %v5198_v24 = vpack.c.bf16 %v5181_v57, %v5179_v44  ;;  %v13459_v57 = vld [vmem:[#allocation43_spill] sm:$0xff]  ;;  %v13460_v28 = vld [vmem:[#allocation44_spill] sm:$0xff] }
 0x135   :  { %v473_v47 = vsel %vm8557_vm9, %v426_v61, 0.0  ;;  %v475_v0 = vsel %vm8562_vm11, %v434_v13, 0.0  ;;  %v498_v16 = vrot.slane %v13456_v11, %v13295_v63  ;;  %v506_v45 = vrot.slane %v13457_v19, %v13295_v63 }
 0x136   :  { %v477_v51 = vsel %vm8567_vm13, %v442_v22, 0.0  ;;  %v514_v4 = vrot.slane %v13458_v48, %v13295_v63  ;;  %v522_v44 = vrot.slane %v13459_v57, %v13295_v63  ;;  %5213 = vmatprep.subr.bf16.mxu0 %v5198_v24  ;;  %v530_v3 = vrot.slane %v13460_v28, %v13295_v63  ;;  %v13462_v22 = vld [vmem:[#allocation46_spill] sm:$0xff] }
 0x137   :  { %v538_v50 = vrot.slane %v13461_v30, %v13295_v63  ;;  %v546_v15 = vrot.slane %v13462_v22, %v13295_v63  ;;  %v554_v5 = vrot.slane %v13463_v35, %v13295_v63  ;;  %vm8628_vm14 = vcmp.eq.f32.partialorder %v13243_v42, %v498_v16 }
 0x138   :  { %vm8633_vm15 = vcmp.eq.f32.partialorder %v13243_v42, %v506_v45  ;;  %vm8638_vm0 = vcmp.eq.f32.partialorder %v13243_v42, %v514_v4  ;;  %vm8643_vm1 = vcmp.eq.f32.partialorder %v13243_v42, %v522_v44  ;;  %vm8648_vm2 = vcmp.eq.f32.partialorder %v13243_v42, %v530_v3 }
 0x139   :  { %vm8653_vm3 = vcmp.eq.f32.partialorder %v13243_v42, %v538_v50  ;;  %vm8658_vm4 = vcmp.eq.f32.partialorder %v13243_v42, %v546_v15  ;;  %vm8663_vm5 = vcmp.eq.f32.partialorder %v13243_v42, %v554_v5  ;;  %v594_v48 = vrot.slane %v13440_v26, %v13295_v63 }
 0x13a   :  { %v602_v4 = vrot.slane %v13442_v56, %v13295_v63  ;;  %v610_v57 = vrot.slane %v13444_v38, %v13295_v63  ;;  %v618_v44 = vrot.slane %v13446_v54, %v13295_v63  ;;  %v626_v28 = vrot.slane %v13448_v23, %v13295_v63 }
 0x13b   :  { %v634_v3 = vrot.slane %v13450_v53, %v13295_v63  ;;  %v642_v30 = vrot.slane %v13452_v9, %v13295_v63  ;;  %v650_v26 = vrot.slane %v13454_v14, %v13295_v63  ;;  %v671_v56 = vsel %vm8628_vm14, %v594_v48, 0.0 }
 0x13c   :  { %v673_v38 = vsel %vm8633_vm15, %v602_v4, 0.0  ;;  %v675_v54 = vsel %vm8638_vm0, %v610_v57, 0.0  ;;  %v677_v23 = vsel %vm8643_vm1, %v618_v44, 0.0  ;;  %v679_v53 = vsel %vm8648_vm2, %v626_v28, 0.0  ;;  %v13499_v57 = vld [vmem:[#allocation62_spill] sm:$0xff] }
 0x13d   :  { %v681_v9 = vsel %vm8653_vm3, %v634_v3, 0.0  ;;  %v683_v14 = vsel %vm8658_vm4, %v642_v30, 0.0  ;;  %v685_v50 = vsel %vm8663_vm5, %v650_v26, 0.0  ;;  %v8699_v22 = vadd.f32 %v671_v56, %v463_v49  ;;  %v13501_v3 = vld [vmem:[#allocation57_spill] sm:$0xff] }
 0x13e   :  { %v8701_v15 = vadd.f32 %v673_v38, %v465_v6  ;;  %v8703_v35 = vadd.f32 %v675_v54, %v467_v32  ;;  %v8705_v5 = vadd.f32 %v677_v23, %v469_v21  ;;  %v8707_v61 = vadd.f32 %v679_v53, %v471_v2  ;;  %v13503_v56 = vld [vmem:[#allocation61_spill] sm:$0xff]  ;;  %v13505_v23 = vld [vmem:[#allocation58_spill] sm:$0xff] }
 0x13f   :  { %v8709_v43 = vadd.f32 %v681_v9, %v473_v47  ;;  %v8711_v13 = vadd.f32 %v683_v14, %v475_v0  ;;  %v8713_v24 = vadd.f32 %v685_v50, %v477_v51  ;;  %v1410_v11 = vrot.slane %v7629_v8, %v13295_v63  ;;  %v13507_v14 = vld [vmem:[#allocation59_spill] sm:$0xff]  ;;  %v13515_v0 = vld [vmem:[#allocation56_spill] sm:$0xff] }
 0x140   :  { %v1418_v49 = vrot.slane %v7641_v55, %v13295_v63  ;;  %v1426_v32 = vrot.slane %v7647_v62, %v13295_v63  ;;  %v1434_v6 = vrot.slane %v7662_v34, %v13295_v63  ;;  %v1442_v21 = vrot.slane %v7638_v60, %v13295_v63  ;;  %v13509_v62 = vld [vmem:[#allocation63_spill] sm:$0xff]  ;;  %v13510_v60 = vld [vmem:[#allocation60_spill] sm:$0xff]  ;;  %v13513_v34 = vld [vmem:[#allocation18_spill] sm:$0xff] }
 0x141   :  { %v1450_v2 = vrot.slane %v7654_v46, %v13295_v63  ;;  %v1458_v47 = vrot.slane %v7658_v12, %v13295_v63  ;;  %v1466_v8 = vrot.slane %v7674_v17, %v13295_v63  ;;  %vm8732_vm12 = vcmp.eq.f32.partialorder %v13243_v42, %v1410_v11  ;;  %v13511_v46 = vld [vmem:[#allocation64_spill] sm:$0xff]  ;;  %v13512_v12 = vld [vmem:[#allocation17_spill] sm:$0xff] }
 0x142   :  { %vm8737_vm10 = vcmp.eq.f32.partialorder %v13243_v42, %v1418_v49  ;;  %vm8742_vm8 = vcmp.eq.f32.partialorder %v13243_v42, %v1426_v32  ;;  %vm8747_vm6 = vcmp.eq.f32.partialorder %v13243_v42, %v1434_v6  ;;  %vm8752_vm7 = vcmp.eq.f32.partialorder %v13243_v42, %v1442_v21  ;;  %v13514_v17 = vld [vmem:[#allocation20_spill] sm:$0xff] }
 0x143   :  { %vm8757_vm9 = vcmp.eq.f32.partialorder %v13243_v42, %v1450_v2  ;;  %vm8762_vm11 = vcmp.eq.f32.partialorder %v13243_v42, %v1458_v47  ;;  %vm8767_vm13 = vcmp.eq.f32.partialorder %v13243_v42, %v1466_v8  ;;  %v13496_v51 = vsub.f32 1.0, %v7667_v33 }
 0x144   :  { %v13497_v19 = vsub.f32 1.0, %v7683_v52  ;;  %v13498_v48 = vsub.f32 1.0, %v7690_v37  ;;  %v13500_v44 = vsub.f32 1.0, %v13499_v57  ;;  %v13502_v30 = vsub.f32 1.0, %v13501_v3 }
 0x145   :  { %v1522_v16 = vrot.slane %v13496_v51, %v13295_v63  ;;  %v13504_v38 = vsub.f32 1.0, %v13503_v56  ;;  %v13506_v53 = vsub.f32 1.0, %v13505_v23  ;;  %v13508_v50 = vsub.f32 1.0, %v13507_v14 }
 0x146   :  { %v1530_v45 = vrot.slane %v13497_v19, %v13295_v63  ;;  %v1538_v4 = vrot.slane %v13498_v48, %v13295_v63  ;;  %v1546_v28 = vrot.slane %v13500_v44, %v13295_v63  ;;  %v1554_v26 = vrot.slane %v13502_v30, %v13295_v63 }
 0x147   :  { %v1562_v54 = vrot.slane %v13504_v38, %v13295_v63  ;;  %v1570_v9 = vrot.slane %v13506_v53, %v13295_v63  ;;  %v1578_v11 = vrot.slane %v13508_v50, %v13295_v63  ;;  %v1599_v49 = vsel %vm8732_vm12, %v1522_v16, 0.0  ;;  %v13543_v50 = vld [vmem:[#allocation76_spill] sm:$0xff] }
 0x148   :  { %v1601_v32 = vsel %vm8737_vm10, %v1530_v45, 0.0  ;;  %v1603_v6 = vsel %vm8742_vm8, %v1538_v4, 0.0  ;;  %v1605_v21 = vsel %vm8747_vm6, %v1546_v28, 0.0  ;;  %v1607_v2 = vsel %vm8752_vm7, %v1554_v26, 0.0  ;;  %v13516_v28 = vld [vmem:[#allocation23_spill] sm:$0xff] }
 0x149   :  { %v1609_v47 = vsel %vm8757_vm9, %v1562_v54, 0.0  ;;  %v1611_v8 = vsel %vm8762_vm11, %v1570_v9, 0.0  ;;  %v1613_v55 = vsel %vm8767_vm13, %v1578_v11, 0.0  ;;  %v1634_v51 = vrot.slane %v13509_v62, %v13295_v63  ;;  %v13537_v26 = vld [vmem:[#allocation71_spill] sm:$0xff] }
 0x14a   :  { %v1642_v16 = vrot.slane %v13510_v60, %v13295_v63  ;;  %v1650_v19 = vrot.slane %v13511_v46, %v13295_v63  ;;  %v1658_v45 = vrot.slane %v13512_v12, %v13295_v63  ;;  %v1666_v48 = vrot.slane %v13513_v34, %v13295_v63 }
 0x14b   :  { %v1674_v4 = vrot.slane %v13514_v17, %v13295_v63  ;;  %v1682_v44 = vrot.slane %v13515_v0, %v13295_v63  ;;  %v1690_v30 = vrot.slane %v13516_v28, %v13295_v63  ;;  %vm8828_vm14 = vcmp.eq.f32.partialorder %v13243_v42, %v1634_v51 }
 0x14c   :  { %vm8833_vm15 = vcmp.eq.f32.partialorder %v13243_v42, %v1642_v16  ;;  %vm8838_vm0 = vcmp.eq.f32.partialorder %v13243_v42, %v1650_v19  ;;  %vm8843_vm1 = vcmp.eq.f32.partialorder %v13243_v42, %v1658_v45  ;;  %vm8848_vm2 = vcmp.eq.f32.partialorder %v13243_v42, %v1666_v48 }
 0x14d   :  { %vm8853_vm3 = vcmp.eq.f32.partialorder %v13243_v42, %v1674_v4  ;;  %vm8858_vm4 = vcmp.eq.f32.partialorder %v13243_v42, %v1682_v44  ;;  %vm8863_vm5 = vcmp.eq.f32.partialorder %v13243_v42, %v1690_v30  ;;  %v1730_v51 = vrot.slane %v7667_v33, %v13295_v63 }
 0x14e   :  { %v1738_v60 = vrot.slane %v7683_v52, %v13295_v63  ;;  %v1746_v16 = vrot.slane %v7690_v37, %v13295_v63  ;;  %v1754_v46 = vrot.slane %v13499_v57, %v13295_v63  ;;  %v1762_v19 = vrot.slane %v13501_v3, %v13295_v63 }
 0x14f   :  { %v1770_v42 = vrot.slane %v13503_v56, %v13295_v63  ;;  %v1778_v12 = vrot.slane %v13505_v23, %v13295_v63  ;;  %v1786_v33 = vrot.slane %v13507_v14, %v13295_v63  ;;  %v1807_v52 = vsel %vm8828_vm14, %v1730_v51, 0.0 }
 0x150   :  { %v1809_v37 = vsel %vm8833_vm15, %v1738_v60, 0.0  ;;  %v1811_v57 = vsel %vm8838_vm0, %v1746_v16, 0.0  ;;  %v1813_v3 = vsel %vm8843_vm1, %v1754_v46, 0.0  ;;  %v1815_v56 = vsel %vm8848_vm2, %v1762_v19, 0.0  ;;  %v13544_v46 = vld [vmem:[#allocation48_spill] sm:$0xff] }
 0x151   :  { %v1817_v23 = vsel %vm8853_vm3, %v1770_v42, 0.0  ;;  %v1819_v14 = vsel %vm8858_vm4, %v1778_v12, 0.0  ;;  %v1821_v45 = vsel %vm8863_vm5, %v1786_v33, 0.0  ;;  %v8899_v34 = vadd.f32 %v1807_v52, %v1599_v49  ;;  %v13538_v49 = vld [vmem:[#allocation73_spill] sm:$0xff] }
 0x152   :  { %v8901_v48 = vadd.f32 %v1809_v37, %v1601_v32  ;;  %v8903_v17 = vadd.f32 %v1811_v57, %v1603_v6  ;;  %v8905_v4 = vadd.f32 %v1813_v3, %v1605_v21  ;;  %v8907_v0 = vadd.f32 %v1815_v56, %v1607_v2  ;;  %v13539_v32 = vld [vmem:[#allocation74_spill] sm:$0xff]  ;;  %v13545_v3 = vld [vmem:[#allocation77_spill] sm:$0xff] }
 0x153   :  { %v8909_v44 = vadd.f32 %v1817_v23, %v1609_v47  ;;  %v8911_v28 = vadd.f32 %v1819_v14, %v1611_v8  ;;  %v8913_v30 = vadd.f32 %v1821_v45, %v1613_v55  ;;  %v1869_v38 = vrot.slane %v13537_v26, %v13295_v63  ;;  %v13540_v21 = vld [vmem:[#allocation78_spill] sm:$0xff]  ;;  %v13541_v47 = vld [vmem:[#allocation72_spill] sm:$0xff]  ;;  %v13542_v55 = vld [vmem:[#allocation75_spill] sm:$0xff] }
 0x154   :  { %13533 = vst [vmem:[#allocation29_spill] sm:$0xff] %v8907_v0  ;;  %v1877_v54 = vrot.slane %v13538_v49, %v13295_v63  ;;  %v1885_v6 = vrot.slane %v13539_v32, %v13295_v63  ;;  %v1893_v53 = vrot.slane %v13540_v21, %v13295_v63  ;;  %v1929_v2 = vrot.slane %v8899_v34, %v13295_v63  ;;  %v13546_v14 = vld [vmem:[#allocation49_spill] sm:$0xff]  ;;  %v13547_v26 = vld [vmem:[#allocation79_spill] sm:$0xff] }
 0x155   :  { %13534 = vst [vmem:[#allocation33_spill] sm:$0xff] %v8909_v44  ;;  %13535 = vst [vmem:[#allocation30_spill] sm:$0xff] %v8911_v28  ;;  %v2028_v8 = vrot.slane %v13541_v47, %v13295_v63  ;;  %v2036_v9 = vrot.slane %v13542_v55, %v13295_v63  ;;  %v2044_v11 = vrot.slane %v13543_v50, %v13295_v63  ;;  %v13550_v32 = vld [vmem:[#allocation81_spill] sm:$0xff]  ;;  %v3132_v58 = vunpack.c.l.bf16 %v13596_v7 }
 0x156   :  { %13536 = vst [vmem:[#allocation34_spill] sm:$0xff] %v8913_v30  ;;  %v1906_v62 = vmul.f32 %v1869_v38, %v8699_v22  ;;  %v1908_v51 = vmul.f32 %v1877_v54, %v8699_v22  ;;  %v1910_v60 = vmul.f32 %v1885_v6, %v8699_v22  ;;  %v1912_v16 = vmul.f32 %v1893_v53, %v8699_v22 }
 0x157   :  { %v2052_v19 = vrot.slane %v13544_v46, %v13295_v63  ;;  %v2065_v42 = vmul.f32 %v2028_v8, %v8701_v15  ;;  %v2067_v12 = vmul.f32 %v2036_v9, %v8701_v15  ;;  %v2069_v33 = vmul.f32 %v2044_v11, %v8701_v15  ;;  %v13552_v9 = vld [vmem:[#allocation87_spill] sm:$0xff] }
 0x158   :  { %v8940_v52 = vcombine.low %v1906_v62, %v1908_v51  ;;  %v8942_v37 = vcombine.low %v1910_v60, %v1912_v16  ;;  %v2088_v57 = vrot.slane %v8901_v48, %v13295_v63  ;;  %v2188_v56 = vrot.slane %v13545_v3, %v13295_v63  ;;  %v13553_v11 = vld [vmem:[#allocation91_spill] sm:$0xff]  ;;  %v13555_v16 = vld [vmem:[#allocation92_spill] sm:$0xff] }
 0x159   :  { %v2071_v22 = vmul.f32 %v2052_v19, %v8701_v15  ;;  %v8949_v23 = vcombine.low %v2065_v42, %v2067_v12  ;;  %v2196_v45 = vrot.slane %v13546_v14, %v13295_v63  ;;  %v2204_v38 = vrot.slane %v13547_v26, %v13295_v63  ;;  %v13556_v19 = vld [vmem:[#allocation96_spill] sm:$0xff]  ;;  %v13558_v14 = vld [vmem:[#allocation94_spill] sm:$0xff] }
 0x15a   :  { %v8956_v49 = vmul.f32 %v8940_v52, %v1929_v2  ;;  %v8959_v54 = vmul.f32 %v8942_v37, %v1929_v2  ;;  %v2212_v6 = vrot.slane %v13550_v32, %v13295_v63  ;;  %v2225_v21 = vmul.f32 %v2188_v56, %v8703_v35  ;;  %v13561_v32 = vld [vmem:[#allocation51_spill] sm:$0xff] }
 0x15b   :  { %v8964_v15 = vcombine.low %v2069_v33, %v2071_v22  ;;  %v8967_v53 = vmul.f32 %v8949_v23, %v2088_v57  ;;  %v2227_v47 = vmul.f32 %v2196_v45, %v8703_v35  ;;  %v2229_v8 = vmul.f32 %v2204_v38, %v8703_v35 }
 0x15c   :  { %13548 = vst [vmem:[#allocation36_spill] sm:$0xff] %v8956_v49  ;;  %13549 = vst [vmem:[#allocation38_spill] sm:$0xff] %v8959_v54  ;;  %v2231_v55 = vmul.f32 %v2212_v6, %v8703_v35  ;;  %v2248_v2 = vrot.slane %v8903_v17, %v13295_v63  ;;  %v2348_v50 = vrot.slane %v13552_v9, %v13295_v63  ;;  %vm4052_vm12 = vcmask 523264  }
 0x15d   :  { %13551 = vst [vmem:[#allocation31_spill] sm:$0xff] %v8967_v53  ;;  %v2356_v62 = vrot.slane %v13553_v11, %v13295_v63  ;;  %v8979_v51 = vmul.f32 %v8964_v15, %v2088_v57  ;;  %v8981_v60 = vcombine.low %v2225_v21, %v2227_v47  ;;  %v2364_v46 = vrot.slane %v13555_v16, %v13295_v63  ;;  %v13562_v21 = vld [vmem:[#allocation97_spill] sm:$0xff]  ;;  %v13566_v16 = vld [vmem:[#allocation99_spill] sm:$0xff] }
 0x15e   :  { %v2372_v35 = vrot.slane %v13556_v19, %v13295_v63  ;;  %v8987_v42 = vcombine.low %v2229_v8, %v2231_v55  ;;  %v2385_v12 = vmul.f32 %v2348_v50, %v8705_v5  ;;  %v2408_v3 = vrot.slane %v8905_v4, %v13295_v63  ;;  %v13564_v55 = vld [vmem:[#allocation98_spill] sm:$0xff] }
 0x15f   :  { %13554 = vst [vmem:[#allocation35_spill] sm:$0xff] %v8979_v51  ;;  %v2387_v33 = vmul.f32 %v2356_v62, %v8705_v5  ;;  %v8994_v57 = vmul.f32 %v8981_v60, %v2248_v2  ;;  %v2389_v56 = vmul.f32 %v2364_v46, %v8705_v5  ;;  %v2508_v45 = vrot.slane %v13558_v14, %v13295_v63 }
 0x160   :  { %v2391_v22 = vmul.f32 %v2372_v35, %v8705_v5  ;;  %v9001_v26 = vmul.f32 %v8987_v42, %v2248_v2  ;;  %v2516_v6 = vrot.slane %v13561_v32, %v13295_v63  ;;  %v2524_v47 = vrot.slane %v13562_v21, %v13295_v63 }
 0x161   :  { %13557 = vst [vmem:[#allocation37_spill] sm:$0xff] %v8994_v57  ;;  %v9003_v38 = vcombine.low %v2385_v12, %v2387_v33  ;;  %v2532_v9 = vrot.slane %v13564_v55, %v13295_v63  ;;  %v2545_v5 = vmul.f32 %v2508_v45, %v8707_v61  ;;  %v2568_v50 = vrot.slane %v8907_v0, %v13295_v63  ;;  %v13568_v12 = vld [vmem:[#allocation102_spill] sm:$0xff] }
 0x162   :  { %13559 = vst [vmem:[#allocation39_spill] sm:$0xff] %v9001_v26  ;;  %v9009_v8 = vcombine.low %v2389_v56, %v2391_v22  ;;  %v2547_v11 = vmul.f32 %v2516_v6, %v8707_v61  ;;  %v2549_v62 = vmul.f32 %v2524_v47, %v8707_v61  ;;  %v2668_v46 = vrot.slane %v13566_v16, %v13295_v63  ;;  %v13569_v56 = vld [vmem:[#allocation103_spill] sm:$0xff]  ;;  %v13571_v45 = vld [vmem:[#allocation106_spill] sm:$0xff] }
 0x163   :  { %13560 = vst [vmem:[#allocation40_spill] sm:$0xff] %v9003_v38  ;;  %v9017_v2 = vmul.f32 %v9003_v38, %v2408_v3  ;;  %v2551_v35 = vmul.f32 %v2532_v9, %v8707_v61  ;;  %v2676_v33 = vrot.slane %v13568_v12, %v13295_v63  ;;  %v2684_v22 = vrot.slane %v13569_v56, %v13295_v63  ;;  %v13573_v55 = vld [vmem:[#allocation110_spill] sm:$0xff]  ;;  %v13576_v12 = vld [vmem:[#allocation115_spill] sm:$0xff] }
 0x164   :  { %13563 = vst [vmem:[#allocation41_spill] sm:$0xff] %v9009_v8  ;;  %v9024_v19 = vmul.f32 %v9009_v8, %v2408_v3  ;;  %v9031_v14 = vcombine.low %v2545_v5, %v2547_v11  ;;  %v2692_v32 = vrot.slane %v13571_v45, %v13295_v63  ;;  %v2705_v6 = vmul.f32 %v2668_v46, %v8709_v43  ;;  %v13575_v16 = vld [vmem:[#allocation114_spill] sm:$0xff] }
 0x165   :  { %13565 = vst [vmem:[#allocation42_spill] sm:$0xff] %v9017_v2  ;;  %v2728_v21 = vrot.slane %v8909_v44, %v13295_v63  ;;  %v9038_v3 = vcombine.low %v2549_v62, %v2551_v35  ;;  %v2707_v61 = vmul.f32 %v2676_v33, %v8709_v43  ;;  %v2709_v47 = vmul.f32 %v2684_v22, %v8709_v43  ;;  %v13579_v33 = vld [vmem:[#allocation120_spill] sm:$0xff] }
 0x166   :  { %13567 = vst [vmem:[#allocation43_spill] sm:$0xff] %v9024_v19  ;;  %13570 = vst [vmem:[#allocation44_spill] sm:$0xff] %v9031_v14  ;;  %v2828_v9 = vrot.slane %v13573_v55, %v13295_v63  ;;  %v9045_v5 = vmul.f32 %v9031_v14, %v2568_v50  ;;  %v2711_v11 = vmul.f32 %v2692_v32, %v8709_v43 }
 0x167   :  { %13572 = vst [vmem:[#allocation45_spill] sm:$0xff] %v9038_v3  ;;  %v2836_v46 = vrot.slane %v13575_v16, %v13295_v63  ;;  %v2844_v56 = vrot.slane %v13576_v12, %v13295_v63  ;;  %v9053_v62 = vmul.f32 %v9038_v3, %v2568_v50  ;;  %v9055_v35 = vcombine.low %v2705_v6, %v2707_v61  ;;  %v13582_v6 = vld [vmem:[#allocation122_spill] sm:$0xff] }
 0x168   :  { %13574 = vst [vmem:[#allocation46_spill] sm:$0xff] %v9045_v5  ;;  %v2852_v22 = vrot.slane %v13579_v33, %v13295_v63  ;;  %v2865_v45 = vmul.f32 %v2828_v9, %v8711_v13  ;;  %v9060_v55 = vcombine.low %v2709_v47, %v2711_v11  ;;  %v2888_v16 = vrot.slane %v8911_v28, %v13295_v63  ;;  %v13583_v33 = vld [vmem:[#allocation125_spill] sm:$0xff] }
 0x169   :  { %13577 = vst [vmem:[#allocation47_spill] sm:$0xff] %v9053_v62  ;;  %13578 = vst [vmem:[#allocation62_spill] sm:$0xff] %v9055_v35  ;;  %v2867_v43 = vmul.f32 %v2836_v46, %v8711_v13  ;;  %v2869_v32 = vmul.f32 %v2844_v56, %v8711_v13  ;;  %v9067_v12 = vmul.f32 %v9055_v35, %v2728_v21  ;;  %v13586_v46 = vld [vmem:[#allocation126_spill] sm:$0xff] }
 0x16a   :  { %13580 = vst [vmem:[#allocation57_spill] sm:$0xff] %v9060_v55  ;;  %v2871_v50 = vmul.f32 %v2852_v22, %v8711_v13  ;;  %v2988_v61 = vrot.slane %v13582_v6, %v13295_v63  ;;  %v2996_v9 = vrot.slane %v13583_v33, %v13295_v63  ;;  %v9075_v47 = vmul.f32 %v9060_v55, %v2728_v21  ;;  %v13590_v33 = vld [vmem:[#allocation53_spill] sm:$0xff] }
 0x16b   :  { %13581 = vst [vmem:[#allocation61_spill] sm:$0xff] %v9067_v12  ;;  %v9077_v11 = vcombine.low %v2865_v45, %v2867_v43  ;;  %v3004_v56 = vrot.slane %v13586_v46, %v13295_v63  ;;  %v3012_v39 = vrot.slane %v13587_v40, %v13295_v63  ;;  %v3048_v6 = vrot.slane %v8913_v30, %v13295_v63 }
 0x16c   :  { %13584 = vst [vmem:[#allocation58_spill] sm:$0xff] %v9075_v47  ;;  %v9083_v31 = vcombine.low %v2869_v32, %v2871_v50  ;;  %v3025_v13 = vmul.f32 %v2988_v61, %v8713_v24  ;;  %v3027_v22 = vmul.f32 %v2996_v9, %v8713_v24  ;;  %v3126_v46 = vunpack.c.l.bf16 %v13590_v33  ;;  %v13593_v50 = vld [vmem:[#allocation111_spill] sm:$0xff]  ;;  %v13594_v9 = vld [vmem:[#allocation112_spill] sm:$0xff] }
 0x16d   :  { %13585 = vst [vmem:[#allocation59_spill] sm:$0xff] %v9077_v11  ;;  %v9090_v21 = vmul.f32 %v9077_v11, %v2888_v16  ;;  %v3029_v45 = vmul.f32 %v3004_v56, %v8713_v24  ;;  %v3031_v43 = vmul.f32 %v3012_v39, %v8713_v24  ;;  %v3128_v61 = vunpack.c.l.bf16 %v13593_v50  ;;  %v13597_v11 = vld [vmem:[#allocation119_spill] sm:$0xff]  ;;  %v13598_v56 = vld [vmem:[#allocation54_spill] sm:$0xff]  ;;  %v13601_v33 = vld [vmem:[#allocation124_spill] sm:$0xff] }
 0x16e   :  { %13588 = vst [vmem:[#allocation63_spill] sm:$0xff] %v9083_v31  ;;  %v9096_v40 = vmul.f32 %v9083_v31, %v2888_v16  ;;  %v9098_v32 = vcombine.low %v3025_v13, %v3027_v22  ;;  %v3130_v20 = vunpack.c.l.bf16 %v13594_v9  ;;  %v3134_v55 = vunpack.c.l.bf16 %v13597_v11  ;;  %v13600_v24 = vld [vmem:[#allocation123_spill] sm:$0xff]  ;;  %v13602_v22 = vld [vmem:[#allocation26_spill] sm:$0xff]  ;;  %v13605_v11 = vld [vmem:[#allocation133_spill] sm:$0xff] }
 0x16f   :  { %13589 = vst [vmem:[#allocation60_spill] sm:$0xff] %v9090_v21  ;;  %v9102_v1 = vcombine.low %v3029_v45, %v3031_v43  ;;  %v3136_v35 = vunpack.c.l.bf16 %v13598_v56  ;;  %v3138_v16 = vunpack.c.l.bf16 %v13600_v24  ;;  %v3140_v13 = vunpack.c.l.bf16 %v13601_v33  ;;  %v13604_v45 = vld [vmem:[#allocation32_spill] sm:$0xff]  ;;  %v13606_v56 = vld [vmem:[#allocation27_spill] sm:$0xff]  ;;  %v13608_v33 = vld [vmem:[#allocation25_spill] sm:$0xff] }
 0x170   :  { %13591 = vst [vmem:[#allocation64_spill] sm:$0xff] %v9096_v40  ;;  %13592 = vst [vmem:[#allocation17_spill] sm:$0xff] %v9098_v32  ;;  %v9108_v39 = vmul.f32 %v9098_v32, %v3048_v6  ;;  %v3197_v50 = vrot.slane %v13602_v22, %v13295_v63  ;;  %v3205_v7 = vrot.slane %v13604_v45, %v13295_v63  ;;  %v13607_v31 = vld [vmem:[#allocation28_spill] sm:$0xff]  ;;  %v13609_v22 = vld [vmem:[#allocation134_spill] sm:$0xff] }
 0x171   :  { %13595 = vst [vmem:[#allocation18_spill] sm:$0xff] %v9102_v1  ;;  %v9115_v9 = vmul.f32 %v9102_v1, %v3048_v6  ;;  %v3213_v43 = vrot.slane %v13605_v11, %v13295_v63  ;;  %v3221_v32 = vrot.slane %v13606_v56, %v13295_v63  ;;  %v3229_v24 = vrot.slane %v13607_v31, %v13295_v63  ;;  %v13610_v6 = vld [vmem:[#allocation136_spill] sm:$0xff] }
 0x172   :  { %13599 = vst [vmem:[#allocation20_spill] sm:$0xff] %v9108_v39  ;;  %v3237_v30 = vrot.slane %v13608_v33, %v13295_v63  ;;  %v3245_v3 = vrot.slane %v13609_v22, %v13295_v63  ;;  %v3253_v1 = vrot.slane %v13610_v6, %v13295_v63  ;;  %v9131_v14 = vmul.f32 %v3197_v50, %v3126_v46  ;;  %v13619_v22 = vld [vmem:[#allocation16_spill] sm:$0xff] }
 0x173   :  { %13603 = vst [vmem:[#allocation56_spill] sm:$0xff] %v9115_v9  ;;  %v9133_v45 = vmul.f32 %v3205_v7, %v3128_v61  ;;  %v9135_v11 = vmul.f32 %v3213_v43, %v3130_v20  ;;  %v9137_v28 = vmul.f32 %v3221_v32, %v3132_v58  ;;  %v9139_v56 = vmul.f32 %v3229_v24, %v3134_v55 }
 0x174   :  { %13611 = vst [vmem:[#allocation23_spill] sm:$0xff] %v9131_v14  ;;  %v9141_v31 = vmul.f32 %v3237_v30, %v3136_v35  ;;  %v9143_v44 = vmul.f32 %v3245_v3, %v3138_v16  ;;  %v9145_v33 = vmul.f32 %v3253_v1, %v3140_v13  ;;  %v9149_v0 = vrot.slane %v9131_v14, %v13619_v22 }
 0x175   :  { %13612 = vst [vmem:[#allocation71_spill] sm:$0xff] %v9133_v45  ;;  %13613 = vst [vmem:[#allocation73_spill] sm:$0xff] %v9135_v11  ;;  %v9153_v46 = vrot.slane %v9133_v45, %v13619_v22  ;;  %v9157_v58 = vrot.slane %v9135_v11, %v13619_v22  ;;  %v9161_v20 = vrot.slane %v9137_v28, %v13619_v22 }
 0x176   :  { %13614 = vst [vmem:[#allocation74_spill] sm:$0xff] %v9137_v28  ;;  %13615 = vst [vmem:[#allocation78_spill] sm:$0xff] %v9139_v56  ;;  %v9165_v1 = vrot.slane %v9139_v56, %v13619_v22  ;;  %v9169_v30 = vrot.slane %v9141_v31, %v13619_v22  ;;  %v9173_v3 = vrot.slane %v9143_v44, %v13619_v22 }
 0x177   :  { %13616 = vst [vmem:[#allocation72_spill] sm:$0xff] %v9141_v31  ;;  %13617 = vst [vmem:[#allocation75_spill] sm:$0xff] %v9143_v44  ;;  %v9177_v35 = vrot.slane %v9145_v33, %v13619_v22  ;;  %v3740_v55 = vmul.f32 %v9149_v0, %v8956_v49  ;;  %v3742_v32 = vmul.f32 %v9149_v0, %v8959_v54 }
 0x178   :  { %13618 = vst [vmem:[#allocation76_spill] sm:$0xff] %v9145_v33  ;;  %13620 = vst [vmem:[#allocation48_spill] sm:$0xff] %v9149_v0  ;;  %v3764_v61 = vmul.f32 %v9153_v46, %v8967_v53  ;;  %v3766_v16 = vmul.f32 %v9153_v46, %v8979_v51  ;;  %v3804_v13 = vmul.f32 %v9157_v58, %v8994_v57 }
 0x179   :  { %13621 = vst [vmem:[#allocation77_spill] sm:$0xff] %v9153_v46  ;;  %13622 = vst [vmem:[#allocation49_spill] sm:$0xff] %v9157_v58  ;;  %v3806_v50 = vmul.f32 %v9157_v58, %v9001_v26  ;;  %v3844_v7 = vmul.f32 %v9161_v20, %v9017_v2  ;;  %v3846_v43 = vmul.f32 %v9161_v20, %v9024_v19 }
 0x17a   :  { %13623 = vst [vmem:[#allocation79_spill] sm:$0xff] %v9161_v20  ;;  %13624 = vst [vmem:[#allocation81_spill] sm:$0xff] %v9165_v1  ;;  %v3780_v24 = vadd.f32 %v3764_v61, %v3740_v55  ;;  %v3782_v6 = vadd.f32 %v3766_v16, %v3742_v32  ;;  %v3884_v63 = vmul.f32 %v9165_v1, %v9045_v5 }
 0x17b   :  { %13625 = vst [vmem:[#allocation87_spill] sm:$0xff] %v9169_v30  ;;  %13626 = vst [vmem:[#allocation91_spill] sm:$0xff] %v9173_v3  ;;  %v3886_v46 = vmul.f32 %v9165_v1, %v9053_v62  ;;  %v3924_v0 = vmul.f32 %v9169_v30, %v9067_v12  ;;  %v3926_v58 = vmul.f32 %v9169_v30, %v9075_v47 }
 0x17c   :  { %13627 = vst [vmem:[#allocation92_spill] sm:$0xff] %v9177_v35  ;;  %v3964_v8 = vmul.f32 %v9173_v3, %v9090_v21  ;;  %v3966_v20 = vmul.f32 %v9173_v3, %v9096_v40  ;;  %v3820_v55 = vadd.f32 %v3804_v13, %v3780_v24  ;;  %v3822_v32 = vadd.f32 %v3806_v50, %v3782_v6 }
 0x17d   :  { %v4004_v61 = vmul.f32 %v9177_v35, %v9108_v39  ;;  %v4006_v16 = vmul.f32 %v9177_v35, %v9115_v9  ;;  %v9213_v1 = vrot.slane %v9131_v14, %v8281_v29  ;;  %v9217_v30 = vrot.slane %v9133_v45, %v8281_v29 }
 0x17e   :  { %v9221_v38 = vrot.slane %v9135_v11, %v8281_v29  ;;  %v9225_v13 = vrot.slane %v9137_v28, %v8281_v29  ;;  %v3860_v50 = vadd.f32 %v3844_v7, %v3820_v55  ;;  %v3862_v24 = vadd.f32 %v3846_v43, %v3822_v32 }
 0x17f   :  { %13628 = vst [vmem:[#allocation96_spill] sm:$0xff] %v9213_v1  ;;  %v9229_v6 = vrot.slane %v9139_v56, %v8281_v29  ;;  %v9233_v14 = vrot.slane %v9141_v31, %v8281_v29  ;;  %v4898_v45 = vmul.f32 %v9213_v1, %v8956_v49  ;;  %v4900_v11 = vmul.f32 %v9213_v1, %v8959_v54 }
 0x180   :  { %v4922_v28 = vmul.f32 %v9217_v30, %v8967_v53  ;;  %v4924_v7 = vmul.f32 %v9217_v30, %v8979_v51  ;;  %v3900_v43 = vadd.f32 %v3884_v63, %v3860_v50  ;;  %v3902_v55 = vadd.f32 %v3886_v46, %v3862_v24 }
 0x181   :  { %v4962_v32 = vmul.f32 %v9221_v38, %v8994_v57  ;;  %v4964_v31 = vmul.f32 %v9221_v38, %v9001_v26  ;;  %v5002_v49 = vmul.f32 %v9225_v13, %v9017_v2  ;;  %v5004_v54 = vmul.f32 %v9225_v13, %v9024_v19  ;;  %v13652_v2 = vld [vmem:[#allocation100_spill] sm:$0xff] }
 0x182   :  { %v4938_v56 = vadd.f32 %v4922_v28, %v4898_v45  ;;  %v4940_v35 = vadd.f32 %v4924_v7, %v4900_v11  ;;  %v3940_v53 = vadd.f32 %v3924_v0, %v3900_v43  ;;  %v3942_v1 = vadd.f32 %v3926_v58, %v3902_v55  ;;  %v13654_v57 = vld [vmem:[#allocation104_spill] sm:$0xff] }
 0x183   :  { %v5042_v63 = vmul.f32 %v9229_v6, %v9045_v5  ;;  %v5044_v46 = vmul.f32 %v9229_v6, %v9053_v62  ;;  %v5082_v28 = vmul.f32 %v9233_v14, %v9067_v12  ;;  %v5084_v45 = vmul.f32 %v9233_v14, %v9075_v47  ;;  %v13648_v62 = vld [vmem:[#allocation90_spill] sm:$0xff] }
 0x184   :  { %v4978_v50 = vadd.f32 %v4962_v32, %v4938_v56  ;;  %v4980_v24 = vadd.f32 %v4964_v31, %v4940_v35  ;;  %v3980_v11 = vadd.f32 %v3964_v8, %v3940_v53  ;;  %v3982_v7 = vadd.f32 %v3966_v20, %v3942_v1  ;;  %v13631_v56 = vld [vmem:[#allocation22_spill] sm:$0xff] }
 0x185   :  { %v9261_v0 = vrot.slane %v9143_v44, %v8281_v29  ;;  %v9265_v58 = vrot.slane %v9145_v33, %v8281_v29  ;;  %v1957_v31 = vrot.slane %v13631_v56, %v13619_v22  ;;  %v13632_v35 = vld [vmem:[#allocation14_spill] sm:$0xff]  ;;  %v13645_v44 = vld [vmem:[#allocation69_spill] sm:$0xff] }
 0x186   :  { %v5018_v43 = vadd.f32 %v5002_v49, %v4978_v50  ;;  %v5020_v55 = vadd.f32 %v5004_v54, %v4980_v24  ;;  %v2117_v32 = vrot.slane %v13632_v35, %v13619_v22  ;;  %v4020_v12 = vadd.f32 %v4004_v61, %v3980_v11  ;;  %v13633_v50 = vld [vmem:[#allocation80_spill] sm:$0xff]  ;;  %v13635_v61 = vld [vmem:[#allocation83_spill] sm:$0xff]  ;;  %v13637_v11 = vld [vmem:[#allocation82_spill] sm:$0xff] }
 0x187   :  { %13629 = vst [vmem:[#allocation94_spill] sm:$0xff] %v9261_v0  ;;  %13630 = vst [vmem:[#allocation51_spill] sm:$0xff] %v9265_v58  ;;  %v4022_v47 = vadd.f32 %v4006_v16, %v3982_v7  ;;  %v5122_v53 = vmul.f32 %v9261_v0, %v9090_v21  ;;  %v5124_v8 = vmul.f32 %v9261_v0, %v9096_v40 }
 0x188   :  { %v5058_v20 = vadd.f32 %v5042_v63, %v5018_v43  ;;  %v5060_v1 = vadd.f32 %v5044_v46, %v5020_v55  ;;  %v5162_v29 = vmul.f32 %v9265_v58, %v9108_v39  ;;  %v5164_v49 = vmul.f32 %v9265_v58, %v9115_v9  ;;  %v13639_v63 = vld [vmem:[#allocation50_spill] sm:$0xff]  ;;  %v13641_v43 = vld [vmem:[#allocation65_spill] sm:$0xff]  ;;  %v13643_v9 = vld [vmem:[#allocation67_spill] sm:$0xff] }
 0x189   :  { %v4039_v54 = vpack.c.bf16 %v4022_v47, %v4020_v12  ;;  %v9280_v24 = vmul.f32 %v13633_v50, %v1957_v31  ;;  %v9283_v16 = vmul.f32 %v13635_v61, %v1957_v31  ;;  %v9286_v7 = vmul.f32 %v13637_v11, %v2117_v32  ;;  %v13642_v12 = vld [vmem:[#allocation66_spill] sm:$0xff]  ;;  %v13644_v31 = vld [vmem:[#allocation68_spill] sm:$0xff] }
 0x18a   :  { %v5098_v21 = vadd.f32 %v5082_v28, %v5058_v20  ;;  %v5100_v40 = vadd.f32 %v5084_v45, %v5060_v1  ;;  %v9289_v46 = vmul.f32 %v13639_v63, %v2117_v32  ;;  %v2277_v55 = vrot.slane %v13641_v43, %v13619_v22  ;;  %v13646_v32 = vld [vmem:[#allocation89_spill] sm:$0xff] }
 0x18b   :  { %13634 = vst [vmem:[#allocation97_spill] sm:$0xff] %v9280_v24  ;;  %13636 = vst [vmem:[#allocation98_spill] sm:$0xff] %v9283_v16  ;;  %4057 = vmatpush1.bf16.msra.mxu1 %v4039_v54  ;;  %v2437_v47 = vrot.slane %v13642_v12, %v13619_v22  ;;  %v2597_v39 = vrot.slane %v13643_v9, %v13619_v22  ;;  %v2757_v33 = vrot.slane %v13644_v31, %v13619_v22  ;;  %v13650_v54 = vld [vmem:[#allocation52_spill] sm:$0xff]  ;;  %v13656_v31 = vld [vmem:[#allocation107_spill] sm:$0xff] }
 0x18c   :  { %13638 = vst [vmem:[#allocation99_spill] sm:$0xff] %v9286_v7  ;;  %13640 = vst [vmem:[#allocation102_spill] sm:$0xff] %v9289_v46  ;;  %v2917_v28 = vrot.slane %v13645_v44, %v13619_v22  ;;  %v5138_v45 = vadd.f32 %v5122_v53, %v5098_v21  ;;  %v5140_v20 = vadd.f32 %v5124_v8, %v5100_v40  ;;  %v13658_v53 = vld [vmem:[#allocation113_spill] sm:$0xff] }
 0x18d   :  { %v9302_v1 = vmul.f32 %v13646_v32, %v2277_v55  ;;  %v9305_v5 = vmul.f32 %v13648_v62, %v2277_v55  ;;  %v9308_v19 = vmul.f32 %v13650_v54, %v2437_v47  ;;  %v9311_v26 = vmul.f32 %v13652_v2, %v2437_v47  ;;  %v13660_v44 = vld [vmem:[#allocation117_spill] sm:$0xff]  ;;  %v13662_v62 = vld [vmem:[#allocation127_spill] sm:$0xff] }
 0x18e   :  { %v9314_v51 = vmul.f32 %v13654_v57, %v2597_v39  ;;  %v9317_v9 = vmul.f32 %v13656_v31, %v2597_v39  ;;  %v5178_v21 = vadd.f32 %v5162_v29, %v5138_v45  ;;  %v5180_v40 = vadd.f32 %v5164_v49, %v5140_v20  ;;  %v13664_v32 = vld [vmem:[#allocation55_spill] sm:$0xff]  ;;  %v13666_v57 = vld [vmem:[#allocation70_spill] sm:$0xff]  ;;  %v13674_v63 = vld [vmem:[#allocation149_spill] sm:$0xff] }
 0x18f   :  { %13647 = vst [vmem:[#allocation103_spill] sm:$0xff] %v9302_v1  ;;  %13649 = vst [vmem:[#allocation106_spill] sm:$0xff] %v9305_v5  ;;  %v9320_v8 = vmul.f32 %v13658_v53, %v2757_v33  ;;  %v9323_v55 = vmul.f32 %v13660_v44, %v2757_v33  ;;  %v9326_v54 = vmul.f32 %v13662_v62, %v2917_v28  ;;  %v13667_v39 = vld [vmem:[#allocation143_spill] sm:$0xff]  ;;  %v13669_v62 = vld [vmem:[#allocation24_spill] sm:$0xff] }
 0x190   :  { %13651 = vst [vmem:[#allocation110_spill] sm:$0xff] %v9308_v19  ;;  %13653 = vst [vmem:[#allocation114_spill] sm:$0xff] %v9311_v26  ;;  %v9329_v47 = vmul.f32 %v13664_v32, %v2917_v28  ;;  %v3077_v2 = vrot.slane %v13666_v57, %v13619_v22  ;;  %v3745_v31 = vmul.f32 %v13667_v39, %v9280_v24  ;;  %v13668_v45 = vld [vmem:[#allocation147_spill] sm:$0xff]  ;;  %v13673_v53 = vld [vmem:[#allocation148_spill] sm:$0xff] }
 0x191   :  { %13655 = vst [vmem:[#allocation115_spill] sm:$0xff] %v9314_v51  ;;  %13657 = vst [vmem:[#allocation120_spill] sm:$0xff] %v9317_v9  ;;  %v5197_v29 = vpack.c.bf16 %v5180_v40, %v5178_v21  ;;  %v3747_v49 = vmul.f32 %v13667_v39, %v9283_v16  ;;  %v3769_v33 = vmul.f32 %v13668_v45, %v9286_v7  ;;  %v13671_v28 = vld [vmem:[#allocation131_spill] sm:$0xff] }
 0x192   :  { %13659 = vst [vmem:[#allocation122_spill] sm:$0xff] %v9320_v8  ;;  %13661 = vst [vmem:[#allocation125_spill] sm:$0xff] %v9323_v55  ;;  %v3771_v20 = vmul.f32 %v13668_v45, %v9289_v46  ;;  %v9342_v44 = vmul.f32 %v13669_v62, %v3077_v2  ;;  %v9345_v32 = vmul.f32 %v13671_v28, %v3077_v2  ;;  %v13675_v62 = vld [vmem:[#allocation144_spill] sm:$0xff]  ;;  %v13676_v28 = vld [vmem:[#allocation150_spill] sm:$0xff] }
 0x193   :  { %13663 = vst [vmem:[#allocation126_spill] sm:$0xff] %v9326_v54  ;;  %13665 = vst [vmem:[#allocation128_spill] sm:$0xff] %v9329_v47  ;;  %v3809_v57 = vmul.f32 %v13673_v53, %v9302_v1  ;;  %v3811_v21 = vmul.f32 %v13673_v53, %v9305_v5  ;;  %5214 = vmatpush1.bf16.msra.mxu0 %v5197_v29  ;;  %v3785_v40 = vadd.f32 %v3769_v33, %v3745_v31  ;;  %v13677_v33 = vld [vmem:[#allocation151_spill] sm:$0xff]  ;;  %v13678_v53 = vld [vmem:[#allocation152_spill] sm:$0xff] }
 0x194   :  { %13670 = vst [vmem:[#allocation53_spill] sm:$0xff] %v9342_v44  ;;  %13672 = vst [vmem:[#allocation111_spill] sm:$0xff] %v9345_v32  ;;  %v3787_v39 = vadd.f32 %v3771_v20, %v3747_v49  ;;  %v3849_v11 = vmul.f32 %v13674_v63, %v9308_v19  ;;  %v3851_v45 = vmul.f32 %v13674_v63, %v9311_v26 }
 0x195   :  { %v3889_v61 = vmul.f32 %v13675_v62, %v9314_v51  ;;  %v3891_v2 = vmul.f32 %v13675_v62, %v9317_v9  ;;  %v3929_v50 = vmul.f32 %v13676_v28, %v9320_v8  ;;  %v3931_v29 = vmul.f32 %v13676_v28, %v9323_v55 }
 0x196   :  { %v3825_v31 = vadd.f32 %v3809_v57, %v3785_v40  ;;  %v3827_v49 = vadd.f32 %v3811_v21, %v3787_v39  ;;  %v3969_v20 = vmul.f32 %v13677_v33, %v9326_v54  ;;  %v3971_v63 = vmul.f32 %v13677_v33, %v9329_v47  ;;  %v13679_v21 = vld [vmem:[#allocation153_spill] sm:$0xff] }
 0x197   :  { %v4009_v12 = vmul.f32 %v13678_v53, %v9342_v44  ;;  %v4011_v62 = vmul.f32 %v13678_v53, %v9345_v32  ;;  %v4903_v43 = vmul.f32 %v8431_v59, %v9280_v24  ;;  %v4905_v28 = vmul.f32 %v8431_v59, %v9283_v16 }
 0x198   :  { %v3865_v57 = vadd.f32 %v3849_v11, %v3825_v31  ;;  %v3867_v39 = vadd.f32 %v3851_v45, %v3827_v49  ;;  %v4927_v40 = vmul.f32 %v13679_v21, %v9286_v7  ;;  %v4929_v33 = vmul.f32 %v13679_v21, %v9289_v46 }
 0x199   :  { %v4967_v35 = vmul.f32 %v8463_v10, %v9302_v1  ;;  %v4969_v53 = vmul.f32 %v8463_v10, %v9305_v5  ;;  %v5007_v24 = vmul.f32 %v8467_v25, %v9308_v19  ;;  %v5009_v16 = vmul.f32 %v8467_v25, %v9311_v26 }
 0x19a   :  { %v3905_v11 = vadd.f32 %v3889_v61, %v3865_v57  ;;  %v3907_v45 = vadd.f32 %v3891_v2, %v3867_v39  ;;  %v4943_v31 = vadd.f32 %v4927_v40, %v4903_v43  ;;  %v4945_v49 = vadd.f32 %v4929_v33, %v4905_v28 }
 0x19b   :  { %v5047_v7 = vmul.f32 %v8471_v27, %v9314_v51  ;;  %v5049_v46 = vmul.f32 %v8471_v27, %v9317_v9  ;;  %v5087_v1 = vmul.f32 %v8475_v18, %v9320_v8  ;;  %v5089_v5 = vmul.f32 %v8475_v18, %v9323_v55  ;;  %v13703_v55 = vld [vmem:[#allocation59_spill] sm:$0xff]  ;;  %v13707_v51 = vld [vmem:[#allocation17_spill] sm:$0xff] }
 0x19c   :  { %v3945_v19 = vadd.f32 %v3929_v50, %v3905_v11  ;;  %v3947_v10 = vadd.f32 %v3931_v29, %v3907_v45  ;;  %v4983_v21 = vadd.f32 %v4967_v35, %v4943_v31  ;;  %v4985_v26 = vadd.f32 %v4969_v53, %v4945_v49  ;;  %v13705_v9 = vld [vmem:[#allocation63_spill] sm:$0xff] }
 0x19d   :  { %v5127_v61 = vmul.f32 %v8495_v41, %v9326_v54  ;;  %v5129_v43 = vmul.f32 %v8495_v41, %v9329_v47  ;;  %v5167_v28 = vmul.f32 %v8499_v36, %v9342_v44  ;;  %v5169_v2 = vmul.f32 %v8499_v36, %v9345_v32  ;;  %v13698_v44 = vld [vmem:[#allocation48_spill] sm:$0xff]  ;;  %v13701_v47 = vld [vmem:[#allocation57_spill] sm:$0xff] }
 0x19e   :  { %v3985_v33 = vadd.f32 %v3969_v20, %v3945_v19  ;;  %v3987_v57 = vadd.f32 %v3971_v63, %v3947_v10  ;;  %v5023_v39 = vadd.f32 %v5007_v24, %v4983_v21  ;;  %v5025_v40 = vadd.f32 %v5009_v16, %v4985_v26  ;;  %v13688_v21 = vld [vmem:[#allocation41_spill] sm:$0xff] }
 0x19f   :  { %v1953_v35 = vrot.slane %v8899_v34, %v13619_v22  ;;  %v2113_v50 = vrot.slane %v8901_v48, %v13619_v22  ;;  %v2273_v53 = vrot.slane %v8903_v17, %v13619_v22  ;;  %v2433_v29 = vrot.slane %v8905_v4, %v13619_v22 }
 0x1a0   :  { %v4025_v11 = vadd.f32 %v4009_v12, %v3985_v33  ;;  %v4027_v45 = vadd.f32 %v4011_v62, %v3987_v57  ;;  %v5063_v31 = vadd.f32 %v5047_v7, %v5023_v39  ;;  %v5065_v49 = vadd.f32 %v5049_v46, %v5025_v40  ;;  %v13686_v7 = vld [vmem:[#allocation40_spill] sm:$0xff]  ;;  %v13690_v57 = vld [vmem:[#allocation29_spill] sm:$0xff] }
 0x1a1   :  { %v9412_v10 = vmul.f32 %v8940_v52, %v1953_v35  ;;  %v9415_v26 = vmul.f32 %v8942_v37, %v1953_v35  ;;  %v9418_v19 = vmul.f32 %v8949_v23, %v2113_v50  ;;  %v9421_v24 = vmul.f32 %v8964_v15, %v2113_v50  ;;  %v13692_v50 = vld [vmem:[#allocation30_spill] sm:$0xff] }
 0x1a2   :  { %v4042_v16 = vpack.c.bf16 %v4027_v45, %v4025_v11  ;;  %v5103_v63 = vadd.f32 %v5087_v1, %v5063_v31  ;;  %v5105_v20 = vadd.f32 %v5089_v5, %v5065_v49  ;;  %v9424_v12 = vmul.f32 %v8981_v60, %v2273_v53  ;;  %v13691_v5 = vld [vmem:[#allocation33_spill] sm:$0xff] }
 0x1a3   :  { %13680 = vst [vmem:[#allocation112_spill] sm:$0xff] %v9412_v10  ;;  %13681 = vst [vmem:[#allocation116_spill] sm:$0xff] %v9415_v26  ;;  %v9427_v62 = vmul.f32 %v8987_v42, %v2273_v53  ;;  %v9430_v46 = vmul.f32 %v13686_v7, %v2433_v29  ;;  %v9433_v33 = vmul.f32 %v13688_v21, %v2433_v29  ;;  %v13693_v53 = vld [vmem:[#allocation44_spill] sm:$0xff]  ;;  %v13695_v31 = vld [vmem:[#allocation45_spill] sm:$0xff] }
 0x1a4   :  { %13682 = vst [vmem:[#allocation119_spill] sm:$0xff] %v9418_v19  ;;  %13683 = vst [vmem:[#allocation54_spill] sm:$0xff] %v9421_v24  ;;  %v2593_v39 = vrot.slane %v13690_v57, %v13619_v22  ;;  %4058 = vmatprep.subr.bf16.mxu1 %v4042_v16  ;;  %v5143_v40 = vadd.f32 %v5127_v61, %v5103_v63  ;;  %v5145_v35 = vadd.f32 %v5129_v43, %v5105_v20  ;;  %v13697_v29 = vld [vmem:[#allocation34_spill] sm:$0xff] }
 0x1a5   :  { %13684 = vst [vmem:[#allocation123_spill] sm:$0xff] %v9424_v12  ;;  %13685 = vst [vmem:[#allocation124_spill] sm:$0xff] %v9427_v62  ;;  %v2753_v1 = vrot.slane %v13691_v5, %v13619_v22  ;;  %v2913_v11 = vrot.slane %v13692_v50, %v13619_v22  ;;  %v3073_v32 = vrot.slane %v13697_v29, %v13619_v22  ;;  %v13699_v63 = vld [vmem:[#allocation62_spill] sm:$0xff] }
 0x1a6   :  { %13687 = vst [vmem:[#allocation26_spill] sm:$0xff] %v9430_v46  ;;  %13689 = vst [vmem:[#allocation32_spill] sm:$0xff] %v9433_v33  ;;  %v9442_v45 = vmul.f32 %v13693_v53, %v2593_v39  ;;  %v9445_v49 = vmul.f32 %v13695_v31, %v2593_v39  ;;  %v3744_v16 = vmul.f32 %v13698_v44, %v9412_v10  ;;  %v13709_v22 = vld [vmem:[#allocation18_spill] sm:$0xff] }
 0x1a7   :  { %v5183_v61 = vadd.f32 %v5167_v28, %v5143_v40  ;;  %v5185_v43 = vadd.f32 %v5169_v2, %v5145_v35  ;;  %v9452_v20 = vmul.f32 %v13699_v63, %v2753_v1  ;;  %v9455_v54 = vmul.f32 %v13701_v47, %v2753_v1  ;;  %v13711_v40 = vld [vmem:[#allocation77_spill] sm:$0xff] }
 0x1a8   :  { %13694 = vst [vmem:[#allocation133_spill] sm:$0xff] %v9442_v45  ;;  %13696 = vst [vmem:[#allocation27_spill] sm:$0xff] %v9445_v49  ;;  %v9458_v8 = vmul.f32 %v13703_v55, %v2913_v11  ;;  %v9461_v39 = vmul.f32 %v13705_v9, %v2913_v11  ;;  %v9464_v31 = vmul.f32 %v13707_v51, %v3073_v32  ;;  %v13712_v55 = vld [vmem:[#allocation49_spill] sm:$0xff]  ;;  %v13713_v9 = vld [vmem:[#allocation79_spill] sm:$0xff] }
 0x1a9   :  { %13700 = vst [vmem:[#allocation28_spill] sm:$0xff] %v9452_v20  ;;  %13702 = vst [vmem:[#allocation25_spill] sm:$0xff] %v9455_v54  ;;  %v9467_v29 = vmul.f32 %v13709_v22, %v3073_v32  ;;  %v5200_v28 = vpack.c.bf16 %v5185_v43, %v5183_v61  ;;  %v3746_v2 = vmul.f32 %v13698_v44, %v9415_v26  ;;  %v13714_v47 = vld [vmem:[#allocation81_spill] sm:$0xff]  ;;  %v13715_v44 = vld [vmem:[#allocation87_spill] sm:$0xff] }
 0x1aa   :  { %13704 = vst [vmem:[#allocation134_spill] sm:$0xff] %v9458_v8  ;;  %13706 = vst [vmem:[#allocation136_spill] sm:$0xff] %v9461_v39  ;;  %v3768_v35 = vmul.f32 %v13711_v40, %v9418_v19  ;;  %v3770_v1 = vmul.f32 %v13711_v40, %v9421_v24  ;;  %v3808_v11 = vmul.f32 %v13712_v55, %v9424_v12 }
 0x1ab   :  { %13708 = vst [vmem:[#allocation16_spill] sm:$0xff] %v9464_v31  ;;  %13710 = vst [vmem:[#allocation40_spill] sm:$0xff] %v9467_v29  ;;  %v3810_v51 = vmul.f32 %v13712_v55, %v9427_v62  ;;  %v3848_v32 = vmul.f32 %v13713_v9, %v9430_v46  ;;  %v3850_v61 = vmul.f32 %v13713_v9, %v9433_v33  ;;  %5215 = vmatprep.subr.bf16.mxu0 %v5200_v28  ;;  %v13717_v9 = vld [vmem:[#allocation96_spill] sm:$0xff] }
 0x1ac   :  { %v3784_v43 = vadd.f32 %v3768_v35, %v3744_v16  ;;  %v3786_v22 = vadd.f32 %v3770_v1, %v3746_v2  ;;  %v3888_v63 = vmul.f32 %v13714_v47, %v9442_v45  ;;  %v3890_v40 = vmul.f32 %v13714_v47, %v9445_v49  ;;  %v13716_v35 = vld [vmem:[#allocation92_spill] sm:$0xff] }
 0x1ad   :  { %v3928_v53 = vmul.f32 %v13715_v44, %v9452_v20  ;;  %v3930_v55 = vmul.f32 %v13715_v44, %v9455_v54  ;;  %v3968_v50 = vmul.f32 %v9173_v3, %v9458_v8  ;;  %v3970_v28 = vmul.f32 %v9173_v3, %v9461_v39 }
 0x1ae   :  { %v3824_v16 = vadd.f32 %v3808_v11, %v3784_v43  ;;  %v3826_v2 = vadd.f32 %v3810_v51, %v3786_v22  ;;  %v4008_v1 = vmul.f32 %v13716_v35, %v9464_v31  ;;  %v4010_v47 = vmul.f32 %v13716_v35, %v9467_v29 }
 0x1af   :  { %v4902_v5 = vmul.f32 %v13717_v9, %v9412_v10  ;;  %v4904_v44 = vmul.f32 %v13717_v9, %v9415_v26  ;;  %v4926_v57 = vmul.f32 %v9217_v30, %v9418_v19  ;;  %v4928_v3 = vmul.f32 %v9217_v30, %v9421_v24  ;;  %v13745_v24 = vld [vmem:[#allocation69_spill] sm:$0xff] }
 0x1b0   :  { %v3864_v11 = vadd.f32 %v3848_v32, %v3824_v16  ;;  %v3866_v51 = vadd.f32 %v3850_v61, %v3826_v2  ;;  %v4966_v22 = vmul.f32 %v9221_v38, %v9424_v12  ;;  %v4968_v43 = vmul.f32 %v9221_v38, %v9427_v62  ;;  %v13741_v62 = vld [vmem:[#allocation100_spill] sm:$0xff] }
 0x1b1   :  { %v4942_v35 = vadd.f32 %v4926_v57, %v4902_v5  ;;  %v4944_v21 = vadd.f32 %v4928_v3, %v4904_v44  ;;  %v5006_v10 = vmul.f32 %v9225_v13, %v9430_v46  ;;  %v5008_v26 = vmul.f32 %v9225_v13, %v9433_v33  ;;  %v13739_v46 = vld [vmem:[#allocation52_spill] sm:$0xff] }
 0x1b2   :  { %v3904_v19 = vadd.f32 %v3888_v63, %v3864_v11  ;;  %v3906_v9 = vadd.f32 %v3890_v40, %v3866_v51  ;;  %v5046_v32 = vmul.f32 %v9229_v6, %v9442_v45  ;;  %v5048_v61 = vmul.f32 %v9229_v6, %v9445_v49  ;;  %v13735_v45 = vld [vmem:[#allocation89_spill] sm:$0xff] }
 0x1b3   :  { %v4982_v16 = vadd.f32 %v4966_v22, %v4942_v35  ;;  %v4984_v2 = vadd.f32 %v4968_v43, %v4944_v21  ;;  %v5086_v57 = vmul.f32 %v9233_v14, %v9452_v20  ;;  %v5088_v44 = vmul.f32 %v9233_v14, %v9455_v54  ;;  %v13718_v20 = vld [vmem:[#allocation13_spill] sm:$0xff] }
 0x1b4   :  { %v3944_v3 = vadd.f32 %v3928_v53, %v3904_v19  ;;  %v3946_v5 = vadd.f32 %v3930_v55, %v3906_v9  ;;  %v5126_v63 = vmul.f32 %v9261_v0, %v9458_v8  ;;  %v5128_v40 = vmul.f32 %v9261_v0, %v9461_v39  ;;  %v13721_v53 = vld [vmem:[#allocation15_spill] sm:$0xff]  ;;  %v13722_v39 = vld [vmem:[#allocation137_spill] sm:$0xff]  ;;  %v13731_v8 = vld [vmem:[#allocation82_spill] sm:$0xff] }
 0x1b5   :  { %v5022_v11 = vadd.f32 %v5006_v10, %v4982_v16  ;;  %v5024_v51 = vadd.f32 %v5008_v26, %v4984_v2  ;;  %v5166_v35 = vmul.f32 %v9265_v58, %v9464_v31  ;;  %v5168_v21 = vmul.f32 %v9265_v58, %v9467_v29 }
 0x1b6   :  { %v3984_v22 = vadd.f32 %v3968_v50, %v3944_v3  ;;  %v3986_v43 = vadd.f32 %v3970_v28, %v3946_v5  ;;  %v9532_v54 = vsub.s32 2, %v13718_v20  ;;  %v9535_v9 = vsub.s32 3, %v13718_v20  ;;  %v13724_v50 = vld [vmem:[#allocation14_spill] sm:$0xff]  ;;  %v13748_v20 = vld [vmem:[#allocation107_spill] sm:$0xff] }
 0x1b7   :  { %v5062_v55 = vadd.f32 %v5046_v32, %v5022_v11  ;;  %v5064_v19 = vadd.f32 %v5048_v61, %v5024_v51  ;;  %v9539_v10 = vrot.slane %v13722_v39, %v13721_v53  ;;  %v12488_v3 = vmov 0   ;;  %v13725_v32 = vld [vmem:[#allocation65_spill] sm:$0xff]  ;;  %v13726_v11 = vld [vmem:[#allocation66_spill] sm:$0xff]  ;;  %v13746_v39 = vld [vmem:[#allocation104_spill] sm:$0xff] }
 0x1b8   :  { %13719 = vst [vmem:[#allocation155_spill] sm:$0xff] %v9532_v54  ;;  %13720 = vst [vmem:[#allocation156_spill] sm:$0xff] %v9535_v9  ;;  %v4024_v26 = vadd.f32 %v4008_v1, %v3984_v22  ;;  %v4026_v16 = vadd.f32 %v4010_v47, %v3986_v43  ;;  %v1973_v2 = vrot.slane %v13631_v56, %v9532_v54  ;;  %4088 = vmatprep.mubr.bf16.mxu1 %v12488_v3  ;;  %v13727_v1 = vld [vmem:[#allocation80_spill] sm:$0xff]  ;;  %v13729_v43 = vld [vmem:[#allocation83_spill] sm:$0xff] }
 0x1b9   :  { %13723 = vst [vmem:[#allocation157_spill] sm:$0xff] %v9539_v10  ;;  %v2133_v28 = vrot.slane %v13724_v50, %v9532_v54  ;;  %v5102_v5 = vadd.f32 %v5086_v57, %v5062_v55  ;;  %v5104_v29 = vadd.f32 %v5088_v44, %v5064_v19  ;;  %v2293_v61 = vrot.slane %v13725_v32, %v9532_v54  ;;  %v13733_v55 = vld [vmem:[#allocation50_spill] sm:$0xff]  ;;  %v13770_v32 = vld [vmem:[#allocation152_spill] sm:$0xff] }
 0x1ba   :  { %v2453_v51 = vrot.slane %v13726_v11, %v9532_v54  ;;  %5245 = vmatprep.mubr.bf16.mxu0 %v12488_v3  ;;  %v4041_v47 = vpack.c.bf16 %v4026_v16, %v4024_v26  ;;  %v9552_v22 = vmul.f32 %v13727_v1, %v1973_v2  ;;  %v9555_v31 = vmul.f32 %v13729_v43, %v1973_v2  ;;  %v13737_v26 = vld [vmem:[#allocation90_spill] sm:$0xff]  ;;  %v13769_v1 = vld [vmem:[#allocation151_spill] sm:$0xff] }
 0x1bb   :  { %v9558_v49 = vmul.f32 %v13731_v8, %v2133_v28  ;;  %6526 = vset.pattern.permute.xlu0 %v12488_v3  ;;  %v5142_v57 = vadd.f32 %v5126_v63, %v5102_v5  ;;  %v5144_v44 = vadd.f32 %v5128_v40, %v5104_v29  ;;  %v9562_v19 = vmul.f32 %v13733_v55, %v2133_v28  ;;  %v13743_v3 = vld [vmem:[#allocation67_spill] sm:$0xff]  ;;  %v13744_v28 = vld [vmem:[#allocation68_spill] sm:$0xff]  ;;  %v13768_v8 = vld [vmem:[#allocation150_spill] sm:$0xff] }
 0x1bc   :  { %13728 = vst [vmem:[#allocation158_spill] sm:$0xff] %v9552_v22  ;;  %13730 = vst [vmem:[#allocation159_spill] sm:$0xff] %v9555_v31  ;;  %v9565_v33 = vmul.f32 %v13735_v45, %v2293_v61  ;;  %4059 = vmatpush1.bf16.msra.mxu1 %v4041_v47  ;;  %v9568_v16 = vmul.f32 %v13737_v26, %v2293_v61  ;;  %v9571_v2 = vmul.f32 %v13739_v46, %v2453_v51  ;;  %v13772_v9 = vld [vmem:[#allocation154_spill] sm:$0xff] }
 0x1bd   :  { %13732 = vst [vmem:[#allocation160_spill] sm:$0xff] %v9558_v49  ;;  %13734 = vst [vmem:[#allocation161_spill] sm:$0xff] %v9562_v19  ;;  %v9574_v12 = vmul.f32 %v13741_v62, %v2453_v51  ;;  %v2613_v63 = vrot.slane %v13743_v3, %v9532_v54  ;;  %v5182_v29 = vadd.f32 %v5166_v35, %v5142_v57  ;;  %v13750_v51 = vld [vmem:[#allocation70_spill] sm:$0xff]  ;;  %v13751_v62 = vld [vmem:[#allocation143_spill] sm:$0xff] }
 0x1be   :  { %13736 = vst [vmem:[#allocation162_spill] sm:$0xff] %v9565_v33  ;;  %13738 = vst [vmem:[#allocation163_spill] sm:$0xff] %v9568_v16  ;;  %v5184_v40 = vadd.f32 %v5168_v21, %v5144_v44  ;;  %v2773_v5 = vrot.slane %v13744_v28, %v9532_v54  ;;  %v2933_v47 = vrot.slane %v13745_v24, %v9532_v54  ;;  %v13752_v21 = vld [vmem:[#allocation113_spill] sm:$0xff]  ;;  %v13756_v24 = vld [vmem:[#allocation127_spill] sm:$0xff] }
 0x1bf   :  { %13740 = vst [vmem:[#allocation164_spill] sm:$0xff] %v9571_v2  ;;  %13742 = vst [vmem:[#allocation165_spill] sm:$0xff] %v9574_v12  ;;  %v9583_v61 = vmul.f32 %v13746_v39, %v2613_v63  ;;  %v9586_v53 = vmul.f32 %v13748_v20, %v2613_v63  ;;  %v3093_v10 = vrot.slane %v13750_v51, %v9532_v54  ;;  %v13754_v44 = vld [vmem:[#allocation117_spill] sm:$0xff]  ;;  %v13758_v39 = vld [vmem:[#allocation55_spill] sm:$0xff] }
 0x1c0   :  { %v3749_v3 = vmul.f32 %v13751_v62, %v9552_v22  ;;  %v5199_v35 = vpack.c.bf16 %v5184_v40, %v5182_v29  ;;  %v9593_v57 = vmul.f32 %v13752_v21, %v2773_v5  ;;  %v9596_v28 = vmul.f32 %v13754_v44, %v2773_v5  ;;  %v13760_v63 = vld [vmem:[#allocation24_spill] sm:$0xff]  ;;  %v13762_v51 = vld [vmem:[#allocation131_spill] sm:$0xff] }
 0x1c1   :  { %13747 = vst [vmem:[#allocation166_spill] sm:$0xff] %v9583_v61  ;;  %13749 = vst [vmem:[#allocation167_spill] sm:$0xff] %v9586_v53  ;;  %v9599_v46 = vmul.f32 %v13756_v24, %v2933_v47  ;;  %v9602_v26 = vmul.f32 %v13758_v39, %v2933_v47  ;;  %v9605_v20 = vmul.f32 %v13760_v63, %v3093_v10  ;;  %v13764_v40 = vld [vmem:[#allocation147_spill] sm:$0xff]  ;;  %v13765_v44 = vld [vmem:[#allocation148_spill] sm:$0xff] }
 0x1c2   :  { %13753 = vst [vmem:[#allocation168_spill] sm:$0xff] %v9593_v57  ;;  %13755 = vst [vmem:[#allocation169_spill] sm:$0xff] %v9596_v28  ;;  %v9608_v45 = vmul.f32 %v13762_v51, %v3093_v10  ;;  %v3751_v29 = vmul.f32 %v13751_v62, %v9555_v31  ;;  %5216 = vmatpush1.bf16.msra.mxu0 %v5199_v35  ;;  %v3773_v5 = vmul.f32 %v13764_v40, %v9558_v49  ;;  %v13766_v39 = vld [vmem:[#allocation149_spill] sm:$0xff]  ;;  %v13767_v35 = vld [vmem:[#allocation144_spill] sm:$0xff] }
 0x1c3   :  { %13757 = vst [vmem:[#allocation170_spill] sm:$0xff] %v9599_v46  ;;  %13759 = vst [vmem:[#allocation171_spill] sm:$0xff] %v9602_v26  ;;  %v3775_v24 = vmul.f32 %v13764_v40, %v9562_v19  ;;  %v3813_v47 = vmul.f32 %v13765_v44, %v9565_v33  ;;  %v3815_v63 = vmul.f32 %v13765_v44, %v9568_v16 }
 0x1c4   :  { %13761 = vst [vmem:[#allocation172_spill] sm:$0xff] %v9605_v20  ;;  %13763 = vst [vmem:[#allocation173_spill] sm:$0xff] %v9608_v45  ;;  %v3853_v10 = vmul.f32 %v13766_v39, %v9571_v2  ;;  %v3855_v51 = vmul.f32 %v13766_v39, %v9574_v12  ;;  %v3893_v21 = vmul.f32 %v13767_v35, %v9583_v61 }
 0x1c5   :  { %v3895_v62 = vmul.f32 %v13767_v35, %v9586_v53  ;;  %v3789_v55 = vadd.f32 %v3773_v5, %v3749_v3  ;;  %v3791_v40 = vadd.f32 %v3775_v24, %v3751_v29  ;;  %v3933_v43 = vmul.f32 %v13768_v8, %v9593_v57 }
 0x1c6   :  { %v3935_v44 = vmul.f32 %v13768_v8, %v9596_v28  ;;  %v3973_v11 = vmul.f32 %v13769_v1, %v9599_v46  ;;  %v3975_v39 = vmul.f32 %v13769_v1, %v9602_v26  ;;  %v4013_v50 = vmul.f32 %v13770_v32, %v9605_v20  ;;  %v13771_v8 = vld [vmem:[#allocation153_spill] sm:$0xff] }
 0x1c7   :  { %v4015_v35 = vmul.f32 %v13770_v32, %v9608_v45  ;;  %v3829_v3 = vadd.f32 %v3813_v47, %v3789_v55  ;;  %v3831_v24 = vadd.f32 %v3815_v63, %v3791_v40  ;;  %v4907_v29 = vmul.f32 %v8431_v59, %v9552_v22 }
 0x1c8   :  { %v4909_v5 = vmul.f32 %v8431_v59, %v9555_v31  ;;  %v4931_v56 = vmul.f32 %v13771_v8, %v9558_v49  ;;  %v4933_v1 = vmul.f32 %v13771_v8, %v9562_v19  ;;  %v4971_v58 = vmul.f32 %v13772_v9, %v9565_v33 }
 0x1c9   :  { %v4973_v32 = vmul.f32 %v13772_v9, %v9568_v16  ;;  %v3869_v55 = vadd.f32 %v3853_v10, %v3829_v3  ;;  %v3871_v63 = vadd.f32 %v3855_v51, %v3831_v24  ;;  %v5011_v40 = vmul.f32 %v8467_v25, %v9571_v2 }
 0x1ca   :  { %v5013_v47 = vmul.f32 %v8467_v25, %v9574_v12  ;;  %v4947_v31 = vadd.f32 %v4931_v56, %v4907_v29  ;;  %v4949_v22 = vadd.f32 %v4933_v1, %v4909_v5  ;;  %v5051_v49 = vmul.f32 %v8471_v27, %v9583_v61  ;;  %v13797_v61 = vld [vmem:[#allocation63_spill] sm:$0xff]  ;;  %v13799_v12 = vld [vmem:[#allocation17_spill] sm:$0xff] }
 0x1cb   :  { %v5053_v19 = vmul.f32 %v8471_v27, %v9586_v53  ;;  %v3909_v33 = vadd.f32 %v3893_v21, %v3869_v55  ;;  %v3911_v8 = vadd.f32 %v3895_v62, %v3871_v63  ;;  %v5091_v10 = vmul.f32 %v8475_v18, %v9593_v57 }
 0x1cc   :  { %v5093_v51 = vmul.f32 %v8475_v18, %v9596_v28  ;;  %v4987_v3 = vadd.f32 %v4971_v58, %v4947_v31  ;;  %v4989_v24 = vadd.f32 %v4973_v32, %v4949_v22  ;;  %v5131_v56 = vmul.f32 %v8495_v41, %v9599_v46  ;;  %v13793_v28 = vld [vmem:[#allocation57_spill] sm:$0xff] }
 0x1cd   :  { %v5133_v1 = vmul.f32 %v8495_v41, %v9602_v26  ;;  %v3949_v29 = vadd.f32 %v3933_v43, %v3909_v33  ;;  %v3951_v5 = vadd.f32 %v3935_v44, %v3911_v8  ;;  %v5171_v21 = vmul.f32 %v8499_v36, %v9605_v20  ;;  %v13790_v26 = vld [vmem:[#allocation48_spill] sm:$0xff] }
 0x1ce   :  { %v5173_v62 = vmul.f32 %v8499_v36, %v9608_v45  ;;  %v5027_v55 = vadd.f32 %v5011_v40, %v4987_v3  ;;  %v5029_v63 = vadd.f32 %v5013_v47, %v4989_v24  ;;  %v1969_v58 = vrot.slane %v8899_v34, %v9532_v54 }
 0x1cf   :  { %v2129_v31 = vrot.slane %v8901_v48, %v9532_v54  ;;  %v3989_v32 = vadd.f32 %v3973_v11, %v3949_v29  ;;  %v3991_v22 = vadd.f32 %v3975_v39, %v3951_v5  ;;  %v2289_v33 = vrot.slane %v8903_v17, %v9532_v54 }
 0x1d0   :  { %v2449_v8 = vrot.slane %v8905_v4, %v9532_v54  ;;  %v5067_v43 = vadd.f32 %v5051_v49, %v5027_v55  ;;  %v5069_v44 = vadd.f32 %v5053_v19, %v5029_v63  ;;  %v9681_v45 = vmul.f32 %v8940_v52, %v1969_v58  ;;  %v13782_v63 = vld [vmem:[#allocation29_spill] sm:$0xff] }
 0x1d1   :  { %v9684_v40 = vmul.f32 %v8942_v37, %v1969_v58  ;;  %v4029_v47 = vadd.f32 %v4013_v50, %v3989_v32  ;;  %v4031_v3 = vadd.f32 %v4015_v35, %v3991_v22  ;;  %v9687_v24 = vmul.f32 %v8949_v23, %v2129_v31  ;;  %v13780_v50 = vld [vmem:[#allocation41_spill] sm:$0xff]  ;;  %v13784_v22 = vld [vmem:[#allocation30_spill] sm:$0xff] }
 0x1d2   :  { %13773 = vst [vmem:[#allocation154_spill] sm:$0xff] %v9681_v45  ;;  %v9690_v39 = vmul.f32 %v8964_v15, %v2129_v31  ;;  %v5107_v11 = vadd.f32 %v5091_v10, %v5067_v43  ;;  %v5109_v29 = vadd.f32 %v5093_v51, %v5069_v44  ;;  %v9693_v5 = vmul.f32 %v8981_v60, %v2289_v33  ;;  %v13783_v10 = vld [vmem:[#allocation33_spill] sm:$0xff] }
 0x1d3   :  { %13774 = vst [vmem:[#allocation174_spill] sm:$0xff] %v9684_v40  ;;  %13775 = vst [vmem:[#allocation175_spill] sm:$0xff] %v9687_v24  ;;  %v9696_v49 = vmul.f32 %v8987_v42, %v2289_v33  ;;  %v4044_v19 = vpack.c.bf16 %v4031_v3, %v4029_v47  ;;  %v9699_v55 = vmul.f32 %v13686_v7, %v2449_v8  ;;  %v13785_v33 = vld [vmem:[#allocation44_spill] sm:$0xff]  ;;  %v13787_v47 = vld [vmem:[#allocation45_spill] sm:$0xff] }
 0x1d4   :  { %13776 = vst [vmem:[#allocation176_spill] sm:$0xff] %v9690_v39  ;;  %13777 = vst [vmem:[#allocation177_spill] sm:$0xff] %v9693_v5  ;;  %v9702_v35 = vmul.f32 %v13780_v50, %v2449_v8  ;;  %v2609_v58 = vrot.slane %v13782_v63, %v9532_v54  ;;  %v5147_v31 = vadd.f32 %v5131_v56, %v5107_v11  ;;  %v13789_v8 = vld [vmem:[#allocation34_spill] sm:$0xff] }
 0x1d5   :  { %13778 = vst [vmem:[#allocation178_spill] sm:$0xff] %v9696_v49  ;;  %13779 = vst [vmem:[#allocation179_spill] sm:$0xff] %v9699_v55  ;;  %v5149_v32 = vadd.f32 %v5133_v1, %v5109_v29  ;;  %v2769_v51 = vrot.slane %v13783_v10, %v9532_v54  ;;  %v2929_v43 = vrot.slane %v13784_v22, %v9532_v54  ;;  %4060 = vmatprep.subr.bf16.mxu1 %v4044_v19  ;;  %v13791_v29 = vld [vmem:[#allocation62_spill] sm:$0xff]  ;;  %v13795_v19 = vld [vmem:[#allocation59_spill] sm:$0xff] }
 0x1d6   :  { %13781 = vst [vmem:[#allocation41_spill] sm:$0xff] %v9702_v35  ;;  %v9711_v44 = vmul.f32 %v13785_v33, %v2609_v58  ;;  %v9714_v3 = vmul.f32 %v13787_v47, %v2609_v58  ;;  %v3089_v20 = vrot.slane %v13789_v8, %v9532_v54  ;;  %v3748_v56 = vmul.f32 %v13790_v26, %v9681_v45  ;;  %v13801_v54 = vld [vmem:[#allocation18_spill] sm:$0xff]  ;;  %v13808_v47 = vld [vmem:[#allocation91_spill] sm:$0xff] }
 0x1d7   :  { %v5187_v1 = vadd.f32 %v5171_v21, %v5147_v31  ;;  %v5189_v11 = vadd.f32 %v5173_v62, %v5149_v32  ;;  %v9721_v46 = vmul.f32 %v13791_v29, %v2769_v51  ;;  %v9724_v57 = vmul.f32 %v13793_v28, %v2769_v51  ;;  %v13803_v31 = vld [vmem:[#allocation77_spill] sm:$0xff] }
 0x1d8   :  { %13786 = vst [vmem:[#allocation180_spill] sm:$0xff] %v9711_v44  ;;  %13788 = vst [vmem:[#allocation181_spill] sm:$0xff] %v9714_v3  ;;  %v9727_v53 = vmul.f32 %v13795_v19, %v2929_v43  ;;  %v9730_v58 = vmul.f32 %v13797_v61, %v2929_v43  ;;  %v9733_v2 = vmul.f32 %v13799_v12, %v3089_v20  ;;  %v13804_v19 = vld [vmem:[#allocation49_spill] sm:$0xff]  ;;  %v13805_v61 = vld [vmem:[#allocation79_spill] sm:$0xff] }
 0x1d9   :  { %13792 = vst [vmem:[#allocation182_spill] sm:$0xff] %v9721_v46  ;;  %13794 = vst [vmem:[#allocation183_spill] sm:$0xff] %v9724_v57  ;;  %v9736_v16 = vmul.f32 %v13801_v54, %v3089_v20  ;;  %v5202_v21 = vpack.c.bf16 %v5189_v11, %v5187_v1  ;;  %v3750_v62 = vmul.f32 %v13790_v26, %v9684_v40  ;;  %v13806_v28 = vld [vmem:[#allocation81_spill] sm:$0xff]  ;;  %v13807_v26 = vld [vmem:[#allocation87_spill] sm:$0xff] }
 0x1da   :  { %13796 = vst [vmem:[#allocation184_spill] sm:$0xff] %v9727_v53  ;;  %13798 = vst [vmem:[#allocation185_spill] sm:$0xff] %v9730_v58  ;;  %v3772_v32 = vmul.f32 %v13803_v31, %v9687_v24  ;;  %v3774_v51 = vmul.f32 %v13803_v31, %v9690_v39  ;;  %v3812_v43 = vmul.f32 %v13804_v19, %v9693_v5 }
 0x1db   :  { %13800 = vst [vmem:[#allocation186_spill] sm:$0xff] %v9733_v2  ;;  %13802 = vst [vmem:[#allocation187_spill] sm:$0xff] %v9736_v16  ;;  %v3814_v12 = vmul.f32 %v13804_v19, %v9696_v49  ;;  %v3852_v20 = vmul.f32 %v13805_v61, %v9699_v55  ;;  %v3854_v1 = vmul.f32 %v13805_v61, %v9702_v35  ;;  %5217 = vmatprep.subr.bf16.mxu0 %v5202_v21  ;;  %v13810_v61 = vld [vmem:[#allocation96_spill] sm:$0xff] }
 0x1dc   :  { %v3788_v11 = vadd.f32 %v3772_v32, %v3748_v56  ;;  %v3790_v54 = vadd.f32 %v3774_v51, %v3750_v62  ;;  %v3892_v29 = vmul.f32 %v13806_v28, %v9711_v44  ;;  %v3894_v31 = vmul.f32 %v13806_v28, %v9714_v3  ;;  %v13809_v32 = vld [vmem:[#allocation92_spill] sm:$0xff] }
 0x1dd   :  { %v3932_v8 = vmul.f32 %v13807_v26, %v9721_v46  ;;  %v3934_v19 = vmul.f32 %v13807_v26, %v9724_v57  ;;  %v3972_v33 = vmul.f32 %v13808_v47, %v9727_v53  ;;  %v3974_v21 = vmul.f32 %v13808_v47, %v9730_v58 }
 0x1de   :  { %v3828_v56 = vadd.f32 %v3812_v43, %v3788_v11  ;;  %v3830_v62 = vadd.f32 %v3814_v12, %v3790_v54  ;;  %v4012_v51 = vmul.f32 %v13809_v32, %v9733_v2  ;;  %v4014_v28 = vmul.f32 %v13809_v32, %v9736_v16 }
 0x1df   :  { %v4906_v22 = vmul.f32 %v13810_v61, %v9681_v45  ;;  %v4908_v26 = vmul.f32 %v13810_v61, %v9684_v40  ;;  %v4930_v10 = vmul.f32 %v9217_v30, %v9687_v24  ;;  %v4932_v47 = vmul.f32 %v9217_v30, %v9690_v39 }
 0x1e0   :  { %v3868_v43 = vadd.f32 %v3852_v20, %v3828_v56  ;;  %v3870_v54 = vadd.f32 %v3854_v1, %v3830_v62  ;;  %v4970_v12 = vmul.f32 %v9221_v38, %v9693_v5  ;;  %v4972_v11 = vmul.f32 %v9221_v38, %v9696_v49  ;;  %v13860_v5 = vld [vmem:[#allocation152_spill] sm:$0xff] }
 0x1e1   :  { %v4946_v32 = vadd.f32 %v4930_v10, %v4906_v22  ;;  %v4948_v63 = vadd.f32 %v4932_v47, %v4908_v26  ;;  %v5010_v45 = vmul.f32 %v9225_v13, %v9699_v55  ;;  %v5012_v40 = vmul.f32 %v9225_v13, %v9702_v35  ;;  %v13858_v35 = vld [vmem:[#allocation150_spill] sm:$0xff] }
 0x1e2   :  { %v3908_v24 = vadd.f32 %v3892_v29, %v3868_v43  ;;  %v3910_v61 = vadd.f32 %v3894_v31, %v3870_v54  ;;  %v5050_v20 = vmul.f32 %v9229_v6, %v9711_v44  ;;  %v5052_v1 = vmul.f32 %v9229_v6, %v9714_v3  ;;  %v13811_v3 = vld [vmem:[#allocation51_spill] sm:$0xff]  ;;  %v13817_v44 = vld [vmem:[#allocation80_spill] sm:$0xff] }
 0x1e3   :  { %v4986_v56 = vadd.f32 %v4970_v12, %v4946_v32  ;;  %v4988_v62 = vadd.f32 %v4972_v11, %v4948_v63  ;;  %v5090_v10 = vmul.f32 %v9233_v14, %v9721_v46  ;;  %v5092_v26 = vmul.f32 %v9233_v14, %v9724_v57  ;;  %v13812_v46 = vld [vmem:[#allocation156_spill] sm:$0xff]  ;;  %v13813_v57 = vld [vmem:[#allocation22_spill] sm:$0xff] }
 0x1e4   :  { %v3948_v22 = vadd.f32 %v3932_v8, %v3908_v24  ;;  %v3950_v47 = vadd.f32 %v3934_v19, %v3910_v61  ;;  %v5130_v29 = vmul.f32 %v9261_v0, %v9727_v53  ;;  %v5132_v31 = vmul.f32 %v9261_v0, %v9730_v58  ;;  %v13814_v61 = vld [vmem:[#allocation14_spill] sm:$0xff]  ;;  %v13815_v58 = vld [vmem:[#allocation65_spill] sm:$0xff] }
 0x1e5   :  { %v5026_v43 = vadd.f32 %v5010_v45, %v4986_v56  ;;  %v5028_v54 = vadd.f32 %v5012_v40, %v4988_v62  ;;  %v5170_v32 = vmul.f32 %v13811_v3, %v9733_v2  ;;  %v5172_v63 = vmul.f32 %v13811_v3, %v9736_v16  ;;  %v13816_v40 = vld [vmem:[#allocation66_spill] sm:$0xff] }
 0x1e6   :  { %v3988_v12 = vadd.f32 %v3972_v33, %v3948_v22  ;;  %v3990_v11 = vadd.f32 %v3974_v21, %v3950_v47  ;;  %v1989_v24 = vrot.slane %v13813_v57, %v13812_v46  ;;  %v2149_v8 = vrot.slane %v13814_v61, %v13812_v46  ;;  %v13819_v33 = vld [vmem:[#allocation83_spill] sm:$0xff]  ;;  %v13821_v47 = vld [vmem:[#allocation82_spill] sm:$0xff] }
 0x1e7   :  { %v5066_v19 = vadd.f32 %v5050_v20, %v5026_v43  ;;  %v5068_v53 = vadd.f32 %v5052_v1, %v5028_v54  ;;  %v2309_v45 = vrot.slane %v13815_v58, %v13812_v46  ;;  %v2469_v56 = vrot.slane %v13816_v40, %v13812_v46  ;;  %v13823_v20 = vld [vmem:[#allocation50_spill] sm:$0xff]  ;;  %v13825_v43 = vld [vmem:[#allocation89_spill] sm:$0xff] }
 0x1e8   :  { %v4028_v62 = vadd.f32 %v4012_v51, %v3988_v12  ;;  %v4030_v2 = vadd.f32 %v4014_v28, %v3990_v11  ;;  %v9809_v16 = vmul.f32 %v13817_v44, %v1989_v24  ;;  %v9812_v21 = vmul.f32 %v13819_v33, %v1989_v24  ;;  %v13827_v51 = vld [vmem:[#allocation90_spill] sm:$0xff]  ;;  %v13829_v44 = vld [vmem:[#allocation52_spill] sm:$0xff]  ;;  %v13835_v40 = vld [vmem:[#allocation69_spill] sm:$0xff] }
 0x1e9   :  { %v5106_v57 = vadd.f32 %v5090_v10, %v5066_v19  ;;  %v5108_v22 = vadd.f32 %v5092_v26, %v5068_v53  ;;  %v9815_v61 = vmul.f32 %v13821_v47, %v2149_v8  ;;  %v9818_v1 = vmul.f32 %v13823_v20, %v2149_v8  ;;  %v13831_v10 = vld [vmem:[#allocation100_spill] sm:$0xff]  ;;  %v13833_v26 = vld [vmem:[#allocation67_spill] sm:$0xff] }
 0x1ea   :  { %13818 = vst [vmem:[#allocation22_spill] sm:$0xff] %v9809_v16  ;;  %13820 = vst [vmem:[#allocation14_spill] sm:$0xff] %v9812_v21  ;;  %v4043_v58 = vpack.c.bf16 %v4030_v2, %v4028_v62  ;;  %v9821_v54 = vmul.f32 %v13825_v43, %v2309_v45  ;;  %v9824_v28 = vmul.f32 %v13827_v51, %v2309_v45  ;;  %v13834_v2 = vld [vmem:[#allocation68_spill] sm:$0xff]  ;;  %v13836_v45 = vld [vmem:[#allocation70_spill] sm:$0xff] }
 0x1eb   :  { %13822 = vst [vmem:[#allocation65_spill] sm:$0xff] %v9815_v61  ;;  %13824 = vst [vmem:[#allocation66_spill] sm:$0xff] %v9818_v1  ;;  %v9827_v12 = vmul.f32 %v13829_v44, %v2469_v56  ;;  %v5146_v11 = vadd.f32 %v5130_v29, %v5106_v57  ;;  %v5148_v24 = vadd.f32 %v5132_v31, %v5108_v22  ;;  %v13837_v47 = vld [vmem:[#allocation143_spill] sm:$0xff]  ;;  %v13844_v44 = vld [vmem:[#allocation117_spill] sm:$0xff] }
 0x1ec   :  { %13826 = vst [vmem:[#allocation80_spill] sm:$0xff] %v9821_v54  ;;  %13828 = vst [vmem:[#allocation83_spill] sm:$0xff] %v9824_v28  ;;  %v9830_v53 = vmul.f32 %v13831_v10, %v2469_v56  ;;  %v2629_v19 = vrot.slane %v13833_v26, %v13812_v46  ;;  %4061 = vmatpush1.bf16.msra.mxu1 %v4043_v58  ;;  %v2789_v8 = vrot.slane %v13834_v2, %v13812_v46  ;;  %v13838_v56 = vld [vmem:[#allocation104_spill] sm:$0xff]  ;;  %v13840_v20 = vld [vmem:[#allocation107_spill] sm:$0xff] }
 0x1ed   :  { %13830 = vst [vmem:[#allocation82_spill] sm:$0xff] %v9827_v12  ;;  %v2949_v62 = vrot.slane %v13835_v40, %v13812_v46  ;;  %v3109_v33 = vrot.slane %v13836_v45, %v13812_v46  ;;  %v3753_v29 = vmul.f32 %v13837_v47, %v9809_v16  ;;  %v5186_v31 = vadd.f32 %v5170_v32, %v5146_v11  ;;  %v13842_v58 = vld [vmem:[#allocation113_spill] sm:$0xff]  ;;  %v13846_v26 = vld [vmem:[#allocation127_spill] sm:$0xff] }
 0x1ee   :  { %13832 = vst [vmem:[#allocation50_spill] sm:$0xff] %v9830_v53  ;;  %v5188_v57 = vadd.f32 %v5172_v63, %v5148_v24  ;;  %v9843_v22 = vmul.f32 %v13838_v56, %v2629_v19  ;;  %v9846_v43 = vmul.f32 %v13840_v20, %v2629_v19  ;;  %v9849_v51 = vmul.f32 %v13842_v58, %v2789_v8  ;;  %v13848_v40 = vld [vmem:[#allocation55_spill] sm:$0xff]  ;;  %v13850_v63 = vld [vmem:[#allocation24_spill] sm:$0xff] }
 0x1ef   :  { %v9852_v10 = vmul.f32 %v13844_v44, %v2789_v8  ;;  %v9855_v2 = vmul.f32 %v13846_v26, %v2949_v62  ;;  %v9858_v45 = vmul.f32 %v13848_v40, %v2949_v62  ;;  %v9861_v11 = vmul.f32 %v13850_v63, %v3109_v33  ;;  %v13852_v24 = vld [vmem:[#allocation131_spill] sm:$0xff]  ;;  %v13855_v44 = vld [vmem:[#allocation148_spill] sm:$0xff] }
 0x1f0   :  { %13839 = vst [vmem:[#allocation89_spill] sm:$0xff] %v9843_v22  ;;  %13841 = vst [vmem:[#allocation90_spill] sm:$0xff] %v9846_v43  ;;  %v5201_v32 = vpack.c.bf16 %v5188_v57, %v5186_v31  ;;  %v9864_v56 = vmul.f32 %v13852_v24, %v3109_v33  ;;  %v3755_v19 = vmul.f32 %v13837_v47, %v9812_v21  ;;  %v13854_v20 = vld [vmem:[#allocation147_spill] sm:$0xff]  ;;  %v13856_v57 = vld [vmem:[#allocation149_spill] sm:$0xff] }
 0x1f1   :  { %13843 = vst [vmem:[#allocation52_spill] sm:$0xff] %v9849_v51  ;;  %13845 = vst [vmem:[#allocation100_spill] sm:$0xff] %v9852_v10  ;;  %v3777_v8 = vmul.f32 %v13854_v20, %v9815_v61  ;;  %v3779_v58 = vmul.f32 %v13854_v20, %v9818_v1  ;;  %v3817_v62 = vmul.f32 %v13855_v44, %v9821_v54  ;;  %v13857_v47 = vld [vmem:[#allocation144_spill] sm:$0xff] }
 0x1f2   :  { %13847 = vst [vmem:[#allocation67_spill] sm:$0xff] %v9855_v2  ;;  %13849 = vst [vmem:[#allocation68_spill] sm:$0xff] %v9858_v45  ;;  %v3819_v31 = vmul.f32 %v13855_v44, %v9824_v28  ;;  %5218 = vmatpush1.bf16.msra.mxu0 %v5201_v32  ;;  %v3857_v33 = vmul.f32 %v13856_v57, %v9827_v12  ;;  %v3859_v26 = vmul.f32 %v13856_v57, %v9830_v53  ;;  %v13859_v44 = vld [vmem:[#allocation151_spill] sm:$0xff] }
 0x1f3   :  { %13851 = vst [vmem:[#allocation69_spill] sm:$0xff] %v9861_v11  ;;  %13853 = vst [vmem:[#allocation70_spill] sm:$0xff] %v9864_v56  ;;  %v3897_v40 = vmul.f32 %v13857_v47, %v9843_v22  ;;  %v3899_v63 = vmul.f32 %v13857_v47, %v9846_v43  ;;  %v3793_v24 = vadd.f32 %v3777_v8, %v3753_v29 }
 0x1f4   :  { %v3795_v20 = vadd.f32 %v3779_v58, %v3755_v19  ;;  %v3937_v55 = vmul.f32 %v13858_v35, %v9849_v51  ;;  %v3939_v32 = vmul.f32 %v13858_v35, %v9852_v10  ;;  %v3977_v49 = vmul.f32 %v13859_v44, %v9855_v2  ;;  %v13861_v58 = vld [vmem:[#allocation153_spill] sm:$0xff] }
 0x1f5   :  { %v3979_v57 = vmul.f32 %v13859_v44, %v9858_v45  ;;  %v4017_v39 = vmul.f32 %v13860_v5, %v9861_v11  ;;  %v4019_v47 = vmul.f32 %v13860_v5, %v9864_v56  ;;  %v3833_v29 = vadd.f32 %v3817_v62, %v3793_v24 }
 0x1f6   :  { %v3835_v19 = vadd.f32 %v3819_v31, %v3795_v20  ;;  %v4911_v8 = vmul.f32 %v8431_v59, %v9809_v16  ;;  %v4913_v35 = vmul.f32 %v8431_v59, %v9812_v21  ;;  %v4935_v3 = vmul.f32 %v13861_v58, %v9815_v61 }
 0x1f7   :  { %v4937_v44 = vmul.f32 %v13861_v58, %v9818_v1  ;;  %v4975_v0 = vmul.f32 %v13772_v9, %v9821_v54  ;;  %v4977_v5 = vmul.f32 %v13772_v9, %v9824_v28  ;;  %v3873_v62 = vadd.f32 %v3857_v33, %v3833_v29 }
 0x1f8   :  { %v3875_v31 = vadd.f32 %v3859_v26, %v3835_v19  ;;  %v5015_v24 = vmul.f32 %v8467_v25, %v9827_v12  ;;  %v5017_v59 = vmul.f32 %v8467_v25, %v9830_v53  ;;  %v4951_v20 = vadd.f32 %v4935_v3, %v4911_v8 }
 0x1f9   :  { %v4953_v21 = vadd.f32 %v4937_v44, %v4913_v35  ;;  %v5055_v61 = vmul.f32 %v8471_v27, %v9843_v22  ;;  %v5057_v58 = vmul.f32 %v8471_v27, %v9846_v43  ;;  %v3913_v54 = vadd.f32 %v3897_v40, %v3873_v62 }
 0x1fa   :  { %v3915_v1 = vadd.f32 %v3899_v63, %v3875_v31  ;;  %v5095_v9 = vmul.f32 %v8475_v18, %v9849_v51  ;;  %v5097_v33 = vmul.f32 %v8475_v18, %v9852_v10  ;;  %v4991_v26 = vadd.f32 %v4975_v0, %v4951_v20  ;;  %v13871_v31 = vld [vmem:[#allocation33_spill] sm:$0xff]  ;;  %v13951_v51 = vld [vmem:[#allocation43_spill] sm:$0xff] }
 0x1fb   :  { %v4993_v29 = vadd.f32 %v4977_v5, %v4953_v21  ;;  %v5135_v25 = vmul.f32 %v8495_v41, %v9855_v2  ;;  %v5137_v3 = vmul.f32 %v8495_v41, %v9858_v45  ;;  %v3953_v19 = vadd.f32 %v3937_v55, %v3913_v54  ;;  %v13950_v2 = vld [vmem:[#allocation42_spill] sm:$0xff] }
 0x1fc   :  { %v3955_v8 = vadd.f32 %v3939_v32, %v3915_v1  ;;  %v5175_v27 = vmul.f32 %v8499_v36, %v9861_v11  ;;  %v5177_v40 = vmul.f32 %v8499_v36, %v9864_v56  ;;  %v5031_v63 = vadd.f32 %v5015_v24, %v4991_v26  ;;  %v13949_v11 = vld [vmem:[#allocation39_spill] sm:$0xff] }
 0x1fd   :  { %v5033_v35 = vadd.f32 %v5017_v59, %v4993_v29  ;;  %v1985_v18 = vrot.slane %v8899_v34, %v13812_v46  ;;  %v2145_v0 = vrot.slane %v8901_v48, %v13812_v46  ;;  %v3993_v21 = vadd.f32 %v3977_v49, %v3953_v19 }
 0x1fe   :  { %v3995_v44 = vadd.f32 %v3979_v57, %v3955_v8  ;;  %v2305_v41 = vrot.slane %v8903_v17, %v13812_v46  ;;  %v2465_v55 = vrot.slane %v8905_v4, %v13812_v46  ;;  %v5071_v1 = vadd.f32 %v5055_v61, %v5031_v63  ;;  %v13881_v8 = vld [vmem:[#allocation57_spill] sm:$0xff] }
 0x1ff   :  { %v5073_v54 = vadd.f32 %v5057_v58, %v5033_v35  ;;  %v9937_v36 = vmul.f32 %v8940_v52, %v1985_v18  ;;  %v9940_v32 = vmul.f32 %v8942_v37, %v1985_v18  ;;  %v4033_v34 = vadd.f32 %v4017_v39, %v3993_v21  ;;  %v13883_v35 = vld [vmem:[#allocation59_spill] sm:$0xff] }
 0x200   :  { %v4035_v5 = vadd.f32 %v4019_v47, %v3995_v44  ;;  %v9943_v48 = vmul.f32 %v8949_v23, %v2145_v0  ;;  %v9946_v49 = vmul.f32 %v8964_v15, %v2145_v0  ;;  %v5111_v17 = vadd.f32 %v5095_v9, %v5071_v1  ;;  %v13870_v23 = vld [vmem:[#allocation29_spill] sm:$0xff]  ;;  %v13885_v0 = vld [vmem:[#allocation63_spill] sm:$0xff] }
 0x201   :  { %13862 = vst [vmem:[#allocation143_spill] sm:$0xff] %v9937_v36  ;;  %13863 = vst [vmem:[#allocation104_spill] sm:$0xff] %v9940_v32  ;;  %v5113_v57 = vadd.f32 %v5097_v33, %v5073_v54  ;;  %v9949_v4 = vmul.f32 %v8981_v60, %v2305_v41  ;;  %v9952_v61 = vmul.f32 %v8987_v42, %v2305_v41  ;;  %v13872_v60 = vld [vmem:[#allocation30_spill] sm:$0xff]  ;;  %v13873_v42 = vld [vmem:[#allocation44_spill] sm:$0xff] }
 0x202   :  { %13864 = vst [vmem:[#allocation107_spill] sm:$0xff] %v9943_v48  ;;  %13865 = vst [vmem:[#allocation113_spill] sm:$0xff] %v9946_v49  ;;  %v4046_v52 = vpack.c.bf16 %v4035_v5, %v4033_v34  ;;  %v9955_v37 = vmul.f32 %v13686_v7, %v2465_v55  ;;  %v9958_v39 = vmul.f32 %v13780_v50, %v2465_v55  ;;  %v13875_v7 = vld [vmem:[#allocation45_spill] sm:$0xff]  ;;  %v13877_v50 = vld [vmem:[#allocation34_spill] sm:$0xff] }
 0x203   :  { %13866 = vst [vmem:[#allocation117_spill] sm:$0xff] %v9949_v4  ;;  %13867 = vst [vmem:[#allocation127_spill] sm:$0xff] %v9952_v61  ;;  %v2625_v47 = vrot.slane %v13870_v23, %v13812_v46  ;;  %v5151_v15 = vadd.f32 %v5135_v25, %v5111_v17  ;;  %v5153_v62 = vadd.f32 %v5137_v3, %v5113_v57  ;;  %v13878_v33 = vld [vmem:[#allocation48_spill] sm:$0xff]  ;;  %v13879_v3 = vld [vmem:[#allocation62_spill] sm:$0xff] }
 0x204   :  { %13868 = vst [vmem:[#allocation55_spill] sm:$0xff] %v9955_v37  ;;  %13869 = vst [vmem:[#allocation24_spill] sm:$0xff] %v9958_v39  ;;  %v2785_v24 = vrot.slane %v13871_v31, %v13812_v46  ;;  %v2945_v59 = vrot.slane %v13872_v60, %v13812_v46  ;;  %4062 = vmatprep.subr.bf16.mxu1 %v4046_v52  ;;  %v3105_v9 = vrot.slane %v13877_v50, %v13812_v46  ;;  %v13887_v44 = vld [vmem:[#allocation17_spill] sm:$0xff]  ;;  %v13889_v55 = vld [vmem:[#allocation18_spill] sm:$0xff] }
 0x205   :  { %v9967_v20 = vmul.f32 %v13873_v42, %v2625_v47  ;;  %v9970_v58 = vmul.f32 %v13875_v7, %v2625_v47  ;;  %v3752_v26 = vmul.f32 %v13878_v33, %v9937_v36  ;;  %v5191_v29 = vadd.f32 %v5175_v27, %v5151_v15  ;;  %v13891_v54 = vld [vmem:[#allocation77_spill] sm:$0xff]  ;;  %v13893_v23 = vld [vmem:[#allocation79_spill] sm:$0xff] }
 0x206   :  { %v5193_v25 = vadd.f32 %v5177_v40, %v5153_v62  ;;  %v9977_v19 = vmul.f32 %v13879_v3, %v2785_v24  ;;  %v9980_v63 = vmul.f32 %v13881_v8, %v2785_v24  ;;  %v9983_v18 = vmul.f32 %v13883_v35, %v2945_v59  ;;  %v13892_v17 = vld [vmem:[#allocation49_spill] sm:$0xff]  ;;  %v13895_v42 = vld [vmem:[#allocation87_spill] sm:$0xff]  ;;  %v13897_v3 = vld [vmem:[#allocation92_spill] sm:$0xff] }
 0x207   :  { %13874 = vst [vmem:[#allocation131_spill] sm:$0xff] %v9967_v20  ;;  %13876 = vst [vmem:[#allocation147_spill] sm:$0xff] %v9970_v58  ;;  %v9986_v21 = vmul.f32 %v13885_v0, %v2945_v59  ;;  %v9989_v41 = vmul.f32 %v13887_v44, %v3105_v9  ;;  %v9992_v1 = vmul.f32 %v13889_v55, %v3105_v9  ;;  %v13894_v24 = vld [vmem:[#allocation81_spill] sm:$0xff]  ;;  %v13896_v9 = vld [vmem:[#allocation91_spill] sm:$0xff] }
 0x208   :  { %13880 = vst [vmem:[#allocation148_spill] sm:$0xff] %v9977_v19  ;;  %13882 = vst [vmem:[#allocation149_spill] sm:$0xff] %v9980_v63  ;;  %v5204_v27 = vpack.c.bf16 %v5193_v25, %v5191_v29  ;;  %v3754_v40 = vmul.f32 %v13878_v33, %v9940_v32  ;;  %v3776_v34 = vmul.f32 %v13891_v54, %v9943_v48  ;;  %v13898_v0 = vld [vmem:[#allocation96_spill] sm:$0xff]  ;;  %v13915_v46 = vld [vmem:[#allocation93_spill] sm:$0xff] }
 0x209   :  { %13884 = vst [vmem:[#allocation144_spill] sm:$0xff] %v9983_v18  ;;  %13886 = vst [vmem:[#allocation150_spill] sm:$0xff] %v9986_v21  ;;  %v3778_v5 = vmul.f32 %v13891_v54, %v9946_v49  ;;  %v3816_v57 = vmul.f32 %v13892_v17, %v9949_v4  ;;  %v3818_v52 = vmul.f32 %v13892_v17, %v9952_v61 }
 0x20a   :  { %13888 = vst [vmem:[#allocation151_spill] sm:$0xff] %v9989_v41  ;;  %13890 = vst [vmem:[#allocation152_spill] sm:$0xff] %v9992_v1  ;;  %v3856_v47 = vmul.f32 %v13893_v23, %v9955_v37  ;;  %v3858_v15 = vmul.f32 %v13893_v23, %v9958_v39  ;;  %5219 = vmatprep.subr.bf16.mxu0 %v5204_v27  ;;  %v3792_v62 = vadd.f32 %v3776_v34, %v3752_v26 }
 0x20b   :  { %v3794_v31 = vadd.f32 %v3778_v5, %v3754_v40  ;;  %v3896_v60 = vmul.f32 %v13894_v24, %v9967_v20  ;;  %v3898_v59 = vmul.f32 %v13894_v24, %v9970_v58  ;;  %v3936_v7 = vmul.f32 %v13895_v42, %v9977_v19 }
 0x20c   :  { %v3938_v50 = vmul.f32 %v13895_v42, %v9980_v63  ;;  %v3976_v33 = vmul.f32 %v13896_v9, %v9983_v18  ;;  %v3978_v29 = vmul.f32 %v13896_v9, %v9986_v21  ;;  %v3832_v26 = vadd.f32 %v3816_v57, %v3792_v62 }
 0x20d   :  { %v3834_v25 = vadd.f32 %v3818_v52, %v3794_v31  ;;  %v4016_v8 = vmul.f32 %v13897_v3, %v9989_v41  ;;  %v4018_v35 = vmul.f32 %v13897_v3, %v9992_v1  ;;  %v4910_v44 = vmul.f32 %v13898_v0, %v9937_v36 }
 0x20e   :  { %v4912_v55 = vmul.f32 %v13898_v0, %v9940_v32  ;;  %v4934_v27 = vmul.f32 %v9217_v30, %v9943_v48  ;;  %v4936_v40 = vmul.f32 %v9217_v30, %v9946_v49  ;;  %v3872_v54 = vadd.f32 %v3856_v47, %v3832_v26  ;;  %v13931_v48 = vld [vmem:[#allocation135_spill] sm:$0xff] }
 0x20f   :  { %v3874_v34 = vadd.f32 %v3858_v15, %v3834_v25  ;;  %v4974_v5 = vmul.f32 %v9221_v38, %v9949_v4  ;;  %v4976_v17 = vmul.f32 %v9221_v38, %v9952_v61  ;;  %v5014_v23 = vmul.f32 %v9225_v13, %v9955_v37 }
 0x210   :  { %v4950_v57 = vadd.f32 %v4934_v27, %v4910_v44  ;;  %v4952_v52 = vadd.f32 %v4936_v40, %v4912_v55  ;;  %v5016_v62 = vmul.f32 %v9225_v13, %v9958_v39  ;;  %v3912_v31 = vadd.f32 %v3896_v60, %v3872_v54  ;;  %v13899_v13 = vld [vmem:[#allocation94_spill] sm:$0xff]  ;;  %v13901_v54 = vld [vmem:[#allocation84_spill] sm:$0xff] }
 0x211   :  { %v3914_v24 = vadd.f32 %v3898_v59, %v3874_v34  ;;  %v5054_v30 = vmul.f32 %v9229_v6, %v9967_v20  ;;  %v5056_v47 = vmul.f32 %v9229_v6, %v9970_v58  ;;  %v5094_v38 = vmul.f32 %v9233_v14, %v9977_v19  ;;  %v13900_v6 = vld [vmem:[#allocation51_spill] sm:$0xff]  ;;  %v13921_v19 = vld [vmem:[#allocation141_spill] sm:$0xff] }
 0x212   :  { %v4990_v15 = vadd.f32 %v4974_v5, %v4950_v57  ;;  %v4992_v42 = vadd.f32 %v4976_v17, %v4952_v52  ;;  %v5096_v9 = vmul.f32 %v9233_v14, %v9980_v63  ;;  %v3952_v26 = vadd.f32 %v3936_v7, %v3912_v31  ;;  %v13902_v14 = vld [vmem:[#allocation157_spill] sm:$0xff]  ;;  %v13904_v57 = vld [vmem:[#allocation15_spill] sm:$0xff] }
 0x213   :  { %v3954_v25 = vadd.f32 %v3938_v50, %v3914_v24  ;;  %v5134_v60 = vmul.f32 %v13899_v13, %v9983_v18  ;;  %v5136_v59 = vmul.f32 %v13899_v13, %v9986_v21  ;;  %v5174_v44 = vmul.f32 %v13900_v6, %v9989_v41  ;;  %v13903_v50 = vld [vmem:[#allocation86_spill] sm:$0xff]  ;;  %v13905_v52 = vld [vmem:[#allocation139_spill] sm:$0xff]  ;;  %v13919_v18 = vld [vmem:[#allocation108_spill] sm:$0xff] }
 0x214   :  { %v5030_v3 = vadd.f32 %v5014_v23, %v4990_v15  ;;  %v5032_v0 = vadd.f32 %v5016_v62, %v4992_v42  ;;  %v5176_v55 = vmul.f32 %v13900_v6, %v9992_v1  ;;  %v3992_v27 = vadd.f32 %v3976_v33, %v3952_v26  ;;  %v13907_v62 = vld [vmem:[#allocation140_spill] sm:$0xff]  ;;  %v13909_v33 = vld [vmem:[#allocation145_spill] sm:$0xff]  ;;  %v13911_v42 = vld [vmem:[#allocation138_spill] sm:$0xff] }
 0x215   :  { %v3994_v40 = vadd.f32 %v3978_v29, %v3954_v25  ;;  %v3315_v7 = vmul.f32 %v13902_v14, %v13901_v54  ;;  %v3317_v34 = vmul.f32 %v13902_v14, %v13903_v50  ;;  %v10062_v23 = vrot.slane %v13905_v52, %v13904_v57  ;;  %v13913_v25 = vld [vmem:[#allocation85_spill] sm:$0xff] }
 0x216   :  { %v5070_v5 = vadd.f32 %v5054_v30, %v5030_v3  ;;  %v5072_v17 = vadd.f32 %v5056_v47, %v5032_v0  ;;  %v10066_v31 = vrot.slane %v13907_v62, %v13904_v57  ;;  %v4032_v24 = vadd.f32 %v4016_v8, %v3992_v27  ;;  %v13914_v3 = vld [vmem:[#allocation88_spill] sm:$0xff] }
 0x217   :  { %13906 = vst [vmem:[#allocation153_spill] sm:$0xff] %v10062_v23  ;;  %v4034_v15 = vadd.f32 %v4018_v35, %v3994_v40  ;;  %v10070_v29 = vrot.slane %v13909_v33, %v13904_v57  ;;  %v10074_v26 = vrot.slane %v13911_v42, %v13904_v57  ;;  %v3355_v13 = vmul.f32 %v10062_v23, %v13913_v25  ;;  %v13916_v35 = vld [vmem:[#allocation95_spill] sm:$0xff]  ;;  %v13917_v40 = vld [vmem:[#allocation101_spill] sm:$0xff] }
 0x218   :  { %13908 = vst [vmem:[#allocation29_spill] sm:$0xff] %v10066_v31  ;;  %v5110_v30 = vadd.f32 %v5094_v38, %v5070_v5  ;;  %v5112_v47 = vadd.f32 %v5096_v9, %v5072_v17  ;;  %v3357_v0 = vmul.f32 %v10062_v23, %v13914_v3  ;;  %v3411_v8 = vmul.f32 %v10066_v31, %v13915_v46  ;;  %v13918_v5 = vld [vmem:[#allocation105_spill] sm:$0xff] }
 0x219   :  { %13910 = vst [vmem:[#allocation33_spill] sm:$0xff] %v10070_v29  ;;  %13912 = vst [vmem:[#allocation30_spill] sm:$0xff] %v10074_v26  ;;  %v4045_v6 = vpack.c.bf16 %v4034_v15, %v4032_v24  ;;  %v3413_v27 = vmul.f32 %v10066_v31, %v13916_v35  ;;  %v3467_v1 = vmul.f32 %v10070_v29, %v13917_v40  ;;  %v13920_v15 = vld [vmem:[#allocation109_spill] sm:$0xff] }
 0x21a   :  { %v5150_v41 = vadd.f32 %v5134_v60, %v5110_v30  ;;  %v5152_v21 = vadd.f32 %v5136_v59, %v5112_v47  ;;  %v3371_v38 = vadd.f32 %v3355_v13, %v3315_v7  ;;  %v3373_v9 = vadd.f32 %v3357_v0, %v3317_v34  ;;  %v13923_v7 = vld [vmem:[#allocation118_spill] sm:$0xff]  ;;  %v13924_v30 = vld [vmem:[#allocation121_spill] sm:$0xff] }
 0x21b   :  { %4063 = vmatpush1.bf16.msra.mxu1 %v4045_v6  ;;  %v3469_v17 = vmul.f32 %v10070_v29, %v13918_v5  ;;  %v3523_v24 = vmul.f32 %v10074_v26, %v13919_v18  ;;  %v3525_v63 = vmul.f32 %v10074_v26, %v13920_v15  ;;  %v10094_v58 = vrot.slane %v13921_v19, %v13904_v57  ;;  %v13925_v13 = vld [vmem:[#allocation142_spill] sm:$0xff] }
 0x21c   :  { %v5190_v20 = vadd.f32 %v5174_v44, %v5150_v41  ;;  %v5192_v39 = vadd.f32 %v5176_v55, %v5152_v21  ;;  %v3427_v60 = vadd.f32 %v3411_v8, %v3371_v38  ;;  %v3429_v59 = vadd.f32 %v3413_v27, %v3373_v9  ;;  %v13926_v6 = vld [vmem:[#allocation146_spill] sm:$0xff]  ;;  %v13927_v21 = vld [vmem:[#allocation13_spill] sm:$0xff]  ;;  %v13930_v9 = vld [vmem:[#allocation132_spill] sm:$0xff] }
 0x21d   :  { %13922 = vst [vmem:[#allocation44_spill] sm:$0xff] %v10094_v58  ;;  %v3579_v34 = vmul.f32 %v10094_v58, %v13923_v7  ;;  %v3581_v47 = vmul.f32 %v10094_v58, %v13924_v30  ;;  %v10102_v0 = vrot.slane %v13925_v13, %v13904_v57  ;;  %v10106_v37 = vrot.slane %v13926_v6, %v13904_v57  ;;  %v13928_v55 = vld [vmem:[#allocation129_spill] sm:$0xff]  ;;  %v13929_v27 = vld [vmem:[#allocation130_spill] sm:$0xff] }
 0x21e   :  { %v5203_v61 = vpack.c.bf16 %v5192_v39, %v5190_v20  ;;  %v3483_v4 = vadd.f32 %v3467_v1, %v3427_v60  ;;  %v3485_v41 = vadd.f32 %v3469_v17, %v3429_v59  ;;  %v10109_v44 = vsub.s32 5, %v13927_v21  ;;  %v13932_v20 = vld [vmem:[#allocation137_spill] sm:$0xff] }
 0x21f   :  { %v3635_v8 = vmul.f32 %v10102_v0, %v13928_v55  ;;  %v3637_v38 = vmul.f32 %v10102_v0, %v13929_v27  ;;  %v3691_v49 = vmul.f32 %v10106_v37, %v13930_v9  ;;  %v3693_v32 = vmul.f32 %v10106_v37, %v13931_v48 }
 0x220   :  { %5220 = vmatpush1.bf16.msra.mxu0 %v5203_v61  ;;  %v3539_v36 = vadd.f32 %v3523_v24, %v3483_v4  ;;  %v3541_v39 = vadd.f32 %v3525_v63, %v3485_v41  ;;  %v10121_v1 = vrot.slane %v13932_v20, %v10109_v44  ;;  %v10125_v17 = vrot.slane %v13905_v52, %v10109_v44 }
 0x221   :  { %v10129_v60 = vrot.slane %v13907_v62, %v10109_v44  ;;  %v10133_v59 = vrot.slane %v13909_v33, %v10109_v44  ;;  %v10137_v4 = vrot.slane %v13911_v42, %v10109_v44  ;;  %v10141_v61 = vrot.slane %v13921_v19, %v10109_v44 }
 0x222   :  { %v3595_v63 = vadd.f32 %v3579_v34, %v3539_v36  ;;  %v3597_v24 = vadd.f32 %v3581_v47, %v3541_v39  ;;  %v5269_v41 = vmul.f32 %v10121_v1, %v13901_v54  ;;  %v5271_v21 = vmul.f32 %v10121_v1, %v13903_v50 }
 0x223   :  { %v5293_v33 = vmul.f32 %v10125_v17, %v13913_v25  ;;  %v5295_v62 = vmul.f32 %v10125_v17, %v13914_v3  ;;  %v5333_v42 = vmul.f32 %v10129_v60, %v13915_v46  ;;  %v5335_v19 = vmul.f32 %v10129_v60, %v13916_v35  ;;  %v6527_v46 = vld [vmem:[#allocation8 + $0x8] sm:$0xff]   ;;  %v13948_v35 = vld [vmem:[#allocation37_spill] sm:$0xff] }
 0x224   :  { %v3651_v36 = vadd.f32 %v3635_v8, %v3595_v63  ;;  %v3653_v34 = vadd.f32 %v3637_v38, %v3597_v24  ;;  %v5373_v47 = vmul.f32 %v10133_v59, %v13917_v40  ;;  %v5375_v39 = vmul.f32 %v10133_v59, %v13918_v5  ;;  %6471 = vmatmul.mubr.msk.bf16.vlgmr.msra.gmra.mrb[0].mxu1 %vm4052_vm12, %v6527_v46 }
 0x225   :  { %v5309_v50 = vadd.f32 %v5293_v33, %v5269_v41  ;;  %v5311_v54 = vadd.f32 %v5295_v62, %v5271_v21  ;;  %v5413_v25 = vmul.f32 %v10137_v4, %v13919_v18  ;;  %v5415_v3 = vmul.f32 %v10137_v4, %v13920_v15  ;;  %v6528_v21 = vld [vmem:[#allocation8 + $0x20] sm:$0xff]   ;;  %v13939_v15 = vld [vmem:[#allocation35_spill] sm:$0xff] }
 0x226   :  { %v3707_v52 = vadd.f32 %v3691_v49, %v3651_v36  ;;  %v3709_v20 = vadd.f32 %v3693_v32, %v3653_v34  ;;  %v5453_v8 = vmul.f32 %v10141_v61, %v13923_v7  ;;  %v5455_v38 = vmul.f32 %v10141_v61, %v13924_v30  ;;  %v13933_v32 = vld [vmem:[#allocation23_spill] sm:$0xff]  ;;  %v13936_v30 = vld [vmem:[#allocation36_spill] sm:$0xff]  ;;  %6479 = vmatmul.mubr.msk.bf16.vlgmr.msra.gmra.mrb[0].mxu0 %vm4052_vm12, %v6528_v21 }
 0x227   :  { %v5349_v63 = vadd.f32 %v5333_v42, %v5309_v50  ;;  %v5351_v24 = vadd.f32 %v5335_v19, %v5311_v54  ;;  %v10169_v62 = vrot.slane %v13925_v13, %v10109_v44  ;;  %v10173_v33 = vrot.slane %v13926_v6, %v10109_v44  ;;  %v13934_v36 = vld [vmem:[#allocation71_spill] sm:$0xff]  ;;  %v13944_v6 = vld [vmem:[#allocation78_spill] sm:$0xff] }
 0x228   :  { %v3725_v41 = vpack.c.bf16 %v3709_v20, %v3707_v52  ;;  %v10177_v49 = vrot.slane %v13933_v32, %v13904_v57  ;;  %v10181_v34 = vrot.slane %v13934_v36, %v13904_v57 }
 0x229   :  { %v5389_v19 = vadd.f32 %v5373_v47, %v5349_v63  ;;  %v5391_v54 = vadd.f32 %v5375_v39, %v5351_v24  ;;  %v5493_v50 = vmul.f32 %v10169_v62, %v13928_v55  ;;  %v5495_v42 = vmul.f32 %v10169_v62, %v13929_v27  ;;  %v13937_v47 = vld [vmem:[#allocation38_spill] sm:$0xff]  ;;  %v13938_v55 = vld [vmem:[#allocation31_spill] sm:$0xff] }
 0x22a   :  { %13935 = vst [vmem:[#allocation45_spill] sm:$0xff] %v10181_v34  ;;  %4107 = vmatprep.subr.bf16.mxu1 %v3725_v41  ;;  %v5533_v52 = vmul.f32 %v10173_v33, %v13930_v9  ;;  %v5535_v20 = vmul.f32 %v10173_v33, %v13931_v48  ;;  %v3314_v7 = vmul.f32 %v10177_v49, %v13936_v30  ;;  %v13940_v41 = vld [vmem:[#allocation73_spill] sm:$0xff]  ;;  %v13942_v48 = vld [vmem:[#allocation74_spill] sm:$0xff] }
 0x22b   :  { %v3316_v39 = vmul.f32 %v10177_v49, %v13937_v47  ;;  %v5429_v63 = vadd.f32 %v5413_v25, %v5389_v19  ;;  %v5431_v24 = vadd.f32 %v5415_v3, %v5391_v54  ;;  %v3354_v27 = vmul.f32 %v10181_v34, %v13938_v55  ;;  %v13946_v3 = vld [vmem:[#allocation72_spill] sm:$0xff] }
 0x22c   :  { %v3356_v46 = vmul.f32 %v10181_v34, %v13939_v15  ;;  %v10203_v9 = vrot.slane %v13940_v41, %v13904_v57  ;;  %v10207_v18 = vrot.slane %v13942_v48, %v13904_v57  ;;  %v10211_v25 = vrot.slane %v13944_v6, %v13904_v57 }
 0x22d   :  { %v10215_v19 = vrot.slane %v13946_v3, %v13904_v57  ;;  %v13947_v54 = vmov 0   ;;  %v5469_v13 = vadd.f32 %v5453_v8, %v5429_v63  ;;  %v5471_v21 = vadd.f32 %v5455_v38, %v5431_v24  ;;  %v13952_v8 = vld [vmem:[#allocation46_spill] sm:$0xff]  ;;  %v13954_v24 = vld [vmem:[#allocation61_spill] sm:$0xff] }
 0x22e   :  { %13941 = vst [vmem:[#allocation34_spill] sm:$0xff] %v10203_v9  ;;  %13943 = vst [vmem:[#allocation48_spill] sm:$0xff] %v10207_v18  ;;  %4139 = vmatprep.mubr.bf16.mxu1 %v13947_v54  ;;  %v3370_v5 = vadd.f32 %v3354_v27, %v3314_v7  ;;  %v3372_v40 = vadd.f32 %v3356_v46, %v3316_v39  ;;  %5615 = vmatprep.mubr.bf16.mxu0 %v13947_v54  ;;  %v13953_v27 = vld [vmem:[#allocation47_spill] sm:$0xff]  ;;  %v13955_v54 = vld [vmem:[#allocation58_spill] sm:$0xff] }
 0x22f   :  { %13945 = vst [vmem:[#allocation62_spill] sm:$0xff] %v10211_v25  ;;  %v3410_v56 = vmul.f32 %v10203_v9, %v13948_v35  ;;  %v3412_v45 = vmul.f32 %v10203_v9, %v13949_v11  ;;  %v3466_v10 = vmul.f32 %v10207_v18, %v13950_v2  ;;  %v3468_v43 = vmul.f32 %v10207_v18, %v13951_v51  ;;  %v13956_v18 = vld [vmem:[#allocation75_spill] sm:$0xff] }
 0x230   :  { %v5509_v22 = vadd.f32 %v5493_v50, %v5469_v13  ;;  %v5511_v53 = vadd.f32 %v5495_v42, %v5471_v21  ;;  %v3522_v7 = vmul.f32 %v10211_v25, %v13952_v8  ;;  %v3524_v38 = vmul.f32 %v10211_v25, %v13953_v27  ;;  %v13958_v50 = vld [vmem:[#allocation76_spill] sm:$0xff] }
 0x231   :  { %v3426_v39 = vadd.f32 %v3410_v56, %v3370_v5  ;;  %v3428_v63 = vadd.f32 %v3412_v45, %v3372_v40  ;;  %v3578_v46 = vmul.f32 %v10215_v19, %v13954_v24  ;;  %v3580_v12 = vmul.f32 %v10215_v19, %v13955_v54  ;;  %v13961_v5 = vld [vmem:[#allocation64_spill] sm:$0xff] }
 0x232   :  { %v5549_v28 = vadd.f32 %v5533_v52, %v5509_v22  ;;  %v5551_v16 = vadd.f32 %v5535_v20, %v5511_v53  ;;  %v10237_v13 = vrot.slane %v13956_v18, %v13904_v57  ;;  %v10241_v42 = vrot.slane %v13958_v50, %v13904_v57  ;;  %v13960_v53 = vld [vmem:[#allocation60_spill] sm:$0xff] }
 0x233   :  { %v3482_v21 = vadd.f32 %v3466_v10, %v3426_v39  ;;  %v3484_v25 = vadd.f32 %v3468_v43, %v3428_v63  ;;  %v10245_v45 = vrot.slane %v13933_v32, %v10109_v44  ;;  %v10249_v56 = vrot.slane %v13934_v36, %v10109_v44  ;;  %v13962_v20 = vld [vmem:[#allocation20_spill] sm:$0xff] }
 0x234   :  { %13957 = vst [vmem:[#allocation57_spill] sm:$0xff] %v10237_v13  ;;  %v5568_v22 = vpack.c.bf16 %v5551_v16, %v5549_v28  ;;  %v3634_v40 = vmul.f32 %v10237_v13, %v13960_v53  ;;  %v3636_v52 = vmul.f32 %v10237_v13, %v13961_v5  ;;  %v3690_v57 = vmul.f32 %v10241_v42, %v13962_v20  ;;  %v13963_v39 = vld [vmem:[#allocation56_spill] sm:$0xff] }
 0x235   :  { %13959 = vst [vmem:[#allocation59_spill] sm:$0xff] %v10249_v56  ;;  %v3538_v10 = vadd.f32 %v3522_v7, %v3482_v21  ;;  %v3540_v43 = vadd.f32 %v3524_v38, %v3484_v25  ;;  %v3692_v63 = vmul.f32 %v10241_v42, %v13963_v39  ;;  %v5268_v32 = vmul.f32 %v10245_v45, %v13936_v30 }
 0x236   :  { %5583 = vmatprep.subr.bf16.mxu0 %v5568_v22  ;;  %v5270_v16 = vmul.f32 %v10245_v45, %v13937_v47  ;;  %v5292_v28 = vmul.f32 %v10249_v56, %v13938_v55  ;;  %v5294_v36 = vmul.f32 %v10249_v56, %v13939_v15  ;;  %v10269_v7 = vrot.slane %v13940_v41, %v10109_v44 }
 0x237   :  { %v3594_v25 = vadd.f32 %v3578_v46, %v3538_v10  ;;  %v3596_v38 = vadd.f32 %v3580_v12, %v3540_v43  ;;  %v10273_v21 = vrot.slane %v13942_v48, %v10109_v44  ;;  %v10277_v22 = vrot.slane %v13944_v6, %v10109_v44  ;;  %v13976_v48 = vld [vmem:[#allocation126_spill] sm:$0xff] }
 0x238   :  { %v5308_v47 = vadd.f32 %v5292_v28, %v5268_v32  ;;  %v5310_v30 = vadd.f32 %v5294_v36, %v5270_v16  ;;  %v5332_v55 = vmul.f32 %v10269_v7, %v13948_v35  ;;  %v5334_v15 = vmul.f32 %v10269_v7, %v13949_v11  ;;  %v13974_v11 = vld [vmem:[#allocation122_spill] sm:$0xff] }
 0x239   :  { %v3650_v41 = vadd.f32 %v3634_v40, %v3594_v25  ;;  %v3652_v56 = vadd.f32 %v3636_v52, %v3596_v38  ;;  %v5372_v12 = vmul.f32 %v10273_v21, %v13950_v2  ;;  %v5374_v46 = vmul.f32 %v10273_v21, %v13951_v51  ;;  %v13972_v51 = vld [vmem:[#allocation115_spill] sm:$0xff] }
 0x23a   :  { %v5348_v10 = vadd.f32 %v5332_v55, %v5308_v47  ;;  %v5350_v43 = vadd.f32 %v5334_v15, %v5310_v30  ;;  %v5412_v32 = vmul.f32 %v10277_v22, %v13952_v8  ;;  %v5414_v36 = vmul.f32 %v10277_v22, %v13953_v27  ;;  %v13964_v30 = vld [vmem:[#allocation97_spill] sm:$0xff] }
 0x23b   :  { %v3706_v16 = vadd.f32 %v3690_v57, %v3650_v41  ;;  %v3708_v28 = vadd.f32 %v3692_v63, %v3652_v56  ;;  %v10293_v40 = vrot.slane %v13946_v3, %v10109_v44  ;;  %v10297_v52 = vrot.slane %v13956_v18, %v10109_v44 }
 0x23c   :  { %v5388_v25 = vadd.f32 %v5372_v12, %v5348_v10  ;;  %v5390_v38 = vadd.f32 %v5374_v46, %v5350_v43  ;;  %v10301_v15 = vrot.slane %v13958_v50, %v10109_v44  ;;  %v3319_v55 = vmul.f32 %v13902_v14, %v13964_v30  ;;  %v13965_v43 = vld [vmem:[#allocation98_spill] sm:$0xff] }
 0x23d   :  { %v3724_v47 = vpack.c.bf16 %v3708_v28, %v3706_v16  ;;  %v5452_v41 = vmul.f32 %v10293_v40, %v13954_v24  ;;  %v5454_v56 = vmul.f32 %v10293_v40, %v13955_v54  ;;  %v5492_v57 = vmul.f32 %v10297_v52, %v13960_v53  ;;  %v13966_v28 = vld [vmem:[#allocation99_spill] sm:$0xff]  ;;  %v13967_v24 = vld [vmem:[#allocation102_spill] sm:$0xff] }
 0x23e   :  { %v5428_v63 = vadd.f32 %v5412_v32, %v5388_v25  ;;  %v5430_v12 = vadd.f32 %v5414_v36, %v5390_v38  ;;  %v5494_v46 = vmul.f32 %v10297_v52, %v13961_v5  ;;  %v5532_v44 = vmul.f32 %v10301_v15, %v13962_v20  ;;  %v13968_v38 = vld [vmem:[#allocation103_spill] sm:$0xff]  ;;  %v13969_v53 = vld [vmem:[#allocation106_spill] sm:$0xff] }
 0x23f   :  { %4108 = vmatpush1.bf16.msra.mxu1 %v3724_v47  ;;  %v5534_v10 = vmul.f32 %v10301_v15, %v13963_v39  ;;  %v3321_v16 = vmul.f32 %v13902_v14, %v13965_v43  ;;  %v3359_v54 = vmul.f32 %v10062_v23, %v13966_v28  ;;  %v3361_v32 = vmul.f32 %v10062_v23, %v13967_v24  ;;  %v13970_v39 = vld [vmem:[#allocation110_spill] sm:$0xff] }
 0x240   :  { %v5468_v36 = vadd.f32 %v5452_v41, %v5428_v63  ;;  %v5470_v25 = vadd.f32 %v5454_v56, %v5430_v12  ;;  %v3415_v5 = vmul.f32 %v10066_v31, %v13968_v38  ;;  %v3417_v47 = vmul.f32 %v10066_v31, %v13969_v53  ;;  %v13971_v50 = vld [vmem:[#allocation114_spill] sm:$0xff]  ;;  %v13973_v56 = vld [vmem:[#allocation120_spill] sm:$0xff]  ;;  %v13978_v31 = vld [vmem:[#allocation53_spill] sm:$0xff] }
 0x241   :  { %v3375_v20 = vadd.f32 %v3359_v54, %v3319_v55  ;;  %v3377_v27 = vadd.f32 %v3361_v32, %v3321_v16  ;;  %v3471_v8 = vmul.f32 %v10070_v29, %v13970_v39  ;;  %v3473_v18 = vmul.f32 %v10070_v29, %v13971_v50  ;;  %v13975_v55 = vld [vmem:[#allocation125_spill] sm:$0xff] }
 0x242   :  { %v5508_v3 = vadd.f32 %v5492_v57, %v5468_v36  ;;  %v5510_v6 = vadd.f32 %v5494_v46, %v5470_v25  ;;  %v3527_v41 = vmul.f32 %v10074_v26, %v13972_v51  ;;  %v3529_v63 = vmul.f32 %v10074_v26, %v13973_v56  ;;  %v13977_v46 = vld [vmem:[#allocation128_spill] sm:$0xff] }
 0x243   :  { %v3431_v12 = vadd.f32 %v3415_v5, %v3375_v20  ;;  %v3433_v2 = vadd.f32 %v3417_v47, %v3377_v27  ;;  %v3583_v54 = vmul.f32 %v10094_v58, %v13974_v11  ;;  %v3585_v16 = vmul.f32 %v10094_v58, %v13975_v55  ;;  %v13979_v27 = vld [vmem:[#allocation111_spill] sm:$0xff] }
 0x244   :  { %v5548_v32 = vadd.f32 %v5532_v44, %v5508_v3  ;;  %v5550_v35 = vadd.f32 %v5534_v10, %v5510_v6  ;;  %v3639_v57 = vmul.f32 %v10102_v0, %v13976_v48  ;;  %v3641_v36 = vmul.f32 %v10102_v0, %v13977_v46 }
 0x245   :  { %v3487_v25 = vadd.f32 %v3471_v8, %v3431_v12  ;;  %v3489_v29 = vadd.f32 %v3473_v18, %v3433_v2  ;;  %v3695_v5 = vmul.f32 %v10106_v37, %v13978_v31  ;;  %v3697_v20 = vmul.f32 %v10106_v37, %v13979_v27 }
 0x246   :  { %v5567_v47 = vpack.c.bf16 %v5550_v35, %v5548_v32  ;;  %v5273_v58 = vmul.f32 %v10121_v1, %v13964_v30  ;;  %v5275_v6 = vmul.f32 %v10121_v1, %v13965_v43  ;;  %v5297_v3 = vmul.f32 %v10125_v17, %v13966_v28 }
 0x247   :  { %v3543_v44 = vadd.f32 %v3527_v41, %v3487_v25  ;;  %v3545_v10 = vadd.f32 %v3529_v63, %v3489_v29  ;;  %v5299_v2 = vmul.f32 %v10125_v17, %v13967_v24  ;;  %v5337_v18 = vmul.f32 %v10129_v60, %v13968_v38 }
 0x248   :  { %5584 = vmatpush1.bf16.msra.mxu0 %v5567_v47  ;;  %v5313_v8 = vadd.f32 %v5297_v3, %v5273_v58  ;;  %v5339_v35 = vmul.f32 %v10129_v60, %v13969_v53  ;;  %v5377_v12 = vmul.f32 %v10133_v59, %v13970_v39  ;;  %v5379_v32 = vmul.f32 %v10133_v59, %v13971_v50  ;;  %v13989_v50 = vld [vmem:[#allocation133_spill] sm:$0xff] }
 0x249   :  { %v3599_v28 = vadd.f32 %v3583_v54, %v3543_v44  ;;  %v3601_v41 = vadd.f32 %v3585_v16, %v3545_v10  ;;  %v5315_v29 = vadd.f32 %v5299_v2, %v5275_v6  ;;  %v5417_v63 = vmul.f32 %v10137_v4, %v13972_v51 }
 0x24a   :  { %v5353_v25 = vadd.f32 %v5337_v18, %v5313_v8  ;;  %v5419_v47 = vmul.f32 %v10137_v4, %v13973_v56  ;;  %v5457_v58 = vmul.f32 %v10141_v61, %v13974_v11  ;;  %v5459_v3 = vmul.f32 %v10141_v61, %v13975_v55  ;;  %v13980_v55 = vld [vmem:[#allocation112_spill] sm:$0xff] }
 0x24b   :  { %v3655_v39 = vadd.f32 %v3639_v57, %v3599_v28  ;;  %v3657_v53 = vadd.f32 %v3641_v36, %v3601_v41  ;;  %v5355_v38 = vadd.f32 %v5339_v35, %v5315_v29  ;;  %v5497_v54 = vmul.f32 %v10169_v62, %v13976_v48  ;;  %v13981_v36 = vld [vmem:[#allocation116_spill] sm:$0xff]  ;;  %v13983_v29 = vld [vmem:[#allocation54_spill] sm:$0xff]  ;;  %v13984_v48 = vld [vmem:[#allocation123_spill] sm:$0xff] }
 0x24c   :  { %v5393_v16 = vadd.f32 %v5377_v12, %v5353_v25  ;;  %v5499_v6 = vmul.f32 %v10169_v62, %v13977_v46  ;;  %v5537_v44 = vmul.f32 %v10173_v33, %v13978_v31  ;;  %v5539_v10 = vmul.f32 %v10173_v33, %v13979_v27  ;;  %v13982_v12 = vld [vmem:[#allocation119_spill] sm:$0xff]  ;;  %v13988_v56 = vld [vmem:[#allocation32_spill] sm:$0xff] }
 0x24d   :  { %v3711_v2 = vadd.f32 %v3695_v5, %v3655_v39  ;;  %v3713_v18 = vadd.f32 %v3697_v20, %v3657_v53  ;;  %v5395_v8 = vadd.f32 %v5379_v32, %v5355_v38  ;;  %v3318_v28 = vmul.f32 %v10177_v49, %v13980_v55  ;;  %v13985_v53 = vld [vmem:[#allocation124_spill] sm:$0xff] }
 0x24e   :  { %v5433_v57 = vadd.f32 %v5417_v63, %v5393_v16  ;;  %v3320_v35 = vmul.f32 %v10177_v49, %v13981_v36  ;;  %v3358_v41 = vmul.f32 %v10181_v34, %v13982_v12  ;;  %v3360_v25 = vmul.f32 %v10181_v34, %v13983_v29  ;;  %v13986_v63 = vld [vmem:[#allocation26_spill] sm:$0xff]  ;;  %v13987_v16 = vld [vmem:[#allocation48_spill] sm:$0xff] }
 0x24f   :  { %v3727_v31 = vpack.c.bf16 %v3713_v18, %v3711_v2  ;;  %v5435_v46 = vadd.f32 %v5419_v47, %v5395_v8  ;;  %v3414_v39 = vmul.f32 %v10203_v9, %v13984_v48  ;;  %v3416_v38 = vmul.f32 %v10203_v9, %v13985_v53  ;;  %v13990_v2 = vld [vmem:[#allocation62_spill] sm:$0xff]  ;;  %v13991_v18 = vld [vmem:[#allocation27_spill] sm:$0xff] }
 0x250   :  { %v5473_v5 = vadd.f32 %v5457_v58, %v5433_v57  ;;  %v3374_v20 = vadd.f32 %v3358_v41, %v3318_v28  ;;  %v3376_v32 = vadd.f32 %v3360_v25, %v3320_v35  ;;  %v3470_v27 = vmul.f32 %v13987_v16, %v13986_v63  ;;  %v13992_v58 = vld [vmem:[#allocation28_spill] sm:$0xff]  ;;  %v13993_v35 = vld [vmem:[#allocation25_spill] sm:$0xff] }
 0x251   :  { %4109 = vmatprep.subr.bf16.mxu1 %v3727_v31  ;;  %v5475_v11 = vadd.f32 %v5459_v3, %v5435_v46  ;;  %v3472_v51 = vmul.f32 %v13987_v16, %v13988_v56  ;;  %v3526_v47 = vmul.f32 %v13990_v2, %v13989_v50  ;;  %v3528_v8 = vmul.f32 %v13990_v2, %v13991_v18  ;;  %v13994_v46 = vld [vmem:[#allocation134_spill] sm:$0xff]  ;;  %v13995_v41 = vld [vmem:[#allocation136_spill] sm:$0xff] }
 0x252   :  { %v5513_v24 = vadd.f32 %v5497_v54, %v5473_v5  ;;  %v3430_v43 = vadd.f32 %v3414_v39, %v3374_v20  ;;  %v3432_v30 = vadd.f32 %v3416_v38, %v3376_v32  ;;  %v3582_v28 = vmul.f32 %v10215_v19, %v13992_v58  ;;  %v13996_v2 = vld [vmem:[#allocation16_spill] sm:$0xff] }
 0x253   :  { %v5515_v57 = vadd.f32 %v5499_v6, %v5475_v11  ;;  %v3584_v31 = vmul.f32 %v10215_v19, %v13993_v35  ;;  %v3638_v3 = vmul.f32 %v10237_v13, %v13994_v46  ;;  %v3640_v25 = vmul.f32 %v10237_v13, %v13995_v41  ;;  %v13997_v38 = vld [vmem:[#allocation40_spill] sm:$0xff]  ;;  %v13998_v13 = vld [vmem:[#allocation59_spill] sm:$0xff] }
 0x254   :  { %v5553_v16 = vadd.f32 %v5537_v44, %v5513_v24  ;;  %v3486_v9 = vadd.f32 %v3470_v27, %v3430_v43  ;;  %v3488_v34 = vadd.f32 %v3472_v51, %v3432_v30  ;;  %v3694_v54 = vmul.f32 %v10241_v42, %v13996_v2 }
 0x255   :  { %v5555_v39 = vadd.f32 %v5539_v10, %v5515_v57  ;;  %v3696_v5 = vmul.f32 %v10241_v42, %v13997_v38  ;;  %v5272_v11 = vmul.f32 %v10245_v45, %v13980_v55  ;;  %v5274_v6 = vmul.f32 %v10245_v45, %v13981_v36 }
 0x256   :  { %v3542_v20 = vadd.f32 %v3526_v47, %v3486_v9  ;;  %v3544_v32 = vadd.f32 %v3528_v8, %v3488_v34  ;;  %v5296_v24 = vmul.f32 %v13998_v13, %v13982_v12  ;;  %v5298_v51 = vmul.f32 %v13998_v13, %v13983_v29 }
 0x257   :  { %v5570_v30 = vpack.c.bf16 %v5555_v39, %v5553_v16  ;;  %v5336_v43 = vmul.f32 %v10269_v7, %v13984_v48  ;;  %v5338_v27 = vmul.f32 %v10269_v7, %v13985_v53  ;;  %v5376_v44 = vmul.f32 %v10273_v21, %v13986_v63 }
 0x258   :  { %v3598_v10 = vadd.f32 %v3582_v28, %v3542_v20  ;;  %v3600_v57 = vadd.f32 %v3584_v31, %v3544_v32  ;;  %v5312_v9 = vadd.f32 %v5296_v24, %v5272_v11  ;;  %v5314_v34 = vadd.f32 %v5298_v51, %v5274_v6 }
 0x259   :  { %5585 = vmatprep.subr.bf16.mxu0 %v5570_v30  ;;  %v5378_v47 = vmul.f32 %v10273_v21, %v13988_v56  ;;  %v5416_v16 = vmul.f32 %v10277_v22, %v13989_v50  ;;  %v5418_v8 = vmul.f32 %v10277_v22, %v13991_v18  ;;  %v5456_v39 = vmul.f32 %v10293_v40, %v13992_v58  ;;  %v14012_v56 = vld [vmem:[#allocation44_spill] sm:$0xff] }
 0x25a   :  { %v3654_v53 = vadd.f32 %v3638_v3, %v3598_v10  ;;  %v3656_v48 = vadd.f32 %v3640_v25, %v3600_v57  ;;  %v5352_v63 = vadd.f32 %v5336_v43, %v5312_v9  ;;  %v5354_v28 = vadd.f32 %v5338_v27, %v5314_v34  ;;  %v13999_v25 = vld [vmem:[#allocation158_spill] sm:$0xff]  ;;  %v14000_v27 = vld [vmem:[#allocation159_spill] sm:$0xff]  ;;  %v14001_v57 = vld [vmem:[#allocation160_spill] sm:$0xff] }
 0x25b   :  { %v5458_v31 = vmul.f32 %v10293_v40, %v13993_v35  ;;  %v5496_v11 = vmul.f32 %v10297_v52, %v13994_v46  ;;  %v5498_v6 = vmul.f32 %v10297_v52, %v13995_v41  ;;  %v5536_v20 = vmul.f32 %v10301_v15, %v13996_v2  ;;  %v14002_v2 = vld [vmem:[#allocation161_spill] sm:$0xff] }
 0x25c   :  { %v3710_v32 = vadd.f32 %v3694_v54, %v3654_v53  ;;  %v3712_v24 = vadd.f32 %v3696_v5, %v3656_v48  ;;  %v5392_v51 = vadd.f32 %v5376_v44, %v5352_v63  ;;  %v5394_v30 = vadd.f32 %v5378_v47, %v5354_v28  ;;  %v14003_v63 = vld [vmem:[#allocation162_spill] sm:$0xff]  ;;  %v14004_v54 = vld [vmem:[#allocation29_spill] sm:$0xff]  ;;  %v14005_v44 = vld [vmem:[#allocation163_spill] sm:$0xff] }
 0x25d   :  { %v5538_v3 = vmul.f32 %v10301_v15, %v13997_v38  ;;  %v3323_v43 = vmul.f32 %v13902_v14, %v13999_v25  ;;  %v3325_v10 = vmul.f32 %v13902_v14, %v14000_v27  ;;  %v3363_v9 = vmul.f32 %v10062_v23, %v14001_v57  ;;  %v14006_v28 = vld [vmem:[#allocation164_spill] sm:$0xff]  ;;  %v14007_v38 = vld [vmem:[#allocation33_spill] sm:$0xff] }
 0x25e   :  { %v3726_v34 = vpack.c.bf16 %v3712_v24, %v3710_v32  ;;  %v5432_v41 = vadd.f32 %v5416_v16, %v5392_v51  ;;  %v5434_v46 = vadd.f32 %v5418_v8, %v5394_v30  ;;  %v3365_v48 = vmul.f32 %v10062_v23, %v14002_v2  ;;  %v14008_v32 = vld [vmem:[#allocation165_spill] sm:$0xff]  ;;  %v14009_v24 = vld [vmem:[#allocation166_spill] sm:$0xff]  ;;  %v14010_v30 = vld [vmem:[#allocation167_spill] sm:$0xff] }
 0x25f   :  { %v3379_v53 = vadd.f32 %v3363_v9, %v3323_v43  ;;  %v3419_v5 = vmul.f32 %v14004_v54, %v14003_v63  ;;  %v3421_v47 = vmul.f32 %v14004_v54, %v14005_v44  ;;  %v3475_v35 = vmul.f32 %v14007_v38, %v14006_v28  ;;  %v14011_v9 = vld [vmem:[#allocation168_spill] sm:$0xff]  ;;  %v14017_v23 = vld [vmem:[#allocation173_spill] sm:$0xff] }
 0x260   :  { %4110 = vmatpush1.bf16.msra.mxu1 %v3726_v34  ;;  %v5472_v58 = vadd.f32 %v5456_v39, %v5432_v41  ;;  %v5474_v18 = vadd.f32 %v5458_v31, %v5434_v46  ;;  %v3381_v50 = vadd.f32 %v3365_v48, %v3325_v10  ;;  %v3477_v16 = vmul.f32 %v14007_v38, %v14008_v32  ;;  %v14013_v34 = vld [vmem:[#allocation169_spill] sm:$0xff]  ;;  %v14014_v39 = vld [vmem:[#allocation170_spill] sm:$0xff]  ;;  %v14015_v10 = vld [vmem:[#allocation171_spill] sm:$0xff] }
 0x261   :  { %v3435_v8 = vadd.f32 %v3419_v5, %v3379_v53  ;;  %v3531_v51 = vmul.f32 %v10074_v26, %v14009_v24  ;;  %v3533_v43 = vmul.f32 %v10074_v26, %v14010_v30  ;;  %v3587_v29 = vmul.f32 %v14012_v56, %v14011_v9  ;;  %v14016_v53 = vld [vmem:[#allocation172_spill] sm:$0xff] }
 0x262   :  { %v5512_v12 = vadd.f32 %v5496_v11, %v5472_v58  ;;  %v5514_v36 = vadd.f32 %v5498_v6, %v5474_v18  ;;  %v3437_v55 = vadd.f32 %v3421_v47, %v3381_v50  ;;  %v3589_v46 = vmul.f32 %v14012_v56, %v14013_v34 }
 0x263   :  { %v3491_v41 = vadd.f32 %v3475_v35, %v3435_v8  ;;  %v3643_v31 = vmul.f32 %v10102_v0, %v14014_v39  ;;  %v3645_v48 = vmul.f32 %v10102_v0, %v14015_v10  ;;  %v3699_v5 = vmul.f32 %v10106_v37, %v14016_v53 }
 0x264   :  { %v5552_v26 = vadd.f32 %v5536_v20, %v5512_v12  ;;  %v5554_v38 = vadd.f32 %v5538_v3, %v5514_v36  ;;  %v3493_v54 = vadd.f32 %v3477_v16, %v3437_v55  ;;  %v3701_v18 = vmul.f32 %v10106_v37, %v14017_v23 }
 0x265   :  { %v3547_v50 = vadd.f32 %v3531_v51, %v3491_v41  ;;  %v5277_v58 = vmul.f32 %v10121_v1, %v13999_v25  ;;  %v5279_v35 = vmul.f32 %v10121_v1, %v14000_v27  ;;  %v5301_v11 = vmul.f32 %v10125_v17, %v14001_v57 }
 0x266   :  { %v5569_v6 = vpack.c.bf16 %v5554_v38, %v5552_v26  ;;  %v3549_v47 = vadd.f32 %v3533_v43, %v3493_v54  ;;  %v5303_v12 = vmul.f32 %v10125_v17, %v14002_v2  ;;  %v5341_v55 = vmul.f32 %v10129_v60, %v14003_v63  ;;  %v14029_v63 = vld [vmem:[#allocation180_spill] sm:$0xff] }
 0x267   :  { %v3603_v36 = vadd.f32 %v3587_v29, %v3547_v50  ;;  %v5317_v20 = vadd.f32 %v5301_v11, %v5277_v58  ;;  %v5343_v3 = vmul.f32 %v10129_v60, %v14005_v44  ;;  %v5381_v16 = vmul.f32 %v10133_v59, %v14006_v28  ;;  %v14028_v28 = vld [vmem:[#allocation41_spill] sm:$0xff] }
 0x268   :  { %5586 = vmatpush1.bf16.msra.mxu0 %v5569_v6  ;;  %v3605_v8 = vadd.f32 %v3589_v46, %v3549_v47  ;;  %v5319_v51 = vadd.f32 %v5303_v12, %v5279_v35  ;;  %v5383_v26 = vmul.f32 %v10133_v59, %v14008_v32  ;;  %v5421_v38 = vmul.f32 %v10137_v4, %v14009_v24 }
 0x269   :  { %v3659_v54 = vadd.f32 %v3643_v31, %v3603_v36  ;;  %v5357_v43 = vadd.f32 %v5341_v55, %v5317_v20  ;;  %v5423_v29 = vmul.f32 %v10137_v4, %v14010_v30  ;;  %v5461_v41 = vmul.f32 %v10141_v61, %v14011_v9  ;;  %v14018_v36 = vld [vmem:[#allocation154_spill] sm:$0xff]  ;;  %v14027_v30 = vld [vmem:[#allocation48_spill] sm:$0xff] }
 0x26a   :  { %v3661_v50 = vadd.f32 %v3645_v48, %v3605_v8  ;;  %v5359_v58 = vadd.f32 %v5343_v3, %v5319_v51  ;;  %v5463_v46 = vmul.f32 %v10141_v61, %v14013_v34  ;;  %v5501_v35 = vmul.f32 %v10169_v62, %v14014_v39  ;;  %v14019_v8 = vld [vmem:[#allocation174_spill] sm:$0xff] }
 0x26b   :  { %v3715_v11 = vadd.f32 %v3699_v5, %v3659_v54  ;;  %v5397_v6 = vadd.f32 %v5381_v16, %v5357_v43  ;;  %v5503_v31 = vmul.f32 %v10169_v62, %v14015_v10  ;;  %v5541_v47 = vmul.f32 %v10173_v33, %v14016_v53  ;;  %v14020_v5 = vld [vmem:[#allocation175_spill] sm:$0xff]  ;;  %v14021_v16 = vld [vmem:[#allocation45_spill] sm:$0xff]  ;;  %v14022_v43 = vld [vmem:[#allocation176_spill] sm:$0xff] }
 0x26c   :  { %v3717_v12 = vadd.f32 %v3701_v18, %v3661_v50  ;;  %v5399_v55 = vadd.f32 %v5383_v26, %v5359_v58  ;;  %v5543_v48 = vmul.f32 %v10173_v33, %v14017_v23  ;;  %v3322_v20 = vmul.f32 %v10177_v49, %v14018_v36  ;;  %v14023_v18 = vld [vmem:[#allocation177_spill] sm:$0xff]  ;;  %v14024_v26 = vld [vmem:[#allocation34_spill] sm:$0xff] }
 0x26d   :  { %v5437_v3 = vadd.f32 %v5421_v38, %v5397_v6  ;;  %v3324_v51 = vmul.f32 %v10177_v49, %v14019_v8  ;;  %v3362_v54 = vmul.f32 %v14021_v16, %v14020_v5  ;;  %v3364_v10 = vmul.f32 %v14021_v16, %v14022_v43  ;;  %v14025_v58 = vld [vmem:[#allocation178_spill] sm:$0xff]  ;;  %v14026_v6 = vld [vmem:[#allocation179_spill] sm:$0xff] }
 0x26e   :  { %v3729_v39 = vpack.c.bf16 %v3717_v12, %v3715_v11  ;;  %v5439_v53 = vadd.f32 %v5423_v29, %v5399_v55  ;;  %v3418_v50 = vmul.f32 %v14024_v26, %v14023_v18  ;;  %v3420_v23 = vmul.f32 %v14024_v26, %v14025_v58  ;;  %v14030_v11 = vld [vmem:[#allocation62_spill] sm:$0xff]  ;;  %v14031_v12 = vld [vmem:[#allocation181_spill] sm:$0xff] }
 0x26f   :  { %v5477_v34 = vadd.f32 %v5461_v41, %v5437_v3  ;;  %v3378_v9 = vadd.f32 %v3362_v54, %v3322_v20  ;;  %v3380_v38 = vadd.f32 %v3364_v10, %v3324_v51  ;;  %v3474_v24 = vmul.f32 %v14027_v30, %v14026_v6  ;;  %v14032_v41 = vld [vmem:[#allocation182_spill] sm:$0xff]  ;;  %v14033_v3 = vld [vmem:[#allocation183_spill] sm:$0xff]  ;;  %v14036_v54 = vld [vmem:[#allocation185_spill] sm:$0xff] }
 0x270   :  { %4111 = vmatprep.subr.bf16.mxu1 %v3729_v39  ;;  %v5479_v32 = vadd.f32 %v5463_v46, %v5439_v53  ;;  %v3476_v44 = vmul.f32 %v14027_v30, %v14028_v28  ;;  %v3530_v29 = vmul.f32 %v14030_v11, %v14029_v63  ;;  %v3532_v55 = vmul.f32 %v14030_v11, %v14031_v12  ;;  %v14034_v53 = vld [vmem:[#allocation184_spill] sm:$0xff]  ;;  %v14035_v46 = vld [vmem:[#allocation57_spill] sm:$0xff]  ;;  %v14037_v11 = vld [vmem:[#allocation186_spill] sm:$0xff] }
 0x271   :  { %v5517_v2 = vadd.f32 %v5501_v35, %v5477_v34  ;;  %v3434_v57 = vadd.f32 %v3418_v50, %v3378_v9  ;;  %v3436_v27 = vadd.f32 %v3420_v23, %v3380_v38  ;;  %v3586_v10 = vmul.f32 %v10215_v19, %v14032_v41  ;;  %v14038_v34 = vld [vmem:[#allocation187_spill] sm:$0xff] }
 0x272   :  { %v5519_v20 = vadd.f32 %v5503_v31, %v5479_v32  ;;  %v3588_v39 = vmul.f32 %v10215_v19, %v14033_v3  ;;  %v3642_v51 = vmul.f32 %v14035_v46, %v14034_v53  ;;  %v3644_v25 = vmul.f32 %v14035_v46, %v14036_v54 }
 0x273   :  { %v5557_v30 = vadd.f32 %v5541_v47, %v5517_v2  ;;  %v3490_v26 = vadd.f32 %v3474_v24, %v3434_v57  ;;  %v3492_v16 = vadd.f32 %v3476_v44, %v3436_v27  ;;  %v3698_v9 = vmul.f32 %v10241_v42, %v14037_v11 }
 0x274   :  { %v5559_v23 = vadd.f32 %v5543_v48, %v5519_v20  ;;  %v3700_v35 = vmul.f32 %v10241_v42, %v14038_v34  ;;  %v5276_v32 = vmul.f32 %v10245_v45, %v14018_v36  ;;  %v5278_v31 = vmul.f32 %v10245_v45, %v14019_v8  ;;  %v14058_v36 = vld [vmem:[#allocation70_spill] sm:$0xff] }
 0x275   :  { %v3546_v50 = vadd.f32 %v3530_v29, %v3490_v26  ;;  %v3548_v38 = vadd.f32 %v3532_v55, %v3492_v16  ;;  %v5300_v2 = vmul.f32 %v13998_v13, %v14020_v5  ;;  %v5302_v27 = vmul.f32 %v13998_v13, %v14022_v43 }
 0x276   :  { %v5572_v57 = vpack.c.bf16 %v5559_v23, %v5557_v30  ;;  %v5340_v44 = vmul.f32 %v10269_v7, %v14023_v18  ;;  %v5342_v24 = vmul.f32 %v10269_v7, %v14025_v58  ;;  %v5380_v47 = vmul.f32 %v10273_v21, %v14026_v6 }
 0x277   :  { %v3602_v48 = vadd.f32 %v3586_v10, %v3546_v50  ;;  %v3604_v20 = vadd.f32 %v3588_v39, %v3548_v38  ;;  %v5316_v26 = vadd.f32 %v5300_v2, %v5276_v32  ;;  %v5318_v16 = vadd.f32 %v5302_v27, %v5278_v31 }
 0x278   :  { %5587 = vmatprep.subr.bf16.mxu0 %v5572_v57  ;;  %v5382_v29 = vmul.f32 %v10273_v21, %v14028_v28  ;;  %v5420_v30 = vmul.f32 %v10277_v22, %v14029_v63  ;;  %v5422_v55 = vmul.f32 %v10277_v22, %v14031_v12  ;;  %v5460_v23 = vmul.f32 %v10293_v40, %v14032_v41 }
 0x279   :  { %v3658_v58 = vadd.f32 %v3642_v51, %v3602_v48  ;;  %v3660_v18 = vadd.f32 %v3644_v25, %v3604_v20  ;;  %v5356_v6 = vadd.f32 %v5340_v44, %v5316_v26  ;;  %v5358_v10 = vadd.f32 %v5342_v24, %v5318_v16  ;;  %v14039_v51 = vld [vmem:[#allocation22_spill] sm:$0xff]  ;;  %v14041_v20 = vld [vmem:[#allocation65_spill] sm:$0xff] }
 0x27a   :  { %v5462_v39 = vmul.f32 %v10293_v40, %v14033_v3  ;;  %v5500_v32 = vmul.f32 %v10297_v52, %v14034_v53  ;;  %v5502_v31 = vmul.f32 %v10297_v52, %v14036_v54  ;;  %v5540_v50 = vmul.f32 %v10301_v15, %v14037_v11  ;;  %v14040_v24 = vld [vmem:[#allocation14_spill] sm:$0xff]  ;;  %v14042_v26 = vld [vmem:[#allocation153_spill] sm:$0xff] }
 0x27b   :  { %v3714_v38 = vadd.f32 %v3698_v9, %v3658_v58  ;;  %v3716_v2 = vadd.f32 %v3700_v35, %v3660_v18  ;;  %v5396_v27 = vadd.f32 %v5380_v47, %v5356_v6  ;;  %v5398_v57 = vadd.f32 %v5382_v29, %v5358_v10  ;;  %v14043_v11 = vld [vmem:[#allocation66_spill] sm:$0xff]  ;;  %v14044_v6 = vld [vmem:[#allocation80_spill] sm:$0xff]  ;;  %v14045_v9 = vld [vmem:[#allocation29_spill] sm:$0xff] }
 0x27c   :  { %v5542_v25 = vmul.f32 %v10301_v15, %v14038_v34  ;;  %v3327_v44 = vmul.f32 %v13902_v14, %v14039_v51  ;;  %v3329_v48 = vmul.f32 %v13902_v14, %v14040_v24  ;;  %v3367_v16 = vmul.f32 %v14042_v26, %v14041_v20  ;;  %v14046_v47 = vld [vmem:[#allocation83_spill] sm:$0xff]  ;;  %v14047_v10 = vld [vmem:[#allocation82_spill] sm:$0xff]  ;;  %v14048_v34 = vld [vmem:[#allocation33_spill] sm:$0xff] }
 0x27d   :  { %v3728_v54 = vpack.c.bf16 %v3716_v2, %v3714_v38  ;;  %v5436_v53 = vadd.f32 %v5420_v30, %v5396_v27  ;;  %v5438_v3 = vadd.f32 %v5422_v55, %v5398_v57  ;;  %v3369_v18 = vmul.f32 %v14042_v26, %v14043_v11  ;;  %v14049_v38 = vld [vmem:[#allocation50_spill] sm:$0xff]  ;;  %v14050_v2 = vld [vmem:[#allocation89_spill] sm:$0xff] }
 0x27e   :  { %v3383_v58 = vadd.f32 %v3367_v16, %v3327_v44  ;;  %v3423_v35 = vmul.f32 %v14045_v9, %v14044_v6  ;;  %v3425_v29 = vmul.f32 %v14045_v9, %v14046_v47  ;;  %v3479_v41 = vmul.f32 %v14048_v34, %v14047_v10  ;;  %v14051_v27 = vld [vmem:[#allocation30_spill] sm:$0xff]  ;;  %v14053_v16 = vld [vmem:[#allocation52_spill] sm:$0xff] }
 0x27f   :  { %4112 = vmatpush1.bf16.msra.mxu1 %v3728_v54  ;;  %v5476_v14 = vadd.f32 %v5460_v23, %v5436_v53  ;;  %v5478_v12 = vadd.f32 %v5462_v39, %v5438_v3  ;;  %v3385_v63 = vadd.f32 %v3369_v18, %v3329_v48  ;;  %v3481_v30 = vmul.f32 %v14048_v34, %v14049_v38  ;;  %v14052_v44 = vld [vmem:[#allocation90_spill] sm:$0xff]  ;;  %v14054_v54 = vld [vmem:[#allocation100_spill] sm:$0xff]  ;;  %v14055_v23 = vld [vmem:[#allocation67_spill] sm:$0xff] }
 0x280   :  { %v3439_v55 = vadd.f32 %v3423_v35, %v3383_v58  ;;  %v3535_v57 = vmul.f32 %v14051_v27, %v14050_v2  ;;  %v3537_v26 = vmul.f32 %v14051_v27, %v14052_v44  ;;  %v3591_v9 = vmul.f32 %v14012_v56, %v14053_v16  ;;  %v14056_v39 = vld [vmem:[#allocation68_spill] sm:$0xff]  ;;  %v14057_v18 = vld [vmem:[#allocation69_spill] sm:$0xff] }
 0x281   :  { %v5516_v28 = vadd.f32 %v5500_v32, %v5476_v14  ;;  %v5518_v43 = vadd.f32 %v5502_v31, %v5478_v12  ;;  %v3441_v5 = vadd.f32 %v3425_v29, %v3385_v63  ;;  %v3593_v3 = vmul.f32 %v14012_v56, %v14054_v54 }
 0x282   :  { %v3495_v53 = vadd.f32 %v3479_v41, %v3439_v55  ;;  %v3647_v34 = vmul.f32 %v10102_v0, %v14055_v23  ;;  %v3649_v48 = vmul.f32 %v10102_v0, %v14056_v39  ;;  %v3703_v58 = vmul.f32 %v10106_v37, %v14057_v18 }
 0x283   :  { %v5556_v35 = vadd.f32 %v5540_v50, %v5516_v28  ;;  %v5558_v27 = vadd.f32 %v5542_v25, %v5518_v43  ;;  %v3497_v8 = vadd.f32 %v3481_v30, %v3441_v5  ;;  %v3705_v12 = vmul.f32 %v10106_v37, %v14058_v36 }
 0x284   :  { %v3551_v63 = vadd.f32 %v3535_v57, %v3495_v53  ;;  %v5281_v56 = vmul.f32 %v10121_v1, %v14039_v51  ;;  %v5283_v41 = vmul.f32 %v10121_v1, %v14040_v24  ;;  %v5305_v32 = vmul.f32 %v10125_v17, %v14041_v20  ;;  %v14134_v20 = vld [vmem:[#allocation47_spill] sm:$0xff] }
 0x285   :  { %v5571_v0 = vpack.c.bf16 %v5558_v27, %v5556_v35  ;;  %v3553_v31 = vadd.f32 %v3537_v26, %v3497_v8  ;;  %v5307_v28 = vmul.f32 %v10125_v17, %v14043_v11  ;;  %v5345_v5 = vmul.f32 %v10129_v60, %v14044_v6 }
 0x286   :  { %v3607_v43 = vadd.f32 %v3591_v9, %v3551_v63  ;;  %v5321_v37 = vadd.f32 %v5305_v32, %v5281_v56  ;;  %v5347_v50 = vmul.f32 %v10129_v60, %v14046_v47  ;;  %v5385_v25 = vmul.f32 %v10133_v59, %v14047_v10  ;;  %v14059_v63 = vld [vmem:[#allocation143_spill] sm:$0xff] }
 0x287   :  { %5588 = vmatpush1.bf16.msra.mxu0 %v5571_v0  ;;  %v3609_v1 = vadd.f32 %v3593_v3, %v3553_v31  ;;  %v5323_v29 = vadd.f32 %v5307_v28, %v5283_v41  ;;  %v5387_v8 = vmul.f32 %v10133_v59, %v14049_v38  ;;  %v5425_v17 = vmul.f32 %v10137_v4, %v14050_v2  ;;  %v14060_v41 = vld [vmem:[#allocation104_spill] sm:$0xff]  ;;  %v14062_v0 = vld [vmem:[#allocation45_spill] sm:$0xff] }
 0x288   :  { %v3663_v14 = vadd.f32 %v3647_v34, %v3607_v43  ;;  %v5361_v30 = vadd.f32 %v5345_v5, %v5321_v37  ;;  %v5427_v55 = vmul.f32 %v10137_v4, %v14052_v44  ;;  %v5465_v60 = vmul.f32 %v10141_v61, %v14053_v16  ;;  %v14063_v28 = vld [vmem:[#allocation113_spill] sm:$0xff]  ;;  %v14065_v37 = vld [vmem:[#allocation34_spill] sm:$0xff] }
 0x289   :  { %v3665_v57 = vadd.f32 %v3649_v48, %v3609_v1  ;;  %v5363_v26 = vadd.f32 %v5347_v50, %v5323_v29  ;;  %v5467_v9 = vmul.f32 %v10141_v61, %v14054_v54  ;;  %v5505_v3 = vmul.f32 %v10169_v62, %v14055_v23  ;;  %v6530_v23 = vld [vmem:[#allocation8 + $0x28] sm:$0xff]   ;;  %v14113_v54 = vld [vmem:[#allocation71_spill] sm:$0xff]  ;;  %v14115_v44 = vld [vmem:[#allocation73_spill] sm:$0xff] }
 0x28a   :  { %v3719_v59 = vadd.f32 %v3703_v58, %v3663_v14  ;;  %v5401_v53 = vadd.f32 %v5385_v25, %v5361_v30  ;;  %v5507_v34 = vmul.f32 %v10169_v62, %v14056_v39  ;;  %v5545_v35 = vmul.f32 %v10173_v33, %v14057_v18  ;;  %v14061_v58 = vld [vmem:[#allocation107_spill] sm:$0xff]  ;;  %v14068_v14 = vld [vmem:[#allocation48_spill] sm:$0xff] }
 0x28b   :  { %v3721_v4 = vadd.f32 %v3705_v12, %v3665_v57  ;;  %v5403_v27 = vadd.f32 %v5387_v8, %v5363_v26  ;;  %v5547_v48 = vmul.f32 %v10173_v33, %v14058_v36  ;;  %v3326_v56 = vmul.f32 %v10177_v49, %v14059_v63  ;;  %v14064_v12 = vld [vmem:[#allocation117_spill] sm:$0xff]  ;;  %v14066_v25 = vld [vmem:[#allocation127_spill] sm:$0xff]  ;;  %v14069_v57 = vld [vmem:[#allocation24_spill] sm:$0xff] }
 0x28c   :  { %v5441_v61 = vadd.f32 %v5425_v17, %v5401_v53  ;;  %v3328_v32 = vmul.f32 %v10177_v49, %v14060_v41  ;;  %v3366_v31 = vmul.f32 %v14062_v0, %v14061_v58  ;;  %v3368_v62 = vmul.f32 %v14062_v0, %v14063_v28  ;;  %v14067_v17 = vld [vmem:[#allocation55_spill] sm:$0xff] }
 0x28d   :  { %v3731_v5 = vpack.c.bf16 %v3721_v4, %v3719_v59  ;;  %v5443_v43 = vadd.f32 %v5427_v55, %v5403_v27  ;;  %v3422_v50 = vmul.f32 %v14065_v37, %v14064_v12  ;;  %v3424_v33 = vmul.f32 %v14065_v37, %v14066_v25  ;;  %v14070_v53 = vld [vmem:[#allocation131_spill] sm:$0xff]  ;;  %v14071_v59 = vld [vmem:[#allocation62_spill] sm:$0xff] }
 0x28e   :  { %v5481_v1 = vadd.f32 %v5465_v60, %v5441_v61  ;;  %v3382_v29 = vadd.f32 %v3366_v31, %v3326_v56  ;;  %v3384_v8 = vadd.f32 %v3368_v62, %v3328_v32  ;;  %v3478_v49 = vmul.f32 %v14068_v14, %v14067_v17  ;;  %v14072_v4 = vld [vmem:[#allocation147_spill] sm:$0xff]  ;;  %v14073_v60 = vld [vmem:[#allocation148_spill] sm:$0xff]  ;;  %v14074_v32 = vld [vmem:[#allocation149_spill] sm:$0xff] }
 0x28f   :  { %4113 = vmatprep.subr.bf16.mxu1 %v3731_v5  ;;  %v5483_v30 = vadd.f32 %v5467_v9, %v5443_v43  ;;  %v3480_v26 = vmul.f32 %v14068_v14, %v14069_v57  ;;  %v3534_v55 = vmul.f32 %v14071_v59, %v14070_v53  ;;  %v3536_v27 = vmul.f32 %v14071_v59, %v14072_v4  ;;  %v14075_v9 = vld [vmem:[#allocation144_spill] sm:$0xff]  ;;  %v14076_v5 = vld [vmem:[#allocation150_spill] sm:$0xff]  ;;  %v14077_v59 = vld [vmem:[#allocation151_spill] sm:$0xff] }
 0x290   :  { %v5521_v0 = vadd.f32 %v5505_v3, %v5481_v1  ;;  %v3438_v36 = vadd.f32 %v3422_v50, %v3382_v29  ;;  %v3440_v37 = vadd.f32 %v3424_v33, %v3384_v8  ;;  %v3590_v56 = vmul.f32 %v10215_v19, %v14073_v60  ;;  %v14078_v33 = vld [vmem:[#allocation152_spill] sm:$0xff] }
 0x291   :  { %v5523_v61 = vadd.f32 %v5507_v34, %v5483_v30  ;;  %v3592_v31 = vmul.f32 %v10215_v19, %v14074_v32  ;;  %v3646_v62 = vmul.f32 %v14035_v46, %v14075_v9  ;;  %v3648_v43 = vmul.f32 %v14035_v46, %v14076_v5 }
 0x292   :  { %v5561_v14 = vadd.f32 %v5545_v35, %v5521_v0  ;;  %v3494_v18 = vadd.f32 %v3478_v49, %v3438_v36  ;;  %v3496_v39 = vadd.f32 %v3480_v26, %v3440_v37  ;;  %v3702_v3 = vmul.f32 %v10241_v42, %v14077_v59 }
 0x293   :  { %v5563_v50 = vadd.f32 %v5547_v48, %v5523_v61  ;;  %v3704_v1 = vmul.f32 %v10241_v42, %v14078_v33  ;;  %v5280_v34 = vmul.f32 %v10245_v45, %v14059_v63  ;;  %v5282_v19 = vmul.f32 %v10245_v45, %v14060_v41 }
 0x294   :  { %v3550_v29 = vadd.f32 %v3534_v55, %v3494_v18  ;;  %v3552_v8 = vadd.f32 %v3536_v27, %v3496_v39  ;;  %v5304_v46 = vmul.f32 %v13998_v13, %v14061_v58  ;;  %v5306_v36 = vmul.f32 %v13998_v13, %v14063_v28 }
 0x295   :  { %v5574_v35 = vpack.c.bf16 %v5563_v50, %v5561_v14  ;;  %v5344_v48 = vmul.f32 %v10269_v7, %v14064_v12  ;;  %v5346_v42 = vmul.f32 %v10269_v7, %v14066_v25  ;;  %v5384_v49 = vmul.f32 %v10273_v21, %v14067_v17  ;;  %v14105_v25 = vld [vmem:[#allocation121_spill] sm:$0xff] }
 0x296   :  { %v3606_v30 = vadd.f32 %v3590_v56, %v3550_v29  ;;  %v3608_v45 = vadd.f32 %v3592_v31, %v3552_v8  ;;  %v5320_v18 = vadd.f32 %v5304_v46, %v5280_v34  ;;  %v5322_v39 = vadd.f32 %v5306_v36, %v5282_v19  ;;  %v14080_v29 = vld [vmem:[#allocation137_spill] sm:$0xff] }
 0x297   :  { %5589 = vmatprep.subr.bf16.mxu0 %v5574_v35  ;;  %v5386_v26 = vmul.f32 %v10273_v21, %v14069_v57  ;;  %v5424_v13 = vmul.f32 %v10277_v22, %v14070_v53  ;;  %v5426_v55 = vmul.f32 %v10277_v22, %v14072_v4  ;;  %v5464_v7 = vmul.f32 %v10293_v40, %v14073_v60  ;;  %v14102_v53 = vld [vmem:[#allocation109_spill] sm:$0xff] }
 0x298   :  { %v3662_v27 = vadd.f32 %v3646_v62, %v3606_v30  ;;  %v3664_v0 = vadd.f32 %v3648_v43, %v3608_v45  ;;  %v5360_v37 = vadd.f32 %v5344_v48, %v5320_v18  ;;  %v5362_v56 = vadd.f32 %v5346_v42, %v5322_v39  ;;  %v14079_v43 = vld [vmem:[#allocation155_spill] sm:$0xff]  ;;  %v14086_v48 = vld [vmem:[#allocation145_spill] sm:$0xff]  ;;  %v14089_v30 = vld [vmem:[#allocation86_spill] sm:$0xff] }
 0x299   :  { %v5466_v61 = vmul.f32 %v10293_v40, %v14074_v32  ;;  %v5504_v31 = vmul.f32 %v10297_v52, %v14075_v9  ;;  %v5506_v21 = vmul.f32 %v10297_v52, %v14076_v5  ;;  %v5544_v14 = vmul.f32 %v10301_v15, %v14077_v59  ;;  %v14082_v40 = vld [vmem:[#allocation139_spill] sm:$0xff]  ;;  %v14084_v52 = vld [vmem:[#allocation140_spill] sm:$0xff]  ;;  %v14090_v18 = vld [vmem:[#allocation85_spill] sm:$0xff] }
 0x29a   :  { %v3718_v22 = vadd.f32 %v3702_v3, %v3662_v27  ;;  %v3720_v50 = vadd.f32 %v3704_v1, %v3664_v0  ;;  %v5400_v34 = vadd.f32 %v5384_v49, %v5360_v37  ;;  %v5402_v19 = vadd.f32 %v5386_v26, %v5362_v56  ;;  %v14091_v26 = vld [vmem:[#allocation88_spill] sm:$0xff]  ;;  %v6529_v0 = vld [vmem:[#allocation8] sm:$0xff]  }
 0x29b   :  { %v5546_v62 = vmul.f32 %v10301_v15, %v14078_v33  ;;  %v10701_v8 = vrot.slane %v14080_v29, %v14079_v43  ;;  %v10705_v46 = vrot.slane %v14082_v40, %v14079_v43  ;;  %v10709_v36 = vrot.slane %v14084_v52, %v14079_v43  ;;  %v14088_v15 = vld [vmem:[#allocation84_spill] sm:$0xff]  ;;  %v14092_v37 = vld [vmem:[#allocation93_spill] sm:$0xff] }
 0x29c   :  { %v3730_v35 = vpack.c.bf16 %v3720_v50, %v3718_v22  ;;  %v5440_v3 = vadd.f32 %v5424_v13, %v5400_v34  ;;  %v5442_v1 = vadd.f32 %v5426_v55, %v5402_v19  ;;  %v10713_v42 = vrot.slane %v14086_v48, %v14079_v43  ;;  %v14093_v22 = vld [vmem:[#allocation95_spill] sm:$0xff]  ;;  %v14094_v33 = vld [vmem:[#allocation101_spill] sm:$0xff] }
 0x29d   :  { %14081 = vst [vmem:[#allocation63_spill] sm:$0xff] %v10701_v8  ;;  %14083 = vst [vmem:[#allocation17_spill] sm:$0xff] %v10705_v46  ;;  %v4159_v49 = vmul.f32 %v10701_v8, %v14088_v15  ;;  %v4161_v45 = vmul.f32 %v10701_v8, %v14089_v30  ;;  %v4183_v39 = vmul.f32 %v10705_v46, %v14090_v18  ;;  %v14095_v5 = vld [vmem:[#allocation105_spill] sm:$0xff] }
 0x29e   :  { %14085 = vst [vmem:[#allocation18_spill] sm:$0xff] %v10709_v36  ;;  %14087 = vst [vmem:[#allocation77_spill] sm:$0xff] %v10713_v42  ;;  %v4185_v27 = vmul.f32 %v10705_v46, %v14091_v26  ;;  %4114 = vmatpush1.bf16.msra.mxu1 %v3730_v35  ;;  %v5480_v13 = vadd.f32 %v5464_v7, %v5440_v3  ;;  %v5482_v55 = vadd.f32 %v5466_v61, %v5442_v1  ;;  %v14096_v35 = vld [vmem:[#allocation138_spill] sm:$0xff]  ;;  %v14098_v61 = vld [vmem:[#allocation141_spill] sm:$0xff] }
 0x29f   :  { %v4223_v56 = vmul.f32 %v10709_v36, %v14092_v37  ;;  %v4225_v50 = vmul.f32 %v10709_v36, %v14093_v22  ;;  %v4199_v34 = vadd.f32 %v4183_v39, %v4159_v49  ;;  %v4263_v59 = vmul.f32 %v10713_v42, %v14094_v33  ;;  %v14099_v49 = vld [vmem:[#allocation142_spill] sm:$0xff] }
 0x2a0   :  { %v4201_v19 = vadd.f32 %v4185_v27, %v4161_v45  ;;  %v4265_v9 = vmul.f32 %v10713_v42, %v14095_v5  ;;  %v5520_v32 = vadd.f32 %v5504_v31, %v5480_v13  ;;  %v5522_v60 = vadd.f32 %v5506_v21, %v5482_v55  ;;  %v14100_v39 = vld [vmem:[#allocation146_spill] sm:$0xff]  ;;  %v14101_v13 = vld [vmem:[#allocation108_spill] sm:$0xff] }
 0x2a1   :  { %v10733_v7 = vrot.slane %v14096_v35, %v14079_v43  ;;  %v10737_v3 = vrot.slane %v14098_v61, %v14079_v43  ;;  %v4239_v1 = vadd.f32 %v4223_v56, %v4199_v34  ;;  %v10741_v45 = vrot.slane %v14099_v49, %v14079_v43  ;;  %6473 = vmatmul.mubr.msk.bf16.vlgmr.msra.gmra.mrb[0].mxu1 %vm4052_vm12, %v6529_v0  ;;  %v14106_v0 = vld [vmem:[#allocation129_spill] sm:$0xff] }
 0x2a2   :  { %v4241_v4 = vadd.f32 %v4225_v50, %v4201_v19  ;;  %v10745_v27 = vrot.slane %v14100_v39, %v14079_v43  ;;  %v5560_v31 = vadd.f32 %v5544_v14, %v5520_v32  ;;  %v5562_v21 = vadd.f32 %v5546_v62, %v5522_v60  ;;  %v14104_v19 = vld [vmem:[#allocation118_spill] sm:$0xff]  ;;  %v14108_v62 = vld [vmem:[#allocation132_spill] sm:$0xff] }
 0x2a3   :  { %14097 = vst [vmem:[#allocation49_spill] sm:$0xff] %v10733_v7  ;;  %v4303_v55 = vmul.f32 %v10733_v7, %v14101_v13  ;;  %v4305_v57 = vmul.f32 %v10733_v7, %v14102_v53  ;;  %v14103_v56 = vmov 0   ;;  %v4279_v50 = vadd.f32 %v4263_v59, %v4239_v1  ;;  %v14107_v32 = vld [vmem:[#allocation130_spill] sm:$0xff]  ;;  %v14109_v59 = vld [vmem:[#allocation135_spill] sm:$0xff] }
 0x2a4   :  { %4505 = vmatprep.mubr.bf16.mxu1 %v14103_v56  ;;  %v4281_v34 = vadd.f32 %v4265_v9, %v4241_v4  ;;  %v4343_v17 = vmul.f32 %v10737_v3, %v14104_v19  ;;  %v4345_v12 = vmul.f32 %v10737_v3, %v14105_v25  ;;  %v5573_v28 = vpack.c.bf16 %v5562_v21, %v5560_v31  ;;  %v14110_v9 = vld [vmem:[#allocation13_spill] sm:$0xff]  ;;  %v14111_v31 = vld [vmem:[#allocation23_spill] sm:$0xff] }
 0x2a5   :  { %v4383_v60 = vmul.f32 %v10741_v45, %v14106_v0  ;;  %v4385_v14 = vmul.f32 %v10741_v45, %v14107_v32  ;;  %v4423_v58 = vmul.f32 %v10745_v27, %v14108_v62  ;;  %v4319_v41 = vadd.f32 %v4303_v55, %v4279_v50 }
 0x2a6   :  { %v4321_v63 = vadd.f32 %v4305_v57, %v4281_v34  ;;  %v4425_v4 = vmul.f32 %v10745_v27, %v14109_v59  ;;  %v10766_v1 = vsub.s32 6, %v14110_v9  ;;  %5590 = vmatpush1.bf16.msra.mxu0 %v5573_v28  ;;  %v10770_v21 = vrot.slane %v14111_v31, %v14079_v43  ;;  %v14117_v57 = vld [vmem:[#allocation74_spill] sm:$0xff] }
 0x2a7   :  { %v10774_v16 = vrot.slane %v14113_v54, %v14079_v43  ;;  %v10778_v55 = vrot.slane %v14115_v44, %v14079_v43  ;;  %v10782_v50 = vrot.slane %v14117_v57, %v14079_v43  ;;  %v4359_v34 = vadd.f32 %v4343_v17, %v4319_v41 }
 0x2a8   :  { %14112 = vst [vmem:[#allocation79_spill] sm:$0xff] %v10770_v21  ;;  %v4361_v9 = vadd.f32 %v4345_v12, %v4321_v63  ;;  %v10786_v28 = vrot.slane %v14080_v29, %v10766_v1  ;;  %v10790_v2 = vrot.slane %v14082_v40, %v10766_v1  ;;  %v10794_v38 = vrot.slane %v14084_v52, %v10766_v1  ;;  %v14128_v29 = vld [vmem:[#allocation78_spill] sm:$0xff] }
 0x2a9   :  { %14114 = vst [vmem:[#allocation81_spill] sm:$0xff] %v10774_v16  ;;  %14116 = vst [vmem:[#allocation87_spill] sm:$0xff] %v10778_v55  ;;  %v10798_v10 = vrot.slane %v14086_v48, %v10766_v1  ;;  %v10802_v41 = vrot.slane %v14096_v35, %v10766_v1  ;;  %v10806_v63 = vrot.slane %v14098_v61, %v10766_v1  ;;  %6481 = vmatmul.mubr.msk.bf16.vlgmr.msra.gmra.mrb[0].mxu0 %vm4052_vm12, %v6530_v23 }
 0x2aa   :  { %14118 = vst [vmem:[#allocation91_spill] sm:$0xff] %v10782_v50  ;;  %v4399_v12 = vadd.f32 %v4383_v60, %v4359_v34  ;;  %v4401_v17 = vadd.f32 %v4385_v14, %v4361_v9  ;;  %v5639_v40 = vmul.f32 %v10786_v28, %v14088_v15  ;;  %v5641_v52 = vmul.f32 %v10786_v28, %v14089_v30 }
 0x2ab   :  { %v5663_v48 = vmul.f32 %v10790_v2, %v14090_v18  ;;  %v5665_v35 = vmul.f32 %v10790_v2, %v14091_v26  ;;  %v5703_v61 = vmul.f32 %v10794_v38, %v14092_v37  ;;  %v5705_v60 = vmul.f32 %v10794_v38, %v14093_v22  ;;  %5985 = vmatprep.mubr.bf16.mxu0 %v14103_v56 }
 0x2ac   :  { %v4439_v14 = vadd.f32 %v4423_v58, %v4399_v12  ;;  %v4441_v9 = vadd.f32 %v4425_v4, %v4401_v17  ;;  %v5743_v34 = vmul.f32 %v10798_v10, %v14094_v33  ;;  %v5745_v23 = vmul.f32 %v10798_v10, %v14095_v5 }
 0x2ad   :  { %v5679_v18 = vadd.f32 %v5663_v48, %v5639_v40  ;;  %v5681_v30 = vadd.f32 %v5665_v35, %v5641_v52  ;;  %v5783_v26 = vmul.f32 %v10802_v41, %v14101_v13  ;;  %v5785_v37 = vmul.f32 %v10802_v41, %v14102_v53  ;;  %v14120_v48 = vld [vmem:[#allocation36_spill] sm:$0xff]  ;;  %v14123_v53 = vld [vmem:[#allocation35_spill] sm:$0xff] }
 0x2ae   :  { %v4458_v15 = vpack.c.bf16 %v4441_v9, %v4439_v14  ;;  %v5823_v56 = vmul.f32 %v10806_v63, %v14104_v19  ;;  %v5825_v58 = vmul.f32 %v10806_v63, %v14105_v25  ;;  %v10836_v4 = vrot.slane %v14099_v49, %v10766_v1  ;;  %v14121_v9 = vld [vmem:[#allocation38_spill] sm:$0xff]  ;;  %v14122_v19 = vld [vmem:[#allocation31_spill] sm:$0xff] }
 0x2af   :  { %v5719_v12 = vadd.f32 %v5703_v61, %v5679_v18  ;;  %v5721_v40 = vadd.f32 %v5705_v60, %v5681_v30  ;;  %v10840_v52 = vrot.slane %v14100_v39, %v10766_v1  ;;  %v4158_v35 = vmul.f32 %v10770_v21, %v14120_v48  ;;  %v14124_v39 = vld [vmem:[#allocation37_spill] sm:$0xff]  ;;  %v14125_v49 = vld [vmem:[#allocation39_spill] sm:$0xff] }
 0x2b0   :  { %4473 = vmatprep.subr.bf16.mxu1 %v4458_v15  ;;  %v5863_v17 = vmul.f32 %v10836_v4, %v14106_v0  ;;  %v5865_v14 = vmul.f32 %v10836_v4, %v14107_v32  ;;  %v4160_v25 = vmul.f32 %v10770_v21, %v14121_v9  ;;  %v4182_v30 = vmul.f32 %v10774_v16, %v14122_v19 }
 0x2b1   :  { %14119 = vst [vmem:[#allocation92_spill] sm:$0xff] %v10840_v52  ;;  %v5759_v18 = vadd.f32 %v5743_v34, %v5719_v12  ;;  %v5761_v61 = vadd.f32 %v5745_v23, %v5721_v40  ;;  %v5903_v60 = vmul.f32 %v10840_v52, %v14108_v62  ;;  %v5905_v15 = vmul.f32 %v10840_v52, %v14109_v59  ;;  %v14126_v34 = vld [vmem:[#allocation42_spill] sm:$0xff]  ;;  %v14127_v12 = vld [vmem:[#allocation43_spill] sm:$0xff]  ;;  %v14139_v52 = vld [vmem:[#allocation20_spill] sm:$0xff] }
 0x2b2   :  { %v4184_v0 = vmul.f32 %v10774_v16, %v14123_v53  ;;  %v4198_v13 = vadd.f32 %v4182_v30, %v4158_v35  ;;  %v4222_v32 = vmul.f32 %v10778_v55, %v14124_v39  ;;  %v4224_v5 = vmul.f32 %v10778_v55, %v14125_v49  ;;  %v14130_v35 = vld [vmem:[#allocation72_spill] sm:$0xff] }
 0x2b3   :  { %v5799_v33 = vadd.f32 %v5783_v26, %v5759_v18  ;;  %v5801_v22 = vadd.f32 %v5785_v37, %v5761_v61  ;;  %v4262_v23 = vmul.f32 %v10782_v50, %v14126_v34  ;;  %v4264_v40 = vmul.f32 %v10782_v50, %v14127_v12  ;;  %v14131_v26 = vld [vmem:[#allocation75_spill] sm:$0xff]  ;;  %v14132_v18 = vld [vmem:[#allocation76_spill] sm:$0xff] }
 0x2b4   :  { %v4200_v62 = vadd.f32 %v4184_v0, %v4160_v25  ;;  %v4238_v59 = vadd.f32 %v4222_v32, %v4198_v13  ;;  %v10868_v47 = vrot.slane %v14128_v29, %v14079_v43  ;;  %v10872_v30 = vrot.slane %v14130_v35, %v14079_v43  ;;  %v14133_v0 = vld [vmem:[#allocation46_spill] sm:$0xff] }
 0x2b5   :  { %v5839_v6 = vadd.f32 %v5823_v56, %v5799_v33  ;;  %v5841_v11 = vadd.f32 %v5825_v58, %v5801_v22  ;;  %v10876_v37 = vrot.slane %v14131_v26, %v14079_v43  ;;  %v10880_v61 = vrot.slane %v14132_v18, %v14079_v43  ;;  %v14135_v33 = vld [vmem:[#allocation61_spill] sm:$0xff]  ;;  %v14136_v56 = vld [vmem:[#allocation58_spill] sm:$0xff]  ;;  %v14137_v43 = vld [vmem:[#allocation60_spill] sm:$0xff] }
 0x2b6   :  { %14129 = vst [vmem:[#allocation96_spill] sm:$0xff] %v10868_v47  ;;  %v4240_v25 = vadd.f32 %v4224_v5, %v4200_v62  ;;  %v4278_v13 = vadd.f32 %v4262_v23, %v4238_v59  ;;  %v4302_v32 = vmul.f32 %v10868_v47, %v14133_v0  ;;  %v4304_v24 = vmul.f32 %v10868_v47, %v14134_v20  ;;  %v14138_v62 = vld [vmem:[#allocation64_spill] sm:$0xff] }
 0x2b7   :  { %v5879_v51 = vadd.f32 %v5863_v17, %v5839_v6  ;;  %v5881_v50 = vadd.f32 %v5865_v14, %v5841_v11  ;;  %v4342_v22 = vmul.f32 %v10872_v30, %v14135_v33  ;;  %v4344_v58 = vmul.f32 %v10872_v30, %v14136_v56  ;;  %v14140_v11 = vld [vmem:[#allocation56_spill] sm:$0xff] }
 0x2b8   :  { %v4280_v55 = vadd.f32 %v4264_v40, %v4240_v25  ;;  %v4318_v16 = vadd.f32 %v4302_v32, %v4278_v13  ;;  %v4382_v5 = vmul.f32 %v10876_v37, %v14137_v43  ;;  %v4384_v59 = vmul.f32 %v10876_v37, %v14138_v62 }
 0x2b9   :  { %v5919_v23 = vadd.f32 %v5903_v60, %v5879_v51  ;;  %v5921_v21 = vadd.f32 %v5905_v15, %v5881_v50  ;;  %v4422_v6 = vmul.f32 %v10880_v61, %v14139_v52  ;;  %v4424_v17 = vmul.f32 %v10880_v61, %v14140_v11 }
 0x2ba   :  { %v4320_v14 = vadd.f32 %v4304_v24, %v4280_v55  ;;  %v4358_v47 = vadd.f32 %v4342_v22, %v4318_v16  ;;  %v10900_v40 = vrot.slane %v14111_v31, %v10766_v1  ;;  %v10904_v25 = vrot.slane %v14113_v54, %v10766_v1  ;;  %v14156_v54 = vld [vmem:[#allocation125_spill] sm:$0xff] }
 0x2bb   :  { %v5938_v13 = vpack.c.bf16 %v5921_v21, %v5919_v23  ;;  %v10908_v51 = vrot.slane %v14115_v44, %v10766_v1  ;;  %v10912_v50 = vrot.slane %v14117_v57, %v10766_v1  ;;  %v10916_v24 = vrot.slane %v14128_v29, %v10766_v1 }
 0x2bc   :  { %v4360_v16 = vadd.f32 %v4344_v58, %v4320_v14  ;;  %v4398_v55 = vadd.f32 %v4382_v5, %v4358_v47  ;;  %v5638_v60 = vmul.f32 %v10900_v40, %v14120_v48  ;;  %v5640_v21 = vmul.f32 %v10900_v40, %v14121_v9  ;;  %v14154_v48 = vld [vmem:[#allocation120_spill] sm:$0xff] }
 0x2bd   :  { %14141 = vst [vmem:[#allocation94_spill] sm:$0xff] %v10916_v24  ;;  %5953 = vmatprep.subr.bf16.mxu0 %v5938_v13  ;;  %v5662_v15 = vmul.f32 %v10904_v25, %v14122_v19  ;;  %v5664_v32 = vmul.f32 %v10904_v25, %v14123_v53  ;;  %v5702_v22 = vmul.f32 %v10908_v51, %v14124_v39 }
 0x2be   :  { %v5704_v58 = vmul.f32 %v10908_v51, %v14125_v49  ;;  %v4400_v47 = vadd.f32 %v4384_v59, %v4360_v16  ;;  %v4438_v5 = vadd.f32 %v4422_v6, %v4398_v55  ;;  %v5742_v23 = vmul.f32 %v10912_v50, %v14126_v34 }
 0x2bf   :  { %v5744_v14 = vmul.f32 %v10912_v50, %v14127_v12  ;;  %v5678_v13 = vadd.f32 %v5662_v15, %v5638_v60  ;;  %v5680_v29 = vadd.f32 %v5664_v32, %v5640_v21  ;;  %v5782_v57 = vmul.f32 %v10916_v24, %v14133_v0  ;;  %v14145_v60 = vld [vmem:[#allocation97_spill] sm:$0xff]  ;;  %v14146_v15 = vld [vmem:[#allocation98_spill] sm:$0xff] }
 0x2c0   :  { %v5784_v53 = vmul.f32 %v10916_v24, %v14134_v20  ;;  %v4440_v39 = vadd.f32 %v4424_v17, %v4400_v47  ;;  %v10940_v49 = vrot.slane %v14130_v35, %v10766_v1  ;;  %v10944_v59 = vrot.slane %v14131_v26, %v10766_v1  ;;  %v14153_v26 = vld [vmem:[#allocation115_spill] sm:$0xff] }
 0x2c1   :  { %v10948_v6 = vrot.slane %v14132_v18, %v10766_v1  ;;  %v5718_v16 = vadd.f32 %v5702_v22, %v5678_v13  ;;  %v5720_v55 = vadd.f32 %v5704_v58, %v5680_v29  ;;  %v4163_v21 = vmul.f32 %v10701_v8, %v14145_v60  ;;  %v14147_v58 = vld [vmem:[#allocation99_spill] sm:$0xff]  ;;  %v14148_v13 = vld [vmem:[#allocation102_spill] sm:$0xff] }
 0x2c2   :  { %14142 = vst [vmem:[#allocation51_spill] sm:$0xff] %v10940_v49  ;;  %14143 = vst [vmem:[#allocation157_spill] sm:$0xff] %v10944_v59  ;;  %v4165_v17 = vmul.f32 %v10701_v8, %v14146_v15  ;;  %v4457_v32 = vpack.c.bf16 %v4440_v39, %v4438_v5  ;;  %v5822_v47 = vmul.f32 %v10940_v49, %v14135_v33  ;;  %v14149_v33 = vld [vmem:[#allocation103_spill] sm:$0xff] }
 0x2c3   :  { %14144 = vst [vmem:[#allocation15_spill] sm:$0xff] %v10948_v6  ;;  %v5824_v20 = vmul.f32 %v10940_v49, %v14136_v56  ;;  %v5862_v0 = vmul.f32 %v10944_v59, %v14137_v43  ;;  %v5758_v1 = vadd.f32 %v5742_v23, %v5718_v16  ;;  %v5760_v18 = vadd.f32 %v5744_v14, %v5720_v55  ;;  %v14150_v55 = vld [vmem:[#allocation106_spill] sm:$0xff] }
 0x2c4   :  { %v5864_v29 = vmul.f32 %v10944_v59, %v14138_v62  ;;  %v5902_v22 = vmul.f32 %v10948_v6, %v14139_v52  ;;  %4474 = vmatpush1.bf16.msra.mxu1 %v4457_v32  ;;  %v5904_v39 = vmul.f32 %v10948_v6, %v14140_v11  ;;  %v4187_v5 = vmul.f32 %v10705_v46, %v14147_v58  ;;  %v14151_v43 = vld [vmem:[#allocation110_spill] sm:$0xff] }
 0x2c5   :  { %v4189_v56 = vmul.f32 %v10705_v46, %v14148_v13  ;;  %v4227_v23 = vmul.f32 %v10709_v36, %v14149_v33  ;;  %v5798_v14 = vadd.f32 %v5782_v57, %v5758_v1  ;;  %v5800_v16 = vadd.f32 %v5784_v53, %v5760_v18  ;;  %v14152_v11 = vld [vmem:[#allocation114_spill] sm:$0xff] }
 0x2c6   :  { %v4229_v62 = vmul.f32 %v10709_v36, %v14150_v55  ;;  %v4267_v32 = vmul.f32 %v10713_v42, %v14151_v43  ;;  %v4203_v52 = vadd.f32 %v4187_v5, %v4163_v21  ;;  %v4269_v34 = vmul.f32 %v10713_v42, %v14152_v11  ;;  %v14155_v53 = vld [vmem:[#allocation122_spill] sm:$0xff]  ;;  %v14158_v42 = vld [vmem:[#allocation128_spill] sm:$0xff]  ;;  %v14160_v36 = vld [vmem:[#allocation111_spill] sm:$0xff] }
 0x2c7   :  { %v4205_v12 = vadd.f32 %v4189_v56, %v4165_v17  ;;  %v4307_v35 = vmul.f32 %v10733_v7, %v14153_v26  ;;  %v5838_v19 = vadd.f32 %v5822_v47, %v5798_v14  ;;  %v5840_v9 = vadd.f32 %v5824_v20, %v5800_v16  ;;  %v14157_v56 = vld [vmem:[#allocation126_spill] sm:$0xff]  ;;  %v14159_v20 = vld [vmem:[#allocation53_spill] sm:$0xff] }
 0x2c8   :  { %v4309_v57 = vmul.f32 %v10733_v7, %v14154_v48  ;;  %v4347_v18 = vmul.f32 %v10737_v3, %v14155_v53  ;;  %v4243_v1 = vadd.f32 %v4227_v23, %v4203_v52  ;;  %v4349_v21 = vmul.f32 %v10737_v3, %v14156_v54 }
 0x2c9   :  { %v4245_v44 = vadd.f32 %v4229_v62, %v4205_v12  ;;  %v4387_v17 = vmul.f32 %v10741_v45, %v14157_v56  ;;  %v5878_v5 = vadd.f32 %v5862_v0, %v5838_v19  ;;  %v5880_v31 = vadd.f32 %v5864_v29, %v5840_v9 }
 0x2ca   :  { %v4389_v47 = vmul.f32 %v10741_v45, %v14158_v42  ;;  %v4427_v14 = vmul.f32 %v10745_v27, %v14159_v20  ;;  %v4283_v16 = vadd.f32 %v4267_v32, %v4243_v1  ;;  %v4429_v52 = vmul.f32 %v10745_v27, %v14160_v36 }
 0x2cb   :  { %v4285_v7 = vadd.f32 %v4269_v34, %v4245_v44  ;;  %v5643_v12 = vmul.f32 %v10786_v28, %v14145_v60  ;;  %v5918_v62 = vadd.f32 %v5902_v22, %v5878_v5  ;;  %v5920_v23 = vadd.f32 %v5904_v39, %v5880_v31 }
 0x2cc   :  { %v5645_v19 = vmul.f32 %v10786_v28, %v14146_v15  ;;  %v5667_v9 = vmul.f32 %v10790_v2, %v14147_v58  ;;  %v4323_v0 = vadd.f32 %v4307_v35, %v4283_v16  ;;  %v5669_v32 = vmul.f32 %v10790_v2, %v14148_v13  ;;  %v14176_v58 = vld [vmem:[#allocation27_spill] sm:$0xff] }
 0x2cd   :  { %v4325_v29 = vadd.f32 %v4309_v57, %v4285_v7  ;;  %v5707_v44 = vmul.f32 %v10794_v38, %v14149_v33  ;;  %v5937_v34 = vpack.c.bf16 %v5920_v23, %v5918_v62  ;;  %v5709_v22 = vmul.f32 %v10794_v38, %v14150_v55  ;;  %v14173_v55 = vld [vmem:[#allocation32_spill] sm:$0xff] }
 0x2ce   :  { %v5683_v1 = vadd.f32 %v5667_v9, %v5643_v12  ;;  %v5747_v31 = vmul.f32 %v10798_v10, %v14151_v43  ;;  %v4363_v39 = vadd.f32 %v4347_v18, %v4323_v0  ;;  %v5685_v15 = vadd.f32 %v5669_v32, %v5645_v19 }
 0x2cf   :  { %v4365_v5 = vadd.f32 %v4349_v21, %v4325_v29  ;;  %v5749_v7 = vmul.f32 %v10798_v10, %v14152_v11  ;;  %5954 = vmatpush1.bf16.msra.mxu0 %v5937_v34  ;;  %v5787_v57 = vmul.f32 %v10802_v41, %v14153_v26  ;;  %v5789_v16 = vmul.f32 %v10802_v41, %v14154_v48  ;;  %v14161_v29 = vld [vmem:[#allocation92_spill] sm:$0xff]  ;;  %v14167_v48 = vld [vmem:[#allocation54_spill] sm:$0xff] }
 0x2d0   :  { %v5723_v35 = vadd.f32 %v5707_v44, %v5683_v1  ;;  %v5827_v12 = vmul.f32 %v10806_v63, %v14155_v53  ;;  %v4403_v62 = vadd.f32 %v4387_v17, %v4363_v39  ;;  %v5725_v9 = vadd.f32 %v5709_v22, %v5685_v15  ;;  %v14163_v22 = vld [vmem:[#allocation79_spill] sm:$0xff] }
 0x2d1   :  { %v4405_v23 = vadd.f32 %v4389_v47, %v4365_v5  ;;  %v5829_v18 = vmul.f32 %v10806_v63, %v14156_v54  ;;  %v5867_v19 = vmul.f32 %v10836_v4, %v14157_v56  ;;  %v5869_v0 = vmul.f32 %v10836_v4, %v14158_v42  ;;  %v14162_v47 = vld [vmem:[#allocation112_spill] sm:$0xff]  ;;  %v14166_v56 = vld [vmem:[#allocation81_spill] sm:$0xff] }
 0x2d2   :  { %v5763_v21 = vadd.f32 %v5747_v31, %v5723_v35  ;;  %v5907_v32 = vmul.f32 %v14161_v29, %v14159_v20  ;;  %v4443_v44 = vadd.f32 %v4427_v14, %v4403_v62  ;;  %v5765_v1 = vadd.f32 %v5749_v7, %v5725_v9  ;;  %v14164_v31 = vld [vmem:[#allocation116_spill] sm:$0xff]  ;;  %v14165_v35 = vld [vmem:[#allocation119_spill] sm:$0xff] }
 0x2d3   :  { %v4445_v34 = vadd.f32 %v4429_v52, %v4405_v23  ;;  %v5909_v17 = vmul.f32 %v14161_v29, %v14160_v36  ;;  %v4162_v39 = vmul.f32 %v14163_v22, %v14162_v47  ;;  %v4164_v5 = vmul.f32 %v14163_v22, %v14164_v31  ;;  %v14168_v52 = vld [vmem:[#allocation123_spill] sm:$0xff]  ;;  %v14171_v36 = vld [vmem:[#allocation26_spill] sm:$0xff] }
 0x2d4   :  { %v5803_v15 = vadd.f32 %v5787_v57, %v5763_v21  ;;  %v4186_v54 = vmul.f32 %v14166_v56, %v14165_v35  ;;  %v5805_v53 = vadd.f32 %v5789_v16, %v5765_v1  ;;  %v4188_v14 = vmul.f32 %v14166_v56, %v14167_v48  ;;  %v14169_v7 = vld [vmem:[#allocation87_spill] sm:$0xff]  ;;  %v14170_v57 = vld [vmem:[#allocation124_spill] sm:$0xff] }
 0x2d5   :  { %v4460_v42 = vpack.c.bf16 %v4445_v34, %v4443_v44  ;;  %v4226_v62 = vmul.f32 %v14169_v7, %v14168_v52  ;;  %v4228_v21 = vmul.f32 %v14169_v7, %v14170_v57  ;;  %v14172_v20 = vld [vmem:[#allocation91_spill] sm:$0xff]  ;;  %v14174_v44 = vld [vmem:[#allocation133_spill] sm:$0xff]  ;;  %v14175_v34 = vld [vmem:[#allocation96_spill] sm:$0xff] }
 0x2d6   :  { %v5843_v23 = vadd.f32 %v5827_v12, %v5803_v15  ;;  %v4202_v9 = vadd.f32 %v4186_v54, %v4162_v39  ;;  %v4266_v26 = vmul.f32 %v14172_v20, %v14171_v36  ;;  %v5845_v11 = vadd.f32 %v5829_v18, %v5805_v53  ;;  %v14177_v12 = vld [vmem:[#allocation28_spill] sm:$0xff]  ;;  %v14178_v7 = vld [vmem:[#allocation25_spill] sm:$0xff]  ;;  %v14179_v53 = vld [vmem:[#allocation134_spill] sm:$0xff] }
 0x2d7   :  { %4475 = vmatprep.subr.bf16.mxu1 %v4460_v42  ;;  %v4204_v43 = vadd.f32 %v4188_v14, %v4164_v5  ;;  %v4268_v16 = vmul.f32 %v14172_v20, %v14173_v55  ;;  %v4306_v1 = vmul.f32 %v14175_v34, %v14174_v44  ;;  %v4308_v54 = vmul.f32 %v14175_v34, %v14176_v58  ;;  %v14180_v20 = vld [vmem:[#allocation136_spill] sm:$0xff] }
 0x2d8   :  { %v5883_v33 = vadd.f32 %v5867_v19, %v5843_v23  ;;  %v4242_v13 = vadd.f32 %v4226_v62, %v4202_v9  ;;  %v4346_v15 = vmul.f32 %v10872_v30, %v14177_v12  ;;  %v5885_v39 = vadd.f32 %v5869_v0, %v5845_v11  ;;  %v14181_v62 = vld [vmem:[#allocation16_spill] sm:$0xff] }
 0x2d9   :  { %v4244_v60 = vadd.f32 %v4228_v21, %v4204_v43  ;;  %v4348_v42 = vmul.f32 %v10872_v30, %v14178_v7  ;;  %v4386_v18 = vmul.f32 %v10876_v37, %v14179_v53  ;;  %v4388_v19 = vmul.f32 %v10876_v37, %v14180_v20  ;;  %v14182_v56 = vld [vmem:[#allocation40_spill] sm:$0xff] }
 0x2da   :  { %v5923_v5 = vadd.f32 %v5907_v32, %v5883_v33  ;;  %v4282_v14 = vadd.f32 %v4266_v26, %v4242_v13  ;;  %v4426_v23 = vmul.f32 %v10880_v61, %v14181_v62  ;;  %v5925_v9 = vadd.f32 %v5909_v17, %v5885_v39 }
 0x2db   :  { %v4284_v34 = vadd.f32 %v4268_v16, %v4244_v60  ;;  %v4428_v11 = vmul.f32 %v10880_v61, %v14182_v56  ;;  %v5642_v43 = vmul.f32 %v10900_v40, %v14162_v47  ;;  %v5644_v21 = vmul.f32 %v10900_v40, %v14164_v31 }
 0x2dc   :  { %v4322_v0 = vadd.f32 %v4306_v1, %v4282_v14  ;;  %v5666_v26 = vmul.f32 %v10904_v25, %v14165_v35  ;;  %v5668_v33 = vmul.f32 %v10904_v25, %v14167_v48  ;;  %v5940_v13 = vpack.c.bf16 %v5925_v9, %v5923_v5 }
 0x2dd   :  { %v4324_v32 = vadd.f32 %v4308_v54, %v4284_v34  ;;  %v5706_v60 = vmul.f32 %v10908_v51, %v14168_v52  ;;  %v5708_v17 = vmul.f32 %v10908_v51, %v14170_v57  ;;  %v5746_v14 = vmul.f32 %v10912_v50, %v14171_v36  ;;  %v14196_v52 = vld [vmem:[#allocation168_spill] sm:$0xff] }
 0x2de   :  { %v4362_v16 = vadd.f32 %v4346_v15, %v4322_v0  ;;  %v5682_v39 = vadd.f32 %v5666_v26, %v5642_v43  ;;  %v5684_v1 = vadd.f32 %v5668_v33, %v5644_v21  ;;  %5955 = vmatprep.subr.bf16.mxu0 %v5940_v13  ;;  %v5748_v35 = vmul.f32 %v10912_v50, %v14173_v55  ;;  %v14194_v55 = vld [vmem:[#allocation49_spill] sm:$0xff] }
 0x2df   :  { %v4364_v31 = vadd.f32 %v4348_v42, %v4324_v32  ;;  %v5786_v34 = vmul.f32 %v10916_v24, %v14174_v44  ;;  %v5788_v54 = vmul.f32 %v10916_v24, %v14176_v58  ;;  %v5826_v15 = vmul.f32 %v10940_v49, %v14177_v12  ;;  %v14193_v44 = vld [vmem:[#allocation166_spill] sm:$0xff] }
 0x2e0   :  { %v4402_v5 = vadd.f32 %v4386_v18, %v4362_v16  ;;  %v5722_v9 = vadd.f32 %v5706_v60, %v5682_v39  ;;  %v5724_v57 = vadd.f32 %v5708_v17, %v5684_v1  ;;  %v5828_v0 = vmul.f32 %v10940_v49, %v14178_v7  ;;  %v14184_v17 = vld [vmem:[#allocation159_spill] sm:$0xff] }
 0x2e1   :  { %v4404_v43 = vadd.f32 %v4388_v19, %v4364_v31  ;;  %v5866_v42 = vmul.f32 %v10944_v59, %v14179_v53  ;;  %v5868_v21 = vmul.f32 %v10944_v59, %v14180_v20  ;;  %v5906_v18 = vmul.f32 %v10948_v6, %v14181_v62  ;;  %v14183_v31 = vld [vmem:[#allocation158_spill] sm:$0xff]  ;;  %v14185_v53 = vld [vmem:[#allocation160_spill] sm:$0xff]  ;;  %v14191_v20 = vld [vmem:[#allocation77_spill] sm:$0xff] }
 0x2e2   :  { %v4442_v26 = vadd.f32 %v4426_v23, %v4402_v5  ;;  %v5762_v33 = vadd.f32 %v5746_v14, %v5722_v9  ;;  %v5764_v13 = vadd.f32 %v5748_v35, %v5724_v57  ;;  %v5908_v60 = vmul.f32 %v10948_v6, %v14182_v56  ;;  %v14186_v14 = vld [vmem:[#allocation161_spill] sm:$0xff]  ;;  %v14187_v5 = vld [vmem:[#allocation162_spill] sm:$0xff]  ;;  %v14190_v62 = vld [vmem:[#allocation164_spill] sm:$0xff] }
 0x2e3   :  { %v4444_v32 = vadd.f32 %v4428_v11, %v4404_v43  ;;  %v4167_v19 = vmul.f32 %v10701_v8, %v14183_v31  ;;  %v4169_v16 = vmul.f32 %v10701_v8, %v14184_v17  ;;  %v4191_v23 = vmul.f32 %v10705_v46, %v14185_v53  ;;  %v14188_v11 = vld [vmem:[#allocation18_spill] sm:$0xff]  ;;  %v14189_v43 = vld [vmem:[#allocation163_spill] sm:$0xff] }
 0x2e4   :  { %v5802_v39 = vadd.f32 %v5786_v34, %v5762_v33  ;;  %v5804_v1 = vadd.f32 %v5788_v54, %v5764_v13  ;;  %v4193_v35 = vmul.f32 %v10705_v46, %v14186_v14  ;;  %v4231_v9 = vmul.f32 %v14188_v11, %v14187_v5  ;;  %v14192_v33 = vld [vmem:[#allocation165_spill] sm:$0xff] }
 0x2e5   :  { %v4459_v57 = vpack.c.bf16 %v4444_v32, %v4442_v26  ;;  %v4233_v56 = vmul.f32 %v14188_v11, %v14189_v43  ;;  %v4271_v7 = vmul.f32 %v14191_v20, %v14190_v62  ;;  %v4207_v34 = vadd.f32 %v4191_v23, %v4167_v19  ;;  %v14195_v32 = vld [vmem:[#allocation167_spill] sm:$0xff] }
 0x2e6   :  { %v5842_v12 = vadd.f32 %v5826_v15, %v5802_v39  ;;  %v5844_v58 = vadd.f32 %v5828_v0, %v5804_v1  ;;  %v4209_v54 = vadd.f32 %v4193_v35, %v4169_v16  ;;  %v4273_v13 = vmul.f32 %v14191_v20, %v14192_v33  ;;  %v14197_v0 = vld [vmem:[#allocation169_spill] sm:$0xff]  ;;  %v14198_v16 = vld [vmem:[#allocation170_spill] sm:$0xff]  ;;  %v14199_v1 = vld [vmem:[#allocation171_spill] sm:$0xff] }
 0x2e7   :  { %4476 = vmatpush1.bf16.msra.mxu1 %v4459_v57  ;;  %v4311_v26 = vmul.f32 %v14194_v55, %v14193_v44  ;;  %v4313_v36 = vmul.f32 %v14194_v55, %v14195_v32  ;;  %v4351_v48 = vmul.f32 %v10737_v3, %v14196_v52  ;;  %v4247_v46 = vadd.f32 %v4231_v9, %v4207_v34  ;;  %v14200_v35 = vld [vmem:[#allocation172_spill] sm:$0xff] }
 0x2e8   :  { %v5882_v47 = vadd.f32 %v5866_v42, %v5842_v12  ;;  %v5884_v11 = vadd.f32 %v5868_v21, %v5844_v58  ;;  %v4249_v15 = vadd.f32 %v4233_v56, %v4209_v54  ;;  %v4353_v19 = vmul.f32 %v10737_v3, %v14197_v0  ;;  %v14201_v12 = vld [vmem:[#allocation173_spill] sm:$0xff] }
 0x2e9   :  { %v4391_v39 = vmul.f32 %v10741_v45, %v14198_v16  ;;  %v4393_v23 = vmul.f32 %v10741_v45, %v14199_v1  ;;  %v4431_v57 = vmul.f32 %v10745_v27, %v14200_v35  ;;  %v4287_v8 = vadd.f32 %v4271_v7, %v4247_v46 }
 0x2ea   :  { %v5922_v55 = vadd.f32 %v5906_v18, %v5882_v47  ;;  %v5924_v20 = vadd.f32 %v5908_v60, %v5884_v11  ;;  %v4289_v6 = vadd.f32 %v4273_v13, %v4249_v15  ;;  %v4433_v58 = vmul.f32 %v10745_v27, %v14201_v12 }
 0x2eb   :  { %v5647_v56 = vmul.f32 %v10786_v28, %v14183_v31  ;;  %v5649_v42 = vmul.f32 %v10786_v28, %v14184_v17  ;;  %v5671_v21 = vmul.f32 %v10790_v2, %v14185_v53  ;;  %v4327_v34 = vadd.f32 %v4311_v26, %v4287_v8  ;;  %v14217_v53 = vld [vmem:[#allocation183_spill] sm:$0xff]  ;;  %v14219_v17 = vld [vmem:[#allocation185_spill] sm:$0xff] }
 0x2ec   :  { %v5939_v9 = vpack.c.bf16 %v5924_v20, %v5922_v55  ;;  %v4329_v54 = vadd.f32 %v4313_v36, %v4289_v6  ;;  %v5673_v47 = vmul.f32 %v10790_v2, %v14186_v14  ;;  %v5711_v7 = vmul.f32 %v10794_v38, %v14187_v5  ;;  %v14215_v5 = vld [vmem:[#allocation181_spill] sm:$0xff] }
 0x2ed   :  { %v5687_v46 = vadd.f32 %v5671_v21, %v5647_v56  ;;  %v5713_v18 = vmul.f32 %v10794_v38, %v14189_v43  ;;  %v5751_v60 = vmul.f32 %v10798_v10, %v14190_v62  ;;  %v4367_v11 = vadd.f32 %v4351_v48, %v4327_v34 }
 0x2ee   :  { %5956 = vmatpush1.bf16.msra.mxu0 %v5939_v9  ;;  %v4369_v13 = vadd.f32 %v4353_v19, %v4329_v54  ;;  %v5689_v15 = vadd.f32 %v5673_v47, %v5649_v42  ;;  %v5753_v8 = vmul.f32 %v10798_v10, %v14192_v33  ;;  %v5791_v6 = vmul.f32 %v10802_v41, %v14193_v44  ;;  %v14212_v33 = vld [vmem:[#allocation41_spill] sm:$0xff] }
 0x2ef   :  { %v5727_v36 = vadd.f32 %v5711_v7, %v5687_v46  ;;  %v5793_v55 = vmul.f32 %v10802_v41, %v14195_v32  ;;  %v5831_v20 = vmul.f32 %v10806_v63, %v14196_v52  ;;  %v4407_v26 = vadd.f32 %v4391_v39, %v4367_v11  ;;  %v14202_v7 = vld [vmem:[#allocation154_spill] sm:$0xff] }
 0x2f0   :  { %v4409_v56 = vadd.f32 %v4393_v23, %v4369_v13  ;;  %v5729_v21 = vadd.f32 %v5713_v18, %v5689_v15  ;;  %v5833_v48 = vmul.f32 %v10806_v63, %v14197_v0  ;;  %v5871_v42 = vmul.f32 %v10836_v4, %v14198_v16  ;;  %v14204_v13 = vld [vmem:[#allocation175_spill] sm:$0xff]  ;;  %v14205_v15 = vld [vmem:[#allocation81_spill] sm:$0xff]  ;;  %v14206_v0 = vld [vmem:[#allocation176_spill] sm:$0xff] }
 0x2f1   :  { %v5767_v19 = vadd.f32 %v5751_v60, %v5727_v36  ;;  %v5873_v9 = vmul.f32 %v10836_v4, %v14199_v1  ;;  %v5911_v34 = vmul.f32 %v14161_v29, %v14200_v35  ;;  %v4447_v54 = vadd.f32 %v4431_v57, %v4407_v26  ;;  %v14203_v60 = vld [vmem:[#allocation174_spill] sm:$0xff]  ;;  %v14211_v35 = vld [vmem:[#allocation91_spill] sm:$0xff] }
 0x2f2   :  { %v4449_v47 = vadd.f32 %v4433_v58, %v4409_v56  ;;  %v5769_v46 = vadd.f32 %v5753_v8, %v5729_v21  ;;  %v5913_v39 = vmul.f32 %v14161_v29, %v14201_v12  ;;  %v4166_v18 = vmul.f32 %v14163_v22, %v14202_v7  ;;  %v14207_v58 = vld [vmem:[#allocation177_spill] sm:$0xff]  ;;  %v14208_v8 = vld [vmem:[#allocation87_spill] sm:$0xff] }
 0x2f3   :  { %v5807_v23 = vadd.f32 %v5791_v6, %v5767_v19  ;;  %v4168_v11 = vmul.f32 %v14163_v22, %v14203_v60  ;;  %v4190_v36 = vmul.f32 %v14205_v15, %v14204_v13  ;;  %v4192_v57 = vmul.f32 %v14205_v15, %v14206_v0  ;;  %v14209_v6 = vld [vmem:[#allocation178_spill] sm:$0xff]  ;;  %v14210_v12 = vld [vmem:[#allocation179_spill] sm:$0xff] }
 0x2f4   :  { %v4462_v1 = vpack.c.bf16 %v4449_v47, %v4447_v54  ;;  %v5809_v16 = vadd.f32 %v5793_v55, %v5769_v46  ;;  %v4230_v26 = vmul.f32 %v14208_v8, %v14207_v58  ;;  %v4232_v19 = vmul.f32 %v14208_v8, %v14209_v6  ;;  %v14213_v54 = vld [vmem:[#allocation180_spill] sm:$0xff] }
 0x2f5   :  { %v5847_v56 = vadd.f32 %v5831_v20, %v5807_v23  ;;  %v4206_v21 = vadd.f32 %v4190_v36, %v4166_v18  ;;  %v4270_v52 = vmul.f32 %v14211_v35, %v14210_v12  ;;  %v4208_v44 = vadd.f32 %v4192_v57, %v4168_v11  ;;  %v14214_v47 = vld [vmem:[#allocation96_spill] sm:$0xff]  ;;  %v14216_v23 = vld [vmem:[#allocation182_spill] sm:$0xff] }
 0x2f6   :  { %4477 = vmatprep.subr.bf16.mxu1 %v4462_v1  ;;  %v5849_v32 = vadd.f32 %v5833_v48, %v5809_v16  ;;  %v4272_v55 = vmul.f32 %v14211_v35, %v14212_v33  ;;  %v4310_v46 = vmul.f32 %v14214_v47, %v14213_v54  ;;  %v4312_v20 = vmul.f32 %v14214_v47, %v14215_v5  ;;  %v14218_v1 = vld [vmem:[#allocation184_spill] sm:$0xff]  ;;  %v14221_v47 = vld [vmem:[#allocation187_spill] sm:$0xff] }
 0x2f7   :  { %v5887_v62 = vadd.f32 %v5871_v42, %v5847_v56  ;;  %v4246_v43 = vadd.f32 %v4230_v26, %v4206_v21  ;;  %v4350_v18 = vmul.f32 %v10872_v30, %v14216_v23  ;;  %v4248_v14 = vadd.f32 %v4232_v19, %v4208_v44  ;;  %v14220_v26 = vld [vmem:[#allocation186_spill] sm:$0xff] }
 0x2f8   :  { %v5889_v36 = vadd.f32 %v5873_v9, %v5849_v32  ;;  %v4352_v16 = vmul.f32 %v10872_v30, %v14217_v53  ;;  %v4390_v48 = vmul.f32 %v10876_v37, %v14218_v1  ;;  %v4392_v42 = vmul.f32 %v10876_v37, %v14219_v17 }
 0x2f9   :  { %v5927_v11 = vadd.f32 %v5911_v34, %v5887_v62  ;;  %v4286_v57 = vadd.f32 %v4270_v52, %v4246_v43  ;;  %v4430_v56 = vmul.f32 %v10880_v61, %v14220_v26  ;;  %v4288_v31 = vadd.f32 %v4272_v55, %v4248_v14 }
 0x2fa   :  { %v5929_v21 = vadd.f32 %v5913_v39, %v5889_v36  ;;  %v4432_v32 = vmul.f32 %v10880_v61, %v14221_v47  ;;  %v5646_v44 = vmul.f32 %v10900_v40, %v14202_v7  ;;  %v5648_v19 = vmul.f32 %v10900_v40, %v14203_v60 }
 0x2fb   :  { %v4326_v9 = vadd.f32 %v4310_v46, %v4286_v57  ;;  %v5670_v52 = vmul.f32 %v10904_v25, %v14204_v13  ;;  %v5672_v62 = vmul.f32 %v10904_v25, %v14206_v0  ;;  %v4328_v34 = vadd.f32 %v4312_v20, %v4288_v31  ;;  %v14238_v0 = vld [vmem:[#allocation52_spill] sm:$0xff] }
 0x2fc   :  { %v5942_v43 = vpack.c.bf16 %v5929_v21, %v5927_v11  ;;  %v5710_v14 = vmul.f32 %v10908_v51, %v14207_v58  ;;  %v5712_v39 = vmul.f32 %v10908_v51, %v14209_v6  ;;  %v5750_v57 = vmul.f32 %v10912_v50, %v14210_v12  ;;  %v14235_v12 = vld [vmem:[#allocation89_spill] sm:$0xff] }
 0x2fd   :  { %v4366_v55 = vadd.f32 %v4350_v18, %v4326_v9  ;;  %v5686_v36 = vadd.f32 %v5670_v52, %v5646_v44  ;;  %v5688_v46 = vadd.f32 %v5672_v62, %v5648_v19  ;;  %v4368_v60 = vadd.f32 %v4352_v16, %v4328_v34 }
 0x2fe   :  { %5957 = vmatprep.subr.bf16.mxu0 %v5942_v43  ;;  %v5752_v13 = vmul.f32 %v10912_v50, %v14212_v33  ;;  %v5790_v31 = vmul.f32 %v10916_v24, %v14213_v54  ;;  %v5792_v20 = vmul.f32 %v10916_v24, %v14215_v5  ;;  %v5830_v18 = vmul.f32 %v10940_v49, %v14216_v23  ;;  %v14226_v23 = vld [vmem:[#allocation65_spill] sm:$0xff] }
 0x2ff   :  { %v4406_v11 = vadd.f32 %v4390_v48, %v4366_v55  ;;  %v5726_v21 = vadd.f32 %v5710_v14, %v5686_v36  ;;  %v5728_v6 = vadd.f32 %v5712_v39, %v5688_v46  ;;  %v4408_v44 = vadd.f32 %v4392_v42, %v4368_v60  ;;  %v14222_v48 = vld [vmem:[#allocation15_spill] sm:$0xff]  ;;  %v14223_v60 = vld [vmem:[#allocation22_spill] sm:$0xff]  ;;  %v14233_v5 = vld [vmem:[#allocation77_spill] sm:$0xff] }
 0x300   :  { %v5832_v9 = vmul.f32 %v10940_v49, %v14217_v53  ;;  %v5870_v16 = vmul.f32 %v10944_v59, %v14218_v1  ;;  %v5872_v19 = vmul.f32 %v10944_v59, %v14219_v17  ;;  %v5910_v34 = vmul.f32 %v14222_v48, %v14220_v26  ;;  %v14224_v42 = vld [vmem:[#allocation63_spill] sm:$0xff]  ;;  %v14225_v36 = vld [vmem:[#allocation14_spill] sm:$0xff]  ;;  %v14227_v17 = vld [vmem:[#allocation17_spill] sm:$0xff] }
 0x301   :  { %v4446_v52 = vadd.f32 %v4430_v56, %v4406_v11  ;;  %v5766_v62 = vadd.f32 %v5750_v57, %v5726_v21  ;;  %v5768_v43 = vadd.f32 %v5752_v13, %v5728_v6  ;;  %v4448_v14 = vadd.f32 %v4432_v32, %v4408_v44  ;;  %v14228_v57 = vld [vmem:[#allocation66_spill] sm:$0xff]  ;;  %v14229_v11 = vld [vmem:[#allocation80_spill] sm:$0xff]  ;;  %v14231_v44 = vld [vmem:[#allocation83_spill] sm:$0xff] }
 0x302   :  { %v5912_v39 = vmul.f32 %v14222_v48, %v14221_v47  ;;  %v4171_v55 = vmul.f32 %v14224_v42, %v14223_v60  ;;  %v4173_v46 = vmul.f32 %v14224_v42, %v14225_v36  ;;  %v4195_v56 = vmul.f32 %v14227_v17, %v14226_v23  ;;  %v14230_v32 = vld [vmem:[#allocation18_spill] sm:$0xff] }
 0x303   :  { %v5806_v1 = vadd.f32 %v5790_v31, %v5766_v62  ;;  %v5808_v53 = vadd.f32 %v5792_v20, %v5768_v43  ;;  %v4197_v13 = vmul.f32 %v14227_v17, %v14228_v57  ;;  %v4461_v6 = vpack.c.bf16 %v4448_v14, %v4446_v52  ;;  %v14232_v26 = vld [vmem:[#allocation82_spill] sm:$0xff]  ;;  %v14236_v17 = vld [vmem:[#allocation49_spill] sm:$0xff] }
 0x304   :  { %v4235_v21 = vmul.f32 %v14230_v32, %v14229_v11  ;;  %v4237_v47 = vmul.f32 %v14230_v32, %v14231_v44  ;;  %v4275_v54 = vmul.f32 %v14233_v5, %v14232_v26  ;;  %v4211_v31 = vadd.f32 %v4195_v56, %v4171_v55  ;;  %v14234_v62 = vld [vmem:[#allocation50_spill] sm:$0xff]  ;;  %v14242_v56 = vld [vmem:[#allocation69_spill] sm:$0xff] }
 0x305   :  { %v5846_v33 = vadd.f32 %v5830_v18, %v5806_v1  ;;  %v5848_v42 = vadd.f32 %v5832_v9, %v5808_v53  ;;  %v4213_v20 = vadd.f32 %v4197_v13, %v4173_v46  ;;  %4478 = vmatpush1.bf16.msra.mxu1 %v4461_v6  ;;  %v4277_v43 = vmul.f32 %v14233_v5, %v14234_v62  ;;  %v14237_v14 = vld [vmem:[#allocation90_spill] sm:$0xff]  ;;  %v14239_v53 = vld [vmem:[#allocation100_spill] sm:$0xff]  ;;  %v14240_v9 = vld [vmem:[#allocation67_spill] sm:$0xff] }
 0x306   :  { %v4315_v52 = vmul.f32 %v14236_v17, %v14235_v12  ;;  %v4317_v58 = vmul.f32 %v14236_v17, %v14237_v14  ;;  %v4355_v32 = vmul.f32 %v10737_v3, %v14238_v0  ;;  %v4251_v59 = vadd.f32 %v4235_v21, %v4211_v31  ;;  %v14241_v5 = vld [vmem:[#allocation68_spill] sm:$0xff] }
 0x307   :  { %v5886_v7 = vadd.f32 %v5870_v16, %v5846_v33  ;;  %v5888_v48 = vadd.f32 %v5872_v19, %v5848_v42  ;;  %v4253_v1 = vadd.f32 %v4237_v47, %v4213_v20  ;;  %v4357_v18 = vmul.f32 %v10737_v3, %v14239_v53  ;;  %v14243_v33 = vld [vmem:[#allocation70_spill] sm:$0xff] }
 0x308   :  { %v4395_v55 = vmul.f32 %v10741_v45, %v14240_v9  ;;  %v4397_v46 = vmul.f32 %v10741_v45, %v14241_v5  ;;  %v4435_v13 = vmul.f32 %v10745_v27, %v14242_v56  ;;  %v4291_v49 = vadd.f32 %v4275_v54, %v4251_v59 }
 0x309   :  { %v5926_v6 = vadd.f32 %v5910_v34, %v5886_v7  ;;  %v5928_v17 = vadd.f32 %v5912_v39, %v5888_v48  ;;  %v4293_v24 = vadd.f32 %v4277_v43, %v4253_v1  ;;  %v4437_v16 = vmul.f32 %v10745_v27, %v14243_v33 }
 0x30a   :  { %v5651_v47 = vmul.f32 %v10786_v28, %v14223_v60  ;;  %v5653_v3 = vmul.f32 %v10786_v28, %v14225_v36  ;;  %v5675_v19 = vmul.f32 %v10790_v2, %v14226_v23  ;;  %v4331_v21 = vadd.f32 %v4315_v52, %v4291_v49 }
 0x30b   :  { %v5941_v45 = vpack.c.bf16 %v5928_v17, %v5926_v6  ;;  %v4333_v42 = vadd.f32 %v4317_v58, %v4293_v24  ;;  %v5677_v7 = vmul.f32 %v10790_v2, %v14228_v57  ;;  %v5715_v54 = vmul.f32 %v10794_v38, %v14229_v11 }
 0x30c   :  { %v5691_v59 = vadd.f32 %v5675_v19, %v5651_v47  ;;  %v5717_v27 = vmul.f32 %v10794_v38, %v14231_v44  ;;  %v5755_v48 = vmul.f32 %v10798_v10, %v14232_v26  ;;  %v4371_v28 = vadd.f32 %v4355_v32, %v4331_v21  ;;  %v14244_v47 = vld [vmem:[#allocation143_spill] sm:$0xff] }
 0x30d   :  { %5958 = vmatpush1.bf16.msra.mxu0 %v5941_v45  ;;  %v4373_v34 = vadd.f32 %v4357_v18, %v4333_v42  ;;  %v5693_v39 = vadd.f32 %v5677_v7, %v5653_v3  ;;  %v5757_v49 = vmul.f32 %v10798_v10, %v14234_v62  ;;  %v5795_v2 = vmul.f32 %v10802_v41, %v14235_v12  ;;  %v14245_v3 = vld [vmem:[#allocation104_spill] sm:$0xff]  ;;  %v14246_v45 = vld [vmem:[#allocation107_spill] sm:$0xff]  ;;  %v14247_v7 = vld [vmem:[#allocation113_spill] sm:$0xff] }
 0x30e   :  { %v5731_v24 = vadd.f32 %v5715_v54, %v5691_v59  ;;  %v5797_v58 = vmul.f32 %v10802_v41, %v14237_v14  ;;  %v5835_v38 = vmul.f32 %v10806_v63, %v14238_v0  ;;  %v4411_v31 = vadd.f32 %v4395_v55, %v4371_v28  ;;  %v14250_v28 = vld [vmem:[#allocation55_spill] sm:$0xff] }
 0x30f   :  { %v4413_v20 = vadd.f32 %v4397_v46, %v4373_v34  ;;  %v5733_v43 = vadd.f32 %v5717_v27, %v5693_v39  ;;  %v5837_v52 = vmul.f32 %v10806_v63, %v14239_v53  ;;  %v5875_v10 = vmul.f32 %v10836_v4, %v14240_v9  ;;  %v14249_v27 = vld [vmem:[#allocation127_spill] sm:$0xff] }
 0x310   :  { %v5771_v32 = vadd.f32 %v5755_v48, %v5731_v24  ;;  %v5877_v1 = vmul.f32 %v10836_v4, %v14241_v5  ;;  %v5915_v18 = vmul.f32 %v14161_v29, %v14242_v56  ;;  %v4451_v41 = vadd.f32 %v4435_v13, %v4411_v31  ;;  %v14295_v5 = vld [vmem:[#allocation13_spill] sm:$0xff]  ;;  %v6532_v53 = vld [vmem:[#allocation8 + $0x30] sm:$0xff]  }
 0x311   :  { %v4453_v6 = vadd.f32 %v4437_v16, %v4413_v20  ;;  %v5773_v17 = vadd.f32 %v5757_v49, %v5733_v43  ;;  %v5917_v55 = vmul.f32 %v14161_v29, %v14243_v33  ;;  %v4170_v63 = vmul.f32 %v14163_v22, %v14244_v47  ;;  %v14248_v16 = vld [vmem:[#allocation117_spill] sm:$0xff]  ;;  %v14251_v49 = vld [vmem:[#allocation24_spill] sm:$0xff]  ;;  %v14254_v43 = vld [vmem:[#allocation147_spill] sm:$0xff] }
 0x312   :  { %v5811_v46 = vadd.f32 %v5795_v2, %v5771_v32  ;;  %v4172_v19 = vmul.f32 %v14163_v22, %v14245_v3  ;;  %v4194_v21 = vmul.f32 %v14205_v15, %v14246_v45  ;;  %v4196_v13 = vmul.f32 %v14205_v15, %v14247_v7  ;;  %v14252_v2 = vld [vmem:[#allocation131_spill] sm:$0xff]  ;;  %v14255_v32 = vld [vmem:[#allocation148_spill] sm:$0xff] }
 0x313   :  { %v4464_v4 = vpack.c.bf16 %v4453_v6, %v4451_v41  ;;  %v5813_v42 = vadd.f32 %v5797_v58, %v5773_v17  ;;  %v4234_v59 = vmul.f32 %v14208_v8, %v14248_v16  ;;  %v4236_v48 = vmul.f32 %v14208_v8, %v14249_v27  ;;  %v14253_v58 = vld [vmem:[#allocation96_spill] sm:$0xff]  ;;  %v14256_v17 = vld [vmem:[#allocation149_spill] sm:$0xff]  ;;  %v14294_v33 = vld [vmem:[#allocation135_spill] sm:$0xff] }
 0x314   :  { %v5851_v54 = vadd.f32 %v5835_v38, %v5811_v46  ;;  %v4210_v29 = vadd.f32 %v4194_v21, %v4170_v63  ;;  %v4274_v34 = vmul.f32 %v14211_v35, %v14250_v28  ;;  %v4212_v39 = vadd.f32 %v4196_v13, %v4172_v19  ;;  %v14257_v46 = vld [vmem:[#allocation144_spill] sm:$0xff]  ;;  %v14258_v21 = vld [vmem:[#allocation150_spill] sm:$0xff]  ;;  %v14314_v62 = vld [vmem:[#allocation75_spill] sm:$0xff] }
 0x315   :  { %4479 = vmatprep.subr.bf16.mxu1 %v4464_v4  ;;  %v5853_v22 = vadd.f32 %v5837_v52, %v5813_v42  ;;  %v4276_v24 = vmul.f32 %v14211_v35, %v14251_v49  ;;  %v4314_v15 = vmul.f32 %v14253_v58, %v14252_v2  ;;  %v4316_v38 = vmul.f32 %v14253_v58, %v14254_v43  ;;  %v14259_v4 = vld [vmem:[#allocation151_spill] sm:$0xff] }
 0x316   :  { %v5891_v31 = vadd.f32 %v5875_v10, %v5851_v54  ;;  %v4250_v20 = vadd.f32 %v4234_v59, %v4210_v29  ;;  %v4354_v8 = vmul.f32 %v10872_v30, %v14255_v32  ;;  %v4252_v6 = vadd.f32 %v4236_v48, %v4212_v39  ;;  %v14260_v54 = vld [vmem:[#allocation152_spill] sm:$0xff]  ;;  %v14316_v44 = vld [vmem:[#allocation43_spill] sm:$0xff] }
 0x317   :  { %v5893_v41 = vadd.f32 %v5877_v1, %v5853_v22  ;;  %v4356_v52 = vmul.f32 %v10872_v30, %v14256_v17  ;;  %v4394_v63 = vmul.f32 %v10876_v37, %v14257_v46  ;;  %v4396_v10 = vmul.f32 %v10876_v37, %v14258_v21 }
 0x318   :  { %v5931_v35 = vadd.f32 %v5915_v18, %v5891_v31  ;;  %v4290_v19 = vadd.f32 %v4274_v34, %v4250_v20  ;;  %v4434_v42 = vmul.f32 %v10880_v61, %v14259_v4  ;;  %v4292_v59 = vadd.f32 %v4276_v24, %v4252_v6 }
 0x319   :  { %v5933_v13 = vadd.f32 %v5917_v55, %v5893_v41  ;;  %v4436_v1 = vmul.f32 %v10880_v61, %v14260_v54  ;;  %v5650_v29 = vmul.f32 %v10900_v40, %v14244_v47  ;;  %v5652_v48 = vmul.f32 %v10900_v40, %v14245_v3 }
 0x31a   :  { %v4330_v30 = vadd.f32 %v4314_v15, %v4290_v19  ;;  %v5674_v18 = vmul.f32 %v10904_v25, %v14246_v45  ;;  %v5676_v37 = vmul.f32 %v10904_v25, %v14247_v7  ;;  %v4332_v22 = vadd.f32 %v4316_v38, %v4292_v59  ;;  %v14261_v25 = vld [vmem:[#allocation94_spill] sm:$0xff]  ;;  %v14289_v45 = vld [vmem:[#allocation121_spill] sm:$0xff] }
 0x31b   :  { %v5944_v34 = vpack.c.bf16 %v5933_v13, %v5931_v35  ;;  %v5714_v55 = vmul.f32 %v10908_v51, %v14248_v16  ;;  %v5716_v61 = vmul.f32 %v10908_v51, %v14249_v27  ;;  %v5754_v40 = vmul.f32 %v10912_v50, %v14250_v28  ;;  %v14285_v28 = vld [vmem:[#allocation146_spill] sm:$0xff] }
 0x31c   :  { %v4370_v39 = vadd.f32 %v4354_v8, %v4330_v30  ;;  %v5690_v24 = vadd.f32 %v5674_v18, %v5650_v29  ;;  %v5692_v58 = vadd.f32 %v5676_v37, %v5652_v48  ;;  %v4372_v15 = vadd.f32 %v4356_v52, %v4332_v22  ;;  %v14262_v8 = vld [vmem:[#allocation51_spill] sm:$0xff]  ;;  %v14263_v52 = vld [vmem:[#allocation157_spill] sm:$0xff]  ;;  %v14288_v16 = vld [vmem:[#allocation118_spill] sm:$0xff] }
 0x31d   :  { %5959 = vmatprep.subr.bf16.mxu0 %v5944_v34  ;;  %v5756_v31 = vmul.f32 %v10912_v50, %v14251_v49  ;;  %v5794_v20 = vmul.f32 %v14261_v25, %v14252_v2  ;;  %v5796_v38 = vmul.f32 %v14261_v25, %v14254_v43  ;;  %v5834_v35 = vmul.f32 %v14262_v8, %v14255_v32  ;;  %v14266_v22 = vld [vmem:[#allocation137_spill] sm:$0xff]  ;;  %v14273_v25 = vld [vmem:[#allocation84_spill] sm:$0xff] }
 0x31e   :  { %v4410_v41 = vadd.f32 %v4394_v63, %v4370_v39  ;;  %v5730_v6 = vadd.f32 %v5714_v55, %v5690_v24  ;;  %v5732_v51 = vadd.f32 %v5716_v61, %v5692_v58  ;;  %v4412_v19 = vadd.f32 %v4396_v10, %v4372_v15  ;;  %v14264_v63 = vld [vmem:[#allocation15_spill] sm:$0xff]  ;;  %v14265_v10 = vld [vmem:[#allocation156_spill] sm:$0xff]  ;;  %v14271_v15 = vld [vmem:[#allocation145_spill] sm:$0xff] }
 0x31f   :  { %v5836_v13 = vmul.f32 %v14262_v8, %v14256_v17  ;;  %v5874_v59 = vmul.f32 %v14263_v52, %v14257_v46  ;;  %v5876_v50 = vmul.f32 %v14263_v52, %v14258_v21  ;;  %v5914_v18 = vmul.f32 %v14264_v63, %v14259_v4  ;;  %v14267_v61 = vld [vmem:[#allocation139_spill] sm:$0xff]  ;;  %v14275_v8 = vld [vmem:[#allocation85_spill] sm:$0xff]  ;;  %v14276_v52 = vld [vmem:[#allocation88_spill] sm:$0xff] }
 0x320   :  { %v4450_v29 = vadd.f32 %v4434_v42, %v4410_v41  ;;  %v5770_v30 = vadd.f32 %v5754_v40, %v5730_v6  ;;  %v5772_v48 = vadd.f32 %v5756_v31, %v5732_v51  ;;  %v4452_v37 = vadd.f32 %v4436_v1, %v4412_v19  ;;  %v14269_v42 = vld [vmem:[#allocation140_spill] sm:$0xff]  ;;  %v14274_v6 = vld [vmem:[#allocation86_spill] sm:$0xff]  ;;  %v14279_v21 = vld [vmem:[#allocation101_spill] sm:$0xff] }
 0x321   :  { %v5916_v34 = vmul.f32 %v14264_v63, %v14260_v54  ;;  %v11348_v55 = vrot.slane %v14266_v22, %v14265_v10  ;;  %v11352_v39 = vrot.slane %v14267_v61, %v14265_v10  ;;  %v11356_v40 = vrot.slane %v14269_v42, %v14265_v10  ;;  %v6531_v54 = vld [vmem:[#allocation8 + $0x10] sm:$0xff]   ;;  %v14280_v17 = vld [vmem:[#allocation105_spill] sm:$0xff] }
 0x322   :  { %v5810_v24 = vadd.f32 %v5794_v20, %v5770_v30  ;;  %v5812_v58 = vadd.f32 %v5796_v38, %v5772_v48  ;;  %v11360_v1 = vrot.slane %v14271_v15, %v14265_v10  ;;  %v4463_v31 = vpack.c.bf16 %v4452_v37, %v4450_v29  ;;  %v14277_v48 = vld [vmem:[#allocation93_spill] sm:$0xff]  ;;  %v14278_v37 = vld [vmem:[#allocation95_spill] sm:$0xff] }
 0x323   :  { %14268 = vst [vmem:[#allocation59_spill] sm:$0xff] %v11352_v39  ;;  %14270 = vst [vmem:[#allocation44_spill] sm:$0xff] %v11356_v40  ;;  %v4529_v41 = vmul.f32 %v11348_v55, %v14273_v25  ;;  %v4531_v51 = vmul.f32 %v11348_v55, %v14274_v6  ;;  %v4553_v19 = vmul.f32 %v11352_v39, %v14275_v8  ;;  %v14290_v47 = vmov 0  }
 0x324   :  { %14272 = vst [vmem:[#allocation57_spill] sm:$0xff] %v11360_v1  ;;  %v5850_v20 = vadd.f32 %v5834_v35, %v5810_v24  ;;  %v5852_v38 = vadd.f32 %v5836_v13, %v5812_v58  ;;  %v4555_v30 = vmul.f32 %v11352_v39, %v14276_v52  ;;  %v4593_v63 = vmul.f32 %v11356_v40, %v14277_v48  ;;  %v14281_v58 = vld [vmem:[#allocation138_spill] sm:$0xff] }
 0x325   :  { %4480 = vmatpush1.bf16.msra.mxu1 %v4463_v31  ;;  %v4569_v29 = vadd.f32 %v4553_v19, %v4529_v41  ;;  %v4595_v4 = vmul.f32 %v11356_v40, %v14278_v37  ;;  %v4633_v46 = vmul.f32 %v11360_v1, %v14279_v21  ;;  %v4635_v32 = vmul.f32 %v11360_v1, %v14280_v17  ;;  %v14283_v31 = vld [vmem:[#allocation141_spill] sm:$0xff]  ;;  %v14284_v19 = vld [vmem:[#allocation142_spill] sm:$0xff] }
 0x326   :  { %v5890_v35 = vadd.f32 %v5874_v59, %v5850_v20  ;;  %v5892_v13 = vadd.f32 %v5876_v50, %v5852_v38  ;;  %v4571_v24 = vadd.f32 %v4555_v30, %v4531_v51  ;;  %v11380_v43 = vrot.slane %v14281_v58, %v14265_v10  ;;  %v14286_v20 = vld [vmem:[#allocation108_spill] sm:$0xff] }
 0x327   :  { %v4609_v2 = vadd.f32 %v4593_v63, %v4569_v29  ;;  %v11384_v41 = vrot.slane %v14283_v31, %v14265_v10  ;;  %v11388_v49 = vrot.slane %v14284_v19, %v14265_v10  ;;  %v11392_v27 = vrot.slane %v14285_v28, %v14265_v10  ;;  %v14287_v63 = vld [vmem:[#allocation109_spill] sm:$0xff] }
 0x328   :  { %14282 = vst [vmem:[#allocation153_spill] sm:$0xff] %v11380_v43  ;;  %v5930_v59 = vadd.f32 %v5914_v18, %v5890_v35  ;;  %v5932_v50 = vadd.f32 %v5916_v34, %v5892_v13  ;;  %v4611_v51 = vadd.f32 %v4595_v4, %v4571_v24  ;;  %v4673_v38 = vmul.f32 %v11380_v43, %v14286_v20  ;;  %v14291_v4 = vld [vmem:[#allocation129_spill] sm:$0xff]  ;;  %v14292_v13 = vld [vmem:[#allocation130_spill] sm:$0xff] }
 0x329   :  { %6475 = vmatmul.mubr.msk.bf16.vlgmr.msra.gmra.mrb[0].mxu1 %vm4052_vm12, %v6531_v54  ;;  %v4649_v30 = vadd.f32 %v4633_v46, %v4609_v2  ;;  %v4675_v29 = vmul.f32 %v11380_v43, %v14287_v63  ;;  %v4713_v7 = vmul.f32 %v11384_v41, %v14288_v16  ;;  %v4715_v3 = vmul.f32 %v11384_v41, %v14289_v45  ;;  %v14293_v46 = vld [vmem:[#allocation132_spill] sm:$0xff] }
 0x32a   :  { %4875 = vmatprep.mubr.bf16.mxu1 %v14290_v47  ;;  %v5943_v18 = vpack.c.bf16 %v5932_v50, %v5930_v59  ;;  %v4651_v34 = vadd.f32 %v4635_v32, %v4611_v51  ;;  %v4753_v35 = vmul.f32 %v11388_v49, %v14291_v4  ;;  %v4755_v54 = vmul.f32 %v11388_v49, %v14292_v13  ;;  %v14296_v32 = vld [vmem:[#allocation23_spill] sm:$0xff] }
 0x32b   :  { %v4689_v2 = vadd.f32 %v4673_v38, %v4649_v30  ;;  %v4793_v24 = vmul.f32 %v11392_v27, %v14293_v46  ;;  %v4795_v56 = vmul.f32 %v11392_v27, %v14294_v33  ;;  %v11413_v9 = vsub.s32 7, %v14295_v5  ;;  %v14298_v51 = vld [vmem:[#allocation71_spill] sm:$0xff]  ;;  %v14300_v38 = vld [vmem:[#allocation73_spill] sm:$0xff] }
 0x32c   :  { %5960 = vmatpush1.bf16.msra.mxu0 %v5943_v18  ;;  %v4691_v59 = vadd.f32 %v4675_v29, %v4651_v34  ;;  %v11417_v50 = vrot.slane %v14296_v32, %v14265_v10  ;;  %v11421_v0 = vrot.slane %v14298_v51, %v14265_v10  ;;  %v11425_v30 = vrot.slane %v14300_v38, %v14265_v10 }
 0x32d   :  { %v4729_v14 = vadd.f32 %v4713_v7, %v4689_v2  ;;  %v11429_v5 = vrot.slane %v14266_v22, %v11413_v9  ;;  %v11433_v29 = vrot.slane %v14267_v61, %v11413_v9  ;;  %v11437_v18 = vrot.slane %v14269_v42, %v11413_v9 }
 0x32e   :  { %14297 = vst [vmem:[#allocation29_spill] sm:$0xff] %v11417_v50  ;;  %14299 = vst [vmem:[#allocation33_spill] sm:$0xff] %v11421_v0  ;;  %v4731_v34 = vadd.f32 %v4715_v3, %v4691_v59  ;;  %v11441_v12 = vrot.slane %v14271_v15, %v11413_v9  ;;  %v11445_v7 = vrot.slane %v14281_v58, %v11413_v9 }
 0x32f   :  { %14301 = vst [vmem:[#allocation30_spill] sm:$0xff] %v11425_v30  ;;  %v11449_v22 = vrot.slane %v14283_v31, %v11413_v9  ;;  %v4769_v2 = vadd.f32 %v4753_v35, %v4729_v14  ;;  %v6009_v61 = vmul.f32 %v11429_v5, %v14273_v25  ;;  %v6011_v42 = vmul.f32 %v11429_v5, %v14274_v6 }
 0x330   :  { %v6033_v3 = vmul.f32 %v11433_v29, %v14275_v8  ;;  %6483 = vmatmul.mubr.msk.bf16.vlgmr.msra.gmra.mrb[0].mxu0 %vm4052_vm12, %v6532_v53  ;;  %v4771_v15 = vadd.f32 %v4755_v54, %v4731_v34  ;;  %v6035_v58 = vmul.f32 %v11433_v29, %v14276_v52  ;;  %v6073_v31 = vmul.f32 %v11437_v18, %v14277_v48 }
 0x331   :  { %v6075_v14 = vmul.f32 %v11437_v18, %v14278_v37  ;;  %6355 = vmatprep.mubr.bf16.mxu0 %v14290_v47  ;;  %v4809_v25 = vadd.f32 %v4793_v24, %v4769_v2  ;;  %v6113_v6 = vmul.f32 %v11441_v12, %v14279_v21  ;;  %v6115_v53 = vmul.f32 %v11441_v12, %v14280_v17  ;;  %v14304_v2 = vld [vmem:[#allocation38_spill] sm:$0xff] }
 0x332   :  { %v6049_v35 = vadd.f32 %v6033_v3, %v6009_v61  ;;  %v4811_v8 = vadd.f32 %v4795_v56, %v4771_v15  ;;  %v6051_v54 = vadd.f32 %v6035_v58, %v6011_v42  ;;  %v6153_v52 = vmul.f32 %v11445_v7, %v14286_v20  ;;  %v14303_v20 = vld [vmem:[#allocation36_spill] sm:$0xff]  ;;  %v14305_v15 = vld [vmem:[#allocation31_spill] sm:$0xff] }
 0x333   :  { %v6155_v48 = vmul.f32 %v11445_v7, %v14287_v63  ;;  %v6193_v47 = vmul.f32 %v11449_v22, %v14288_v16  ;;  %v6195_v37 = vmul.f32 %v11449_v22, %v14289_v45  ;;  %v11479_v21 = vrot.slane %v14284_v19, %v11413_v9  ;;  %v6396_v16 = vld [vmem:[%s12025_s3] sm:$0xff] }
 0x334   :  { %v6089_v59 = vadd.f32 %v6073_v31, %v6049_v35  ;;  %v4828_v17 = vpack.c.bf16 %v4811_v8, %v4809_v25  ;;  %v6091_v56 = vadd.f32 %v6075_v14, %v6051_v54  ;;  %v11483_v24 = vrot.slane %v14285_v28, %v11413_v9  ;;  %6400 = vperm.xlu0 %6526, %v6396_v16   ;;  %v14306_v31 = vld [vmem:[#allocation35_spill] sm:$0xff]  ;;  %v14307_v25 = vld [vmem:[#allocation37_spill] sm:$0xff]  ;;  %v14313_v16 = vld [vmem:[#allocation72_spill] sm:$0xff] }
 0x335   :  { %v4528_v63 = vmul.f32 %v11417_v50, %v14303_v20  ;;  %v6233_v45 = vmul.f32 %v11479_v21, %v14291_v4  ;;  %v6235_v19 = vmul.f32 %v11479_v21, %v14292_v13  ;;  %v4530_v61 = vmul.f32 %v11417_v50, %v14304_v2  ;;  %v6397_v4 = vld [vmem:[%s12025_s3 + $0x8] sm:$0xff]  ;;  %s6652_s3 = smov [#allocation9]  }
 0x336   :  { %14302 = vst [vmem:[#allocation45_spill] sm:$0xff] %v11483_v24  ;;  %v6129_v34 = vadd.f32 %v6113_v6, %v6089_v59  ;;  %4843 = vmatprep.subr.bf16.mxu1 %v4828_v17  ;;  %v6131_v28 = vadd.f32 %v6115_v53, %v6091_v56  ;;  %v6273_v42 = vmul.f32 %v11483_v24, %v14293_v46  ;;  %v14308_v6 = vld [vmem:[#allocation39_spill] sm:$0xff]  ;;  %v14311_v59 = vld [vmem:[#allocation78_spill] sm:$0xff]  ;;  %s6425_s6 = sshll.u32 %s6652_s3, 4  ;;  %s6426_s6 = int_to_ptr.vmem [resolvable:$true] %s6425_s6 }
 0x337   :  { %v6275_v3 = vmul.f32 %v11483_v24, %v14294_v33  ;;  %v4552_v58 = vmul.f32 %v11421_v0, %v14305_v15  ;;  %v4554_v14 = vmul.f32 %v11421_v0, %v14306_v31  ;;  %v4592_v35 = vmul.f32 %v11425_v30, %v14307_v25  ;;  %v14309_v33 = vld [vmem:[#allocation74_spill] sm:$0xff]  ;;  %v14321_v0 = vld [vmem:[#allocation60_spill] sm:$0xff]  ;;  %s6613_s7 = scalar_lea.vmem %s6426_s6, 512  ;;  %p6618_p11 = scmp.lt.s32.totalorder %s6426_s6, %s6426_s6 }
 0x338   :  { %v6169_v13 = vadd.f32 %v6153_v52, %v6129_v34  ;;  %v4594_v46 = vmul.f32 %v11425_v30, %v14308_v6  ;;  %v6171_v53 = vadd.f32 %v6155_v48, %v6131_v28  ;;  %v11513_v54 = vrot.slane %v14309_v33, %v14265_v10  ;;  %6405 = vperm.xlu0 %6526, %v6397_v4   ;;  %v14315_v28 = vld [vmem:[#allocation42_spill] sm:$0xff]  ;;  %v14319_v30 = vld [vmem:[#allocation61_spill] sm:$0xff]  ;;  %p6614_p10 = scmp.ne.s32.totalorder %s6426_s6, %s6613_s7  ;;  %p6619_p12 = scmp.lt.s32.totalorder %s6613_s7, %s6613_s7 }
 0x339   :  { %v4568_v8 = vadd.f32 %v4552_v58, %v4528_v63  ;;  %v11517_v17 = vrot.slane %v14311_v59, %v14265_v10  ;;  %v4570_v56 = vadd.f32 %v4554_v14, %v4530_v61  ;;  %v11521_v34 = vrot.slane %v14313_v16, %v14265_v10  ;;  %v14317_v61 = vld [vmem:[#allocation46_spill] sm:$0xff]  ;;  %v14318_v14 = vld [vmem:[#allocation47_spill] sm:$0xff] }
 0x33a   :  { %14310 = vst [vmem:[#allocation34_spill] sm:$0xff] %v11513_v54  ;;  %v6209_v52 = vadd.f32 %v6193_v47, %v6169_v13  ;;  %v11525_v26 = vrot.slane %v14314_v62, %v14265_v10  ;;  %v6211_v48 = vadd.f32 %v6195_v37, %v6171_v53  ;;  %v4632_v58 = vmul.f32 %v11513_v54, %v14315_v28  ;;  %v14320_v4 = vld [vmem:[#allocation58_spill] sm:$0xff]  ;;  %p6620_p13 = por %p6619_p12, %p6618_p11 }
 0x33b   :  { %14312 = vst [vmem:[#allocation48_spill] sm:$0xff] %v11517_v17  ;;  %v4608_v63 = vadd.f32 %v4592_v35, %v4568_v8  ;;  %v4634_v11 = vmul.f32 %v11513_v54, %v14316_v44  ;;  %v4610_v47 = vadd.f32 %v4594_v46, %v4570_v56  ;;  %v4672_v13 = vmul.f32 %v11517_v17, %v14317_v61  ;;  %v14322_v46 = vld [vmem:[#allocation64_spill] sm:$0xff] }
 0x33c   :  { %v6249_v57 = vadd.f32 %v6233_v45, %v6209_v52  ;;  %v4674_v23 = vmul.f32 %v11517_v17, %v14318_v14  ;;  %v6251_v36 = vadd.f32 %v6235_v19, %v6211_v48  ;;  %v4712_v37 = vmul.f32 %v11521_v34, %v14319_v30  ;;  %v14323_v17 = vld [vmem:[#allocation76_spill] sm:$0xff]  ;;  %p6621_p0 = pnand %p6620_p13, %p6614_p10 }
 0x33d   :  { %v4648_v60 = vadd.f32 %v4632_v58, %v4608_v63  ;;  %v4714_v35 = vmul.f32 %v11521_v34, %v14320_v4  ;;  %v4650_v8 = vadd.f32 %v4634_v11, %v4610_v47  ;;  %v4752_v45 = vmul.f32 %v11525_v26, %v14321_v0 }
 0x33e   :  { %v6289_v53 = vadd.f32 %v6273_v42, %v6249_v57  ;;  %v4754_v52 = vmul.f32 %v11525_v26, %v14322_v46  ;;  %v6291_v56 = vadd.f32 %v6275_v3, %v6251_v36  ;;  %v11545_v19 = vrot.slane %v14323_v17, %v14265_v10  ;;  %v14324_v42 = vld [vmem:[#allocation20_spill] sm:$0xff] }
 0x33f   :  { %v4688_v54 = vadd.f32 %v4672_v13, %v4648_v60  ;;  %v11549_v48 = vrot.slane %v14296_v32, %v11413_v9  ;;  %v4690_v63 = vadd.f32 %v4674_v23, %v4650_v8  ;;  %v11553_v57 = vrot.slane %v14298_v51, %v11413_v9  ;;  %v14325_v32 = vld [vmem:[#allocation56_spill] sm:$0xff] }
 0x340   :  { %v11557_v11 = vrot.slane %v14300_v38, %v11413_v9  ;;  %v11561_v60 = vrot.slane %v14309_v33, %v11413_v9  ;;  %v6308_v36 = vpack.c.bf16 %v6291_v56, %v6289_v53  ;;  %v4792_v3 = vmul.f32 %v11545_v19, %v14324_v42 }
 0x341   :  { %v4728_v10 = vadd.f32 %v4712_v37, %v4688_v54  ;;  %v4794_v23 = vmul.f32 %v11545_v19, %v14325_v32  ;;  %v4730_v58 = vadd.f32 %v4714_v35, %v4690_v63  ;;  %v6008_v51 = vmul.f32 %v11549_v48, %v14303_v20 }
 0x342   :  { %v6010_v38 = vmul.f32 %v11549_v48, %v14304_v2  ;;  %v6032_v47 = vmul.f32 %v11553_v57, %v14305_v15  ;;  %6323 = vmatprep.subr.bf16.mxu0 %v6308_v36  ;;  %v6034_v54 = vmul.f32 %v11553_v57, %v14306_v31  ;;  %v6072_v13 = vmul.f32 %v11557_v11, %v14307_v25 }
 0x343   :  { %v4768_v33 = vadd.f32 %v4752_v45, %v4728_v10  ;;  %v6074_v37 = vmul.f32 %v11557_v11, %v14308_v6  ;;  %v4770_v35 = vadd.f32 %v4754_v52, %v4730_v58  ;;  %v6112_v20 = vmul.f32 %v11561_v60, %v14315_v28  ;;  %v14327_v58 = vld [vmem:[#allocation98_spill] sm:$0xff] }
 0x344   :  { %v6048_v53 = vadd.f32 %v6032_v47, %v6008_v51  ;;  %v6114_v2 = vmul.f32 %v11561_v60, %v14316_v44  ;;  %v6050_v8 = vadd.f32 %v6034_v54, %v6010_v38  ;;  %v11585_v45 = vrot.slane %v14311_v59, %v11413_v9  ;;  %v14328_v51 = vld [vmem:[#allocation99_spill] sm:$0xff]  ;;  %v14329_v47 = vld [vmem:[#allocation102_spill] sm:$0xff] }
 0x345   :  { %v4808_v15 = vadd.f32 %v4792_v3, %v4768_v33  ;;  %v11589_v31 = vrot.slane %v14313_v16, %v11413_v9  ;;  %v4810_v25 = vadd.f32 %v4794_v23, %v4770_v35  ;;  %v11593_v52 = vrot.slane %v14314_v62, %v11413_v9  ;;  %v14326_v3 = vld [vmem:[#allocation97_spill] sm:$0xff]  ;;  %v14330_v33 = vld [vmem:[#allocation103_spill] sm:$0xff]  ;;  %v14331_v54 = vld [vmem:[#allocation106_spill] sm:$0xff] }
 0x346   :  { %v6088_v6 = vadd.f32 %v6072_v13, %v6048_v53  ;;  %v11597_v28 = vrot.slane %v14323_v17, %v11413_v9  ;;  %v6090_v44 = vadd.f32 %v6074_v37, %v6050_v8  ;;  %v6152_v56 = vmul.f32 %v11585_v45, %v14317_v61  ;;  %v14332_v35 = vld [vmem:[#allocation110_spill] sm:$0xff] }
 0x347   :  { %v6154_v59 = vmul.f32 %v11585_v45, %v14318_v14  ;;  %v6192_v16 = vmul.f32 %v11589_v31, %v14319_v30  ;;  %v4827_v63 = vpack.c.bf16 %v4810_v25, %v4808_v15  ;;  %v6194_v62 = vmul.f32 %v11589_v31, %v14320_v4  ;;  %v14334_v25 = vld [vmem:[#allocation115_spill] sm:$0xff] }
 0x348   :  { %v6128_v36 = vadd.f32 %v6112_v20, %v6088_v6  ;;  %v6232_v10 = vmul.f32 %v11593_v52, %v14321_v0  ;;  %v6130_v9 = vadd.f32 %v6114_v2, %v6090_v44  ;;  %v6234_v17 = vmul.f32 %v11593_v52, %v14322_v46  ;;  %v14333_v20 = vld [vmem:[#allocation114_spill] sm:$0xff]  ;;  %v14335_v44 = vld [vmem:[#allocation120_spill] sm:$0xff] }
 0x349   :  { %v6272_v61 = vmul.f32 %v11597_v28, %v14324_v42  ;;  %v6274_v14 = vmul.f32 %v11597_v28, %v14325_v32  ;;  %4844 = vmatpush1.bf16.msra.mxu1 %v4827_v63  ;;  %v4533_v23 = vmul.f32 %v11348_v55, %v14326_v3  ;;  %v4535_v4 = vmul.f32 %v11348_v55, %v14327_v58 }
 0x34a   :  { %v6168_v30 = vadd.f32 %v6152_v56, %v6128_v36  ;;  %v4557_v0 = vmul.f32 %v11352_v39, %v14328_v51  ;;  %v6170_v38 = vadd.f32 %v6154_v59, %v6130_v9  ;;  %v4559_v46 = vmul.f32 %v11352_v39, %v14329_v47  ;;  %v14336_v36 = vld [vmem:[#allocation122_spill] sm:$0xff]  ;;  %v14337_v9 = vld [vmem:[#allocation125_spill] sm:$0xff] }
 0x34b   :  { %v4597_v42 = vmul.f32 %v11356_v40, %v14330_v33  ;;  %v4599_v32 = vmul.f32 %v11356_v40, %v14331_v54  ;;  %v4637_v53 = vmul.f32 %v11360_v1, %v14332_v35  ;;  %v4639_v2 = vmul.f32 %v11360_v1, %v14333_v20  ;;  %v14338_v40 = vld [vmem:[#allocation126_spill] sm:$0xff]  ;;  %v14340_v39 = vld [vmem:[#allocation53_spill] sm:$0xff] }
 0x34c   :  { %v6208_v13 = vadd.f32 %v6192_v16, %v6168_v30  ;;  %v4573_v37 = vadd.f32 %v4557_v0, %v4533_v23  ;;  %v6210_v15 = vadd.f32 %v6194_v62, %v6170_v38  ;;  %v4575_v8 = vadd.f32 %v4559_v46, %v4535_v4  ;;  %v14339_v4 = vld [vmem:[#allocation128_spill] sm:$0xff] }
 0x34d   :  { %v4677_v6 = vmul.f32 %v11380_v43, %v14334_v25  ;;  %v4679_v56 = vmul.f32 %v11380_v43, %v14335_v44  ;;  %v4717_v16 = vmul.f32 %v11384_v41, %v14336_v36  ;;  %v4719_v30 = vmul.f32 %v11384_v41, %v14337_v9 }
 0x34e   :  { %v6248_v59 = vadd.f32 %v6232_v10, %v6208_v13  ;;  %v4613_v63 = vadd.f32 %v4597_v42, %v4573_v37  ;;  %v6250_v23 = vadd.f32 %v6234_v17, %v6210_v15  ;;  %v4615_v0 = vadd.f32 %v4599_v32, %v4575_v8  ;;  %v14341_v42 = vld [vmem:[#allocation111_spill] sm:$0xff] }
 0x34f   :  { %v4757_v62 = vmul.f32 %v11388_v49, %v14338_v40  ;;  %v4759_v38 = vmul.f32 %v11388_v49, %v14339_v4  ;;  %v4797_v10 = vmul.f32 %v11392_v27, %v14340_v39  ;;  %v4799_v13 = vmul.f32 %v11392_v27, %v14341_v42 }
 0x350   :  { %v6288_v46 = vadd.f32 %v6272_v61, %v6248_v59  ;;  %v4653_v1 = vadd.f32 %v4637_v53, %v4613_v63  ;;  %v6290_v37 = vadd.f32 %v6274_v14, %v6250_v23  ;;  %v4655_v43 = vadd.f32 %v4639_v2, %v4615_v0 }
 0x351   :  { %v6013_v17 = vmul.f32 %v11429_v5, %v14326_v3  ;;  %v6015_v32 = vmul.f32 %v11429_v5, %v14327_v58  ;;  %v6037_v8 = vmul.f32 %v11433_v29, %v14328_v51  ;;  %v6039_v61 = vmul.f32 %v11433_v29, %v14329_v47 }
 0x352   :  { %v4693_v15 = vadd.f32 %v4677_v6, %v4653_v1  ;;  %v6077_v53 = vmul.f32 %v11437_v18, %v14330_v33  ;;  %v6307_v59 = vpack.c.bf16 %v6290_v37, %v6288_v46  ;;  %v4695_v63 = vadd.f32 %v4679_v56, %v4655_v43  ;;  %v14342_v37 = vld [vmem:[#allocation112_spill] sm:$0xff] }
 0x353   :  { %v6079_v14 = vmul.f32 %v11437_v18, %v14331_v54  ;;  %v6117_v3 = vmul.f32 %v11441_v12, %v14332_v35  ;;  %v6053_v58 = vadd.f32 %v6037_v8, %v6013_v17  ;;  %v6055_v1 = vadd.f32 %v6039_v61, %v6015_v32  ;;  %v14345_v32 = vld [vmem:[#allocation33_spill] sm:$0xff]  ;;  %v14346_v61 = vld [vmem:[#allocation54_spill] sm:$0xff] }
 0x354   :  { %v4733_v2 = vadd.f32 %v4717_v16, %v4693_v15  ;;  %v6119_v51 = vmul.f32 %v11441_v12, %v14333_v20  ;;  %6324 = vmatpush1.bf16.msra.mxu0 %v6307_v59  ;;  %v4735_v6 = vadd.f32 %v4719_v30, %v4695_v63  ;;  %v6157_v47 = vmul.f32 %v11445_v7, %v14334_v25 }
 0x355   :  { %v6159_v43 = vmul.f32 %v11445_v7, %v14335_v44  ;;  %v6197_v33 = vmul.f32 %v11449_v22, %v14336_v36  ;;  %v6093_v56 = vadd.f32 %v6077_v53, %v6053_v58  ;;  %v6095_v35 = vadd.f32 %v6079_v14, %v6055_v1  ;;  %v14348_v53 = vld [vmem:[#allocation30_spill] sm:$0xff] }
 0x356   :  { %v4773_v54 = vadd.f32 %v4757_v62, %v4733_v2  ;;  %v6199_v16 = vmul.f32 %v11449_v22, %v14337_v9  ;;  %v4775_v23 = vadd.f32 %v4759_v38, %v4735_v6  ;;  %v6237_v20 = vmul.f32 %v11479_v21, %v14338_v40  ;;  %v14343_v38 = vld [vmem:[#allocation116_spill] sm:$0xff]  ;;  %v14344_v40 = vld [vmem:[#allocation119_spill] sm:$0xff]  ;;  %v14351_v2 = vld [vmem:[#allocation34_spill] sm:$0xff] }
 0x357   :  { %v6239_v30 = vmul.f32 %v11479_v21, %v14339_v4  ;;  %v6277_v25 = vmul.f32 %v11483_v24, %v14340_v39  ;;  %v6133_v0 = vadd.f32 %v6117_v3, %v6093_v56  ;;  %v6135_v46 = vadd.f32 %v6119_v51, %v6095_v35  ;;  %v14350_v3 = vld [vmem:[#allocation26_spill] sm:$0xff]  ;;  %v14353_v56 = vld [vmem:[#allocation133_spill] sm:$0xff]  ;;  %v14354_v35 = vld [vmem:[#allocation48_spill] sm:$0xff] }
 0x358   :  { %v4813_v44 = vadd.f32 %v4797_v10, %v4773_v54  ;;  %v6279_v36 = vmul.f32 %v11483_v24, %v14341_v42  ;;  %v4815_v62 = vadd.f32 %v4799_v13, %v4775_v23  ;;  %v4532_v9 = vmul.f32 %v11417_v50, %v14342_v37  ;;  %v14347_v10 = vld [vmem:[#allocation123_spill] sm:$0xff]  ;;  %v14349_v13 = vld [vmem:[#allocation124_spill] sm:$0xff] }
 0x359   :  { %v4534_v17 = vmul.f32 %v11417_v50, %v14343_v38  ;;  %v4556_v15 = vmul.f32 %v14345_v32, %v14344_v40  ;;  %v6173_v4 = vadd.f32 %v6157_v47, %v6133_v0  ;;  %v6175_v8 = vadd.f32 %v6159_v43, %v6135_v46  ;;  %v14352_v54 = vld [vmem:[#allocation32_spill] sm:$0xff]  ;;  %v14355_v0 = vld [vmem:[#allocation27_spill] sm:$0xff] }
 0x35a   :  { %v4558_v39 = vmul.f32 %v14345_v32, %v14346_v61  ;;  %v4596_v59 = vmul.f32 %v14348_v53, %v14347_v10  ;;  %v4830_v63 = vpack.c.bf16 %v4815_v62, %v4813_v44  ;;  %v4598_v14 = vmul.f32 %v14348_v53, %v14349_v13  ;;  %v14356_v46 = vld [vmem:[#allocation28_spill] sm:$0xff] }
 0x35b   :  { %v4572_v42 = vadd.f32 %v4556_v15, %v4532_v9  ;;  %v4636_v58 = vmul.f32 %v14351_v2, %v14350_v3  ;;  %v6213_v1 = vadd.f32 %v6197_v33, %v6173_v4  ;;  %v6215_v51 = vadd.f32 %v6199_v16, %v6175_v8  ;;  %v14357_v33 = vld [vmem:[#allocation25_spill] sm:$0xff]  ;;  %v14358_v4 = vld [vmem:[#allocation134_spill] sm:$0xff]  ;;  %v14361_v50 = vld [vmem:[#allocation40_spill] sm:$0xff] }
 0x35c   :  { %v4574_v6 = vadd.f32 %v4558_v39, %v4534_v17  ;;  %v4638_v47 = vmul.f32 %v14351_v2, %v14352_v54  ;;  %4845 = vmatprep.subr.bf16.mxu1 %v4830_v63  ;;  %v4676_v23 = vmul.f32 %v14354_v35, %v14353_v56  ;;  %v4678_v44 = vmul.f32 %v14354_v35, %v14355_v0  ;;  %v14359_v39 = vld [vmem:[#allocation136_spill] sm:$0xff] }
 0x35d   :  { %v4612_v43 = vadd.f32 %v4596_v59, %v4572_v42  ;;  %v4716_v62 = vmul.f32 %v11521_v34, %v14356_v46  ;;  %v6253_v9 = vadd.f32 %v6237_v20, %v6213_v1  ;;  %v6255_v15 = vadd.f32 %v6239_v30, %v6215_v51  ;;  %v14360_v63 = vld [vmem:[#allocation16_spill] sm:$0xff] }
 0x35e   :  { %v4614_v53 = vadd.f32 %v4598_v14, %v4574_v6  ;;  %v4718_v16 = vmul.f32 %v11521_v34, %v14357_v33  ;;  %v4756_v8 = vmul.f32 %v11525_v26, %v14358_v4  ;;  %v4758_v59 = vmul.f32 %v11525_v26, %v14359_v39 }
 0x35f   :  { %v4652_v17 = vadd.f32 %v4636_v58, %v4612_v43  ;;  %v4796_v42 = vmul.f32 %v11545_v19, %v14360_v63  ;;  %v6293_v35 = vadd.f32 %v6277_v25, %v6253_v9  ;;  %v6295_v2 = vadd.f32 %v6279_v36, %v6255_v15 }
 0x360   :  { %v4654_v32 = vadd.f32 %v4638_v47, %v4614_v53  ;;  %v4798_v20 = vmul.f32 %v11545_v19, %v14361_v50  ;;  %v6012_v14 = vmul.f32 %v11549_v48, %v14342_v37  ;;  %v6014_v58 = vmul.f32 %v11549_v48, %v14343_v38 }
 0x361   :  { %v4692_v30 = vadd.f32 %v4676_v23, %v4652_v17  ;;  %v6036_v1 = vmul.f32 %v11553_v57, %v14344_v40  ;;  %v6310_v51 = vpack.c.bf16 %v6295_v2, %v6293_v35  ;;  %v6038_v25 = vmul.f32 %v11553_v57, %v14346_v61  ;;  %v14362_v17 = vld [vmem:[#allocation158_spill] sm:$0xff] }
 0x362   :  { %v4694_v6 = vadd.f32 %v4678_v44, %v4654_v32  ;;  %v6076_v36 = vmul.f32 %v11557_v11, %v14347_v10  ;;  %v6078_v43 = vmul.f32 %v11557_v11, %v14349_v13  ;;  %v6116_v37 = vmul.f32 %v11561_v60, %v14350_v3 }
 0x363   :  { %v4732_v53 = vadd.f32 %v4716_v62, %v4692_v30  ;;  %v6052_v47 = vadd.f32 %v6036_v1, %v6012_v14  ;;  %6325 = vmatprep.subr.bf16.mxu0 %v6310_v51  ;;  %v6054_v23 = vadd.f32 %v6038_v25, %v6014_v58  ;;  %v6118_v40 = vmul.f32 %v11561_v60, %v14352_v54  ;;  %v14365_v30 = vld [vmem:[#allocation59_spill] sm:$0xff]  ;;  %v14366_v58 = vld [vmem:[#allocation161_spill] sm:$0xff]  ;;  %v14368_v51 = vld [vmem:[#allocation44_spill] sm:$0xff] }
 0x364   :  { %v4734_v38 = vadd.f32 %v4718_v16, %v4694_v6  ;;  %v6156_v32 = vmul.f32 %v11585_v45, %v14353_v56  ;;  %v6158_v10 = vmul.f32 %v11585_v45, %v14355_v0  ;;  %v6196_v13 = vmul.f32 %v11589_v31, %v14356_v46  ;;  %v14369_v25 = vld [vmem:[#allocation163_spill] sm:$0xff] }
 0x365   :  { %v4772_v61 = vadd.f32 %v4756_v8, %v4732_v53  ;;  %v6092_v2 = vadd.f32 %v6076_v36, %v6052_v47  ;;  %v6094_v44 = vadd.f32 %v6078_v43, %v6054_v23  ;;  %v6198_v3 = vmul.f32 %v11589_v31, %v14357_v33  ;;  %v14370_v43 = vld [vmem:[#allocation164_spill] sm:$0xff] }
 0x366   :  { %v4774_v35 = vadd.f32 %v4758_v59, %v4734_v38  ;;  %v6236_v62 = vmul.f32 %v11593_v52, %v14358_v4  ;;  %v6238_v56 = vmul.f32 %v11593_v52, %v14359_v39  ;;  %v6276_v15 = vmul.f32 %v11597_v28, %v14360_v63  ;;  %v14363_v59 = vld [vmem:[#allocation159_spill] sm:$0xff] }
 0x367   :  { %v4812_v54 = vadd.f32 %v4796_v42, %v4772_v61  ;;  %v6132_v9 = vadd.f32 %v6116_v37, %v6092_v2  ;;  %v6134_v16 = vadd.f32 %v6118_v40, %v6094_v44  ;;  %v6278_v46 = vmul.f32 %v11597_v28, %v14361_v50  ;;  %v14364_v42 = vld [vmem:[#allocation160_spill] sm:$0xff]  ;;  %v14371_v37 = vld [vmem:[#allocation57_spill] sm:$0xff]  ;;  %v14373_v61 = vld [vmem:[#allocation166_spill] sm:$0xff] }
 0x368   :  { %v4814_v0 = vadd.f32 %v4798_v20, %v4774_v35  ;;  %v4537_v8 = vmul.f32 %v11348_v55, %v14362_v17  ;;  %v4539_v4 = vmul.f32 %v11348_v55, %v14363_v59  ;;  %v4561_v14 = vmul.f32 %v14365_v30, %v14364_v42  ;;  %v14367_v20 = vld [vmem:[#allocation162_spill] sm:$0xff]  ;;  %v14372_v40 = vld [vmem:[#allocation165_spill] sm:$0xff]  ;;  %v14375_v35 = vld [vmem:[#allocation167_spill] sm:$0xff] }
 0x369   :  { %v6172_v33 = vadd.f32 %v6156_v32, %v6132_v9  ;;  %v4563_v39 = vmul.f32 %v14365_v30, %v14366_v58  ;;  %v6174_v63 = vadd.f32 %v6158_v10, %v6134_v16  ;;  %v4601_v6 = vmul.f32 %v14368_v51, %v14367_v20  ;;  %v14374_v2 = vld [vmem:[#allocation153_spill] sm:$0xff] }
 0x36a   :  { %v4829_v1 = vpack.c.bf16 %v4814_v0, %v4812_v54  ;;  %v4603_v50 = vmul.f32 %v14368_v51, %v14369_v25  ;;  %v4577_v53 = vadd.f32 %v4561_v14, %v4537_v8  ;;  %v4641_v38 = vmul.f32 %v14371_v37, %v14370_v43 }
 0x36b   :  { %v6212_v36 = vadd.f32 %v6196_v13, %v6172_v33  ;;  %v4579_v47 = vadd.f32 %v4563_v39, %v4539_v4  ;;  %v6214_v23 = vadd.f32 %v6198_v3, %v6174_v63  ;;  %v4643_v32 = vmul.f32 %v14371_v37, %v14372_v40  ;;  %v14376_v13 = vld [vmem:[#allocation168_spill] sm:$0xff]  ;;  %v14377_v33 = vld [vmem:[#allocation169_spill] sm:$0xff]  ;;  %v14378_v3 = vld [vmem:[#allocation170_spill] sm:$0xff] }
 0x36c   :  { %4846 = vmatpush1.bf16.msra.mxu1 %v4829_v1  ;;  %v4681_v10 = vmul.f32 %v14374_v2, %v14373_v61  ;;  %v4683_v44 = vmul.f32 %v14374_v2, %v14375_v35  ;;  %v4617_v9 = vadd.f32 %v4601_v6, %v4577_v53  ;;  %v4721_v16 = vmul.f32 %v11384_v41, %v14376_v13  ;;  %v14379_v39 = vld [vmem:[#allocation171_spill] sm:$0xff]  ;;  %v14380_v2 = vld [vmem:[#allocation172_spill] sm:$0xff] }
 0x36d   :  { %v6252_v54 = vadd.f32 %v6236_v62, %v6212_v36  ;;  %v4619_v0 = vadd.f32 %v4603_v50, %v4579_v47  ;;  %v6254_v8 = vadd.f32 %v6238_v56, %v6214_v23  ;;  %v4723_v4 = vmul.f32 %v11384_v41, %v14377_v33  ;;  %v14381_v50 = vld [vmem:[#allocation173_spill] sm:$0xff] }
 0x36e   :  { %v4761_v14 = vmul.f32 %v11388_v49, %v14378_v3  ;;  %v4763_v1 = vmul.f32 %v11388_v49, %v14379_v39  ;;  %v4657_v37 = vadd.f32 %v4641_v38, %v4617_v9  ;;  %v4801_v62 = vmul.f32 %v11392_v27, %v14380_v2 }
 0x36f   :  { %v6292_v63 = vadd.f32 %v6276_v15, %v6252_v54  ;;  %v4659_v51 = vadd.f32 %v4643_v32, %v4619_v0  ;;  %v6294_v6 = vadd.f32 %v6278_v46, %v6254_v8  ;;  %v4803_v36 = vmul.f32 %v11392_v27, %v14381_v50 }
 0x370   :  { %v6017_v56 = vmul.f32 %v11429_v5, %v14362_v17  ;;  %v6019_v53 = vmul.f32 %v11429_v5, %v14363_v59  ;;  %v4697_v47 = vadd.f32 %v4681_v10, %v4657_v37  ;;  %v6041_v15 = vmul.f32 %v11433_v29, %v14364_v42 }
 0x371   :  { %v4699_v23 = vadd.f32 %v4683_v44, %v4659_v51  ;;  %v6043_v38 = vmul.f32 %v11433_v29, %v14366_v58  ;;  %v6309_v32 = vpack.c.bf16 %v6294_v6, %v6292_v63  ;;  %v6081_v46 = vmul.f32 %v11437_v18, %v14367_v20  ;;  %v14383_v6 = vld [vmem:[#allocation29_spill] sm:$0xff] }
 0x372   :  { %v6083_v54 = vmul.f32 %v11437_v18, %v14369_v25  ;;  %v6121_v17 = vmul.f32 %v11441_v12, %v14370_v43  ;;  %v4737_v9 = vadd.f32 %v4721_v16, %v4697_v47  ;;  %v6057_v37 = vadd.f32 %v6041_v15, %v6017_v56  ;;  %v14386_v47 = vld [vmem:[#allocation33_spill] sm:$0xff] }
 0x373   :  { %v4739_v59 = vadd.f32 %v4723_v4, %v4699_v23  ;;  %v6059_v51 = vadd.f32 %v6043_v38, %v6019_v53  ;;  %6326 = vmatpush1.bf16.msra.mxu0 %v6309_v32  ;;  %v6123_v42 = vmul.f32 %v11441_v12, %v14372_v40  ;;  %v6161_v58 = vmul.f32 %v11445_v7, %v14373_v61  ;;  %v14388_v32 = vld [vmem:[#allocation177_spill] sm:$0xff] }
 0x374   :  { %v6163_v20 = vmul.f32 %v11445_v7, %v14375_v35  ;;  %v6201_v25 = vmul.f32 %v11449_v22, %v14376_v13  ;;  %v4777_v10 = vadd.f32 %v4761_v14, %v4737_v9  ;;  %v6097_v43 = vadd.f32 %v6081_v46, %v6057_v37  ;;  %v14389_v46 = vld [vmem:[#allocation30_spill] sm:$0xff]  ;;  %v14391_v9 = vld [vmem:[#allocation179_spill] sm:$0xff] }
 0x375   :  { %v4779_v44 = vadd.f32 %v4763_v1, %v4739_v59  ;;  %v6099_v0 = vadd.f32 %v6083_v54, %v6059_v51  ;;  %v6203_v16 = vmul.f32 %v11449_v22, %v14377_v33  ;;  %v6241_v8 = vmul.f32 %v11479_v21, %v14378_v3  ;;  %v14382_v1 = vld [vmem:[#allocation154_spill] sm:$0xff]  ;;  %v14385_v3 = vld [vmem:[#allocation175_spill] sm:$0xff] }
 0x376   :  { %v6243_v40 = vmul.f32 %v11479_v21, %v14379_v39  ;;  %v6281_v61 = vmul.f32 %v11483_v24, %v14380_v2  ;;  %v4817_v35 = vadd.f32 %v4801_v62, %v4777_v10  ;;  %v6137_v63 = vadd.f32 %v6121_v17, %v6097_v43  ;;  %v14384_v33 = vld [vmem:[#allocation174_spill] sm:$0xff]  ;;  %v14387_v2 = vld [vmem:[#allocation176_spill] sm:$0xff] }
 0x377   :  { %v4819_v4 = vadd.f32 %v4803_v36, %v4779_v44  ;;  %v6139_v13 = vadd.f32 %v6123_v42, %v6099_v0  ;;  %v6283_v14 = vmul.f32 %v11483_v24, %v14381_v50  ;;  %v4536_v56 = vmul.f32 %v14383_v6, %v14382_v1  ;;  %v14390_v50 = vld [vmem:[#allocation178_spill] sm:$0xff]  ;;  %v14393_v44 = vld [vmem:[#allocation41_spill] sm:$0xff]  ;;  %v14394_v43 = vld [vmem:[#allocation180_spill] sm:$0xff] }
 0x378   :  { %v4538_v53 = vmul.f32 %v14383_v6, %v14384_v33  ;;  %v4560_v23 = vmul.f32 %v14386_v47, %v14385_v3  ;;  %v6177_v15 = vadd.f32 %v6161_v58, %v6137_v63  ;;  %v4562_v62 = vmul.f32 %v14386_v47, %v14387_v2  ;;  %v14392_v59 = vld [vmem:[#allocation34_spill] sm:$0xff]  ;;  %v14395_v0 = vld [vmem:[#allocation48_spill] sm:$0xff]  ;;  %v14402_v24 = vld [vmem:[#allocation187_spill] sm:$0xff] }
 0x379   :  { %v4832_v39 = vpack.c.bf16 %v4819_v4, %v4817_v35  ;;  %v6179_v38 = vadd.f32 %v6163_v20, %v6139_v13  ;;  %v4600_v54 = vmul.f32 %v14389_v46, %v14388_v32  ;;  %v4602_v17 = vmul.f32 %v14389_v46, %v14390_v50  ;;  %v14396_v4 = vld [vmem:[#allocation181_spill] sm:$0xff]  ;;  %v14397_v13 = vld [vmem:[#allocation182_spill] sm:$0xff] }
 0x37a   :  { %v4576_v36 = vadd.f32 %v4560_v23, %v4536_v56  ;;  %v4640_v37 = vmul.f32 %v14392_v59, %v14391_v9  ;;  %v6217_v51 = vadd.f32 %v6201_v25, %v6177_v15  ;;  %v4578_v10 = vadd.f32 %v4562_v62, %v4538_v53  ;;  %v14399_v53 = vld [vmem:[#allocation184_spill] sm:$0xff] }
 0x37b   :  { %4847 = vmatprep.subr.bf16.mxu1 %v4832_v39  ;;  %v6219_v42 = vadd.f32 %v6203_v16, %v6179_v38  ;;  %v4642_v58 = vmul.f32 %v14392_v59, %v14393_v44  ;;  %v4680_v35 = vmul.f32 %v14395_v0, %v14394_v43  ;;  %v4682_v63 = vmul.f32 %v14395_v0, %v14396_v4  ;;  %v14398_v39 = vld [vmem:[#allocation183_spill] sm:$0xff]  ;;  %v14400_v38 = vld [vmem:[#allocation185_spill] sm:$0xff] }
 0x37c   :  { %v4616_v20 = vadd.f32 %v4600_v54, %v4576_v36  ;;  %v4720_v56 = vmul.f32 %v11521_v34, %v14397_v13  ;;  %v6257_v23 = vadd.f32 %v6241_v8, %v6217_v51  ;;  %v4618_v47 = vadd.f32 %v4602_v17, %v4578_v10  ;;  %v14401_v36 = vld [vmem:[#allocation186_spill] sm:$0xff] }
 0x37d   :  { %v6259_v46 = vadd.f32 %v6243_v40, %v6219_v42  ;;  %v4722_v25 = vmul.f32 %v11521_v34, %v14398_v39  ;;  %v4760_v15 = vmul.f32 %v11525_v26, %v14399_v53  ;;  %v4762_v62 = vmul.f32 %v11525_v26, %v14400_v38 }
 0x37e   :  { %v4656_v16 = vadd.f32 %v4640_v37, %v4616_v20  ;;  %v4800_v54 = vmul.f32 %v11545_v19, %v14401_v36  ;;  %v6297_v0 = vadd.f32 %v6281_v61, %v6257_v23  ;;  %v4658_v6 = vadd.f32 %v4642_v58, %v4618_v47 }
 0x37f   :  { %v6299_v59 = vadd.f32 %v6283_v14, %v6259_v46  ;;  %v4802_v8 = vmul.f32 %v11545_v19, %v14402_v24  ;;  %v6016_v17 = vmul.f32 %v11549_v48, %v14382_v1  ;;  %v6018_v37 = vmul.f32 %v11549_v48, %v14384_v33 }
 0x380   :  { %v4696_v40 = vadd.f32 %v4680_v35, %v4656_v16  ;;  %v6040_v51 = vmul.f32 %v11553_v57, %v14385_v3  ;;  %v4698_v10 = vadd.f32 %v4682_v63, %v4658_v6  ;;  %v6042_v61 = vmul.f32 %v11553_v57, %v14387_v2  ;;  %v14403_v16 = vld [vmem:[#allocation22_spill] sm:$0xff] }
 0x381   :  { %v6312_v42 = vpack.c.bf16 %v6299_v59, %v6297_v0  ;;  %v6080_v14 = vmul.f32 %v11557_v11, %v14388_v32  ;;  %v6082_v58 = vmul.f32 %v11557_v11, %v14390_v50  ;;  %v6120_v1 = vmul.f32 %v11561_v60, %v14391_v9 }
 0x382   :  { %v4736_v47 = vadd.f32 %v4720_v56, %v4696_v40  ;;  %v6056_v46 = vadd.f32 %v6040_v51, %v6016_v17  ;;  %v4738_v33 = vadd.f32 %v4722_v25, %v4698_v10  ;;  %v6058_v20 = vadd.f32 %v6042_v61, %v6018_v37  ;;  %v14406_v17 = vld [vmem:[#allocation66_spill] sm:$0xff]  ;;  %v14408_v51 = vld [vmem:[#allocation44_spill] sm:$0xff]  ;;  %v14409_v10 = vld [vmem:[#allocation83_spill] sm:$0xff] }
 0x383   :  { %6327 = vmatprep.subr.bf16.mxu0 %v6312_v42  ;;  %v6122_v6 = vmul.f32 %v11561_v60, %v14393_v44  ;;  %v6160_v3 = vmul.f32 %v11585_v45, %v14394_v43  ;;  %v6162_v32 = vmul.f32 %v11585_v45, %v14396_v4  ;;  %v6200_v50 = vmul.f32 %v11589_v31, %v14397_v13 }
 0x384   :  { %v4776_v2 = vadd.f32 %v4760_v15, %v4736_v47  ;;  %v6096_v59 = vadd.f32 %v6080_v14, %v6056_v46  ;;  %v4778_v0 = vadd.f32 %v4762_v62, %v4738_v33  ;;  %v6098_v35 = vadd.f32 %v6082_v58, %v6058_v20  ;;  %v14404_v62 = vld [vmem:[#allocation14_spill] sm:$0xff]  ;;  %v14411_v58 = vld [vmem:[#allocation57_spill] sm:$0xff] }
 0x385   :  { %v6202_v9 = vmul.f32 %v11589_v31, %v14398_v39  ;;  %v6240_v63 = vmul.f32 %v11593_v52, %v14399_v53  ;;  %v6242_v43 = vmul.f32 %v11593_v52, %v14400_v38  ;;  %v6280_v23 = vmul.f32 %v11597_v28, %v14401_v36  ;;  %v14410_v46 = vld [vmem:[#allocation82_spill] sm:$0xff] }
 0x386   :  { %v4816_v44 = vadd.f32 %v4800_v54, %v4776_v2  ;;  %v6136_v56 = vadd.f32 %v6120_v1, %v6096_v59  ;;  %v4818_v4 = vadd.f32 %v4802_v8, %v4778_v0  ;;  %v6138_v25 = vadd.f32 %v6122_v6, %v6098_v35  ;;  %v14405_v54 = vld [vmem:[#allocation65_spill] sm:$0xff]  ;;  %v14407_v8 = vld [vmem:[#allocation80_spill] sm:$0xff]  ;;  %v14412_v33 = vld [vmem:[#allocation50_spill] sm:$0xff] }
 0x387   :  { %v6282_v13 = vmul.f32 %v11597_v28, %v14402_v24  ;;  %v4541_v15 = vmul.f32 %v11348_v55, %v14403_v16  ;;  %v4543_v53 = vmul.f32 %v11348_v55, %v14404_v62  ;;  %v4565_v40 = vmul.f32 %v14365_v30, %v14405_v54  ;;  %v14414_v6 = vld [vmem:[#allocation153_spill] sm:$0xff]  ;;  %v14415_v2 = vld [vmem:[#allocation90_spill] sm:$0xff] }
 0x388   :  { %v6176_v39 = vadd.f32 %v6160_v3, %v6136_v56  ;;  %v4567_v38 = vmul.f32 %v14365_v30, %v14406_v17  ;;  %v4831_v37 = vpack.c.bf16 %v4818_v4, %v4816_v44  ;;  %v6178_v36 = vadd.f32 %v6162_v32, %v6138_v25  ;;  %v14413_v30 = vld [vmem:[#allocation89_spill] sm:$0xff]  ;;  %v14417_v4 = vld [vmem:[#allocation100_spill] sm:$0xff] }
 0x389   :  { %v4605_v42 = vmul.f32 %v14408_v51, %v14407_v8  ;;  %v4607_v24 = vmul.f32 %v14408_v51, %v14409_v10  ;;  %v4581_v14 = vadd.f32 %v4565_v40, %v4541_v15  ;;  %v4645_v55 = vmul.f32 %v14411_v58, %v14410_v46 }
 0x38a   :  { %v6216_v61 = vadd.f32 %v6200_v50, %v6176_v39  ;;  %v4583_v47 = vadd.f32 %v4567_v38, %v4543_v53  ;;  %4848 = vmatpush1.bf16.msra.mxu1 %v4831_v37  ;;  %v6218_v1 = vadd.f32 %v6202_v9, %v6178_v36  ;;  %v4647_v20 = vmul.f32 %v14411_v58, %v14412_v33  ;;  %v14416_v50 = vld [vmem:[#allocation52_spill] sm:$0xff]  ;;  %v14418_v9 = vld [vmem:[#allocation67_spill] sm:$0xff]  ;;  %v14420_v36 = vld [vmem:[#allocation69_spill] sm:$0xff] }
 0x38b   :  { %v4685_v3 = vmul.f32 %v14414_v6, %v14413_v30  ;;  %v4687_v59 = vmul.f32 %v14414_v6, %v14415_v2  ;;  %v4621_v0 = vadd.f32 %v4605_v42, %v4581_v14  ;;  %v4725_v44 = vmul.f32 %v11384_v41, %v14416_v50  ;;  %v14419_v39 = vld [vmem:[#allocation68_spill] sm:$0xff]  ;;  %v14421_v42 = vld [vmem:[#allocation70_spill] sm:$0xff] }
 0x38c   :  { %v6256_v32 = vadd.f32 %v6240_v63, %v6216_v61  ;;  %v4623_v35 = vadd.f32 %v4607_v24, %v4583_v47  ;;  %v6258_v56 = vadd.f32 %v6242_v43, %v6218_v1  ;;  %v4727_v25 = vmul.f32 %v11384_v41, %v14417_v4 }
 0x38d   :  { %v4765_v15 = vmul.f32 %v11388_v49, %v14418_v9  ;;  %v4767_v53 = vmul.f32 %v11388_v49, %v14419_v39  ;;  %v4661_v38 = vadd.f32 %v4645_v55, %v4621_v0  ;;  %v4805_v63 = vmul.f32 %v11392_v27, %v14420_v36  ;;  %v14423_v0 = vld [vmem:[#allocation143_spill] sm:$0xff] }
 0x38e   :  { %v6296_v40 = vadd.f32 %v6280_v23, %v6256_v32  ;;  %v4663_v37 = vadd.f32 %v4647_v20, %v4623_v35  ;;  %v6298_v51 = vadd.f32 %v6282_v13, %v6258_v56  ;;  %v4807_v24 = vmul.f32 %v11392_v27, %v14421_v42  ;;  %v14424_v35 = vld [vmem:[#allocation29_spill] sm:$0xff]  ;;  %v14426_v56 = vld [vmem:[#allocation107_spill] sm:$0xff] }
 0x38f   :  { %v6021_v43 = vmul.f32 %v11429_v5, %v14403_v16  ;;  %v6023_v41 = vmul.f32 %v11429_v5, %v14404_v62  ;;  %v4701_v61 = vadd.f32 %v4685_v3, %v4661_v38  ;;  %v6045_v49 = vmul.f32 %v11433_v29, %v14405_v54  ;;  %v14429_v38 = vld [vmem:[#allocation117_spill] sm:$0xff] }
 0x390   :  { %v4703_v14 = vadd.f32 %v4687_v59, %v4663_v37  ;;  %v6047_v23 = vmul.f32 %v11433_v29, %v14406_v17  ;;  %v6311_v47 = vpack.c.bf16 %v6298_v51, %v6296_v40  ;;  %v6085_v13 = vmul.f32 %v11437_v18, %v14407_v8  ;;  %v14430_v37 = vld [vmem:[#allocation30_spill] sm:$0xff] }
 0x391   :  { %v6087_v27 = vmul.f32 %v11437_v18, %v14409_v10  ;;  %v6125_v16 = vmul.f32 %v11441_v12, %v14410_v46  ;;  %v4741_v58 = vadd.f32 %v4725_v44, %v4701_v61  ;;  %v6061_v62 = vadd.f32 %v6045_v49, %v6021_v43  ;;  %v14434_v49 = vld [vmem:[#allocation24_spill] sm:$0xff] }
 0x392   :  { %v4743_v5 = vadd.f32 %v4727_v25, %v4703_v14  ;;  %v6063_v55 = vadd.f32 %v6047_v23, %v6023_v41  ;;  %6328 = vmatpush1.bf16.msra.mxu0 %v6311_v47  ;;  %v6127_v54 = vmul.f32 %v11441_v12, %v14412_v33  ;;  %v6165_v29 = vmul.f32 %v11445_v7, %v14413_v30  ;;  %v14422_v33 = vld [vmem:[#allocation45_spill] sm:$0xff] }
 0x393   :  { %v6167_v17 = vmul.f32 %v11445_v7, %v14415_v2  ;;  %v6205_v18 = vmul.f32 %v11449_v22, %v14416_v50  ;;  %v4781_v8 = vadd.f32 %v4765_v15, %v4741_v58  ;;  %v6101_v46 = vadd.f32 %v6085_v13, %v6061_v62  ;;  %v14435_v13 = vld [vmem:[#allocation131_spill] sm:$0xff] }
 0x394   :  { %v4783_v10 = vadd.f32 %v4767_v53, %v4743_v5  ;;  %v6103_v1 = vadd.f32 %v6087_v27, %v6063_v55  ;;  %v6207_v20 = vmul.f32 %v11449_v22, %v14417_v4  ;;  %v6245_v6 = vmul.f32 %v11479_v21, %v14418_v9  ;;  %v14425_v22 = vld [vmem:[#allocation104_spill] sm:$0xff]  ;;  %v14427_v4 = vld [vmem:[#allocation33_spill] sm:$0xff]  ;;  %v14437_v58 = vld [vmem:[#allocation147_spill] sm:$0xff] }
 0x395   :  { %v6247_v12 = vmul.f32 %v11479_v21, %v14419_v39  ;;  %v6285_v30 = vmul.f32 %v14422_v33, %v14420_v36  ;;  %v4821_v7 = vadd.f32 %v4805_v63, %v4781_v8  ;;  %v6141_v2 = vadd.f32 %v6125_v16, %v6101_v46  ;;  %v14428_v39 = vld [vmem:[#allocation113_spill] sm:$0xff]  ;;  %v14431_v63 = vld [vmem:[#allocation127_spill] sm:$0xff]  ;;  %v14436_v27 = vld [vmem:[#allocation48_spill] sm:$0xff] }
 0x396   :  { %v4823_v3 = vadd.f32 %v4807_v24, %v4783_v10  ;;  %v6143_v59 = vadd.f32 %v6127_v54, %v6103_v1  ;;  %v6287_v32 = vmul.f32 %v14422_v33, %v14421_v42  ;;  %v4540_v50 = vmul.f32 %v14424_v35, %v14423_v0  ;;  %v14432_v42 = vld [vmem:[#allocation55_spill] sm:$0xff]  ;;  %v14433_v24 = vld [vmem:[#allocation34_spill] sm:$0xff]  ;;  %v14440_v46 = vld [vmem:[#allocation144_spill] sm:$0xff] }
 0x397   :  { %v4542_v44 = vmul.f32 %v14424_v35, %v14425_v22  ;;  %v4564_v25 = vmul.f32 %v14427_v4, %v14426_v56  ;;  %v6181_v9 = vadd.f32 %v6165_v29, %v6141_v2  ;;  %v4566_v53 = vmul.f32 %v14427_v4, %v14428_v39  ;;  %v14438_v29 = vld [vmem:[#allocation148_spill] sm:$0xff] }
 0x398   :  { %v4834_v21 = vpack.c.bf16 %v4823_v3, %v4821_v7  ;;  %v6183_v15 = vadd.f32 %v6167_v17, %v6143_v59  ;;  %v4604_v36 = vmul.f32 %v14430_v37, %v14429_v38  ;;  %v4606_v51 = vmul.f32 %v14430_v37, %v14431_v63  ;;  %v14442_v59 = vld [vmem:[#allocation151_spill] sm:$0xff] }
 0x399   :  { %v4580_v40 = vadd.f32 %v4564_v25, %v4540_v50  ;;  %v4644_v43 = vmul.f32 %v14433_v24, %v14432_v42  ;;  %v6221_v41 = vadd.f32 %v6205_v18, %v6181_v9  ;;  %v4582_v14 = vadd.f32 %v4566_v53, %v4542_v44  ;;  %v14439_v18 = vld [vmem:[#allocation149_spill] sm:$0xff] }
 0x39a   :  { %4849 = vmatprep.subr.bf16.mxu1 %v4834_v21  ;;  %v6223_v61 = vadd.f32 %v6207_v20, %v6183_v15  ;;  %v4646_v23 = vmul.f32 %v14433_v24, %v14434_v49  ;;  %v4684_v16 = vmul.f32 %v14436_v27, %v14435_v13  ;;  %v4686_v5 = vmul.f32 %v14436_v27, %v14437_v58  ;;  %v14441_v20 = vld [vmem:[#allocation150_spill] sm:$0xff] }
 0x39b   :  { %v4620_v47 = vadd.f32 %v4604_v36, %v4580_v40  ;;  %v6261_v62 = vadd.f32 %v6245_v6, %v6221_v41  ;;  %v4622_v54 = vadd.f32 %v4606_v51, %v4582_v14  ;;  %v4724_v17 = vmul.f32 %v11521_v34, %v14438_v29 }
 0x39c   :  { %v6263_v55 = vadd.f32 %v6247_v12, %v6223_v61  ;;  %v4726_v10 = vmul.f32 %v11521_v34, %v14439_v18  ;;  %v4764_v1 = vmul.f32 %v11525_v26, %v14440_v46  ;;  %v4766_v33 = vmul.f32 %v11525_v26, %v14441_v20 }
 0x39d   :  { %v4660_v8 = vadd.f32 %v4644_v43, %v4620_v47  ;;  %v6301_v7 = vadd.f32 %v6285_v30, %v6261_v62  ;;  %v4662_v2 = vadd.f32 %v4646_v23, %v4622_v54  ;;  %v4804_v6 = vmul.f32 %v11545_v19, %v14442_v59 }
 0x39e   :  { %v6303_v3 = vadd.f32 %v6287_v32, %v6263_v55  ;;  %v6020_v35 = vmul.f32 %v11549_v48, %v14423_v0  ;;  %v6022_v50 = vmul.f32 %v11549_v48, %v14425_v22  ;;  %v6044_v34 = vmul.f32 %v11553_v57, %v14426_v56  ;;  %v14443_v22 = vld [vmem:[#allocation152_spill] sm:$0xff]  ;;  %v14445_v55 = vld [vmem:[#allocation21_spill] sm:$0xff] }
 0x39f   :  { %v4700_v12 = vadd.f32 %v4684_v16, %v4660_v8  ;;  %v4702_v4 = vadd.f32 %v4686_v5, %v4662_v2  ;;  %v6046_v26 = vmul.f32 %v11553_v57, %v14428_v39  ;;  %v6084_v30 = vmul.f32 %v11557_v11, %v14429_v38  ;;  %v6534_v5 = vld [vmem:[#allocation8 + $0x38] sm:$0xff]  }
 0x3a0   :  { %v6314_v44 = vpack.c.bf16 %v6303_v3, %v6301_v7  ;;  %v6060_v25 = vadd.f32 %v6044_v34, %v6020_v35  ;;  %v6086_v21 = vmul.f32 %v11557_v11, %v14431_v63  ;;  %v6124_v0 = vmul.f32 %v11561_v60, %v14432_v42 }
 0x3a1   :  { %v4740_v32 = vadd.f32 %v4724_v17, %v4700_v12  ;;  %v4742_v48 = vadd.f32 %v4726_v10, %v4702_v4  ;;  %v4806_v56 = vmul.f32 %v11545_v19, %v14443_v22  ;;  %v6062_v9 = vadd.f32 %v6046_v26, %v6022_v50 }
 0x3a2   :  { %6329 = vmatprep.subr.bf16.mxu0 %v6314_v44  ;;  %v6126_v57 = vmul.f32 %v11561_v60, %v14434_v49  ;;  %v6100_v39 = vadd.f32 %v6084_v30, %v6060_v25  ;;  %v6164_v53 = vmul.f32 %v11585_v45, %v14435_v13  ;;  %v6166_v11 = vmul.f32 %v11585_v45, %v14437_v58  ;;  %v6533_v49 = vld [vmem:[#allocation8 + $0x18] sm:$0xff]  }
 0x3a3   :  { %v4780_v15 = vadd.f32 %v4764_v1, %v4740_v32  ;;  %v4782_v40 = vadd.f32 %v4766_v33, %v4742_v48  ;;  %v6102_v38 = vadd.f32 %v6086_v21, %v6062_v9  ;;  %v6204_v63 = vmul.f32 %v11589_v31, %v14438_v29 }
 0x3a4   :  { %v6140_v36 = vadd.f32 %v6124_v0, %v6100_v39  ;;  %v6206_v60 = vmul.f32 %v11589_v31, %v14439_v18  ;;  %v6244_v24 = vmul.f32 %v11593_v52, %v14440_v46  ;;  %v6246_v61 = vmul.f32 %v11593_v52, %v14441_v20  ;;  %v14444_v52 = vld [vmem:[#allocation19_spill] sm:$0xff] }
 0x3a5   :  { %v4820_v37 = vadd.f32 %v4804_v6, %v4780_v15  ;;  %v4822_v19 = vadd.f32 %v4806_v56, %v4782_v40  ;;  %v6142_v51 = vadd.f32 %v6126_v57, %v6102_v38  ;;  %v6284_v14 = vmul.f32 %v11597_v28, %v14442_v59 }
 0x3a6   :  { %v6180_v42 = vadd.f32 %v6164_v53, %v6140_v36  ;;  %v6286_v47 = vmul.f32 %v11597_v28, %v14443_v22  ;;  %v6370_v62 = vrot.slane %v14444_v52, 4  ;;  %v6376_v54 = vrot.slane %v14445_v55, 4 }
 0x3a7   :  { %v4833_v43 = vpack.c.bf16 %v4822_v19, %v4820_v37  ;;  %v6182_v41 = vadd.f32 %v6166_v11, %v6142_v51 }
 0x3a8   :  { %v6220_v45 = vadd.f32 %v6204_v63, %v6180_v42  ;;  %v6371_v29 = vadd.f32 %v6370_v62, %v14444_v52  ;;  %v6377_v17 = vadd.f32 %v6376_v54, %v14445_v55 }
 0x3a9   :  { %4850 = vmatpush1.bf16.msra.mxu1 %v4833_v43  ;;  %v6222_v23 = vadd.f32 %v6206_v60, %v6182_v41 }
 0x3aa   :  { %v6260_v31 = vadd.f32 %v6244_v24, %v6220_v45  ;;  %v6372_v28 = vrot.slane %v6371_v29, 2  ;;  %v6378_v8 = vrot.slane %v6377_v17, 2 }
 0x3ab   :  { %v6262_v13 = vadd.f32 %v6246_v61, %v6222_v23 }
 0x3ac   :  { %v6300_v27 = vadd.f32 %v6284_v14, %v6260_v31  ;;  %6477 = vmatmul.mubr.msk.bf16.vlgmr.msra.gmra.mrb[0].mxu1 %vm4052_vm12, %v6533_v49  ;;  %v6373_v18 = vadd.f32 %v6372_v28, %v6371_v29  ;;  %v6379_v10 = vadd.f32 %v6378_v8, %v6377_v17 }
 0x3ad   :  { %v6302_v16 = vadd.f32 %v6286_v47, %v6262_v13 }
 0x3ae   :  { %v6374_v46 = vrot.slane %v6373_v18, 1  ;;  %v6380_v1 = vrot.slane %v6379_v10, 1 }
 0x3af   :  { %v6313_v58 = vpack.c.bf16 %v6302_v16, %v6300_v27 }
 0x3b0   :  { %v6375_v20 = vadd.f32 %v6374_v46, %v6373_v18  ;;  %v6381_v33 = vadd.f32 %v6380_v1, %v6379_v10 }
 0x3b1   :  { %6330 = vmatpush1.bf16.msra.mxu0 %v6313_v58 }
 0x3b2   :  { %vm6382_vm10 = vcmp.ne.f32.partialorder %v6375_v20, 0.0  ;;  %vm6383_vm8 = vcmp.ne.f32.partialorder %v6381_v33, 0.0 }
 0x3b3   :  { %v6384_v7 = vsel %vm6382_vm10, %v6375_v20, 1.0  ;;  %v6385_v3 = vsel %vm6383_vm8, %v6381_v33, 1.0  ;;  %v6401_v34 = vpop.permute.xlu0 %6400 }
 0x3b4   :  { %6485 = vmatmul.mubr.msk.bf16.vlgmr.msra.gmra.mrb[0].mxu0 %vm4052_vm12, %v6534_v5  ;;  %6543 = vrcp.f32 %v6384_v7 }
 0x3b5   :  { %6545 = vrcp.f32 %v6385_v3 }
 0x3b7   :  { %v6406_v53 = vpop.permute.xlu0 %6405 }
 0x3be   :  { %v6544_v35 = vpop.eup %6543 }
 0x3bf   :  { %v6546_v50 = vpop.eup %6545  ;;  %v6390_v4 = vsel %vm6382_vm10, %v6544_v35, 1.0 }
 0x3c0   :  { %v6391_v32 = vsel %vm6383_vm8, %v6546_v50, 1.0 }
 0x47f   :  { %v4877_v2 = vpop.f32.mrb[0].mxu1 }
 0x480   :  { %v4879_v59 = vpop.f32.mrb[1].mxu1 }
 0x481   :  { %v4881_v6 = vpop.f32.mrb[2].mxu1 }
 0x482   :  { %v4883_v12 = vpop.f32.mrb[3].mxu1 }
 0x487   :  { %v6357_v44 = vpop.f32.mrb[0].mxu0 }
 0x488   :  { %v6486_v26 = vadd.f32 %v6357_v44, %v4877_v2  ;;  %v6359_v30 = vpop.f32.mrb[1].mxu0 }
 0x489   :  { %v6487_v25 = vadd.f32 %v6359_v30, %v4879_v59  ;;  %v6361_v21 = vpop.f32.mrb[2].mxu0 }
 0x48a   :  { %v6392_v0 = vmul.f32 %v6486_v26, %v6390_v4  ;;  %v6488_v48 = vadd.f32 %v6361_v21, %v4881_v6  ;;  %v6363_v22 = vpop.f32.mrb[3].mxu0 }
 0x48b   :  { %v6393_v56 = vmul.f32 %v6487_v25, %v6391_v32  ;;  %v6489_v9 = vadd.f32 %v6363_v22, %v4883_v12 }
 0x48c   :  { %v6408_v57 = vadd.f32 %v6401_v34, %v6392_v0  ;;  %v6394_v15 = vmul.f32 %v6488_v48, %v6390_v4 }
 0x48d   :  { %v6409_v39 = vadd.f32 %v6401_v34, %v6393_v56  ;;  %v6395_v40 = vmul.f32 %v6489_v9, %v6391_v32 }
 0x48e   :  { %v6412_v38 = vmax.f32 %v6408_v57, 0.0  ;;  %v6410_v11 = vadd.f32 %v6406_v53, %v6394_v15 }
 0x48f   :  { %v6413_v37 = vmax.f32 %v6409_v39, 0.0  ;;  %v6411_v36 = vadd.f32 %v6406_v53, %v6395_v40 }
 0x490   :  { %6416 = vst [vmem:[#allocation9] sm:$0xff] %v6412_v38  ;;  %v6414_v63 = vmax.f32 %v6410_v11, 0.0 }
 0x491   :  { %6417 = vst [vmem:[#allocation9 + $0x8] sm:$0xff] %v6413_v37  ;;  %v6415_v19 = vmax.f32 %v6411_v36, 0.0 }
 0x492   :  { %6418 = vst [vmem:[#allocation9 + $0x10] sm:$0xff] %v6414_v63 }
 0x493   :  { %6419 = vst [vmem:[#allocation9 + $0x18] sm:$0xff] %v6415_v19 }
 0x494   :  { %6624 = shalt.err (!%p6621_p0)
}
 0x495   :  { %s6625_s10 = scalar_lea.hbm %s12026_s4, 512 }
 0x496   :  { %p6626_p1 = scmp.ne.s32.totalorder %s12026_s4, %s6625_s10  ;;  %p6629_p2 = scmp.lt.u32.totalorder %s6625_s10, %s12026_s4 }
 0x498   :  { %p6631_p3 = pnand %p6629_p2, %p6626_p1 }
 0x49a   :  { %6634 = shalt.err (!%p6631_p3)
}
 0x49b   :  { %6431 = dma.vmem_to_hbm [thread:$0]  %s6426_s6, 512, %s12026_s4, [#allocation5], %s6645_s1, %s6645_s1, %s6646_s13  }
 0x49c   :  { %6639 = dma.done.wait [#allocation5], 512  }
 0x49d   :  { %6640 = vsyncadd [#allocation5], 4294966784 }
 0x49e   :  { %6435 = vsyncpa [#allocation4], 1 }
 0x49f   :  { %6436 = vsyncpa [#allocation7], 1 }
 0x4a0   :  { %6437 = vsyncpa [#allocation5], 1 }

</bundles_post_ra>
